<compile_context>
chip_gen: v6e
topology: v6e:2x2x1
jax: 0.10.0
libtpu: 0.0.40
codegen_flags: <defaults>
</compile_context>

<pallas_src>
import math
import jax
import jax.numpy as jnp
from jax import lax
from jax.experimental import pallas as pl
from jax.experimental.pallas import tpu as pltpu

HIDDEN_SIZE = 768
N_HEADS = 12
HEAD_DIM = HIDDEN_SIZE // N_HEADS  # 64


def _attn_kernel(x_ref, w_ref, b_ref, o_ref):
    # x_ref : (1, S, H)   f32 activations for the current batch row (cast here)
    # w_ref : (H, 3H)     bf16 fused [Wq*scale | Wk | Wv] (input-major)
    # b_ref : (1, 3H)     f32  fused [bq*scale | bk | bv]
    # o_ref : (1, S, H)   lane-dense output (heads written slice-by-slice)
    H, NH, D = HIDDEN_SIZE, N_HEADS, HEAD_DIM

    # In-kernel bf16 cast: x arrives straight from HBM as f32; the cast runs on
    # the VMEM-resident block instead of a separate XLA pass over HBM.
    x = x_ref[0].astype(jnp.bfloat16)  # (S, H)

    # Fused, lane-dense QKV projection: one (S,H)@(H,3H) MXU matmul, f32 acc.
    # 1/sqrt(D) is folded into the q third of w/b at prep time, so the (S,S)
    # score matrices are never rescaled.
    qkv = jnp.dot(x, w_ref[...], preferred_element_type=jnp.float32) + b_ref[...]

    # Heads are statically unrolled (NH=12): each head's 64-wide slices use
    # STATIC offsets (dynamic lane-offset slicing is a Mosaic lowering risk),
    # are taken exactly once, and the head result is stored into o_ref
    # immediately so it does not accumulate toward a final concat.
    # TODO(synk): for production S switch to a query/KV-tiled online-softmax
    # (flash) path with heads / query tiles as a grid axis.  The monolithic
    # (S,S) f32 score buffers are what blow VMEM first: crossing the 32 MiB
    # default scoped limit around S~700-800 and v7x's 64 MiB/TC physical VMEM
    # well before S=2048 (v6e/v5e have 128 MiB physical but 32/16 MiB default
    # scoped limits).
    for h in range(NH):
        q = qkv[:, h * D:(h + 1) * D].astype(jnp.bfloat16)                    # (S, D)
        k = qkv[:, H + h * D:H + (h + 1) * D].astype(jnp.bfloat16)            # (S, D)
        v = qkv[:, 2 * H + h * D:2 * H + (h + 1) * D].astype(jnp.bfloat16)    # (S, D)

        # q @ k^T contracting the D axes directly (no transposed copy of k).
        scores = lax.dot_general(q, k, (((1,), (1,)), ((), ())),
                                 preferred_element_type=jnp.float32)          # (S, S)

        # Numerically-stable softmax kept in f32 (v5e has no bf16 VPU/EUP path).
        # TODO(synk): on v6e/v7x the exp could run in bf16 for ~2x EUP throughput.
        m = jnp.max(scores, axis=-1, keepdims=True)
        e = jnp.exp(scores - m)
        # approx reciprocal -> EUP slot; rows sum to 1 within ~2^-12 rel. error.
        probs = e * pl.reciprocal(jnp.sum(e, axis=-1, keepdims=True), approx=True)
        # TODO(synk): training-mode Dropout(p=0.1) on attention probs not
        # implemented (identity, i.e. eval mode).

        attn = jnp.dot(probs.astype(jnp.bfloat16), v,
                       preferred_element_type=jnp.float32)                    # (S, D)

        # Per-head direct store into the lane-dense (1,S,H) output block: this
        # IS torch's permute(0,2,1,3).reshape(B,S,H), and it retires the head's
        # result right away (no 12-way concat, no extra HBM pass).
        o_ref[0, :, h * D:(h + 1) * D] = attn.astype(o_ref.dtype)


def prepare_params(wq, bq, wk, bk, wv, bv, dtype=jnp.bfloat16):
    """One-time weight prep (do at weight-load time, not per forward call).

    torch Linear computes x @ W.T + b.  Fuse the three projections into one
    input-major (H, 3H) matrix and fold the 1/sqrt(D) attention scale into the
    q slice so the kernel never scales the (S, S) score matrix.
    """
    scale = 1.0 / math.sqrt(HEAD_DIM)
    w = jnp.concatenate([wq.T * scale, wk.T, wv.T], axis=1)            # (H, 3H)
    b = jnp.concatenate([bq * scale, bk, bv]).reshape(1, 3 * HIDDEN_SIZE)
    return w.astype(dtype), b.astype(jnp.float32)


def _attention_call(x, w, b, *, single_buffer_weights):
    B, S, H = x.shape
    if single_buffer_weights:
        # Constant index map -> the fused weights/bias never change across grid
        # steps; one VMEM buffer suffices (saves ~3.4 MiB of double-buffering).
        wspec = pl.BlockSpec((H, 3 * H), lambda bb: (0, 0),
                             pipeline_mode=pl.Buffered(1))
        bspec = pl.BlockSpec((1, 3 * H), lambda bb: (0, 0),
                             pipeline_mode=pl.Buffered(1))
    else:
        wspec = pl.BlockSpec((H, 3 * H), lambda bb: (0, 0))
        bspec = pl.BlockSpec((1, 3 * H), lambda bb: (0, 0))

    return pl.pallas_call(
        _attn_kernel,
        # Output kept at x.dtype (f32) for parity with the torch module; pass a
        # bf16 x / use bf16 out_shape downstream to halve output HBM writeback.
        out_shape=jax.ShapeDtypeStruct((B, S, H), x.dtype),
        grid_spec=pltpu.PrefetchScalarGridSpec(
            num_scalar_prefetch=0,
            grid=(B,),  # one step per batch row; fused weights stay VMEM-resident
            in_specs=[
                pl.BlockSpec((1, S, H), lambda bb: (bb, 0, 0)),   # x (f32, cast in-kernel)
                wspec,                                            # fused W (same block every step)
                bspec,                                            # fused bias
            ],
            out_specs=pl.BlockSpec((1, S, H), lambda bb: (bb, 0, 0)),
        ),
        compiler_params=pltpu.CompilerParams(
            dimension_semantics=("parallel",),          # batch shardable over v7x's 2 TCs
            vmem_limit_bytes=48 * 1024 * 1024,          # > 16/32 MiB defaults, < all physical
        ),
    )(x, w, b)


def self_attention(x, params):
    """x: (B, S, H) float32; params from prepare_params(). Returns (B, S, H)."""
    w, b = params
    B, S, H = x.shape
    assert H == HIDDEN_SIZE
    try:
        return _attention_call(x, w, b, single_buffer_weights=True)
    except Exception:
        # Fallback for JAX builds that reject pipeline_mode=pl.Buffered(1);
        # identical semantics, just default double-buffered weight blocks.
        return _attention_call(x, w, b, single_buffer_weights=False)


def _reference(x, wq, bq, wk, bk, wv, bv):
    B, S, H = x.shape
    D, NH = HEAD_DIM, N_HEADS

    def proj(w, b):
        y = jnp.einsum("bsh,oh->bso", x, w) + b               # torch Linear: x @ W.T + b
        return y.reshape(B, S, NH, D).transpose(0, 2, 1, 3)   # (B, NH, S, D)

    q, k, v = proj(wq, bq), proj(wk, bk), proj(wv, bv)
    scores = jnp.einsum("bhqd,bhkd->bhqk", q, k) / math.sqrt(D)
    probs = jax.nn.softmax(scores, axis=-1)
    attn = jnp.einsum("bhqk,bhkd->bhqd", probs, v)
    return attn.transpose(0, 2, 1, 3).reshape(B, S, H)


if __name__ == "__main__":
    key = jax.random.PRNGKey(0)
    kx, k1, k2, k3, k4, k5, k6 = jax.random.split(key, 7)

    B, S, H = 2, 8, HIDDEN_SIZE
    x = jax.random.normal(kx, (B, S, H), dtype=jnp.float32)

    bound = 1.0 / math.sqrt(H)  # torch nn.Linear default init range
    wq = jax.random.uniform(k1, (H, H), jnp.float32, -bound, bound)
    wk = jax.random.uniform(k2, (H, H), jnp.float32, -bound, bound)
    wv = jax.random.uniform(k3, (H, H), jnp.float32, -bound, bound)
    bq = jax.random.uniform(k4, (H,), jnp.float32, -bound, bound)
    bk = jax.random.uniform(k5, (H,), jnp.float32, -bound, bound)
    bv = jax.random.uniform(k6, (H,), jnp.float32, -bound, bound)

    params = prepare_params(wq, bq, wk, bk, wv, bv)  # hoisted out of the call path
    out = jax.block_until_ready(self_attention(x, params))
    ref = jax.block_until_ready(_reference(x, wq, bq, wk, bk, wv, bv))

    assert out.shape == (B, S, H), out.shape
    # bf16 matmuls with f32 accumulation + approx reciprocal vs f32 reference.
    assert jnp.allclose(out, ref, atol=2e-2, rtol=2e-2), float(jnp.max(jnp.abs(out - ref)))
    print("KERNEL_OK")
</pallas_src>

<mosaic_0001>
module attributes {stable_mosaic.version = 11 : i64} {
  func.func @_attn_kernel(%arg0: i32, %arg1: memref<1x8x768xf32, #tpu.memory_space<vmem>>, %arg2: memref<768x2304xbf16, #tpu.memory_space<vmem>>, %arg3: memref<1x2304xf32, #tpu.memory_space<vmem>>, %arg4: memref<1x8x768xf32, #tpu.memory_space<vmem>>) attributes {dimension_semantics = [#tpu.dimension_semantics<parallel>], iteration_bounds = array<i64: 2>, scalar_prefetch = 0 : i64, scratch_operands = 0 : i64, tpu.core_type = #tpu.core_type<tc>, window_params = [{transform_indices = @transform_0, window_bounds = array<i64: 1, 8, 768>}, {pipeline_mode = #tpu.pipeline_mode<synchronous>, transform_indices = @transform_1, window_bounds = array<i64: 768, 2304>}, {pipeline_mode = #tpu.pipeline_mode<synchronous>, transform_indices = @transform_2, window_bounds = array<i64: 1, 2304>}, {transform_indices = @transform_3, window_bounds = array<i64: 1, 8, 768>}]} {
    %c0 = arith.constant 0 : index
    %c0_0 = arith.constant 0 : index
    %c0_1 = arith.constant 0 : index
    %0 = vector.load %arg1[%c0, %c0_0, %c0_1] : memref<1x8x768xf32, #tpu.memory_space<vmem>>, vector<1x8x768xf32>
    %1 = vector.shape_cast %0 : vector<1x8x768xf32> to vector<8x768xf32>
    %2 = arith.truncf %1 : vector<8x768xf32> to vector<8x768xbf16>
    %c0_2 = arith.constant 0 : index
    %c0_3 = arith.constant 0 : index
    %3 = vector.load %arg2[%c0_2, %c0_3] : memref<768x2304xbf16, #tpu.memory_space<vmem>>, vector<768x2304xbf16>
    %cst = arith.constant dense<0.000000e+00> : vector<8x2304xf32>
    %4 = tpu.matmul %2, %3, %cst {dimension_numbers = #tpu.dot_dimension_numbers<[1], [0], [0], [1], [0, 0, 1, 1], [], []>} : vector<8x768xbf16>, vector<768x2304xbf16>, vector<8x2304xf32> -> vector<8x2304xf32>
    %c0_4 = arith.constant 0 : index
    %c0_5 = arith.constant 0 : index
    %5 = vector.load %arg3[%c0_4, %c0_5] : memref<1x2304xf32, #tpu.memory_space<vmem>>, vector<1x2304xf32>
    %6 = vector.broadcast %5 : vector<1x2304xf32> to vector<8x2304xf32>
    %7 = arith.addf %4, %6 : vector<8x2304xf32>
    %8 = vector.extract_strided_slice %7 {offsets = [0, 0], sizes = [8, 64], strides = [1, 1]} : vector<8x2304xf32> to vector<8x64xf32>
    %9 = arith.truncf %8 : vector<8x64xf32> to vector<8x64xbf16>
    %10 = vector.extract_strided_slice %7 {offsets = [0, 768], sizes = [8, 64], strides = [1, 1]} : vector<8x2304xf32> to vector<8x64xf32>
    %11 = arith.truncf %10 : vector<8x64xf32> to vector<8x64xbf16>
    %12 = vector.extract_strided_slice %7 {offsets = [0, 1536], sizes = [8, 64], strides = [1, 1]} : vector<8x2304xf32> to vector<8x64xf32>
    %13 = arith.truncf %12 : vector<8x64xf32> to vector<8x64xbf16>
    %cst_6 = arith.constant dense<0.000000e+00> : vector<8x8xf32>
    %14 = tpu.matmul %9, %11, %cst_6 {dimension_numbers = #tpu.dot_dimension_numbers<[1], [1], [0], [0], [0, 0, 1, 0], [], []>} : vector<8x64xbf16>, vector<8x64xbf16>, vector<8x8xf32> -> vector<8x8xf32>
    %cst_7 = arith.constant dense<0xFF800000> : vector<8xf32>
    %15 = vector.multi_reduction <maximumf>, %14, %cst_7 [1] : vector<8x8xf32> to vector<8xf32>
    %16 = vector.shape_cast %15 : vector<8xf32> to vector<8x1xf32>
    %17 = vector.broadcast %16 : vector<8x1xf32> to vector<8x8xf32>
    %18 = arith.subf %14, %17 : vector<8x8xf32>
    %19 = math.exp %18 : vector<8x8xf32>
    %cst_8 = arith.constant dense<0.000000e+00> : vector<8xf32>
    %20 = vector.multi_reduction <add>, %19, %cst_8 [1] : vector<8x8xf32> to vector<8xf32>
    %21 = vector.shape_cast %20 : vector<8xf32> to vector<8x1xf32>
    %22 = tpu.reciprocal %21 {approx = true} : vector<8x1xf32> -> vector<8x1xf32>
    %23 = vector.broadcast %22 : vector<8x1xf32> to vector<8x8xf32>
    %24 = arith.mulf %19, %23 : vector<8x8xf32>
    %25 = arith.truncf %24 : vector<8x8xf32> to vector<8x8xbf16>
    %cst_9 = arith.constant dense<0.000000e+00> : vector<8x64xf32>
    %26 = tpu.matmul %25, %13, %cst_9 {dimension_numbers = #tpu.dot_dimension_numbers<[1], [0], [0], [1], [0, 0, 1, 1], [], []>} : vector<8x8xbf16>, vector<8x64xbf16>, vector<8x64xf32> -> vector<8x64xf32>
    %c0_10 = arith.constant 0 : index
    %c0_11 = arith.constant 0 : index
    %c0_12 = arith.constant 0 : index
    %27 = vector.load %arg4[%c0_10, %c0_11, %c0_12] : memref<1x8x768xf32, #tpu.memory_space<vmem>>, vector<1x8x64xf32>
    %28 = vector.shape_cast %27 : vector<1x8x64xf32> to vector<8x64xf32>
    %29 = vector.shape_cast %26 : vector<8x64xf32> to vector<1x8x64xf32>
    tpu.vector_store %arg4[%c0_10, %c0_11, %c0_12], %29 {strides = array<i32>} : memref<1x8x768xf32, #tpu.memory_space<vmem>>, vector<1x8x64xf32>,
    %30 = vector.extract_strided_slice %7 {offsets = [0, 64], sizes = [8, 64], strides = [1, 1]} : vector<8x2304xf32> to vector<8x64xf32>
    %31 = arith.truncf %30 : vector<8x64xf32> to vector<8x64xbf16>
    %32 = vector.extract_strided_slice %7 {offsets = [0, 832], sizes = [8, 64], strides = [1, 1]} : vector<8x2304xf32> to vector<8x64xf32>
    %33 = arith.truncf %32 : vector<8x64xf32> to vector<8x64xbf16>
    %34 = vector.extract_strided_slice %7 {offsets = [0, 1600], sizes = [8, 64], strides = [1, 1]} : vector<8x2304xf32> to vector<8x64xf32>
    %35 = arith.truncf %34 : vector<8x64xf32> to vector<8x64xbf16>
    %cst_13 = arith.constant dense<0.000000e+00> : vector<8x8xf32>
    %36 = tpu.matmul %31, %33, %cst_13 {dimension_numbers = #tpu.dot_dimension_numbers<[1], [1], [0], [0], [0, 0, 1, 0], [], []>} : vector<8x64xbf16>, vector<8x64xbf16>, vector<8x8xf32> -> vector<8x8xf32>
    %cst_14 = arith.constant dense<0xFF800000> : vector<8xf32>
    %37 = vector.multi_reduction <maximumf>, %36, %cst_14 [1] : vector<8x8xf32> to vector<8xf32>
    %38 = vector.shape_cast %37 : vector<8xf32> to vector<8x1xf32>
    %39 = vector.broadcast %38 : vector<8x1xf32> to vector<8x8xf32>
    %40 = arith.subf %36, %39 : vector<8x8xf32>
    %41 = math.exp %40 : vector<8x8xf32>
    %cst_15 = arith.constant dense<0.000000e+00> : vector<8xf32>
    %42 = vector.multi_reduction <add>, %41, %cst_15 [1] : vector<8x8xf32> to vector<8xf32>
    %43 = vector.shape_cast %42 : vector<8xf32> to vector<8x1xf32>
    %44 = tpu.reciprocal %43 {approx = true} : vector<8x1xf32> -> vector<8x1xf32>
    %45 = vector.broadcast %44 : vector<8x1xf32> to vector<8x8xf32>
    %46 = arith.mulf %41, %45 : vector<8x8xf32>
    %47 = arith.truncf %46 : vector<8x8xf32> to vector<8x8xbf16>
    %cst_16 = arith.constant dense<0.000000e+00> : vector<8x64xf32>
    %48 = tpu.matmul %47, %35, %cst_16 {dimension_numbers = #tpu.dot_dimension_numbers<[1], [0], [0], [1], [0, 0, 1, 1], [], []>} : vector<8x8xbf16>, vector<8x64xbf16>, vector<8x64xf32> -> vector<8x64xf32>
    %c0_17 = arith.constant 0 : index
    %c0_18 = arith.constant 0 : index
    %c64 = arith.constant 64 : index
    %49 = vector.load %arg4[%c0_17, %c0_18, %c64] : memref<1x8x768xf32, #tpu.memory_space<vmem>>, vector<1x8x64xf32>
    %50 = vector.shape_cast %49 : vector<1x8x64xf32> to vector<8x64xf32>
    %51 = vector.shape_cast %48 : vector<8x64xf32> to vector<1x8x64xf32>
    tpu.vector_store %arg4[%c0_17, %c0_18, %c64], %51 {strides = array<i32>} : memref<1x8x768xf32, #tpu.memory_space<vmem>>, vector<1x8x64xf32>,
    %52 = vector.extract_strided_slice %7 {offsets = [0, 128], sizes = [8, 64], strides = [1, 1]} : vector<8x2304xf32> to vector<8x64xf32>
    %53 = arith.truncf %52 : vector<8x64xf32> to vector<8x64xbf16>
    %54 = vector.extract_strided_slice %7 {offsets = [0, 896], sizes = [8, 64], strides = [1, 1]} : vector<8x2304xf32> to vector<8x64xf32>
    %55 = arith.truncf %54 : vector<8x64xf32> to vector<8x64xbf16>
    %56 = vector.extract_strided_slice %7 {offsets = [0, 1664], sizes = [8, 64], strides = [1, 1]} : vector<8x2304xf32> to vector<8x64xf32>
    %57 = arith.truncf %56 : vector<8x64xf32> to vector<8x64xbf16>
    %cst_19 = arith.constant dense<0.000000e+00> : vector<8x8xf32>
    %58 = tpu.matmul %53, %55, %cst_19 {dimension_numbers = #tpu.dot_dimension_numbers<[1], [1], [0], [0], [0, 0, 1, 0], [], []>} : vector<8x64xbf16>, vector<8x64xbf16>, vector<8x8xf32> -> vector<8x8xf32>
    %cst_20 = arith.constant dense<0xFF800000> : vector<8xf32>
    %59 = vector.multi_reduction <maximumf>, %58, %cst_20 [1] : vector<8x8xf32> to vector<8xf32>
    %60 = vector.shape_cast %59 : vector<8xf32> to vector<8x1xf32>
    %61 = vector.broadcast %60 : vector<8x1xf32> to vector<8x8xf32>
    %62 = arith.subf %58, %61 : vector<8x8xf32>
    %63 = math.exp %62 : vector<8x8xf32>
    %cst_21 = arith.constant dense<0.000000e+00> : vector<8xf32>
    %64 = vector.multi_reduction <add>, %63, %cst_21 [1] : vector<8x8xf32> to vector<8xf32>
    %65 = vector.shape_cast %64 : vector<8xf32> to vector<8x1xf32>
    %66 = tpu.reciprocal %65 {approx = true} : vector<8x1xf32> -> vector<8x1xf32>
    %67 = vector.broadcast %66 : vector<8x1xf32> to vector<8x8xf32>
    %68 = arith.mulf %63, %67 : vector<8x8xf32>
    %69 = arith.truncf %68 : vector<8x8xf32> to vector<8x8xbf16>
    %cst_22 = arith.constant dense<0.000000e+00> : vector<8x64xf32>
    %70 = tpu.matmul %69, %57, %cst_22 {dimension_numbers = #tpu.dot_dimension_numbers<[1], [0], [0], [1], [0, 0, 1, 1], [], []>} : vector<8x8xbf16>, vector<8x64xbf16>, vector<8x64xf32> -> vector<8x64xf32>
    %c0_23 = arith.constant 0 : index
    %c0_24 = arith.constant 0 : index
    %c128 = arith.constant 128 : index
    %71 = vector.load %arg4[%c0_23, %c0_24, %c128] : memref<1x8x768xf32, #tpu.memory_space<vmem>>, vector<1x8x64xf32>
    %72 = vector.shape_cast %71 : vector<1x8x64xf32> to vector<8x64xf32>
    %73 = vector.shape_cast %70 : vector<8x64xf32> to vector<1x8x64xf32>
    tpu.vector_store %arg4[%c0_23, %c0_24, %c128], %73 {strides = array<i32>} : memref<1x8x768xf32, #tpu.memory_space<vmem>>, vector<1x8x64xf32>,
    %74 = vector.extract_strided_slice %7 {offsets = [0, 192], sizes = [8, 64], strides = [1, 1]} : vector<8x2304xf32> to vector<8x64xf32>
    %75 = arith.truncf %74 : vector<8x64xf32> to vector<8x64xbf16>
    %76 = vector.extract_strided_slice %7 {offsets = [0, 960], sizes = [8, 64], strides = [1, 1]} : vector<8x2304xf32> to vector<8x64xf32>
    %77 = arith.truncf %76 : vector<8x64xf32> to vector<8x64xbf16>
    %78 = vector.extract_strided_slice %7 {offsets = [0, 1728], sizes = [8, 64], strides = [1, 1]} : vector<8x2304xf32> to vector<8x64xf32>
    %79 = arith.truncf %78 : vector<8x64xf32> to vector<8x64xbf16>
    %cst_25 = arith.constant dense<0.000000e+00> : vector<8x8xf32>
    %80 = tpu.matmul %75, %77, %cst_25 {dimension_numbers = #tpu.dot_dimension_numbers<[1], [1], [0], [0], [0, 0, 1, 0], [], []>} : vector<8x64xbf16>, vector<8x64xbf16>, vector<8x8xf32> -> vector<8x8xf32>
    %cst_26 = arith.constant dense<0xFF800000> : vector<8xf32>
    %81 = vector.multi_reduction <maximumf>, %80, %cst_26 [1] : vector<8x8xf32> to vector<8xf32>
    %82 = vector.shape_cast %81 : vector<8xf32> to vector<8x1xf32>
    %83 = vector.broadcast %82 : vector<8x1xf32> to vector<8x8xf32>
    %84 = arith.subf %80, %83 : vector<8x8xf32>
    %85 = math.exp %84 : vector<8x8xf32>
    %cst_27 = arith.constant dense<0.000000e+00> : vector<8xf32>
    %86 = vector.multi_reduction <add>, %85, %cst_27 [1] : vector<8x8xf32> to vector<8xf32>
    %87 = vector.shape_cast %86 : vector<8xf32> to vector<8x1xf32>
    %88 = tpu.reciprocal %87 {approx = true} : vector<8x1xf32> -> vector<8x1xf32>
    %89 = vector.broadcast %88 : vector<8x1xf32> to vector<8x8xf32>
    %90 = arith.mulf %85, %89 : vector<8x8xf32>
    %91 = arith.truncf %90 : vector<8x8xf32> to vector<8x8xbf16>
    %cst_28 = arith.constant dense<0.000000e+00> : vector<8x64xf32>
    %92 = tpu.matmul %91, %79, %cst_28 {dimension_numbers = #tpu.dot_dimension_numbers<[1], [0], [0], [1], [0, 0, 1, 1], [], []>} : vector<8x8xbf16>, vector<8x64xbf16>, vector<8x64xf32> -> vector<8x64xf32>
    %c0_29 = arith.constant 0 : index
    %c0_30 = arith.constant 0 : index
    %c192 = arith.constant 192 : index
    %93 = vector.load %arg4[%c0_29, %c0_30, %c192] : memref<1x8x768xf32, #tpu.memory_space<vmem>>, vector<1x8x64xf32>
    %94 = vector.shape_cast %93 : vector<1x8x64xf32> to vector<8x64xf32>
    %95 = vector.shape_cast %92 : vector<8x64xf32> to vector<1x8x64xf32>
    tpu.vector_store %arg4[%c0_29, %c0_30, %c192], %95 {strides = array<i32>} : memref<1x8x768xf32, #tpu.memory_space<vmem>>, vector<1x8x64xf32>,
    %96 = vector.extract_strided_slice %7 {offsets = [0, 256], sizes = [8, 64], strides = [1, 1]} : vector<8x2304xf32> to vector<8x64xf32>
    %97 = arith.truncf %96 : vector<8x64xf32> to vector<8x64xbf16>
    %98 = vector.extract_strided_slice %7 {offsets = [0, 1024], sizes = [8, 64], strides = [1, 1]} : vector<8x2304xf32> to vector<8x64xf32>
    %99 = arith.truncf %98 : vector<8x64xf32> to vector<8x64xbf16>
    %100 = vector.extract_strided_slice %7 {offsets = [0, 1792], sizes = [8, 64], strides = [1, 1]} : vector<8x2304xf32> to vector<8x64xf32>
    %101 = arith.truncf %100 : vector<8x64xf32> to vector<8x64xbf16>
    %cst_31 = arith.constant dense<0.000000e+00> : vector<8x8xf32>
    %102 = tpu.matmul %97, %99, %cst_31 {dimension_numbers = #tpu.dot_dimension_numbers<[1], [1], [0], [0], [0, 0, 1, 0], [], []>} : vector<8x64xbf16>, vector<8x64xbf16>, vector<8x8xf32> -> vector<8x8xf32>
    %cst_32 = arith.constant dense<0xFF800000> : vector<8xf32>
    %103 = vector.multi_reduction <maximumf>, %102, %cst_32 [1] : vector<8x8xf32> to vector<8xf32>
    %104 = vector.shape_cast %103 : vector<8xf32> to vector<8x1xf32>
    %105 = vector.broadcast %104 : vector<8x1xf32> to vector<8x8xf32>
    %106 = arith.subf %102, %105 : vector<8x8xf32>
    %107 = math.exp %106 : vector<8x8xf32>
    %cst_33 = arith.constant dense<0.000000e+00> : vector<8xf32>
    %108 = vector.multi_reduction <add>, %107, %cst_33 [1] : vector<8x8xf32> to vector<8xf32>
    %109 = vector.shape_cast %108 : vector<8xf32> to vector<8x1xf32>
    %110 = tpu.reciprocal %109 {approx = true} : vector<8x1xf32> -> vector<8x1xf32>
    %111 = vector.broadcast %110 : vector<8x1xf32> to vector<8x8xf32>
    %112 = arith.mulf %107, %111 : vector<8x8xf32>
    %113 = arith.truncf %112 : vector<8x8xf32> to vector<8x8xbf16>
    %cst_34 = arith.constant dense<0.000000e+00> : vector<8x64xf32>
    %114 = tpu.matmul %113, %101, %cst_34 {dimension_numbers = #tpu.dot_dimension_numbers<[1], [0], [0], [1], [0, 0, 1, 1], [], []>} : vector<8x8xbf16>, vector<8x64xbf16>, vector<8x64xf32> -> vector<8x64xf32>
    %c0_35 = arith.constant 0 : index
    %c0_36 = arith.constant 0 : index
    %c256 = arith.constant 256 : index
    %115 = vector.load %arg4[%c0_35, %c0_36, %c256] : memref<1x8x768xf32, #tpu.memory_space<vmem>>, vector<1x8x64xf32>
    %116 = vector.shape_cast %115 : vector<1x8x64xf32> to vector<8x64xf32>
    %117 = vector.shape_cast %114 : vector<8x64xf32> to vector<1x8x64xf32>
    tpu.vector_store %arg4[%c0_35, %c0_36, %c256], %117 {strides = array<i32>} : memref<1x8x768xf32, #tpu.memory_space<vmem>>, vector<1x8x64xf32>,
    %118 = vector.extract_strided_slice %7 {offsets = [0, 320], sizes = [8, 64], strides = [1, 1]} : vector<8x2304xf32> to vector<8x64xf32>
    %119 = arith.truncf %118 : vector<8x64xf32> to vector<8x64xbf16>
    %120 = vector.extract_strided_slice %7 {offsets = [0, 1088], sizes = [8, 64], strides = [1, 1]} : vector<8x2304xf32> to vector<8x64xf32>
    %121 = arith.truncf %120 : vector<8x64xf32> to vector<8x64xbf16>
    %122 = vector.extract_strided_slice %7 {offsets = [0, 1856], sizes = [8, 64], strides = [1, 1]} : vector<8x2304xf32> to vector<8x64xf32>
    %123 = arith.truncf %122 : vector<8x64xf32> to vector<8x64xbf16>
    %cst_37 = arith.constant dense<0.000000e+00> : vector<8x8xf32>
    %124 = tpu.matmul %119, %121, %cst_37 {dimension_numbers = #tpu.dot_dimension_numbers<[1], [1], [0], [0], [0, 0, 1, 0], [], []>} : vector<8x64xbf16>, vector<8x64xbf16>, vector<8x8xf32> -> vector<8x8xf32>
    %cst_38 = arith.constant dense<0xFF800000> : vector<8xf32>
    %125 = vector.multi_reduction <maximumf>, %124, %cst_38 [1] : vector<8x8xf32> to vector<8xf32>
    %126 = vector.shape_cast %125 : vector<8xf32> to vector<8x1xf32>
    %127 = vector.broadcast %126 : vector<8x1xf32> to vector<8x8xf32>
    %128 = arith.subf %124, %127 : vector<8x8xf32>
    %129 = math.exp %128 : vector<8x8xf32>
    %cst_39 = arith.constant dense<0.000000e+00> : vector<8xf32>
    %130 = vector.multi_reduction <add>, %129, %cst_39 [1] : vector<8x8xf32> to vector<8xf32>
    %131 = vector.shape_cast %130 : vector<8xf32> to vector<8x1xf32>
    %132 = tpu.reciprocal %131 {approx = true} : vector<8x1xf32> -> vector<8x1xf32>
    %133 = vector.broadcast %132 : vector<8x1xf32> to vector<8x8xf32>
    %134 = arith.mulf %129, %133 : vector<8x8xf32>
    %135 = arith.truncf %134 : vector<8x8xf32> to vector<8x8xbf16>
    %cst_40 = arith.constant dense<0.000000e+00> : vector<8x64xf32>
    %136 = tpu.matmul %135, %123, %cst_40 {dimension_numbers = #tpu.dot_dimension_numbers<[1], [0], [0], [1], [0, 0, 1, 1], [], []>} : vector<8x8xbf16>, vector<8x64xbf16>, vector<8x64xf32> -> vector<8x64xf32>
    %c0_41 = arith.constant 0 : index
    %c0_42 = arith.constant 0 : index
    %c320 = arith.constant 320 : index
    %137 = vector.load %arg4[%c0_41, %c0_42, %c320] : memref<1x8x768xf32, #tpu.memory_space<vmem>>, vector<1x8x64xf32>
    %138 = vector.shape_cast %137 : vector<1x8x64xf32> to vector<8x64xf32>
    %139 = vector.shape_cast %136 : vector<8x64xf32> to vector<1x8x64xf32>
    tpu.vector_store %arg4[%c0_41, %c0_42, %c320], %139 {strides = array<i32>} : memref<1x8x768xf32, #tpu.memory_space<vmem>>, vector<1x8x64xf32>,
    %140 = vector.extract_strided_slice %7 {offsets = [0, 384], sizes = [8, 64], strides = [1, 1]} : vector<8x2304xf32> to vector<8x64xf32>
    %141 = arith.truncf %140 : vector<8x64xf32> to vector<8x64xbf16>
    %142 = vector.extract_strided_slice %7 {offsets = [0, 1152], sizes = [8, 64], strides = [1, 1]} : vector<8x2304xf32> to vector<8x64xf32>
    %143 = arith.truncf %142 : vector<8x64xf32> to vector<8x64xbf16>
    %144 = vector.extract_strided_slice %7 {offsets = [0, 1920], sizes = [8, 64], strides = [1, 1]} : vector<8x2304xf32> to vector<8x64xf32>
    %145 = arith.truncf %144 : vector<8x64xf32> to vector<8x64xbf16>
    %cst_43 = arith.constant dense<0.000000e+00> : vector<8x8xf32>
    %146 = tpu.matmul %141, %143, %cst_43 {dimension_numbers = #tpu.dot_dimension_numbers<[1], [1], [0], [0], [0, 0, 1, 0], [], []>} : vector<8x64xbf16>, vector<8x64xbf16>, vector<8x8xf32> -> vector<8x8xf32>
    %cst_44 = arith.constant dense<0xFF800000> : vector<8xf32>
    %147 = vector.multi_reduction <maximumf>, %146, %cst_44 [1] : vector<8x8xf32> to vector<8xf32>
    %148 = vector.shape_cast %147 : vector<8xf32> to vector<8x1xf32>
    %149 = vector.broadcast %148 : vector<8x1xf32> to vector<8x8xf32>
    %150 = arith.subf %146, %149 : vector<8x8xf32>
    %151 = math.exp %150 : vector<8x8xf32>
    %cst_45 = arith.constant dense<0.000000e+00> : vector<8xf32>
    %152 = vector.multi_reduction <add>, %151, %cst_45 [1] : vector<8x8xf32> to vector<8xf32>
    %153 = vector.shape_cast %152 : vector<8xf32> to vector<8x1xf32>
    %154 = tpu.reciprocal %153 {approx = true} : vector<8x1xf32> -> vector<8x1xf32>
    %155 = vector.broadcast %154 : vector<8x1xf32> to vector<8x8xf32>
    %156 = arith.mulf %151, %155 : vector<8x8xf32>
    %157 = arith.truncf %156 : vector<8x8xf32> to vector<8x8xbf16>
    %cst_46 = arith.constant dense<0.000000e+00> : vector<8x64xf32>
    %158 = tpu.matmul %157, %145, %cst_46 {dimension_numbers = #tpu.dot_dimension_numbers<[1], [0], [0], [1], [0, 0, 1, 1], [], []>} : vector<8x8xbf16>, vector<8x64xbf16>, vector<8x64xf32> -> vector<8x64xf32>
    %c0_47 = arith.constant 0 : index
    %c0_48 = arith.constant 0 : index
    %c384 = arith.constant 384 : index
    %159 = vector.load %arg4[%c0_47, %c0_48, %c384] : memref<1x8x768xf32, #tpu.memory_space<vmem>>, vector<1x8x64xf32>
    %160 = vector.shape_cast %159 : vector<1x8x64xf32> to vector<8x64xf32>
    %161 = vector.shape_cast %158 : vector<8x64xf32> to vector<1x8x64xf32>
    tpu.vector_store %arg4[%c0_47, %c0_48, %c384], %161 {strides = array<i32>} : memref<1x8x768xf32, #tpu.memory_space<vmem>>, vector<1x8x64xf32>,
    %162 = vector.extract_strided_slice %7 {offsets = [0, 448], sizes = [8, 64], strides = [1, 1]} : vector<8x2304xf32> to vector<8x64xf32>
    %163 = arith.truncf %162 : vector<8x64xf32> to vector<8x64xbf16>
    %164 = vector.extract_strided_slice %7 {offsets = [0, 1216], sizes = [8, 64], strides = [1, 1]} : vector<8x2304xf32> to vector<8x64xf32>
    %165 = arith.truncf %164 : vector<8x64xf32> to vector<8x64xbf16>
    %166 = vector.extract_strided_slice %7 {offsets = [0, 1984], sizes = [8, 64], strides = [1, 1]} : vector<8x2304xf32> to vector<8x64xf32>
    %167 = arith.truncf %166 : vector<8x64xf32> to vector<8x64xbf16>
    %cst_49 = arith.constant dense<0.000000e+00> : vector<8x8xf32>
    %168 = tpu.matmul %163, %165, %cst_49 {dimension_numbers = #tpu.dot_dimension_numbers<[1], [1], [0], [0], [0, 0, 1, 0], [], []>} : vector<8x64xbf16>, vector<8x64xbf16>, vector<8x8xf32> -> vector<8x8xf32>
    %cst_50 = arith.constant dense<0xFF800000> : vector<8xf32>
    %169 = vector.multi_reduction <maximumf>, %168, %cst_50 [1] : vector<8x8xf32> to vector<8xf32>
    %170 = vector.shape_cast %169 : vector<8xf32> to vector<8x1xf32>
    %171 = vector.broadcast %170 : vector<8x1xf32> to vector<8x8xf32>
    %172 = arith.subf %168, %171 : vector<8x8xf32>
    %173 = math.exp %172 : vector<8x8xf32>
    %cst_51 = arith.constant dense<0.000000e+00> : vector<8xf32>
    %174 = vector.multi_reduction <add>, %173, %cst_51 [1] : vector<8x8xf32> to vector<8xf32>
    %175 = vector.shape_cast %174 : vector<8xf32> to vector<8x1xf32>
    %176 = tpu.reciprocal %175 {approx = true} : vector<8x1xf32> -> vector<8x1xf32>
    %177 = vector.broadcast %176 : vector<8x1xf32> to vector<8x8xf32>
    %178 = arith.mulf %173, %177 : vector<8x8xf32>
    %179 = arith.truncf %178 : vector<8x8xf32> to vector<8x8xbf16>
    %cst_52 = arith.constant dense<0.000000e+00> : vector<8x64xf32>
    %180 = tpu.matmul %179, %167, %cst_52 {dimension_numbers = #tpu.dot_dimension_numbers<[1], [0], [0], [1], [0, 0, 1, 1], [], []>} : vector<8x8xbf16>, vector<8x64xbf16>, vector<8x64xf32> -> vector<8x64xf32>
    %c0_53 = arith.constant 0 : index
    %c0_54 = arith.constant 0 : index
    %c448 = arith.constant 448 : index
    %181 = vector.load %arg4[%c0_53, %c0_54, %c448] : memref<1x8x768xf32, #tpu.memory_space<vmem>>, vector<1x8x64xf32>
    %182 = vector.shape_cast %181 : vector<1x8x64xf32> to vector<8x64xf32>
    %183 = vector.shape_cast %180 : vector<8x64xf32> to vector<1x8x64xf32>
    tpu.vector_store %arg4[%c0_53, %c0_54, %c448], %183 {strides = array<i32>} : memref<1x8x768xf32, #tpu.memory_space<vmem>>, vector<1x8x64xf32>,
    %184 = vector.extract_strided_slice %7 {offsets = [0, 512], sizes = [8, 64], strides = [1, 1]} : vector<8x2304xf32> to vector<8x64xf32>
    %185 = arith.truncf %184 : vector<8x64xf32> to vector<8x64xbf16>
    %186 = vector.extract_strided_slice %7 {offsets = [0, 1280], sizes = [8, 64], strides = [1, 1]} : vector<8x2304xf32> to vector<8x64xf32>
    %187 = arith.truncf %186 : vector<8x64xf32> to vector<8x64xbf16>
    %188 = vector.extract_strided_slice %7 {offsets = [0, 2048], sizes = [8, 64], strides = [1, 1]} : vector<8x2304xf32> to vector<8x64xf32>
    %189 = arith.truncf %188 : vector<8x64xf32> to vector<8x64xbf16>
    %cst_55 = arith.constant dense<0.000000e+00> : vector<8x8xf32>
    %190 = tpu.matmul %185, %187, %cst_55 {dimension_numbers = #tpu.dot_dimension_numbers<[1], [1], [0], [0], [0, 0, 1, 0], [], []>} : vector<8x64xbf16>, vector<8x64xbf16>, vector<8x8xf32> -> vector<8x8xf32>
    %cst_56 = arith.constant dense<0xFF800000> : vector<8xf32>
    %191 = vector.multi_reduction <maximumf>, %190, %cst_56 [1] : vector<8x8xf32> to vector<8xf32>
    %192 = vector.shape_cast %191 : vector<8xf32> to vector<8x1xf32>
    %193 = vector.broadcast %192 : vector<8x1xf32> to vector<8x8xf32>
    %194 = arith.subf %190, %193 : vector<8x8xf32>
    %195 = math.exp %194 : vector<8x8xf32>
    %cst_57 = arith.constant dense<0.000000e+00> : vector<8xf32>
    %196 = vector.multi_reduction <add>, %195, %cst_57 [1] : vector<8x8xf32> to vector<8xf32>
    %197 = vector.shape_cast %196 : vector<8xf32> to vector<8x1xf32>
    %198 = tpu.reciprocal %197 {approx = true} : vector<8x1xf32> -> vector<8x1xf32>
    %199 = vector.broadcast %198 : vector<8x1xf32> to vector<8x8xf32>
    %200 = arith.mulf %195, %199 : vector<8x8xf32>
    %201 = arith.truncf %200 : vector<8x8xf32> to vector<8x8xbf16>
    %cst_58 = arith.constant dense<0.000000e+00> : vector<8x64xf32>
    %202 = tpu.matmul %201, %189, %cst_58 {dimension_numbers = #tpu.dot_dimension_numbers<[1], [0], [0], [1], [0, 0, 1, 1], [], []>} : vector<8x8xbf16>, vector<8x64xbf16>, vector<8x64xf32> -> vector<8x64xf32>
    %c0_59 = arith.constant 0 : index
    %c0_60 = arith.constant 0 : index
    %c512 = arith.constant 512 : index
    %203 = vector.load %arg4[%c0_59, %c0_60, %c512] : memref<1x8x768xf32, #tpu.memory_space<vmem>>, vector<1x8x64xf32>
    %204 = vector.shape_cast %203 : vector<1x8x64xf32> to vector<8x64xf32>
    %205 = vector.shape_cast %202 : vector<8x64xf32> to vector<1x8x64xf32>
    tpu.vector_store %arg4[%c0_59, %c0_60, %c512], %205 {strides = array<i32>} : memref<1x8x768xf32, #tpu.memory_space<vmem>>, vector<1x8x64xf32>,
    %206 = vector.extract_strided_slice %7 {offsets = [0, 576], sizes = [8, 64], strides = [1, 1]} : vector<8x2304xf32> to vector<8x64xf32>
    %207 = arith.truncf %206 : vector<8x64xf32> to vector<8x64xbf16>
    %208 = vector.extract_strided_slice %7 {offsets = [0, 1344], sizes = [8, 64], strides = [1, 1]} : vector<8x2304xf32> to vector<8x64xf32>
    %209 = arith.truncf %208 : vector<8x64xf32> to vector<8x64xbf16>
    %210 = vector.extract_strided_slice %7 {offsets = [0, 2112], sizes = [8, 64], strides = [1, 1]} : vector<8x2304xf32> to vector<8x64xf32>
    %211 = arith.truncf %210 : vector<8x64xf32> to vector<8x64xbf16>
    %cst_61 = arith.constant dense<0.000000e+00> : vector<8x8xf32>
    %212 = tpu.matmul %207, %209, %cst_61 {dimension_numbers = #tpu.dot_dimension_numbers<[1], [1], [0], [0], [0, 0, 1, 0], [], []>} : vector<8x64xbf16>, vector<8x64xbf16>, vector<8x8xf32> -> vector<8x8xf32>
    %cst_62 = arith.constant dense<0xFF800000> : vector<8xf32>
    %213 = vector.multi_reduction <maximumf>, %212, %cst_62 [1] : vector<8x8xf32> to vector<8xf32>
    %214 = vector.shape_cast %213 : vector<8xf32> to vector<8x1xf32>
    %215 = vector.broadcast %214 : vector<8x1xf32> to vector<8x8xf32>
    %216 = arith.subf %212, %215 : vector<8x8xf32>
    %217 = math.exp %216 : vector<8x8xf32>
    %cst_63 = arith.constant dense<0.000000e+00> : vector<8xf32>
    %218 = vector.multi_reduction <add>, %217, %cst_63 [1] : vector<8x8xf32> to vector<8xf32>
    %219 = vector.shape_cast %218 : vector<8xf32> to vector<8x1xf32>
    %220 = tpu.reciprocal %219 {approx = true} : vector<8x1xf32> -> vector<8x1xf32>
    %221 = vector.broadcast %220 : vector<8x1xf32> to vector<8x8xf32>
    %222 = arith.mulf %217, %221 : vector<8x8xf32>
    %223 = arith.truncf %222 : vector<8x8xf32> to vector<8x8xbf16>
    %cst_64 = arith.constant dense<0.000000e+00> : vector<8x64xf32>
    %224 = tpu.matmul %223, %211, %cst_64 {dimension_numbers = #tpu.dot_dimension_numbers<[1], [0], [0], [1], [0, 0, 1, 1], [], []>} : vector<8x8xbf16>, vector<8x64xbf16>, vector<8x64xf32> -> vector<8x64xf32>
    %c0_65 = arith.constant 0 : index
    %c0_66 = arith.constant 0 : index
    %c576 = arith.constant 576 : index
    %225 = vector.load %arg4[%c0_65, %c0_66, %c576] : memref<1x8x768xf32, #tpu.memory_space<vmem>>, vector<1x8x64xf32>
    %226 = vector.shape_cast %225 : vector<1x8x64xf32> to vector<8x64xf32>
    %227 = vector.shape_cast %224 : vector<8x64xf32> to vector<1x8x64xf32>
    tpu.vector_store %arg4[%c0_65, %c0_66, %c576], %227 {strides = array<i32>} : memref<1x8x768xf32, #tpu.memory_space<vmem>>, vector<1x8x64xf32>,
    %228 = vector.extract_strided_slice %7 {offsets = [0, 640], sizes = [8, 64], strides = [1, 1]} : vector<8x2304xf32> to vector<8x64xf32>
    %229 = arith.truncf %228 : vector<8x64xf32> to vector<8x64xbf16>
    %230 = vector.extract_strided_slice %7 {offsets = [0, 1408], sizes = [8, 64], strides = [1, 1]} : vector<8x2304xf32> to vector<8x64xf32>
    %231 = arith.truncf %230 : vector<8x64xf32> to vector<8x64xbf16>
    %232 = vector.extract_strided_slice %7 {offsets = [0, 2176], sizes = [8, 64], strides = [1, 1]} : vector<8x2304xf32> to vector<8x64xf32>
    %233 = arith.truncf %232 : vector<8x64xf32> to vector<8x64xbf16>
    %cst_67 = arith.constant dense<0.000000e+00> : vector<8x8xf32>
    %234 = tpu.matmul %229, %231, %cst_67 {dimension_numbers = #tpu.dot_dimension_numbers<[1], [1], [0], [0], [0, 0, 1, 0], [], []>} : vector<8x64xbf16>, vector<8x64xbf16>, vector<8x8xf32> -> vector<8x8xf32>
    %cst_68 = arith.constant dense<0xFF800000> : vector<8xf32>
    %235 = vector.multi_reduction <maximumf>, %234, %cst_68 [1] : vector<8x8xf32> to vector<8xf32>
    %236 = vector.shape_cast %235 : vector<8xf32> to vector<8x1xf32>
    %237 = vector.broadcast %236 : vector<8x1xf32> to vector<8x8xf32>
    %238 = arith.subf %234, %237 : vector<8x8xf32>
    %239 = math.exp %238 : vector<8x8xf32>
    %cst_69 = arith.constant dense<0.000000e+00> : vector<8xf32>
    %240 = vector.multi_reduction <add>, %239, %cst_69 [1] : vector<8x8xf32> to vector<8xf32>
    %241 = vector.shape_cast %240 : vector<8xf32> to vector<8x1xf32>
    %242 = tpu.reciprocal %241 {approx = true} : vector<8x1xf32> -> vector<8x1xf32>
    %243 = vector.broadcast %242 : vector<8x1xf32> to vector<8x8xf32>
    %244 = arith.mulf %239, %243 : vector<8x8xf32>
    %245 = arith.truncf %244 : vector<8x8xf32> to vector<8x8xbf16>
    %cst_70 = arith.constant dense<0.000000e+00> : vector<8x64xf32>
    %246 = tpu.matmul %245, %233, %cst_70 {dimension_numbers = #tpu.dot_dimension_numbers<[1], [0], [0], [1], [0, 0, 1, 1], [], []>} : vector<8x8xbf16>, vector<8x64xbf16>, vector<8x64xf32> -> vector<8x64xf32>
    %c0_71 = arith.constant 0 : index
    %c0_72 = arith.constant 0 : index
    %c640 = arith.constant 640 : index
    %247 = vector.load %arg4[%c0_71, %c0_72, %c640] : memref<1x8x768xf32, #tpu.memory_space<vmem>>, vector<1x8x64xf32>
    %248 = vector.shape_cast %247 : vector<1x8x64xf32> to vector<8x64xf32>
    %249 = vector.shape_cast %246 : vector<8x64xf32> to vector<1x8x64xf32>
    tpu.vector_store %arg4[%c0_71, %c0_72, %c640], %249 {strides = array<i32>} : memref<1x8x768xf32, #tpu.memory_space<vmem>>, vector<1x8x64xf32>,
    %250 = vector.extract_strided_slice %7 {offsets = [0, 704], sizes = [8, 64], strides = [1, 1]} : vector<8x2304xf32> to vector<8x64xf32>
    %251 = arith.truncf %250 : vector<8x64xf32> to vector<8x64xbf16>
    %252 = vector.extract_strided_slice %7 {offsets = [0, 1472], sizes = [8, 64], strides = [1, 1]} : vector<8x2304xf32> to vector<8x64xf32>
    %253 = arith.truncf %252 : vector<8x64xf32> to vector<8x64xbf16>
    %254 = vector.extract_strided_slice %7 {offsets = [0, 2240], sizes = [8, 64], strides = [1, 1]} : vector<8x2304xf32> to vector<8x64xf32>
    %255 = arith.truncf %254 : vector<8x64xf32> to vector<8x64xbf16>
    %cst_73 = arith.constant dense<0.000000e+00> : vector<8x8xf32>
    %256 = tpu.matmul %251, %253, %cst_73 {dimension_numbers = #tpu.dot_dimension_numbers<[1], [1], [0], [0], [0, 0, 1, 0], [], []>} : vector<8x64xbf16>, vector<8x64xbf16>, vector<8x8xf32> -> vector<8x8xf32>
    %cst_74 = arith.constant dense<0xFF800000> : vector<8xf32>
    %257 = vector.multi_reduction <maximumf>, %256, %cst_74 [1] : vector<8x8xf32> to vector<8xf32>
    %258 = vector.shape_cast %257 : vector<8xf32> to vector<8x1xf32>
    %259 = vector.broadcast %258 : vector<8x1xf32> to vector<8x8xf32>
    %260 = arith.subf %256, %259 : vector<8x8xf32>
    %261 = math.exp %260 : vector<8x8xf32>
    %cst_75 = arith.constant dense<0.000000e+00> : vector<8xf32>
    %262 = vector.multi_reduction <add>, %261, %cst_75 [1] : vector<8x8xf32> to vector<8xf32>
    %263 = vector.shape_cast %262 : vector<8xf32> to vector<8x1xf32>
    %264 = tpu.reciprocal %263 {approx = true} : vector<8x1xf32> -> vector<8x1xf32>
    %265 = vector.broadcast %264 : vector<8x1xf32> to vector<8x8xf32>
    %266 = arith.mulf %261, %265 : vector<8x8xf32>
    %267 = arith.truncf %266 : vector<8x8xf32> to vector<8x8xbf16>
    %cst_76 = arith.constant dense<0.000000e+00> : vector<8x64xf32>
    %268 = tpu.matmul %267, %255, %cst_76 {dimension_numbers = #tpu.dot_dimension_numbers<[1], [0], [0], [1], [0, 0, 1, 1], [], []>} : vector<8x8xbf16>, vector<8x64xbf16>, vector<8x64xf32> -> vector<8x64xf32>
    %c0_77 = arith.constant 0 : index
    %c0_78 = arith.constant 0 : index
    %c704 = arith.constant 704 : index
    %269 = vector.load %arg4[%c0_77, %c0_78, %c704] : memref<1x8x768xf32, #tpu.memory_space<vmem>>, vector<1x8x64xf32>
    %270 = vector.shape_cast %269 : vector<1x8x64xf32> to vector<8x64xf32>
    %271 = vector.shape_cast %268 : vector<8x64xf32> to vector<1x8x64xf32>
    tpu.vector_store %arg4[%c0_77, %c0_78, %c704], %271 {strides = array<i32>} : memref<1x8x768xf32, #tpu.memory_space<vmem>>, vector<1x8x64xf32>,
    return
  }
  func.func @transform_0(%arg0: i32) -> (i32, i32, i32) {
    %c0_i32 = arith.constant 0 : i32
    %c0_i32_0 = arith.constant 0 : i32
    %c0_i32_1 = arith.constant 0 : i32
    return %arg0, %c0_i32, %c0_i32_0 : i32, i32, i32
  }
  func.func @transform_1(%arg0: i32) -> (i32, i32) {
    %c0_i32 = arith.constant 0 : i32
    %c0_i32_0 = arith.constant 0 : i32
    %c0_i32_1 = arith.constant 0 : i32
    return %c0_i32, %c0_i32_0 : i32, i32
  }
  func.func @transform_2(%arg0: i32) -> (i32, i32) {
    %c0_i32 = arith.constant 0 : i32
    %c0_i32_0 = arith.constant 0 : i32
    %c0_i32_1 = arith.constant 0 : i32
    return %c0_i32, %c0_i32_0 : i32, i32
  }
  func.func @transform_3(%arg0: i32) -> (i32, i32, i32) {
    %c0_i32 = arith.constant 0 : i32
    %c0_i32_0 = arith.constant 0 : i32
    %c0_i32_1 = arith.constant 0 : i32
    return %arg0, %c0_i32, %c0_i32_0 : i32, i32, i32
  }
}

module attributes {stable_mosaic.version = 11 : i64} {
  func.func @_attn_kernel(%arg0: i32, %arg1: memref<1x8x768xf32, #tpu.memory_space<vmem>>, %arg2: memref<768x2304xbf16, #tpu.memory_space<vmem>>, %arg3: memref<1x2304xf32, #tpu.memory_space<vmem>>, %arg4: memref<1x8x768xf32, #tpu.memory_space<vmem>>) attributes {dimension_semantics = [#tpu.dimension_semantics<parallel>], iteration_bounds = array<i64: 2>, scalar_prefetch = 0 : i64, scratch_operands = 0 : i64, tpu.core_type = #tpu.core_type<tc>, window_params = [{transform_indices = @transform_0, window_bounds = array<i64: 1, 8, 768>}, {pipeline_mode = #tpu.pipeline_mode<synchronous>, transform_indices = @transform_1, window_bounds = array<i64: 768, 2304>}, {pipeline_mode = #tpu.pipeline_mode<synchronous>, transform_indices = @transform_2, window_bounds = array<i64: 1, 2304>}, {transform_indices = @transform_3, window_bounds = array<i64: 1, 8, 768>}]} {
    %c0 = arith.constant 0 : index
    %c0_0 = arith.constant 0 : index
    %c0_1 = arith.constant 0 : index
    %0 = vector.load %arg1[%c0, %c0_0, %c0_1] : memref<1x8x768xf32, #tpu.memory_space<vmem>>, vector<1x8x768xf32>
    %1 = vector.shape_cast %0 : vector<1x8x768xf32> to vector<8x768xf32>
    %2 = arith.truncf %1 : vector<8x768xf32> to vector<8x768xbf16>
    %c0_2 = arith.constant 0 : index
    %c0_3 = arith.constant 0 : index
    %3 = vector.load %arg2[%c0_2, %c0_3] : memref<768x2304xbf16, #tpu.memory_space<vmem>>, vector<768x2304xbf16>
    %cst = arith.constant dense<0.000000e+00> : vector<8x2304xf32>
    %4 = tpu.matmul %2, %3, %cst {dimension_numbers = #tpu.dot_dimension_numbers<[1], [0], [0], [1], [0, 0, 1, 1], [], []>} : vector<8x768xbf16>, vector<768x2304xbf16>, vector<8x2304xf32> -> vector<8x2304xf32>
    %c0_4 = arith.constant 0 : index
    %c0_5 = arith.constant 0 : index
    %5 = vector.load %arg3[%c0_4, %c0_5] : memref<1x2304xf32, #tpu.memory_space<vmem>>, vector<1x2304xf32>
    %6 = vector.broadcast %5 : vector<1x2304xf32> to vector<8x2304xf32>
    %7 = arith.addf %4, %6 : vector<8x2304xf32>
    %8 = vector.extract_strided_slice %7 {offsets = [0, 0], sizes = [8, 64], strides = [1, 1]} : vector<8x2304xf32> to vector<8x64xf32>
    %9 = arith.truncf %8 : vector<8x64xf32> to vector<8x64xbf16>
    %10 = vector.extract_strided_slice %7 {offsets = [0, 768], sizes = [8, 64], strides = [1, 1]} : vector<8x2304xf32> to vector<8x64xf32>
    %11 = arith.truncf %10 : vector<8x64xf32> to vector<8x64xbf16>
    %12 = vector.extract_strided_slice %7 {offsets = [0, 1536], sizes = [8, 64], strides = [1, 1]} : vector<8x2304xf32> to vector<8x64xf32>
    %13 = arith.truncf %12 : vector<8x64xf32> to vector<8x64xbf16>
    %cst_6 = arith.constant dense<0.000000e+00> : vector<8x8xf32>
    %14 = tpu.matmul %9, %11, %cst_6 {dimension_numbers = #tpu.dot_dimension_numbers<[1], [1], [0], [0], [0, 0, 1, 0], [], []>} : vector<8x64xbf16>, vector<8x64xbf16>, vector<8x8xf32> -> vector<8x8xf32>
    %cst_7 = arith.constant dense<0xFF800000> : vector<8xf32>
    %15 = vector.multi_reduction <maximumf>, %14, %cst_7 [1] : vector<8x8xf32> to vector<8xf32>
    %16 = vector.shape_cast %15 : vector<8xf32> to vector<8x1xf32>
    %17 = vector.broadcast %16 : vector<8x1xf32> to vector<8x8xf32>
    %18 = arith.subf %14, %17 : vector<8x8xf32>
    %19 = math.exp %18 : vector<8x8xf32>
    %cst_8 = arith.constant dense<0.000000e+00> : vector<8xf32>
    %20 = vector.multi_reduction <add>, %19, %cst_8 [1] : vector<8x8xf32> to vector<8xf32>
    %21 = vector.shape_cast %20 : vector<8xf32> to vector<8x1xf32>
    %22 = tpu.reciprocal %21 {approx = true} : vector<8x1xf32> -> vector<8x1xf32>
    %23 = vector.broadcast %22 : vector<8x1xf32> to vector<8x8xf32>
    %24 = arith.mulf %19, %23 : vector<8x8xf32>
    %25 = arith.truncf %24 : vector<8x8xf32> to vector<8x8xbf16>
    %cst_9 = arith.constant dense<0.000000e+00> : vector<8x64xf32>
    %26 = tpu.matmul %25, %13, %cst_9 {dimension_numbers = #tpu.dot_dimension_numbers<[1], [0], [0], [1], [0, 0, 1, 1], [], []>} : vector<8x8xbf16>, vector<8x64xbf16>, vector<8x64xf32> -> vector<8x64xf32>
    %c0_10 = arith.constant 0 : index
    %c0_11 = arith.constant 0 : index
    %c0_12 = arith.constant 0 : index
    %27 = vector.load %arg4[%c0_10, %c0_11, %c0_12] : memref<1x8x768xf32, #tpu.memory_space<vmem>>, vector<1x8x64xf32>
    %28 = vector.shape_cast %27 : vector<1x8x64xf32> to vector<8x64xf32>
    %29 = vector.shape_cast %26 : vector<8x64xf32> to vector<1x8x64xf32>
    tpu.vector_store %arg4[%c0_10, %c0_11, %c0_12], %29 {strides = array<i32>} : memref<1x8x768xf32, #tpu.memory_space<vmem>>, vector<1x8x64xf32>,
    %30 = vector.extract_strided_slice %7 {offsets = [0, 64], sizes = [8, 64], strides = [1, 1]} : vector<8x2304xf32> to vector<8x64xf32>
    %31 = arith.truncf %30 : vector<8x64xf32> to vector<8x64xbf16>
    %32 = vector.extract_strided_slice %7 {offsets = [0, 832], sizes = [8, 64], strides = [1, 1]} : vector<8x2304xf32> to vector<8x64xf32>
    %33 = arith.truncf %32 : vector<8x64xf32> to vector<8x64xbf16>
    %34 = vector.extract_strided_slice %7 {offsets = [0, 1600], sizes = [8, 64], strides = [1, 1]} : vector<8x2304xf32> to vector<8x64xf32>
    %35 = arith.truncf %34 : vector<8x64xf32> to vector<8x64xbf16>
    %cst_13 = arith.constant dense<0.000000e+00> : vector<8x8xf32>
    %36 = tpu.matmul %31, %33, %cst_13 {dimension_numbers = #tpu.dot_dimension_numbers<[1], [1], [0], [0], [0, 0, 1, 0], [], []>} : vector<8x64xbf16>, vector<8x64xbf16>, vector<8x8xf32> -> vector<8x8xf32>
    %cst_14 = arith.constant dense<0xFF800000> : vector<8xf32>
    %37 = vector.multi_reduction <maximumf>, %36, %cst_14 [1] : vector<8x8xf32> to vector<8xf32>
    %38 = vector.shape_cast %37 : vector<8xf32> to vector<8x1xf32>
    %39 = vector.broadcast %38 : vector<8x1xf32> to vector<8x8xf32>
    %40 = arith.subf %36, %39 : vector<8x8xf32>
    %41 = math.exp %40 : vector<8x8xf32>
    %cst_15 = arith.constant dense<0.000000e+00> : vector<8xf32>
    %42 = vector.multi_reduction <add>, %41, %cst_15 [1] : vector<8x8xf32> to vector<8xf32>
    %43 = vector.shape_cast %42 : vector<8xf32> to vector<8x1xf32>
    %44 = tpu.reciprocal %43 {approx = true} : vector<8x1xf32> -> vector<8x1xf32>
    %45 = vector.broadcast %44 : vector<8x1xf32> to vector<8x8xf32>
    %46 = arith.mulf %41, %45 : vector<8x8xf32>
    %47 = arith.truncf %46 : vector<8x8xf32> to vector<8x8xbf16>
    %cst_16 = arith.constant dense<0.000000e+00> : vector<8x64xf32>
    %48 = tpu.matmul %47, %35, %cst_16 {dimension_numbers = #tpu.dot_dimension_numbers<[1], [0], [0], [1], [0, 0, 1, 1], [], []>} : vector<8x8xbf16>, vector<8x64xbf16>, vector<8x64xf32> -> vector<8x64xf32>
    %c0_17 = arith.constant 0 : index
    %c0_18 = arith.constant 0 : index
    %c64 = arith.constant 64 : index
    %49 = vector.load %arg4[%c0_17, %c0_18, %c64] : memref<1x8x768xf32, #tpu.memory_space<vmem>>, vector<1x8x64xf32>
    %50 = vector.shape_cast %49 : vector<1x8x64xf32> to vector<8x64xf32>
    %51 = vector.shape_cast %48 : vector<8x64xf32> to vector<1x8x64xf32>
    tpu.vector_store %arg4[%c0_17, %c0_18, %c64], %51 {strides = array<i32>} : memref<1x8x768xf32, #tpu.memory_space<vmem>>, vector<1x8x64xf32>,
    %52 = vector.extract_strided_slice %7 {offsets = [0, 128], sizes = [8, 64], strides = [1, 1]} : vector<8x2304xf32> to vector<8x64xf32>
    %53 = arith.truncf %52 : vector<8x64xf32> to vector<8x64xbf16>
    %54 = vector.extract_strided_slice %7 {offsets = [0, 896], sizes = [8, 64], strides = [1, 1]} : vector<8x2304xf32> to vector<8x64xf32>
    %55 = arith.truncf %54 : vector<8x64xf32> to vector<8x64xbf16>
    %56 = vector.extract_strided_slice %7 {offsets = [0, 1664], sizes = [8, 64], strides = [1, 1]} : vector<8x2304xf32> to vector<8x64xf32>
    %57 = arith.truncf %56 : vector<8x64xf32> to vector<8x64xbf16>
    %cst_19 = arith.constant dense<0.000000e+00> : vector<8x8xf32>
    %58 = tpu.matmul %53, %55, %cst_19 {dimension_numbers = #tpu.dot_dimension_numbers<[1], [1], [0], [0], [0, 0, 1, 0], [], []>} : vector<8x64xbf16>, vector<8x64xbf16>, vector<8x8xf32> -> vector<8x8xf32>
    %cst_20 = arith.constant dense<0xFF800000> : vector<8xf32>
    %59 = vector.multi_reduction <maximumf>, %58, %cst_20 [1] : vector<8x8xf32> to vector<8xf32>
    %60 = vector.shape_cast %59 : vector<8xf32> to vector<8x1xf32>
    %61 = vector.broadcast %60 : vector<8x1xf32> to vector<8x8xf32>
    %62 = arith.subf %58, %61 : vector<8x8xf32>
    %63 = math.exp %62 : vector<8x8xf32>
    %cst_21 = arith.constant dense<0.000000e+00> : vector<8xf32>
    %64 = vector.multi_reduction <add>, %63, %cst_21 [1] : vector<8x8xf32> to vector<8xf32>
    %65 = vector.shape_cast %64 : vector<8xf32> to vector<8x1xf32>
    %66 = tpu.reciprocal %65 {approx = true} : vector<8x1xf32> -> vector<8x1xf32>
    %67 = vector.broadcast %66 : vector<8x1xf32> to vector<8x8xf32>
    %68 = arith.mulf %63, %67 : vector<8x8xf32>
    %69 = arith.truncf %68 : vector<8x8xf32> to vector<8x8xbf16>
    %cst_22 = arith.constant dense<0.000000e+00> : vector<8x64xf32>
    %70 = tpu.matmul %69, %57, %cst_22 {dimension_numbers = #tpu.dot_dimension_numbers<[1], [0], [0], [1], [0, 0, 1, 1], [], []>} : vector<8x8xbf16>, vector<8x64xbf16>, vector<8x64xf32> -> vector<8x64xf32>
    %c0_23 = arith.constant 0 : index
    %c0_24 = arith.constant 0 : index
    %c128 = arith.constant 128 : index
    %71 = vector.load %arg4[%c0_23, %c0_24, %c128] : memref<1x8x768xf32, #tpu.memory_space<vmem>>, vector<1x8x64xf32>
    %72 = vector.shape_cast %71 : vector<1x8x64xf32> to vector<8x64xf32>
    %73 = vector.shape_cast %70 : vector<8x64xf32> to vector<1x8x64xf32>
    tpu.vector_store %arg4[%c0_23, %c0_24, %c128], %73 {strides = array<i32>} : memref<1x8x768xf32, #tpu.memory_space<vmem>>, vector<1x8x64xf32>,
    %74 = vector.extract_strided_slice %7 {offsets = [0, 192], sizes = [8, 64], strides = [1, 1]} : vector<8x2304xf32> to vector<8x64xf32>
    %75 = arith.truncf %74 : vector<8x64xf32> to vector<8x64xbf16>
    %76 = vector.extract_strided_slice %7 {offsets = [0, 960], sizes = [8, 64], strides = [1, 1]} : vector<8x2304xf32> to vector<8x64xf32>
    %77 = arith.truncf %76 : vector<8x64xf32> to vector<8x64xbf16>
    %78 = vector.extract_strided_slice %7 {offsets = [0, 1728], sizes = [8, 64], strides = [1, 1]} : vector<8x2304xf32> to vector<8x64xf32>
    %79 = arith.truncf %78 : vector<8x64xf32> to vector<8x64xbf16>
    %cst_25 = arith.constant dense<0.000000e+00> : vector<8x8xf32>
    %80 = tpu.matmul %75, %77, %cst_25 {dimension_numbers = #tpu.dot_dimension_numbers<[1], [1], [0], [0], [0, 0, 1, 0], [], []>} : vector<8x64xbf16>, vector<8x64xbf16>, vector<8x8xf32> -> vector<8x8xf32>
    %cst_26 = arith.constant dense<0xFF800000> : vector<8xf32>
    %81 = vector.multi_reduction <maximumf>, %80, %cst_26 [1] : vector<8x8xf32> to vector<8xf32>
    %82 = vector.shape_cast %81 : vector<8xf32> to vector<8x1xf32>
    %83 = vector.broadcast %82 : vector<8x1xf32> to vector<8x8xf32>
    %84 = arith.subf %80, %83 : vector<8x8xf32>
    %85 = math.exp %84 : vector<8x8xf32>
    %cst_27 = arith.constant dense<0.000000e+00> : vector<8xf32>
    %86 = vector.multi_reduction <add>, %85, %cst_27 [1] : vector<8x8xf32> to vector<8xf32>
    %87 = vector.shape_cast %86 : vector<8xf32> to vector<8x1xf32>
    %88 = tpu.reciprocal %87 {approx = true} : vector<8x1xf32> -> vector<8x1xf32>
    %89 = vector.broadcast %88 : vector<8x1xf32> to vector<8x8xf32>
    %90 = arith.mulf %85, %89 : vector<8x8xf32>
    %91 = arith.truncf %90 : vector<8x8xf32> to vector<8x8xbf16>
    %cst_28 = arith.constant dense<0.000000e+00> : vector<8x64xf32>
    %92 = tpu.matmul %91, %79, %cst_28 {dimension_numbers = #tpu.dot_dimension_numbers<[1], [0], [0], [1], [0, 0, 1, 1], [], []>} : vector<8x8xbf16>, vector<8x64xbf16>, vector<8x64xf32> -> vector<8x64xf32>
    %c0_29 = arith.constant 0 : index
    %c0_30 = arith.constant 0 : index
    %c192 = arith.constant 192 : index
    %93 = vector.load %arg4[%c0_29, %c0_30, %c192] : memref<1x8x768xf32, #tpu.memory_space<vmem>>, vector<1x8x64xf32>
    %94 = vector.shape_cast %93 : vector<1x8x64xf32> to vector<8x64xf32>
    %95 = vector.shape_cast %92 : vector<8x64xf32> to vector<1x8x64xf32>
    tpu.vector_store %arg4[%c0_29, %c0_30, %c192], %95 {strides = array<i32>} : memref<1x8x768xf32, #tpu.memory_space<vmem>>, vector<1x8x64xf32>,
    %96 = vector.extract_strided_slice %7 {offsets = [0, 256], sizes = [8, 64], strides = [1, 1]} : vector<8x2304xf32> to vector<8x64xf32>
    %97 = arith.truncf %96 : vector<8x64xf32> to vector<8x64xbf16>
    %98 = vector.extract_strided_slice %7 {offsets = [0, 1024], sizes = [8, 64], strides = [1, 1]} : vector<8x2304xf32> to vector<8x64xf32>
    %99 = arith.truncf %98 : vector<8x64xf32> to vector<8x64xbf16>
    %100 = vector.extract_strided_slice %7 {offsets = [0, 1792], sizes = [8, 64], strides = [1, 1]} : vector<8x2304xf32> to vector<8x64xf32>
    %101 = arith.truncf %100 : vector<8x64xf32> to vector<8x64xbf16>
    %cst_31 = arith.constant dense<0.000000e+00> : vector<8x8xf32>
    %102 = tpu.matmul %97, %99, %cst_31 {dimension_numbers = #tpu.dot_dimension_numbers<[1], [1], [0], [0], [0, 0, 1, 0], [], []>} : vector<8x64xbf16>, vector<8x64xbf16>, vector<8x8xf32> -> vector<8x8xf32>
    %cst_32 = arith.constant dense<0xFF800000> : vector<8xf32>
    %103 = vector.multi_reduction <maximumf>, %102, %cst_32 [1] : vector<8x8xf32> to vector<8xf32>
    %104 = vector.shape_cast %103 : vector<8xf32> to vector<8x1xf32>
    %105 = vector.broadcast %104 : vector<8x1xf32> to vector<8x8xf32>
    %106 = arith.subf %102, %105 : vector<8x8xf32>
    %107 = math.exp %106 : vector<8x8xf32>
    %cst_33 = arith.constant dense<0.000000e+00> : vector<8xf32>
    %108 = vector.multi_reduction <add>, %107, %cst_33 [1] : vector<8x8xf32> to vector<8xf32>
    %109 = vector.shape_cast %108 : vector<8xf32> to vector<8x1xf32>
    %110 = tpu.reciprocal %109 {approx = true} : vector<8x1xf32> -> vector<8x1xf32>
    %111 = vector.broadcast %110 : vector<8x1xf32> to vector<8x8xf32>
    %112 = arith.mulf %107, %111 : vector<8x8xf32>
    %113 = arith.truncf %112 : vector<8x8xf32> to vector<8x8xbf16>
    %cst_34 = arith.constant dense<0.000000e+00> : vector<8x64xf32>
    %114 = tpu.matmul %113, %101, %cst_34 {dimension_numbers = #tpu.dot_dimension_numbers<[1], [0], [0], [1], [0, 0, 1, 1], [], []>} : vector<8x8xbf16>, vector<8x64xbf16>, vector<8x64xf32> -> vector<8x64xf32>
    %c0_35 = arith.constant 0 : index
    %c0_36 = arith.constant 0 : index
    %c256 = arith.constant 256 : index
    %115 = vector.load %arg4[%c0_35, %c0_36, %c256] : memref<1x8x768xf32, #tpu.memory_space<vmem>>, vector<1x8x64xf32>
    %116 = vector.shape_cast %115 : vector<1x8x64xf32> to vector<8x64xf32>
    %117 = vector.shape_cast %114 : vector<8x64xf32> to vector<1x8x64xf32>
    tpu.vector_store %arg4[%c0_35, %c0_36, %c256], %117 {strides = array<i32>} : memref<1x8x768xf32, #tpu.memory_space<vmem>>, vector<1x8x64xf32>,
    %118 = vector.extract_strided_slice %7 {offsets = [0, 320], sizes = [8, 64], strides = [1, 1]} : vector<8x2304xf32> to vector<8x64xf32>
    %119 = arith.truncf %118 : vector<8x64xf32> to vector<8x64xbf16>
    %120 = vector.extract_strided_slice %7 {offsets = [0, 1088], sizes = [8, 64], strides = [1, 1]} : vector<8x2304xf32> to vector<8x64xf32>
    %121 = arith.truncf %120 : vector<8x64xf32> to vector<8x64xbf16>
    %122 = vector.extract_strided_slice %7 {offsets = [0, 1856], sizes = [8, 64], strides = [1, 1]} : vector<8x2304xf32> to vector<8x64xf32>
    %123 = arith.truncf %122 : vector<8x64xf32> to vector<8x64xbf16>
    %cst_37 = arith.constant dense<0.000000e+00> : vector<8x8xf32>
    %124 = tpu.matmul %119, %121, %cst_37 {dimension_numbers = #tpu.dot_dimension_numbers<[1], [1], [0], [0], [0, 0, 1, 0], [], []>} : vector<8x64xbf16>, vector<8x64xbf16>, vector<8x8xf32> -> vector<8x8xf32>
    %cst_38 = arith.constant dense<0xFF800000> : vector<8xf32>
    %125 = vector.multi_reduction <maximumf>, %124, %cst_38 [1] : vector<8x8xf32> to vector<8xf32>
    %126 = vector.shape_cast %125 : vector<8xf32> to vector<8x1xf32>
    %127 = vector.broadcast %126 : vector<8x1xf32> to vector<8x8xf32>
    %128 = arith.subf %124, %127 : vector<8x8xf32>
    %129 = math.exp %128 : vector<8x8xf32>
    %cst_39 = arith.constant dense<0.000000e+00> : vector<8xf32>
    %130 = vector.multi_reduction <add>, %129, %cst_39 [1] : vector<8x8xf32> to vector<8xf32>
    %131 = vector.shape_cast %130 : vector<8xf32> to vector<8x1xf32>
    %132 = tpu.reciprocal %131 {approx = true} : vector<8x1xf32> -> vector<8x1xf32>
    %133 = vector.broadcast %132 : vector<8x1xf32> to vector<8x8xf32>
    %134 = arith.mulf %129, %133 : vector<8x8xf32>
    %135 = arith.truncf %134 : vector<8x8xf32> to vector<8x8xbf16>
    %cst_40 = arith.constant dense<0.000000e+00> : vector<8x64xf32>
    %136 = tpu.matmul %135, %123, %cst_40 {dimension_numbers = #tpu.dot_dimension_numbers<[1], [0], [0], [1], [0, 0, 1, 1], [], []>} : vector<8x8xbf16>, vector<8x64xbf16>, vector<8x64xf32> -> vector<8x64xf32>
    %c0_41 = arith.constant 0 : index
    %c0_42 = arith.constant 0 : index
    %c320 = arith.constant 320 : index
    %137 = vector.load %arg4[%c0_41, %c0_42, %c320] : memref<1x8x768xf32, #tpu.memory_space<vmem>>, vector<1x8x64xf32>
    %138 = vector.shape_cast %137 : vector<1x8x64xf32> to vector<8x64xf32>
    %139 = vector.shape_cast %136 : vector<8x64xf32> to vector<1x8x64xf32>
    tpu.vector_store %arg4[%c0_41, %c0_42, %c320], %139 {strides = array<i32>} : memref<1x8x768xf32, #tpu.memory_space<vmem>>, vector<1x8x64xf32>,
    %140 = vector.extract_strided_slice %7 {offsets = [0, 384], sizes = [8, 64], strides = [1, 1]} : vector<8x2304xf32> to vector<8x64xf32>
    %141 = arith.truncf %140 : vector<8x64xf32> to vector<8x64xbf16>
    %142 = vector.extract_strided_slice %7 {offsets = [0, 1152], sizes = [8, 64], strides = [1, 1]} : vector<8x2304xf32> to vector<8x64xf32>
    %143 = arith.truncf %142 : vector<8x64xf32> to vector<8x64xbf16>
    %144 = vector.extract_strided_slice %7 {offsets = [0, 1920], sizes = [8, 64], strides = [1, 1]} : vector<8x2304xf32> to vector<8x64xf32>
    %145 = arith.truncf %144 : vector<8x64xf32> to vector<8x64xbf16>
    %cst_43 = arith.constant dense<0.000000e+00> : vector<8x8xf32>
    %146 = tpu.matmul %141, %143, %cst_43 {dimension_numbers = #tpu.dot_dimension_numbers<[1], [1], [0], [0], [0, 0, 1, 0], [], []>} : vector<8x64xbf16>, vector<8x64xbf16>, vector<8x8xf32> -> vector<8x8xf32>
    %cst_44 = arith.constant dense<0xFF800000> : vector<8xf32>
    %147 = vector.multi_reduction <maximumf>, %146, %cst_44 [1] : vector<8x8xf32> to vector<8xf32>
    %148 = vector.shape_cast %147 : vector<8xf32> to vector<8x1xf32>
    %149 = vector.broadcast %148 : vector<8x1xf32> to vector<8x8xf32>
    %150 = arith.subf %146, %149 : vector<8x8xf32>
    %151 = math.exp %150 : vector<8x8xf32>
    %cst_45 = arith.constant dense<0.000000e+00> : vector<8xf32>
    %152 = vector.multi_reduction <add>, %151, %cst_45 [1] : vector<8x8xf32> to vector<8xf32>
    %153 = vector.shape_cast %152 : vector<8xf32> to vector<8x1xf32>
    %154 = tpu.reciprocal %153 {approx = true} : vector<8x1xf32> -> vector<8x1xf32>
    %155 = vector.broadcast %154 : vector<8x1xf32> to vector<8x8xf32>
    %156 = arith.mulf %151, %155 : vector<8x8xf32>
    %157 = arith.truncf %156 : vector<8x8xf32> to vector<8x8xbf16>
    %cst_46 = arith.constant dense<0.000000e+00> : vector<8x64xf32>
    %158 = tpu.matmul %157, %145, %cst_46 {dimension_numbers = #tpu.dot_dimension_numbers<[1], [0], [0], [1], [0, 0, 1, 1], [], []>} : vector<8x8xbf16>, vector<8x64xbf16>, vector<8x64xf32> -> vector<8x64xf32>
    %c0_47 = arith.constant 0 : index
    %c0_48 = arith.constant 0 : index
    %c384 = arith.constant 384 : index
    %159 = vector.load %arg4[%c0_47, %c0_48, %c384] : memref<1x8x768xf32, #tpu.memory_space<vmem>>, vector<1x8x64xf32>
    %160 = vector.shape_cast %159 : vector<1x8x64xf32> to vector<8x64xf32>
    %161 = vector.shape_cast %158 : vector<8x64xf32> to vector<1x8x64xf32>
    tpu.vector_store %arg4[%c0_47, %c0_48, %c384], %161 {strides = array<i32>} : memref<1x8x768xf32, #tpu.memory_space<vmem>>, vector<1x8x64xf32>,
    %162 = vector.extract_strided_slice %7 {offsets = [0, 448], sizes = [8, 64], strides = [1, 1]} : vector<8x2304xf32> to vector<8x64xf32>
    %163 = arith.truncf %162 : vector<8x64xf32> to vector<8x64xbf16>
    %164 = vector.extract_strided_slice %7 {offsets = [0, 1216], sizes = [8, 64], strides = [1, 1]} : vector<8x2304xf32> to vector<8x64xf32>
    %165 = arith.truncf %164 : vector<8x64xf32> to vector<8x64xbf16>
    %166 = vector.extract_strided_slice %7 {offsets = [0, 1984], sizes = [8, 64], strides = [1, 1]} : vector<8x2304xf32> to vector<8x64xf32>
    %167 = arith.truncf %166 : vector<8x64xf32> to vector<8x64xbf16>
    %cst_49 = arith.constant dense<0.000000e+00> : vector<8x8xf32>
    %168 = tpu.matmul %163, %165, %cst_49 {dimension_numbers = #tpu.dot_dimension_numbers<[1], [1], [0], [0], [0, 0, 1, 0], [], []>} : vector<8x64xbf16>, vector<8x64xbf16>, vector<8x8xf32> -> vector<8x8xf32>
    %cst_50 = arith.constant dense<0xFF800000> : vector<8xf32>
    %169 = vector.multi_reduction <maximumf>, %168, %cst_50 [1] : vector<8x8xf32> to vector<8xf32>
    %170 = vector.shape_cast %169 : vector<8xf32> to vector<8x1xf32>
    %171 = vector.broadcast %170 : vector<8x1xf32> to vector<8x8xf32>
    %172 = arith.subf %168, %171 : vector<8x8xf32>
    %173 = math.exp %172 : vector<8x8xf32>
    %cst_51 = arith.constant dense<0.000000e+00> : vector<8xf32>
    %174 = vector.multi_reduction <add>, %173, %cst_51 [1] : vector<8x8xf32> to vector<8xf32>
    %175 = vector.shape_cast %174 : vector<8xf32> to vector<8x1xf32>
    %176 = tpu.reciprocal %175 {approx = true} : vector<8x1xf32> -> vector<8x1xf32>
    %177 = vector.broadcast %176 : vector<8x1xf32> to vector<8x8xf32>
    %178 = arith.mulf %173, %177 : vector<8x8xf32>
    %179 = arith.truncf %178 : vector<8x8xf32> to vector<8x8xbf16>
    %cst_52 = arith.constant dense<0.000000e+00> : vector<8x64xf32>
    %180 = tpu.matmul %179, %167, %cst_52 {dimension_numbers = #tpu.dot_dimension_numbers<[1], [0], [0], [1], [0, 0, 1, 1], [], []>} : vector<8x8xbf16>, vector<8x64xbf16>, vector<8x64xf32> -> vector<8x64xf32>
    %c0_53 = arith.constant 0 : index
    %c0_54 = arith.constant 0 : index
    %c448 = arith.constant 448 : index
    %181 = vector.load %arg4[%c0_53, %c0_54, %c448] : memref<1x8x768xf32, #tpu.memory_space<vmem>>, vector<1x8x64xf32>
    %182 = vector.shape_cast %181 : vector<1x8x64xf32> to vector<8x64xf32>
    %183 = vector.shape_cast %180 : vector<8x64xf32> to vector<1x8x64xf32>
    tpu.vector_store %arg4[%c0_53, %c0_54, %c448], %183 {strides = array<i32>} : memref<1x8x768xf32, #tpu.memory_space<vmem>>, vector<1x8x64xf32>,
    %184 = vector.extract_strided_slice %7 {offsets = [0, 512], sizes = [8, 64], strides = [1, 1]} : vector<8x2304xf32> to vector<8x64xf32>
    %185 = arith.truncf %184 : vector<8x64xf32> to vector<8x64xbf16>
    %186 = vector.extract_strided_slice %7 {offsets = [0, 1280], sizes = [8, 64], strides = [1, 1]} : vector<8x2304xf32> to vector<8x64xf32>
    %187 = arith.truncf %186 : vector<8x64xf32> to vector<8x64xbf16>
    %188 = vector.extract_strided_slice %7 {offsets = [0, 2048], sizes = [8, 64], strides = [1, 1]} : vector<8x2304xf32> to vector<8x64xf32>
    %189 = arith.truncf %188 : vector<8x64xf32> to vector<8x64xbf16>
    %cst_55 = arith.constant dense<0.000000e+00> : vector<8x8xf32>
    %190 = tpu.matmul %185, %187, %cst_55 {dimension_numbers = #tpu.dot_dimension_numbers<[1], [1], [0], [0], [0, 0, 1, 0], [], []>} : vector<8x64xbf16>, vector<8x64xbf16>, vector<8x8xf32> -> vector<8x8xf32>
    %cst_56 = arith.constant dense<0xFF800000> : vector<8xf32>
    %191 = vector.multi_reduction <maximumf>, %190, %cst_56 [1] : vector<8x8xf32> to vector<8xf32>
    %192 = vector.shape_cast %191 : vector<8xf32> to vector<8x1xf32>
    %193 = vector.broadcast %192 : vector<8x1xf32> to vector<8x8xf32>
    %194 = arith.subf %190, %193 : vector<8x8xf32>
    %195 = math.exp %194 : vector<8x8xf32>
    %cst_57 = arith.constant dense<0.000000e+00> : vector<8xf32>
    %196 = vector.multi_reduction <add>, %195, %cst_57 [1] : vector<8x8xf32> to vector<8xf32>
    %197 = vector.shape_cast %196 : vector<8xf32> to vector<8x1xf32>
    %198 = tpu.reciprocal %197 {approx = true} : vector<8x1xf32> -> vector<8x1xf32>
    %199 = vector.broadcast %198 : vector<8x1xf32> to vector<8x8xf32>
    %200 = arith.mulf %195, %199 : vector<8x8xf32>
    %201 = arith.truncf %200 : vector<8x8xf32> to vector<8x8xbf16>
    %cst_58 = arith.constant dense<0.000000e+00> : vector<8x64xf32>
    %202 = tpu.matmul %201, %189, %cst_58 {dimension_numbers = #tpu.dot_dimension_numbers<[1], [0], [0], [1], [0, 0, 1, 1], [], []>} : vector<8x8xbf16>, vector<8x64xbf16>, vector<8x64xf32> -> vector<8x64xf32>
    %c0_59 = arith.constant 0 : index
    %c0_60 = arith.constant 0 : index
    %c512 = arith.constant 512 : index
    %203 = vector.load %arg4[%c0_59, %c0_60, %c512] : memref<1x8x768xf32, #tpu.memory_space<vmem>>, vector<1x8x64xf32>
    %204 = vector.shape_cast %203 : vector<1x8x64xf32> to vector<8x64xf32>
    %205 = vector.shape_cast %202 : vector<8x64xf32> to vector<1x8x64xf32>
    tpu.vector_store %arg4[%c0_59, %c0_60, %c512], %205 {strides = array<i32>} : memref<1x8x768xf32, #tpu.memory_space<vmem>>, vector<1x8x64xf32>,
    %206 = vector.extract_strided_slice %7 {offsets = [0, 576], sizes = [8, 64], strides = [1, 1]} : vector<8x2304xf32> to vector<8x64xf32>
    %207 = arith.truncf %206 : vector<8x64xf32> to vector<8x64xbf16>
    %208 = vector.extract_strided_slice %7 {offsets = [0, 1344], sizes = [8, 64], strides = [1, 1]} : vector<8x2304xf32> to vector<8x64xf32>
    %209 = arith.truncf %208 : vector<8x64xf32> to vector<8x64xbf16>
    %210 = vector.extract_strided_slice %7 {offsets = [0, 2112], sizes = [8, 64], strides = [1, 1]} : vector<8x2304xf32> to vector<8x64xf32>
    %211 = arith.truncf %210 : vector<8x64xf32> to vector<8x64xbf16>
    %cst_61 = arith.constant dense<0.000000e+00> : vector<8x8xf32>
    %212 = tpu.matmul %207, %209, %cst_61 {dimension_numbers = #tpu.dot_dimension_numbers<[1], [1], [0], [0], [0, 0, 1, 0], [], []>} : vector<8x64xbf16>, vector<8x64xbf16>, vector<8x8xf32> -> vector<8x8xf32>
    %cst_62 = arith.constant dense<0xFF800000> : vector<8xf32>
    %213 = vector.multi_reduction <maximumf>, %212, %cst_62 [1] : vector<8x8xf32> to vector<8xf32>
    %214 = vector.shape_cast %213 : vector<8xf32> to vector<8x1xf32>
    %215 = vector.broadcast %214 : vector<8x1xf32> to vector<8x8xf32>
    %216 = arith.subf %212, %215 : vector<8x8xf32>
    %217 = math.exp %216 : vector<8x8xf32>
    %cst_63 = arith.constant dense<0.000000e+00> : vector<8xf32>
    %218 = vector.multi_reduction <add>, %217, %cst_63 [1] : vector<8x8xf32> to vector<8xf32>
    %219 = vector.shape_cast %218 : vector<8xf32> to vector<8x1xf32>
    %220 = tpu.reciprocal %219 {approx = true} : vector<8x1xf32> -> vector<8x1xf32>
    %221 = vector.broadcast %220 : vector<8x1xf32> to vector<8x8xf32>
    %222 = arith.mulf %217, %221 : vector<8x8xf32>
    %223 = arith.truncf %222 : vector<8x8xf32> to vector<8x8xbf16>
    %cst_64 = arith.constant dense<0.000000e+00> : vector<8x64xf32>
    %224 = tpu.matmul %223, %211, %cst_64 {dimension_numbers = #tpu.dot_dimension_numbers<[1], [0], [0], [1], [0, 0, 1, 1], [], []>} : vector<8x8xbf16>, vector<8x64xbf16>, vector<8x64xf32> -> vector<8x64xf32>
    %c0_65 = arith.constant 0 : index
    %c0_66 = arith.constant 0 : index
    %c576 = arith.constant 576 : index
    %225 = vector.load %arg4[%c0_65, %c0_66, %c576] : memref<1x8x768xf32, #tpu.memory_space<vmem>>, vector<1x8x64xf32>
    %226 = vector.shape_cast %225 : vector<1x8x64xf32> to vector<8x64xf32>
    %227 = vector.shape_cast %224 : vector<8x64xf32> to vector<1x8x64xf32>
    tpu.vector_store %arg4[%c0_65, %c0_66, %c576], %227 {strides = array<i32>} : memref<1x8x768xf32, #tpu.memory_space<vmem>>, vector<1x8x64xf32>,
    %228 = vector.extract_strided_slice %7 {offsets = [0, 640], sizes = [8, 64], strides = [1, 1]} : vector<8x2304xf32> to vector<8x64xf32>
    %229 = arith.truncf %228 : vector<8x64xf32> to vector<8x64xbf16>
    %230 = vector.extract_strided_slice %7 {offsets = [0, 1408], sizes = [8, 64], strides = [1, 1]} : vector<8x2304xf32> to vector<8x64xf32>
    %231 = arith.truncf %230 : vector<8x64xf32> to vector<8x64xbf16>
    %232 = vector.extract_strided_slice %7 {offsets = [0, 2176], sizes = [8, 64], strides = [1, 1]} : vector<8x2304xf32> to vector<8x64xf32>
    %233 = arith.truncf %232 : vector<8x64xf32> to vector<8x64xbf16>
    %cst_67 = arith.constant dense<0.000000e+00> : vector<8x8xf32>
    %234 = tpu.matmul %229, %231, %cst_67 {dimension_numbers = #tpu.dot_dimension_numbers<[1], [1], [0], [0], [0, 0, 1, 0], [], []>} : vector<8x64xbf16>, vector<8x64xbf16>, vector<8x8xf32> -> vector<8x8xf32>
    %cst_68 = arith.constant dense<0xFF800000> : vector<8xf32>
    %235 = vector.multi_reduction <maximumf>, %234, %cst_68 [1] : vector<8x8xf32> to vector<8xf32>
    %236 = vector.shape_cast %235 : vector<8xf32> to vector<8x1xf32>
    %237 = vector.broadcast %236 : vector<8x1xf32> to vector<8x8xf32>
    %238 = arith.subf %234, %237 : vector<8x8xf32>
    %239 = math.exp %238 : vector<8x8xf32>
    %cst_69 = arith.constant dense<0.000000e+00> : vector<8xf32>
    %240 = vector.multi_reduction <add>, %239, %cst_69 [1] : vector<8x8xf32> to vector<8xf32>
    %241 = vector.shape_cast %240 : vector<8xf32> to vector<8x1xf32>
    %242 = tpu.reciprocal %241 {approx = true} : vector<8x1xf32> -> vector<8x1xf32>
    %243 = vector.broadcast %242 : vector<8x1xf32> to vector<8x8xf32>
    %244 = arith.mulf %239, %243 : vector<8x8xf32>
    %245 = arith.truncf %244 : vector<8x8xf32> to vector<8x8xbf16>
    %cst_70 = arith.constant dense<0.000000e+00> : vector<8x64xf32>
    %246 = tpu.matmul %245, %233, %cst_70 {dimension_numbers = #tpu.dot_dimension_numbers<[1], [0], [0], [1], [0, 0, 1, 1], [], []>} : vector<8x8xbf16>, vector<8x64xbf16>, vector<8x64xf32> -> vector<8x64xf32>
    %c0_71 = arith.constant 0 : index
    %c0_72 = arith.constant 0 : index
    %c640 = arith.constant 640 : index
    %247 = vector.load %arg4[%c0_71, %c0_72, %c640] : memref<1x8x768xf32, #tpu.memory_space<vmem>>, vector<1x8x64xf32>
    %248 = vector.shape_cast %247 : vector<1x8x64xf32> to vector<8x64xf32>
    %249 = vector.shape_cast %246 : vector<8x64xf32> to vector<1x8x64xf32>
    tpu.vector_store %arg4[%c0_71, %c0_72, %c640], %249 {strides = array<i32>} : memref<1x8x768xf32, #tpu.memory_space<vmem>>, vector<1x8x64xf32>,
    %250 = vector.extract_strided_slice %7 {offsets = [0, 704], sizes = [8, 64], strides = [1, 1]} : vector<8x2304xf32> to vector<8x64xf32>
    %251 = arith.truncf %250 : vector<8x64xf32> to vector<8x64xbf16>
    %252 = vector.extract_strided_slice %7 {offsets = [0, 1472], sizes = [8, 64], strides = [1, 1]} : vector<8x2304xf32> to vector<8x64xf32>
    %253 = arith.truncf %252 : vector<8x64xf32> to vector<8x64xbf16>
    %254 = vector.extract_strided_slice %7 {offsets = [0, 2240], sizes = [8, 64], strides = [1, 1]} : vector<8x2304xf32> to vector<8x64xf32>
    %255 = arith.truncf %254 : vector<8x64xf32> to vector<8x64xbf16>
    %cst_73 = arith.constant dense<0.000000e+00> : vector<8x8xf32>
    %256 = tpu.matmul %251, %253, %cst_73 {dimension_numbers = #tpu.dot_dimension_numbers<[1], [1], [0], [0], [0, 0, 1, 0], [], []>} : vector<8x64xbf16>, vector<8x64xbf16>, vector<8x8xf32> -> vector<8x8xf32>
    %cst_74 = arith.constant dense<0xFF800000> : vector<8xf32>
    %257 = vector.multi_reduction <maximumf>, %256, %cst_74 [1] : vector<8x8xf32> to vector<8xf32>
    %258 = vector.shape_cast %257 : vector<8xf32> to vector<8x1xf32>
    %259 = vector.broadcast %258 : vector<8x1xf32> to vector<8x8xf32>
    %260 = arith.subf %256, %259 : vector<8x8xf32>
    %261 = math.exp %260 : vector<8x8xf32>
    %cst_75 = arith.constant dense<0.000000e+00> : vector<8xf32>
    %262 = vector.multi_reduction <add>, %261, %cst_75 [1] : vector<8x8xf32> to vector<8xf32>
    %263 = vector.shape_cast %262 : vector<8xf32> to vector<8x1xf32>
    %264 = tpu.reciprocal %263 {approx = true} : vector<8x1xf32> -> vector<8x1xf32>
    %265 = vector.broadcast %264 : vector<8x1xf32> to vector<8x8xf32>
    %266 = arith.mulf %261, %265 : vector<8x8xf32>
    %267 = arith.truncf %266 : vector<8x8xf32> to vector<8x8xbf16>
    %cst_76 = arith.constant dense<0.000000e+00> : vector<8x64xf32>
    %268 = tpu.matmul %267, %255, %cst_76 {dimension_numbers = #tpu.dot_dimension_numbers<[1], [0], [0], [1], [0, 0, 1, 1], [], []>} : vector<8x8xbf16>, vector<8x64xbf16>, vector<8x64xf32> -> vector<8x64xf32>
    %c0_77 = arith.constant 0 : index
    %c0_78 = arith.constant 0 : index
    %c704 = arith.constant 704 : index
    %269 = vector.load %arg4[%c0_77, %c0_78, %c704] : memref<1x8x768xf32, #tpu.memory_space<vmem>>, vector<1x8x64xf32>
    %270 = vector.shape_cast %269 : vector<1x8x64xf32> to vector<8x64xf32>
    %271 = vector.shape_cast %268 : vector<8x64xf32> to vector<1x8x64xf32>
    tpu.vector_store %arg4[%c0_77, %c0_78, %c704], %271 {strides = array<i32>} : memref<1x8x768xf32, #tpu.memory_space<vmem>>, vector<1x8x64xf32>,
    return
  }
  func.func @transform_0(%arg0: i32) -> (i32, i32, i32) {
    %c0_i32 = arith.constant 0 : i32
    %c0_i32_0 = arith.constant 0 : i32
    %c0_i32_1 = arith.constant 0 : i32
    return %arg0, %c0_i32, %c0_i32_0 : i32, i32, i32
  }
  func.func @transform_1(%arg0: i32) -> (i32, i32) {
    %c0_i32 = arith.constant 0 : i32
    %c0_i32_0 = arith.constant 0 : i32
    %c0_i32_1 = arith.constant 0 : i32
    return %c0_i32, %c0_i32_0 : i32, i32
  }
  func.func @transform_2(%arg0: i32) -> (i32, i32) {
    %c0_i32 = arith.constant 0 : i32
    %c0_i32_0 = arith.constant 0 : i32
    %c0_i32_1 = arith.constant 0 : i32
    return %c0_i32, %c0_i32_0 : i32, i32
  }
  func.func @transform_3(%arg0: i32) -> (i32, i32, i32) {
    %c0_i32 = arith.constant 0 : i32
    %c0_i32_0 = arith.constant 0 : i32
    %c0_i32_1 = arith.constant 0 : i32
    return %arg0, %c0_i32, %c0_i32_0 : i32, i32, i32
  }
}

</mosaic_0001>

<bundles_post_ra>
// kernel: tpu_custom_call.1
= control target key start
LH: loop header
LB: loop body
LE: loop exit
PB: predicated region body
PF: predicated region fallthrough
CT: control target
= control target key end

     0   :  { %8 = vsyncpa [#allocation3], 0  ;;  %s11465_s0 = inlined_call_operand.hbm [shape: f32[2,8,768], index: 0, kind: input, shape index: {}]   ;;  %s11466_s1 = inlined_call_operand.hbm [shape: bf16[768,2304], index: 1, kind: input, shape index: {}]   ;;  %s11467_s2 = inlined_call_operand.hbm [shape: f32[1,2304], index: 2, kind: input, shape index: {}]   ;;  %s11468_s3 = inlined_call_operand.hbm [shape: f32[2,8,768], index: 3, kind: output, shape index: {}]  }
   0x1   :  { %10 = vsyncpa [#allocation3 + $0x1], 0 }
   0x2   :  { %11 = vsyncpa [#allocation6], 0 }
   0x3   :  { %12 = vsyncpa [#allocation4], 0 }
   0x4   :  { %14 = vsyncpa [#allocation4 + $0x1], 0  ;;  %s10772_s12 = smov 0   ;;  %s10774_s13 = smov 0  }
   0x5   :  { %s10776_s14 = smov 0   ;;  %s10778_s15 = smov 0  }
   0x6 LB: > { %s10793_s16 = sadd.s32 4294967295, %s10741_s15   ;;  %s8078_s17 = sadd.s32 4294967294, %s10741_s15   ;;  %s10741_s15 = sphi %s10778_s15, %s11490_s15   ;;  %s10737_s14 = sphi %s10776_s14, %s11489_s14   ;;  %s10733_s13 = sphi %s10774_s13, %s11488_s13   ;;  %s10729_s12 = sphi %s10772_s12, %s11487_s12  }
   0x7   : > { %p40_p0 = scmp.ne.s32.totalorder %s10733_s13, %s10729_s12  ;;  %p11469_p1 = scmp.eq.s32.totalorder %s10793_s16, 0 }
   0x8   : > { %p112_p3 = scmp.eq.s32.totalorder %s8078_s17, 1  ;;  %p8079_p5 = scmp.ge.s32.totalorder %s10741_s15, 1 }
   0x9   : > { %p10802_p4 = por %p11469_p1, %p40_p0  ;;  %p119_p7 = scmp.lt.s32.totalorder %s10741_s15, 3 }
   0xa   : > { %p10807_p6 = por %p112_p3, %p40_p0  ;;  %s10743_s21 = smov [#allocation5]  }
   0xb   : > { %s11473_s18 = scalar_select %p10802_p4, 1, 0 }
   0xc   : > { %s11474_s19 = scalar_select %p10807_p6, 1, 0 }
   0xd   : > { %p10812_p8 = pnand %p8079_p5, %p119_p7  ;;  %s131_s22 = sshll.u32 %s10743_s21, 4  ;;  %s132_s22 = int_to_ptr.vmem [resolvable:$true] %s131_s22 }
   0xe   : > { %s10744_s24 = smov [#allocation7]   ;;  %s10604_s26 = scalar_lea.vmem %s132_s22, 110592 }
   0xf   : > { %s11475_s20 = scalar_select %p10812_p8, 1, 0 }
  0x10   : > { %p9186_p9 = pneg %p10812_p8  ;;  %s145_s25 = sshll.u32 %s10744_s24, 4  ;;  %s146_s25 = int_to_ptr.vmem [resolvable:$true] %s145_s25 }
  0x11   : > { %p10605_p13 = scmp.ne.s32.totalorder %s132_s22, %s10604_s26  ;;  %p10612_p5 = scmp.lt.s32.totalorder %s132_s22, %s132_s22 }
  0x12   : > { %p10821_p11 = pnand %p9186_p9, %p11469_p1  ;;  %p10613_p7 = scmp.lt.s32.totalorder %s10604_s26, %s10604_s26 }
  0x14   : > { %p10595_p12 = pneg %p10821_p11  ;;  %p10614_p10 = por %p10613_p7, %p10612_p5 }
  0x16   : > { %p10607_p0 = pnand %p10605_p13, %p10595_p12 }
  0x18   : > { %p10608_p3 = pneg %p10607_p0 }
  0x1a   : > { %p10615_p9 = pnand %p10614_p10, %p10608_p3 }
  0x1c   : > { %10618 = shalt.err (!%p10615_p9)
}
  0x1d   : > { %s10745_s27 = smov 1152   ;;  %s10746_s28 = smov 72  }
  0x1e   : > { %9189 = dma.hbm_to_vmem [thread:$0]  (!%p10821_p11), %s11466_s1, 110592, %s132_s22, [#allocation6], %s10745_s27, %s10745_s27, %s10746_s28  }
  0x1f   : > { %s10630_s4 = scalar_lea.vmem %s146_s25, 288  ;;  %p10638_p2 = scmp.lt.s32.totalorder %s146_s25, %s146_s25 }
  0x20   : > { %p10631_p1 = scmp.ne.s32.totalorder %s146_s25, %s10630_s4  ;;  %p10639_p6 = scmp.lt.s32.totalorder %s10630_s4, %s10630_s4 }
  0x22   : > { %p10633_p13 = pnand %p10631_p1, %p10595_p12  ;;  %p10640_p5 = por %p10639_p6, %p10638_p2 }
  0x24   : > { %p10634_p0 = pneg %p10633_p13 }
  0x26   : > { %p10641_p10 = pnand %p10640_p5, %p10634_p0 }
  0x28   : > { %10644 = shalt.err (!%p10641_p10)
}
  0x29   : > { %9192 = dma.hbm_to_vmem [thread:$0]  (!%p10821_p11), %s11467_s2, 288, %s146_s25, [#allocation6]  }
  0x2a   : > { %s10844_s7 = sadd.s32 1, %s10741_s15   ;;  %s27_s8 = sadd.s32 1, %s10737_s14 }
  0x2b   : > { %s24_s9 = ssub.s32 %s10741_s15, %s10844_s7  ;;  %p34_p1 = scmp.ne.s32.totalorder %s10737_s14, %s10733_s13 }
  0x2c   : > { %p25_p2 = scmp.eq.s32.totalorder %s24_s9, 0  ;;  %p35_p6 = scmp.eq.s32.totalorder %s10741_s15, 0 }
  0x2d   : > { %p11477_p12 = scmp.eq.s32.totalorder %s10793_s16, 1  ;;  %p9203_p7 = scmp.lt.s32.totalorder %s10741_s15, 2 }
  0x2e   : > { %s10860_s11 = scalar_select %p25_p2, %s10737_s14, %s27_s8  }
  0x2f   : > { %p10854_p3 = por %p11477_p12, %p34_p1  ;;  %p36_p9 = por %p35_p6, %p34_p1 }
  0x30   : > { %s156_s17 = sand.u32 1, %s10737_s14   ;;  %s9171_s22 = smul.u32 768, %s10741_s15 }
  0x31   : > { %s11478_s10 = scalar_select %p10854_p3, 1, 0 }
  0x32   : > { %s9170_s21 = smul.u32 48, %s156_s17  ;;  %p10864_p11 = pnand %p9203_p7, %p36_p9 }
  0x33   : > { %s10871_s26 = scalar_lea.hbm %s11465_s0, %s9171_s22  ;;  %s157_s29 = scalar_lea.sflag [#allocation3], %s156_s17 }
  0x34   : > { %s160_s27 = scalar_lea.vmem [#allocation2], %s9170_s21  ;;  %s10645_s30 = scalar_lea.hbm %s10871_s26, 768 }
  0x35   : > { %s168_s28 = sshll.u32 %s160_s27, 4  ;;  %p10646_p13 = scmp.ne.s32.totalorder %s10871_s26, %s10645_s30  ;;  %s169_s28 = int_to_ptr.vmem [resolvable:$true] %s168_s28 }
  0x36   : > { %p10647_p0 = pneg %p10864_p11  ;;  %s10650_s6 = scalar_lea.hbm %s11465_s0, 1536 }
  0x37   : > { %p10651_p1 = scmp.lt.s32.totalorder %s10871_s26, %s11465_s0  ;;  %p10652_p2 = scmp.lt.s32.totalorder %s10650_s6, %s10645_s30 }
  0x38   : > { %p10648_p5 = pnand %p10647_p0, %p10646_p13 }
  0x39   : > { %p10653_p6 = por %p10652_p2, %p10651_p1 }
  0x3a   : > { %p10649_p10 = pneg %p10648_p5 }
  0x3c   : > { %p10654_p12 = pnand %p10653_p6, %p10649_p10 }
  0x3e   : > { %10657 = shalt.err (!%p10654_p12)
}
  0x3f   : > { %s10658_s21 = scalar_lea.vmem %s169_s28, 768  ;;  %s10747_s17 = smov [#allocation2]  }
  0x40   : > { %p10659_p7 = scmp.ne.s32.totalorder %s169_s28, %s10658_s21  ;;  %s10663_s22 = sshll.u32 %s10747_s17, 4  ;;  %s10664_s22 = int_to_ptr.vmem [resolvable:$false] %s10663_s22 }
  0x41   : > { %s10665_s24 = scalar_lea.vmem %s10664_s22, 1536  ;;  %p10666_p13 = scmp.lt.s32.totalorder %s169_s28, %s10664_s22 }
  0x42   : > { %p10661_p9 = pnand %p10659_p7, %p10647_p0  ;;  %p10667_p5 = scmp.lt.s32.totalorder %s10665_s24, %s10658_s21 }
  0x44   : > { %p10662_p3 = pneg %p10661_p9  ;;  %p10668_p4 = por %p10667_p5, %p10666_p13 }
  0x46   : > { %p10669_p8 = pnand %p10668_p4, %p10662_p3 }
  0x48   : > { %10672 = shalt.err (!%p10669_p8)
}
  0x49   : > { %9196 = dma.hbm_to_vmem [thread:$0]  (!%p10864_p11), %s10871_s26, 768, %s169_s28, %s157_s29  }
  0x4a   : > { %p11480_p10 = scmp.ne.s32.totalorder %s11475_s20, 0 }
  0x4b   : > { %s10890_s25 = sand.u32 (!%p11480_p10), 1, %s10733_s13   ;;  %p11481_p4 = scmp.ne.s32.totalorder (!%p11480_p10), %s11473_s18, 0 }
  0x4c   : > { %177 = sbr.rel (%p11480_p10) target bundleno = 3383 (0xd37), region = 32  ;;  %s180_s30 = scalar_lea.sflag (!%p11480_p10), [#allocation3], %s10890_s25 }
  0x4d   : > { %s9172_s27 = smul.u32 (!%p11480_p10), 48, %s10890_s25 }
  0x4f   : > { %s10896_s4 = scalar_lea.vmem (!%p11480_p10), [#allocation2], %s9172_s27 }
  0x51   : > { %10716 = dma.done.wait (%p11481_p4), %s180_s30, 768  }
  0x52   : > { %10718 = vsyncadd (%p11481_p4), %s180_s30, 4294966528  ;;  %p11482_p8 = scmp.eq.s32.totalorder %s10793_s16, 0 }
  0x54   : > { %10720 = dma.done.wait (%p11482_p8), [#allocation6], 110880   ;;  %p11483_p3 = pmov %p11482_p8 }
  0x55   : > { %v9246_v0 = vld [vmem:[#allocation5 + $0x3f4] ss:$72 sps:$4 sm:$0xff]   ;;  %v9250_v2 = vld [vmem:[#allocation5 + $0x3f0] ss:$72 sps:$4 sm:$0xff]   ;;  %v9252_v4 = vld [vmem:[#allocation5 + $0x364] ss:$72 sps:$4 sm:$0xff]  }
  0x56   : > { %10722 = vsyncadd (%p11483_p3), [#allocation6], 4294856416  ;;  %v9248_v1 = vld [vmem:[#allocation5 + $0xcf4] ss:$72 sps:$4 sm:$0xff]   ;;  %5507 = vmatprep.subr.bf16.mxu0 %v9246_v0  ;;  %v9251_v3 = vld [vmem:[#allocation5 + $0xcf0] ss:$72 sps:$4 sm:$0xff]  }
  0x57   : > { %5548 = vmatprep.subr.bf16.mxu1 %v9248_v1  ;;  %5508 = vmatpush1.bf16.msra.mxu0 %v9250_v2  ;;  %v9254_v5 = vld [vmem:[#allocation5 + $0xc64] ss:$72 sps:$4 sm:$0xff]   ;;  %v9256_v6 = vld [vmem:[#allocation5 + $0x360] ss:$72 sps:$4 sm:$0xff]   ;;  %v9258_v8 = vld [vmem:[#allocation5 + $0x2d4] ss:$72 sps:$4 sm:$0xff]  }
  0x58   : > { %5549 = vmatpush1.bf16.msra.mxu1 %v9251_v3  ;;  %5509 = vmatprep.subr.bf16.mxu0 %v9252_v4  ;;  %v9257_v7 = vld [vmem:[#allocation5 + $0xc60] ss:$72 sps:$4 sm:$0xff]   ;;  %v9260_v9 = vld [vmem:[#allocation5 + $0xbd4] ss:$72 sps:$4 sm:$0xff]   ;;  %v9262_v10 = vld [vmem:[#allocation5 + $0x2d0] ss:$72 sps:$4 sm:$0xff]  }
  0x59   : > { %5550 = vmatprep.subr.bf16.mxu1 %v9254_v5  ;;  %v9263_v11 = vld [vmem:[#allocation5 + $0xbd0] ss:$72 sps:$4 sm:$0xff]   ;;  %v9264_v12 = vld [vmem:[#allocation5 + $0x244] ss:$72 sps:$4 sm:$0xff]   ;;  %v9268_v14 = vld [vmem:[#allocation5 + $0x240] ss:$72 sps:$4 sm:$0xff]  }
  0x5a   : > { %v9266_v13 = vld [vmem:[#allocation5 + $0xb44] ss:$72 sps:$4 sm:$0xff]   ;;  %v9269_v15 = vld [vmem:[#allocation5 + $0xb40] ss:$72 sps:$4 sm:$0xff]   ;;  %v9270_v16 = vld [vmem:[#allocation5 + $0x1b4] ss:$72 sps:$4 sm:$0xff]  }
  0x5b   : > { %5510 = vmatpush1.bf16.msra.mxu0 %v9256_v6  ;;  %v9272_v17 = vld [vmem:[#allocation5 + $0xab4] ss:$72 sps:$4 sm:$0xff]   ;;  %v9274_v18 = vld [vmem:[#allocation5 + $0x1b0] ss:$72 sps:$4 sm:$0xff]   ;;  %v9276_v20 = vld [vmem:[#allocation5 + $0x124] ss:$72 sps:$4 sm:$0xff]  }
  0x5c   : > { %5551 = vmatpush1.bf16.msra.mxu1 %v9257_v7  ;;  %5511 = vmatprep.subr.bf16.mxu0 %v9258_v8  ;;  %v9275_v19 = vld [vmem:[#allocation5 + $0xab0] ss:$72 sps:$4 sm:$0xff]   ;;  %v9278_v21 = vld [vmem:[#allocation5 + $0xa24] ss:$72 sps:$4 sm:$0xff]   ;;  %v9280_v22 = vld [vmem:[#allocation5 + $0x120] ss:$72 sps:$4 sm:$0xff]  }
  0x5d   : > { %5552 = vmatprep.subr.bf16.mxu1 %v9260_v9  ;;  %v9281_v23 = vld [vmem:[#allocation5 + $0xa20] ss:$72 sps:$4 sm:$0xff]   ;;  %v9282_v24 = vld [vmem:[#allocation5 + $0x94] ss:$72 sps:$4 sm:$0xff]   ;;  %v9286_v26 = vld [vmem:[#allocation5 + $0x90] ss:$72 sps:$4 sm:$0xff]  }
  0x5e   : > { %v9284_v25 = vld [vmem:[#allocation5 + $0x994] ss:$72 sps:$4 sm:$0xff]   ;;  %v9287_v27 = vld [vmem:[#allocation5 + $0x990] ss:$72 sps:$4 sm:$0xff]   ;;  %v9288_v28 = vld [vmem:[#allocation5 + $0x4] ss:$72 sps:$4 sm:$0xff]  }
  0x5f   : > { %5512 = vmatpush1.bf16.msra.mxu0 %v9262_v10  ;;  %v9290_v29 = vld [vmem:[#allocation5 + $0x904] ss:$72 sps:$4 sm:$0xff]   ;;  %v9292_v30 = vld [vmem:[#allocation5] ss:$72 sps:$4 sm:$0xff]   ;;  %v9294_v32 = vld [vmem:[#allocation5 + $0x874] ss:$72 sps:$4 sm:$0xff]  }
  0x60   : > { %5553 = vmatpush1.bf16.msra.mxu1 %v9263_v11  ;;  %5513 = vmatprep.subr.bf16.mxu0 %v9264_v12  ;;  %v9293_v31 = vld [vmem:[#allocation5 + $0x900] ss:$72 sps:$4 sm:$0xff]   ;;  %v9296_v33 = vld [vmem:[#allocation5 + $0x1174] ss:$72 sps:$4 sm:$0xff]   ;;  %v9298_v34 = vld [vmem:[#allocation5 + $0x870] ss:$72 sps:$4 sm:$0xff]  }
  0x61   : > { %5554 = vmatprep.subr.bf16.mxu1 %v9266_v13  ;;  %v9299_v35 = vld [vmem:[#allocation5 + $0x1170] ss:$72 sps:$4 sm:$0xff]   ;;  %v9300_v36 = vld [vmem:[#allocation5 + $0x7e4] ss:$72 sps:$4 sm:$0xff]   ;;  %v9304_v38 = vld [vmem:[#allocation5 + $0x7e0] ss:$72 sps:$4 sm:$0xff]  }
  0x62   : > { %v9302_v37 = vld [vmem:[#allocation5 + $0x10e4] ss:$72 sps:$4 sm:$0xff]   ;;  %v9305_v39 = vld [vmem:[#allocation5 + $0x10e0] ss:$72 sps:$4 sm:$0xff]   ;;  %v9306_v40 = vld [vmem:[#allocation5 + $0x754] ss:$72 sps:$4 sm:$0xff]  }
  0x63   : > { %5514 = vmatpush1.bf16.msra.mxu0 %v9268_v14  ;;  %v9308_v41 = vld [vmem:[#allocation5 + $0x1054] ss:$72 sps:$4 sm:$0xff]   ;;  %v9310_v42 = vld [vmem:[#allocation5 + $0x750] ss:$72 sps:$4 sm:$0xff]   ;;  %v9312_v44 = vld [vmem:[#allocation5 + $0x6c4] ss:$72 sps:$4 sm:$0xff]  }
  0x64   : > { %5555 = vmatpush1.bf16.msra.mxu1 %v9269_v15  ;;  %5515 = vmatprep.subr.bf16.mxu0 %v9270_v16  ;;  %v9311_v43 = vld [vmem:[#allocation5 + $0x1050] ss:$72 sps:$4 sm:$0xff]   ;;  %v9314_v45 = vld [vmem:[#allocation5 + $0xfc4] ss:$72 sps:$4 sm:$0xff]   ;;  %v9316_v47 = vld [vmem:[#allocation5 + $0x6c0] ss:$72 sps:$4 sm:$0xff]  }
  0x65   : > { %5556 = vmatprep.subr.bf16.mxu1 %v9272_v17  ;;  %v216_v46 = vld [vmem:[%s10896_s4 + $0x8] sm:$0xff]  ;;  %v218_v50 = vld [vmem:[%s10896_s4 + $0x18] sm:$0xff]  ;;  %v215_v4 = vld [vmem:[%s10896_s4] sm:$0xff]  ;;  %s10748_s18 = smov 64   ;;  %vm6617_vm0 = vcmask 523264   ;;  %vm10750_vm1 = vmmov 0  }
  0x66   : > { %v9317_v48 = vld [vmem:[#allocation5 + $0xfc0] ss:$72 sps:$4 sm:$0xff]   ;;  %v10907_v49 = vpack.c.bf16 %v216_v46, %v216_v46  ;;  %v9318_v51 = vld [vmem:[#allocation5 + $0x634] ss:$72 sps:$4 sm:$0xff]   ;;  %v10910_v52 = vpack.c.bf16 %v218_v50, %v218_v50  ;;  %v9322_v54 = vld [vmem:[#allocation5 + $0x630] ss:$72 sps:$4 sm:$0xff]   ;;  %v10916_v8 = vpack.c.bf16 %v215_v4, %v215_v4 }
  0x67   : > { %5516 = vmatpush1.bf16.msra.mxu0 %v9274_v18  ;;  %v9320_v53 = vld [vmem:[#allocation5 + $0xf34] ss:$72 sps:$4 sm:$0xff]   ;;  %v9323_v55 = vld [vmem:[#allocation5 + $0xf30] ss:$72 sps:$4 sm:$0xff]   ;;  %v9324_v56 = vld [vmem:[#allocation5 + $0x5a4] ss:$72 sps:$4 sm:$0xff]  }
  0x68   : > { %5557 = vmatpush1.bf16.msra.mxu1 %v9275_v19  ;;  %5517 = vmatprep.subr.bf16.mxu0 %v9276_v20  ;;  %v9326_v57 = vld [vmem:[#allocation5 + $0xea4] ss:$72 sps:$4 sm:$0xff]   ;;  %v9328_v58 = vld [vmem:[#allocation5 + $0x5a0] ss:$72 sps:$4 sm:$0xff]   ;;  %v9330_v60 = vld [vmem:[#allocation5 + $0x514] ss:$72 sps:$4 sm:$0xff]  }
  0x69   : > { %5558 = vmatprep.subr.bf16.mxu1 %v9278_v21  ;;  %5539 = vmatprep.mubr.bf16.mxu0 %v10907_v49  ;;  %v9329_v59 = vld [vmem:[#allocation5 + $0xea0] ss:$72 sps:$4 sm:$0xff]   ;;  %v9332_v61 = vld [vmem:[#allocation5 + $0xe14] ss:$72 sps:$4 sm:$0xff]   ;;  %v9334_v62 = vld [vmem:[#allocation5 + $0x510] ss:$72 sps:$4 sm:$0xff]  }
  0x6a   : > { %5580 = vmatprep.mubr.bf16.mxu1 %v10910_v52  ;;  %v9335_v63 = vld [vmem:[#allocation5 + $0xe10] ss:$72 sps:$4 sm:$0xff]   ;;  %v9336_v0 = vld [vmem:[#allocation5 + $0x484] ss:$72 sps:$4 sm:$0xff]   ;;  %v9340_v2 = vld [vmem:[#allocation5 + $0x480] ss:$72 sps:$4 sm:$0xff]  }
  0x6b   : > { %5518 = vmatpush1.bf16.msra.mxu0 %v9280_v22  ;;  %v9338_v1 = vld [vmem:[#allocation5 + $0xd84] ss:$72 sps:$4 sm:$0xff]   ;;  %v9341_v3 = vld [vmem:[#allocation5 + $0xd80] ss:$72 sps:$4 sm:$0xff]   ;;  %v9344_v6 = vld [vmem:[#allocation5 + $0x15f4] ss:$72 sps:$4 sm:$0xff]  }
  0x6c   : > { %5559 = vmatpush1.bf16.msra.mxu1 %v9281_v23  ;;  %5519 = vmatprep.subr.bf16.mxu0 %v9282_v24  ;;  %v217_v5 = vld [vmem:[%s10896_s4 + $0x10] sm:$0xff]  ;;  %vm6680_vm2 = vcmask 1043456   ;;  %vm6664_vm3 = vcmask 64512   ;;  %s11169_s20 = scalar_lea.vmem [#allocation8], %s9172_s27  ;;  %vm6842_vm4 = vcmask 1048064   ;;  %s9173_s23 = smul.u32 768, %s10793_s16 }
  0x6d   : > { %5560 = vmatprep.subr.bf16.mxu1 %v9284_v25  ;;  %v9347_v7 = vld [vmem:[#allocation5 + $0x3fc] ss:$72 sps:$4 sm:$0xff]   ;;  %v10918_v9 = vpack.c.bf16 %v217_v5, %v217_v5  ;;  %v9342_v10 = vld [vmem:[#allocation5 + $0x15f0] ss:$72 sps:$4 sm:$0xff]   ;;  %v9353_v13 = vld [vmem:[#allocation5 + $0x36c] ss:$72 sps:$4 sm:$0xff]  }
  0x6e   : > { %v9345_v11 = vld [vmem:[#allocation5 + $0x3f8] ss:$72 sps:$4 sm:$0xff]   ;;  %v9350_v12 = vld [vmem:[#allocation5 + $0x1564] ss:$72 sps:$4 sm:$0xff]   ;;  %v9351_v15 = vld [vmem:[#allocation5 + $0x368] ss:$72 sps:$4 sm:$0xff]   ;;  %s11426_s5 = scalar_lea.hbm %s11468_s3, %s9173_s23 }
  0x6f   : > { %5520 = vmatpush1.bf16.msra.mxu0 %v9286_v26  ;;  %v9348_v14 = vld [vmem:[#allocation5 + $0x1560] ss:$72 sps:$4 sm:$0xff]   ;;  %v9356_v16 = vld [vmem:[#allocation5 + $0x14d4] ss:$72 sps:$4 sm:$0xff]   ;;  %v9354_v18 = vld [vmem:[#allocation5 + $0x14d0] ss:$72 sps:$4 sm:$0xff]  }
  0x70   : > { %5561 = vmatpush1.bf16.msra.mxu1 %v9287_v27  ;;  %5521 = vmatprep.subr.bf16.mxu0 %v9288_v28  ;;  %v9359_v17 = vld [vmem:[#allocation5 + $0x2dc] ss:$72 sps:$4 sm:$0xff]   ;;  %v9357_v19 = vld [vmem:[#allocation5 + $0x2d8] ss:$72 sps:$4 sm:$0xff]   ;;  %v9365_v21 = vld [vmem:[#allocation5 + $0x24c] ss:$72 sps:$4 sm:$0xff]  }
  0x71   : > { %5562 = vmatprep.subr.bf16.mxu1 %v9290_v29  ;;  %v9362_v20 = vld [vmem:[#allocation5 + $0x1444] ss:$72 sps:$4 sm:$0xff]   ;;  %v9360_v22 = vld [vmem:[#allocation5 + $0x1440] ss:$72 sps:$4 sm:$0xff]   ;;  %v9368_v24 = vld [vmem:[#allocation5 + $0x13b4] ss:$72 sps:$4 sm:$0xff]  }
  0x72   : > { %v9363_v23 = vld [vmem:[#allocation5 + $0x248] ss:$72 sps:$4 sm:$0xff]   ;;  %v9371_v25 = vld [vmem:[#allocation5 + $0x1bc] ss:$72 sps:$4 sm:$0xff]   ;;  %v9369_v27 = vld [vmem:[#allocation5 + $0x1b8] ss:$72 sps:$4 sm:$0xff]  }
  0x73   : > { %5522 = vmatpush1.bf16.msra.mxu0 %v9292_v30  ;;  %v9366_v26 = vld [vmem:[#allocation5 + $0x13b0] ss:$72 sps:$4 sm:$0xff]   ;;  %v9374_v28 = vld [vmem:[#allocation5 + $0x1324] ss:$72 sps:$4 sm:$0xff]   ;;  %v9372_v30 = vld [vmem:[#allocation5 + $0x1320] ss:$72 sps:$4 sm:$0xff]  }
  0x74   : > { %5563 = vmatpush1.bf16.msra.mxu1 %v9293_v31  ;;  %5523 = vmatprep.subr.bf16.mxu0 %v9294_v32  ;;  %v9377_v29 = vld [vmem:[#allocation5 + $0x12c] ss:$72 sps:$4 sm:$0xff]   ;;  %v9375_v31 = vld [vmem:[#allocation5 + $0x128] ss:$72 sps:$4 sm:$0xff]   ;;  %v9431_v5 = vld [vmem:[#allocation5 + $0x51c] ss:$72 sps:$4 sm:$0xff]  }
  0x75   : > { %5564 = vmatprep.subr.bf16.mxu1 %v9296_v33  ;;  %v9380_v32 = vld [vmem:[#allocation5 + $0x1294] ss:$72 sps:$4 sm:$0xff]   ;;  %v9398_v46 = vld [vmem:[#allocation5 + $0x19e4] ss:$72 sps:$4 sm:$0xff]   ;;  %v9399_v50 = vld [vmem:[#allocation5 + $0x7e8] ss:$72 sps:$4 sm:$0xff]  }
  0x76   : > { %v9383_v33 = vld [vmem:[#allocation5 + $0x9c] ss:$72 sps:$4 sm:$0xff]   ;;  %s7989_s26 = sshll.u32 %s11169_s20, 4  ;;  %s7975_s6 = scalar_lea.sflag [#allocation4], %s10890_s25  ;;  %s7990_s26 = int_to_ptr.vmem [resolvable:$true] %s7989_s26 }
  0x77   : > { %5524 = vmatpush2.bf16.msra.mxu0 %v9298_v34  ;;  %v220_v34 = vld [vmem:[%s10896_s4 + $0x28] sm:$0xff]  ;;  %s10673_s8 = scalar_lea.vmem %s7990_s26, 768  ;;  %p11484_p0 = scmp.ne.s32.totalorder %s11478_s10, 0 }
  0x78   : > { %5565 = vmatpush2.bf16.msra.mxu1 %v9299_v35  ;;  %5525 = vmatprep.subr.bf16.mxu0 %v9300_v36  ;;  %v10924_v35 = vpack.c.bf16 %v220_v34, %v220_v34  ;;  %v9378_v36 = vld [vmem:[#allocation5 + $0x1290] ss:$72 sps:$4 sm:$0xff]   ;;  %v9428_v4 = vld [vmem:[#allocation5 + $0x1714] ss:$72 sps:$4 sm:$0xff]   ;;  %p10674_p11 = scmp.ne.s32.totalorder %s7990_s26, %s10673_s8  ;;  %s10751_s9 = smov [#allocation8]  }
  0x79   : > { %5566 = vmatprep.subr.bf16.mxu1 %v9302_v37  ;;  %v9381_v37 = vld [vmem:[#allocation5 + $0x98] ss:$72 sps:$4 sm:$0xff]   ;;  %s10677_s21 = sshll.u32 %s10751_s9, 4  ;;  %s10678_s21 = int_to_ptr.vmem [resolvable:$false] %s10677_s21 }
  0x7a   : > { %v9462_v34 = vld [vmem:[#allocation5 + $0xab8] ss:$72 sps:$4 sm:$0xff]   ;;  %p10675_p1 = pnand %p10674_p11, %p11484_p0  ;;  %s10679_s16 = scalar_lea.vmem %s10678_s21, 1536 }
  0x7b   : > { %5526 = vmatpush2.bf16.msra.mxu0 %v9304_v38  ;;  %v9386_v38 = vld [vmem:[#allocation5 + $0x1204] ss:$72 sps:$4 sm:$0xff]   ;;  %p10680_p6 = scmp.lt.s32.totalorder %s7990_s26, %s10678_s21  ;;  %p10681_p12 = scmp.lt.s32.totalorder %s10679_s16, %s10673_s8 }
  0x7c   : > { %5567 = vmatpush2.bf16.msra.mxu1 %v9305_v39  ;;  %5527 = vmatprep.subr.bf16.mxu0 %v9306_v40  ;;  %v9389_v39 = vld [vmem:[#allocation5 + $0xc] ss:$72 sps:$4 sm:$0xff]   ;;  %v9384_v40 = vld [vmem:[#allocation5 + $0x1200] ss:$72 sps:$4 sm:$0xff]   ;;  %p10676_p2 = pneg %p10675_p1 }
  0x7d   : > { %5568 = vmatprep.subr.bf16.mxu1 %v9308_v41  ;;  %v9387_v41 = vld [vmem:[#allocation5 + $0x8] ss:$72 sps:$4 sm:$0xff]   ;;  %p10682_p7 = por %p10681_p12, %p10680_p6 }
  0x7f   : > { %5528 = vmatpush2.bf16.msra.mxu0 %v9310_v42  ;;  %v9392_v42 = vld [vmem:[#allocation5 + $0x1a74] ss:$72 sps:$4 sm:$0xff]   ;;  %p10683_p9 = pnand %p10682_p7, %p10676_p2 }
  0x80   : > { %5569 = vmatpush2.bf16.msra.mxu1 %v9311_v43  ;;  %5529 = vmatprep.subr.bf16.mxu0 %v9312_v44  ;;  %v9395_v43 = vld [vmem:[#allocation5 + $0x87c] ss:$72 sps:$4 sm:$0xff]   ;;  %v9390_v44 = vld [vmem:[#allocation5 + $0x1a70] ss:$72 sps:$4 sm:$0xff]  }
  0x81   : > { %5570 = vmatprep.subr.bf16.mxu1 %v9314_v45  ;;  %v9393_v45 = vld [vmem:[#allocation5 + $0x878] ss:$72 sps:$4 sm:$0xff]  }
  0x83   : > { %5530 = vmatpush2.bf16.msra.mxu0 %v9316_v47  ;;  %v9401_v47 = vld [vmem:[#allocation5 + $0x7ec] ss:$72 sps:$4 sm:$0xff]  }
  0x84   : > { %5571 = vmatpush2.bf16.msra.mxu1 %v9317_v48  ;;  %5531 = vmatprep.subr.bf16.mxu0 %v9318_v51  ;;  %v9396_v48 = vld [vmem:[#allocation5 + $0x19e0] ss:$72 sps:$4 sm:$0xff]   ;;  %v9404_v51 = vld [vmem:[#allocation5 + $0x1954] ss:$72 sps:$4 sm:$0xff]  }
  0x85   : > { %5572 = vmatprep.subr.bf16.mxu1 %v9320_v53  ;;  %v9407_v53 = vld [vmem:[#allocation5 + $0x75c] ss:$72 sps:$4 sm:$0xff]  }
  0x87   : > { %5532 = vmatpush2.bf16.msra.mxu0 %v9322_v54  ;;  %v9402_v54 = vld [vmem:[#allocation5 + $0x1950] ss:$72 sps:$4 sm:$0xff]  }
  0x88   : > { %5573 = vmatpush2.bf16.msra.mxu1 %v9323_v55  ;;  %5533 = vmatprep.subr.bf16.mxu0 %v9324_v56  ;;  %v9405_v55 = vld [vmem:[#allocation5 + $0x758] ss:$72 sps:$4 sm:$0xff]   ;;  %v9410_v56 = vld [vmem:[#allocation5 + $0x18c4] ss:$72 sps:$4 sm:$0xff]  }
  0x89   : > { %5574 = vmatprep.subr.bf16.mxu1 %v9326_v57  ;;  %v9413_v57 = vld [vmem:[#allocation5 + $0x6cc] ss:$72 sps:$4 sm:$0xff]  }
  0x8b   : > { %5534 = vmatpush2.bf16.msra.mxu0 %v9328_v58  ;;  %v9408_v58 = vld [vmem:[#allocation5 + $0x18c0] ss:$72 sps:$4 sm:$0xff]  }
  0x8c   : > { %5575 = vmatpush2.bf16.msra.mxu1 %v9329_v59  ;;  %5535 = vmatprep.subr.bf16.mxu0 %v9330_v60  ;;  %v9411_v59 = vld [vmem:[#allocation5 + $0x6c8] ss:$72 sps:$4 sm:$0xff]   ;;  %v9416_v60 = vld [vmem:[#allocation5 + $0x1834] ss:$72 sps:$4 sm:$0xff]  }
  0x8d   : > { %5576 = vmatprep.subr.bf16.mxu1 %v9332_v61  ;;  %v9419_v61 = vld [vmem:[#allocation5 + $0x63c] ss:$72 sps:$4 sm:$0xff]  }
  0x8f   : > { %5536 = vmatpush2.bf16.msra.mxu0 %v9334_v62  ;;  %v9414_v62 = vld [vmem:[#allocation5 + $0x1830] ss:$72 sps:$4 sm:$0xff]  }
  0x90   : > { %5577 = vmatpush2.bf16.msra.mxu1 %v9335_v63  ;;  %5537 = vmatprep.subr.bf16.mxu0 %v9336_v0  ;;  %v9417_v63 = vld [vmem:[#allocation5 + $0x638] ss:$72 sps:$4 sm:$0xff]   ;;  %v9422_v0 = vld [vmem:[#allocation5 + $0x17a4] ss:$72 sps:$4 sm:$0xff]  }
  0x91   : > { %5578 = vmatprep.subr.bf16.mxu1 %v9338_v1  ;;  %v9425_v1 = vld [vmem:[#allocation5 + $0x5ac] ss:$72 sps:$4 sm:$0xff]  }
  0x93   : > { %5538 = vmatpush2.bf16.msra.mxu0 %v9340_v2  ;;  %v9420_v2 = vld [vmem:[#allocation5 + $0x17a0] ss:$72 sps:$4 sm:$0xff]  }
  0x94   : > { %5579 = vmatpush2.bf16.msra.mxu1 %v9341_v3  ;;  %5589 = vmatprep.subr.bf16.mxu0 %v9344_v6  ;;  %v9423_v3 = vld [vmem:[#allocation5 + $0x5a8] ss:$72 sps:$4 sm:$0xff]  }
  0x95   : > { %5630 = vmatprep.subr.bf16.mxu1 %v9347_v7  ;;  %v9426_v6 = vld [vmem:[#allocation5 + $0x1710] ss:$72 sps:$4 sm:$0xff]  }
  0x96   : > { %5540 = vmatmul.mubr.bf16.vlgmr.msra.gmra.mxu0 %v10916_v8  ;;  %v9429_v7 = vld [vmem:[#allocation5 + $0x518] ss:$72 sps:$4 sm:$0xff]  }
  0x97   : > { %5581 = vmatmul.mubr.bf16.vlgmr.msra.gmra.mxu1 %v10918_v9  ;;  %5590 = vmatpush1.bf16.msra.mxu0 %v9342_v10  ;;  %v9434_v10 = vld [vmem:[#allocation5 + $0x1684] ss:$72 sps:$4 sm:$0xff]  }
  0x98   : > { %5631 = vmatpush1.bf16.msra.mxu1 %v9345_v11  ;;  %5591 = vmatprep.subr.bf16.mxu0 %v9350_v12  ;;  %v9437_v11 = vld [vmem:[#allocation5 + $0x48c] ss:$72 sps:$4 sm:$0xff]   ;;  %v9432_v12 = vld [vmem:[#allocation5 + $0x1680] ss:$72 sps:$4 sm:$0xff]  }
  0x99   : > { %5632 = vmatprep.subr.bf16.mxu1 %v9353_v13  ;;  %5662 = vmatprep.mubr.bf16.mxu1 %v10907_v49  ;;  %v9435_v13 = vld [vmem:[#allocation5 + $0x488] ss:$72 sps:$4 sm:$0xff]  }
  0x9a   : > { %5621 = vmatprep.mubr.bf16.mxu0 %v10924_v35 }
  0x9b   : > { %5592 = vmatpush1.bf16.msra.mxu0 %v9348_v14  ;;  %v219_v14 = vld [vmem:[%s10896_s4 + $0x20] sm:$0xff] }
  0x9c   : > { %5633 = vmatpush1.bf16.msra.mxu1 %v9351_v15  ;;  %5593 = vmatprep.subr.bf16.mxu0 %v9356_v16  ;;  %v9440_v15 = vld [vmem:[#allocation5 + $0xcfc] ss:$72 sps:$4 sm:$0xff]  }
  0x9d   : > { %5634 = vmatprep.subr.bf16.mxu1 %v9359_v17  ;;  %v9443_v16 = vld [vmem:[#allocation5 + $0x15fc] ss:$72 sps:$4 sm:$0xff]   ;;  %v10928_v17 = vpack.c.bf16 %v219_v14, %v219_v14 }
  0x9e   : > { %v9527_v14 = vld [vmem:[#allocation5 + $0x171c] ss:$72 sps:$4 sm:$0xff]  }
  0x9f   : > { %5594 = vmatpush1.bf16.msra.mxu0 %v9354_v18  ;;  %v9438_v18 = vld [vmem:[#allocation5 + $0xcf8] ss:$72 sps:$4 sm:$0xff]  }
  0xa0   : > { %5635 = vmatpush1.bf16.msra.mxu1 %v9357_v19  ;;  %5595 = vmatprep.subr.bf16.mxu0 %v9362_v20  ;;  %v9441_v19 = vld [vmem:[#allocation5 + $0x15f8] ss:$72 sps:$4 sm:$0xff]   ;;  %v9446_v20 = vld [vmem:[#allocation5 + $0xc6c] ss:$72 sps:$4 sm:$0xff]  }
  0xa1   : > { %5636 = vmatprep.subr.bf16.mxu1 %v9365_v21  ;;  %v9449_v21 = vld [vmem:[#allocation5 + $0x156c] ss:$72 sps:$4 sm:$0xff]  }
  0xa3   : > { %5596 = vmatpush1.bf16.msra.mxu0 %v9360_v22  ;;  %v9444_v22 = vld [vmem:[#allocation5 + $0xc68] ss:$72 sps:$4 sm:$0xff]  }
  0xa4   : > { %5637 = vmatpush1.bf16.msra.mxu1 %v9363_v23  ;;  %5597 = vmatprep.subr.bf16.mxu0 %v9368_v24  ;;  %v9447_v23 = vld [vmem:[#allocation5 + $0x1568] ss:$72 sps:$4 sm:$0xff]   ;;  %v9452_v24 = vld [vmem:[#allocation5 + $0xbdc] ss:$72 sps:$4 sm:$0xff]  }
  0xa5   : > { %5638 = vmatprep.subr.bf16.mxu1 %v9371_v25  ;;  %v9455_v25 = vld [vmem:[#allocation5 + $0x14dc] ss:$72 sps:$4 sm:$0xff]  }
  0xa7   : > { %5598 = vmatpush1.bf16.msra.mxu0 %v9366_v26  ;;  %v9450_v26 = vld [vmem:[#allocation5 + $0xbd8] ss:$72 sps:$4 sm:$0xff]  }
  0xa8   : > { %5639 = vmatpush1.bf16.msra.mxu1 %v9369_v27  ;;  %5599 = vmatprep.subr.bf16.mxu0 %v9374_v28  ;;  %v9453_v27 = vld [vmem:[#allocation5 + $0x14d8] ss:$72 sps:$4 sm:$0xff]   ;;  %v9458_v28 = vld [vmem:[#allocation5 + $0xb4c] ss:$72 sps:$4 sm:$0xff]  }
  0xa9   : > { %5640 = vmatprep.subr.bf16.mxu1 %v9377_v29  ;;  %v9461_v29 = vld [vmem:[#allocation5 + $0x144c] ss:$72 sps:$4 sm:$0xff]  }
  0xab   : > { %5600 = vmatpush1.bf16.msra.mxu0 %v9372_v30  ;;  %v9456_v30 = vld [vmem:[#allocation5 + $0xb48] ss:$72 sps:$4 sm:$0xff]  }
  0xac   : > { %5641 = vmatpush1.bf16.msra.mxu1 %v9375_v31  ;;  %5601 = vmatprep.subr.bf16.mxu0 %v9380_v32  ;;  %v9459_v31 = vld [vmem:[#allocation5 + $0x1448] ss:$72 sps:$4 sm:$0xff]   ;;  %v9464_v32 = vld [vmem:[#allocation5 + $0xabc] ss:$72 sps:$4 sm:$0xff]  }
  0xad   : > { %5642 = vmatprep.subr.bf16.mxu1 %v9383_v33  ;;  %v9467_v33 = vld [vmem:[#allocation5 + $0x13bc] ss:$72 sps:$4 sm:$0xff]  }
  0xaf   : > { %5602 = vmatpush1.bf16.msra.mxu0 %v9378_v36  ;;  %v9465_v36 = vld [vmem:[#allocation5 + $0x13b8] ss:$72 sps:$4 sm:$0xff]  }
  0xb0   : > { %5643 = vmatpush1.bf16.msra.mxu1 %v9381_v37  ;;  %5603 = vmatprep.subr.bf16.mxu0 %v9386_v38  ;;  %v9470_v37 = vld [vmem:[#allocation5 + $0xa2c] ss:$72 sps:$4 sm:$0xff]  }
  0xb1   : > { %5644 = vmatprep.subr.bf16.mxu1 %v9389_v39  ;;  %v9473_v38 = vld [vmem:[#allocation5 + $0x132c] ss:$72 sps:$4 sm:$0xff]   ;;  %v9468_v39 = vld [vmem:[#allocation5 + $0xa28] ss:$72 sps:$4 sm:$0xff]  }
  0xb3   : > { %5604 = vmatpush1.bf16.msra.mxu0 %v9384_v40  ;;  %v9471_v40 = vld [vmem:[#allocation5 + $0x1328] ss:$72 sps:$4 sm:$0xff]  }
  0xb4   : > { %5645 = vmatpush1.bf16.msra.mxu1 %v9387_v41  ;;  %5605 = vmatprep.subr.bf16.mxu0 %v9392_v42  ;;  %v9476_v41 = vld [vmem:[#allocation5 + $0x99c] ss:$72 sps:$4 sm:$0xff]  }
  0xb5   : > { %5646 = vmatprep.subr.bf16.mxu1 %v9395_v43  ;;  %v9479_v42 = vld [vmem:[#allocation5 + $0x129c] ss:$72 sps:$4 sm:$0xff]   ;;  %v9474_v43 = vld [vmem:[#allocation5 + $0x998] ss:$72 sps:$4 sm:$0xff]  }
  0xb7   : > { %5606 = vmatpush2.bf16.msra.mxu0 %v9390_v44  ;;  %v9477_v44 = vld [vmem:[#allocation5 + $0x1298] ss:$72 sps:$4 sm:$0xff]  }
  0xb8   : > { %5647 = vmatpush2.bf16.msra.mxu1 %v9393_v45  ;;  %5607 = vmatprep.subr.bf16.mxu0 %v9398_v46  ;;  %v9482_v45 = vld [vmem:[#allocation5 + $0x90c] ss:$72 sps:$4 sm:$0xff]  }
  0xb9   : > { %5648 = vmatprep.subr.bf16.mxu1 %v9401_v47  ;;  %v9485_v46 = vld [vmem:[#allocation5 + $0x120c] ss:$72 sps:$4 sm:$0xff]   ;;  %v9480_v47 = vld [vmem:[#allocation5 + $0x908] ss:$72 sps:$4 sm:$0xff]  }
  0xbb   : > { %5608 = vmatpush2.bf16.msra.mxu0 %v9396_v48  ;;  %v9483_v48 = vld [vmem:[#allocation5 + $0x1208] ss:$72 sps:$4 sm:$0xff]  }
  0xbc   : > { %5649 = vmatpush2.bf16.msra.mxu1 %v9399_v50  ;;  %5609 = vmatprep.subr.bf16.mxu0 %v9404_v51  ;;  %v9488_v50 = vld [vmem:[#allocation5 + $0x117c] ss:$72 sps:$4 sm:$0xff]  }
  0xbd   : > { %5650 = vmatprep.subr.bf16.mxu1 %v9407_v53  ;;  %v9491_v51 = vld [vmem:[#allocation5 + $0x1a7c] ss:$72 sps:$4 sm:$0xff]   ;;  %v9486_v53 = vld [vmem:[#allocation5 + $0x1178] ss:$72 sps:$4 sm:$0xff]  }
  0xbf   : > { %5610 = vmatpush2.bf16.msra.mxu0 %v9402_v54  ;;  %v9489_v54 = vld [vmem:[#allocation5 + $0x1a78] ss:$72 sps:$4 sm:$0xff]  }
  0xc0   : > { %5651 = vmatpush2.bf16.msra.mxu1 %v9405_v55  ;;  %5611 = vmatprep.subr.bf16.mxu0 %v9410_v56  ;;  %v9494_v55 = vld [vmem:[#allocation5 + $0x10ec] ss:$72 sps:$4 sm:$0xff]  }
  0xc1   : > { %5652 = vmatprep.subr.bf16.mxu1 %v9413_v57  ;;  %v9497_v56 = vld [vmem:[#allocation5 + $0x19ec] ss:$72 sps:$4 sm:$0xff]   ;;  %v9492_v57 = vld [vmem:[#allocation5 + $0x10e8] ss:$72 sps:$4 sm:$0xff]  }
  0xc3   : > { %5612 = vmatpush2.bf16.msra.mxu0 %v9408_v58  ;;  %v9495_v58 = vld [vmem:[#allocation5 + $0x19e8] ss:$72 sps:$4 sm:$0xff]  }
  0xc4   : > { %5653 = vmatpush2.bf16.msra.mxu1 %v9411_v59  ;;  %5613 = vmatprep.subr.bf16.mxu0 %v9416_v60  ;;  %v9500_v59 = vld [vmem:[#allocation5 + $0x105c] ss:$72 sps:$4 sm:$0xff]  }
  0xc5   : > { %5654 = vmatprep.subr.bf16.mxu1 %v9419_v61  ;;  %v9503_v60 = vld [vmem:[#allocation5 + $0x195c] ss:$72 sps:$4 sm:$0xff]   ;;  %v9498_v61 = vld [vmem:[#allocation5 + $0x1058] ss:$72 sps:$4 sm:$0xff]  }
  0xc7   : > { %5614 = vmatpush2.bf16.msra.mxu0 %v9414_v62  ;;  %v9501_v62 = vld [vmem:[#allocation5 + $0x1958] ss:$72 sps:$4 sm:$0xff]  }
  0xc8   : > { %5655 = vmatpush2.bf16.msra.mxu1 %v9417_v63  ;;  %5615 = vmatprep.subr.bf16.mxu0 %v9422_v0  ;;  %v9506_v63 = vld [vmem:[#allocation5 + $0xfcc] ss:$72 sps:$4 sm:$0xff]  }
  0xc9   : > { %5656 = vmatprep.subr.bf16.mxu1 %v9425_v1  ;;  %v9509_v0 = vld [vmem:[#allocation5 + $0x18cc] ss:$72 sps:$4 sm:$0xff]   ;;  %v9504_v1 = vld [vmem:[#allocation5 + $0xfc8] ss:$72 sps:$4 sm:$0xff]  }
  0xcb   : > { %5616 = vmatpush2.bf16.msra.mxu0 %v9420_v2  ;;  %v9507_v2 = vld [vmem:[#allocation5 + $0x18c8] ss:$72 sps:$4 sm:$0xff]  }
  0xcc   : > { %5657 = vmatpush2.bf16.msra.mxu1 %v9423_v3  ;;  %5617 = vmatprep.subr.bf16.mxu0 %v9428_v4  ;;  %v9512_v3 = vld [vmem:[#allocation5 + $0xf3c] ss:$72 sps:$4 sm:$0xff]  }
  0xcd   : > { %5658 = vmatprep.subr.bf16.mxu1 %v9431_v5  ;;  %v9515_v4 = vld [vmem:[#allocation5 + $0x183c] ss:$72 sps:$4 sm:$0xff]   ;;  %v9510_v5 = vld [vmem:[#allocation5 + $0xf38] ss:$72 sps:$4 sm:$0xff]  }
  0xcf   : > { %5618 = vmatpush2.bf16.msra.mxu0 %v9426_v6  ;;  %v9513_v6 = vld [vmem:[#allocation5 + $0x1838] ss:$72 sps:$4 sm:$0xff]  }
  0xd0   : > { %5659 = vmatpush2.bf16.msra.mxu1 %v9429_v7  ;;  %5619 = vmatprep.subr.bf16.mxu0 %v9434_v10  ;;  %v9518_v7 = vld [vmem:[#allocation5 + $0xeac] ss:$72 sps:$4 sm:$0xff]  }
  0xd1   : > { %5660 = vmatprep.subr.bf16.mxu1 %v9437_v11  ;;  %v9521_v10 = vld [vmem:[#allocation5 + $0x17ac] ss:$72 sps:$4 sm:$0xff]   ;;  %v9516_v11 = vld [vmem:[#allocation5 + $0xea8] ss:$72 sps:$4 sm:$0xff]  }
  0xd3   : > { %5620 = vmatpush2.bf16.msra.mxu0 %v9432_v12  ;;  %v9519_v12 = vld [vmem:[#allocation5 + $0x17a8] ss:$72 sps:$4 sm:$0xff]  }
  0xd4   : > { %5661 = vmatpush2.bf16.msra.mxu1 %v9435_v13  ;;  %5671 = vmatprep.subr.bf16.mxu0 %v9440_v15  ;;  %v9524_v13 = vld [vmem:[#allocation5 + $0xe1c] ss:$72 sps:$4 sm:$0xff]   ;;  %v9522_v15 = vld [vmem:[#allocation5 + $0xe18] ss:$72 sps:$4 sm:$0xff]  }
  0xd5   : > { %5712 = vmatprep.subr.bf16.mxu1 %v9443_v16  ;;  %v9525_v16 = vld [vmem:[#allocation5 + $0x1718] ss:$72 sps:$4 sm:$0xff]  }
  0xd6   : > { %5622 = vmatmul.mubr.bf16.vlgmr.msra.gmra.mxu0 %v10928_v17 }
  0xd7   : > { %5663 = vmatmul.mubr.bf16.vlgmr.msra.gmra.mxu1 %v10916_v8  ;;  %5672 = vmatpush1.bf16.msra.mxu0 %v9438_v18  ;;  %v9530_v18 = vld [vmem:[#allocation5 + $0xd8c] ss:$72 sps:$4 sm:$0xff]  }
  0xd8   : > { %5713 = vmatpush1.bf16.msra.mxu1 %v9441_v19  ;;  %5673 = vmatprep.subr.bf16.mxu0 %v9446_v20  ;;  %v9533_v19 = vld [vmem:[#allocation5 + $0x168c] ss:$72 sps:$4 sm:$0xff]   ;;  %v9528_v20 = vld [vmem:[#allocation5 + $0xd88] ss:$72 sps:$4 sm:$0xff]  }
  0xd9   : > { %5714 = vmatprep.subr.bf16.mxu1 %v9449_v21  ;;  %5703 = vmatprep.mubr.bf16.mxu0 %v10910_v52  ;;  %v9531_v21 = vld [vmem:[#allocation5 + $0x1688] ss:$72 sps:$4 sm:$0xff]  }
  0xda   : > { %5744 = vmatprep.mubr.bf16.mxu1 %v10924_v35 }
  0xdb   : > { %5674 = vmatpush1.bf16.msra.mxu0 %v9444_v22  ;;  %v9536_v22 = vld [vmem:[#allocation5 + $0x404] ss:$72 sps:$4 sm:$0xff]  }
  0xdc   : > { %5715 = vmatpush1.bf16.msra.mxu1 %v9447_v23  ;;  %5675 = vmatprep.subr.bf16.mxu0 %v9452_v24  ;;  %v9539_v23 = vld [vmem:[#allocation5 + $0xd04] ss:$72 sps:$4 sm:$0xff]   ;;  %v9534_v24 = vld [vmem:[#allocation5 + $0x400] ss:$72 sps:$4 sm:$0xff]  }
  0xdd   : > { %5716 = vmatprep.subr.bf16.mxu1 %v9455_v25  ;;  %v9537_v25 = vld [vmem:[#allocation5 + $0xd00] ss:$72 sps:$4 sm:$0xff]  }
  0xdf   : > { %5676 = vmatpush1.bf16.msra.mxu0 %v9450_v26  ;;  %v9542_v26 = vld [vmem:[#allocation5 + $0x374] ss:$72 sps:$4 sm:$0xff]  }
  0xe0   : > { %5717 = vmatpush1.bf16.msra.mxu1 %v9453_v27  ;;  %5677 = vmatprep.subr.bf16.mxu0 %v9458_v28  ;;  %v9545_v27 = vld [vmem:[#allocation5 + $0xc74] ss:$72 sps:$4 sm:$0xff]   ;;  %v9540_v28 = vld [vmem:[#allocation5 + $0x370] ss:$72 sps:$4 sm:$0xff]  }
  0xe1   : > { %5718 = vmatprep.subr.bf16.mxu1 %v9461_v29  ;;  %v9543_v29 = vld [vmem:[#allocation5 + $0xc70] ss:$72 sps:$4 sm:$0xff]  }
  0xe3   : > { %5678 = vmatpush1.bf16.msra.mxu0 %v9456_v30  ;;  %v9548_v30 = vld [vmem:[#allocation5 + $0x2e4] ss:$72 sps:$4 sm:$0xff]  }
  0xe4   : > { %5719 = vmatpush1.bf16.msra.mxu1 %v9459_v31  ;;  %5679 = vmatprep.subr.bf16.mxu0 %v9464_v32  ;;  %v9551_v31 = vld [vmem:[#allocation5 + $0xbe4] ss:$72 sps:$4 sm:$0xff]   ;;  %v9546_v32 = vld [vmem:[#allocation5 + $0x2e0] ss:$72 sps:$4 sm:$0xff]  }
  0xe5   : > { %5720 = vmatprep.subr.bf16.mxu1 %v9467_v33  ;;  %v9549_v33 = vld [vmem:[#allocation5 + $0xbe0] ss:$72 sps:$4 sm:$0xff]  }
  0xe7   : > { %5680 = vmatpush1.bf16.msra.mxu0 %v9462_v34  ;;  %v9554_v34 = vld [vmem:[#allocation5 + $0x254] ss:$72 sps:$4 sm:$0xff]  }
  0xe8   : > { %5721 = vmatpush1.bf16.msra.mxu1 %v9465_v36  ;;  %5681 = vmatprep.subr.bf16.mxu0 %v9470_v37  ;;  %v9557_v36 = vld [vmem:[#allocation5 + $0xb54] ss:$72 sps:$4 sm:$0xff]   ;;  %v9552_v37 = vld [vmem:[#allocation5 + $0x250] ss:$72 sps:$4 sm:$0xff]  }
  0xe9   : > { %5722 = vmatprep.subr.bf16.mxu1 %v9473_v38  ;;  %v9555_v38 = vld [vmem:[#allocation5 + $0xb50] ss:$72 sps:$4 sm:$0xff]  }
  0xeb   : > { %5682 = vmatpush1.bf16.msra.mxu0 %v9468_v39  ;;  %v9560_v39 = vld [vmem:[#allocation5 + $0x1c4] ss:$72 sps:$4 sm:$0xff]  }
  0xec   : > { %5723 = vmatpush1.bf16.msra.mxu1 %v9471_v40  ;;  %5683 = vmatprep.subr.bf16.mxu0 %v9476_v41  ;;  %v9563_v40 = vld [vmem:[#allocation5 + $0xac4] ss:$72 sps:$4 sm:$0xff]   ;;  %v9558_v41 = vld [vmem:[#allocation5 + $0x1c0] ss:$72 sps:$4 sm:$0xff]  }
  0xed   : > { %5724 = vmatprep.subr.bf16.mxu1 %v9479_v42  ;;  %v9561_v42 = vld [vmem:[#allocation5 + $0xac0] ss:$72 sps:$4 sm:$0xff]  }
  0xef   : > { %5684 = vmatpush1.bf16.msra.mxu0 %v9474_v43  ;;  %v9566_v43 = vld [vmem:[#allocation5 + $0x134] ss:$72 sps:$4 sm:$0xff]  }
  0xf0   : > { %5725 = vmatpush1.bf16.msra.mxu1 %v9477_v44  ;;  %5685 = vmatprep.subr.bf16.mxu0 %v9482_v45  ;;  %v9569_v44 = vld [vmem:[#allocation5 + $0xa34] ss:$72 sps:$4 sm:$0xff]   ;;  %v9564_v45 = vld [vmem:[#allocation5 + $0x130] ss:$72 sps:$4 sm:$0xff]  }
  0xf1   : > { %5726 = vmatprep.subr.bf16.mxu1 %v9485_v46  ;;  %v9567_v46 = vld [vmem:[#allocation5 + $0xa30] ss:$72 sps:$4 sm:$0xff]  }
  0xf3   : > { %5686 = vmatpush1.bf16.msra.mxu0 %v9480_v47  ;;  %v9572_v47 = vld [vmem:[#allocation5 + $0xa4] ss:$72 sps:$4 sm:$0xff]  }
  0xf4   : > { %5727 = vmatpush1.bf16.msra.mxu1 %v9483_v48  ;;  %5687 = vmatprep.subr.bf16.mxu0 %v9488_v50  ;;  %v9575_v48 = vld [vmem:[#allocation5 + $0x9a4] ss:$72 sps:$4 sm:$0xff]   ;;  %v9570_v50 = vld [vmem:[#allocation5 + $0xa0] ss:$72 sps:$4 sm:$0xff]  }
  0xf5   : > { %5728 = vmatprep.subr.bf16.mxu1 %v9491_v51  ;;  %v9573_v51 = vld [vmem:[#allocation5 + $0x9a0] ss:$72 sps:$4 sm:$0xff]  }
  0xf7   : > { %5688 = vmatpush2.bf16.msra.mxu0 %v9486_v53  ;;  %v9578_v53 = vld [vmem:[#allocation5 + $0x14] ss:$72 sps:$4 sm:$0xff]  }
  0xf8   : > { %5729 = vmatpush2.bf16.msra.mxu1 %v9489_v54  ;;  %5689 = vmatprep.subr.bf16.mxu0 %v9494_v55  ;;  %v9581_v54 = vld [vmem:[#allocation5 + $0x914] ss:$72 sps:$4 sm:$0xff]   ;;  %v9576_v55 = vld [vmem:[#allocation5 + $0x10] ss:$72 sps:$4 sm:$0xff]  }
  0xf9   : > { %5730 = vmatprep.subr.bf16.mxu1 %v9497_v56  ;;  %v9579_v56 = vld [vmem:[#allocation5 + $0x910] ss:$72 sps:$4 sm:$0xff]  }
  0xfb   : > { %5690 = vmatpush2.bf16.msra.mxu0 %v9492_v57  ;;  %v9584_v57 = vld [vmem:[#allocation5 + $0x884] ss:$72 sps:$4 sm:$0xff]  }
  0xfc   : > { %5731 = vmatpush2.bf16.msra.mxu1 %v9495_v58  ;;  %5691 = vmatprep.subr.bf16.mxu0 %v9500_v59  ;;  %v9587_v58 = vld [vmem:[#allocation5 + $0x1184] ss:$72 sps:$4 sm:$0xff]   ;;  %v9582_v59 = vld [vmem:[#allocation5 + $0x880] ss:$72 sps:$4 sm:$0xff]  }
  0xfd   : > { %5732 = vmatprep.subr.bf16.mxu1 %v9503_v60  ;;  %v9585_v60 = vld [vmem:[#allocation5 + $0x1180] ss:$72 sps:$4 sm:$0xff]  }
  0xff   : > { %5692 = vmatpush2.bf16.msra.mxu0 %v9498_v61  ;;  %v9590_v61 = vld [vmem:[#allocation5 + $0x7f4] ss:$72 sps:$4 sm:$0xff]  }
 0x100   : > { %5733 = vmatpush2.bf16.msra.mxu1 %v9501_v62  ;;  %5693 = vmatprep.subr.bf16.mxu0 %v9506_v63  ;;  %v9593_v62 = vld [vmem:[#allocation5 + $0x10f4] ss:$72 sps:$4 sm:$0xff]   ;;  %v9588_v63 = vld [vmem:[#allocation5 + $0x7f0] ss:$72 sps:$4 sm:$0xff]  }
 0x101   : > { %5734 = vmatprep.subr.bf16.mxu1 %v9509_v0  ;;  %v9591_v0 = vld [vmem:[#allocation5 + $0x10f0] ss:$72 sps:$4 sm:$0xff]  }
 0x103   : > { %5694 = vmatpush2.bf16.msra.mxu0 %v9504_v1  ;;  %v9596_v1 = vld [vmem:[#allocation5 + $0x764] ss:$72 sps:$4 sm:$0xff]  }
 0x104   : > { %5735 = vmatpush2.bf16.msra.mxu1 %v9507_v2  ;;  %5695 = vmatprep.subr.bf16.mxu0 %v9512_v3  ;;  %v9599_v2 = vld [vmem:[#allocation5 + $0x1064] ss:$72 sps:$4 sm:$0xff]   ;;  %v9594_v3 = vld [vmem:[#allocation5 + $0x760] ss:$72 sps:$4 sm:$0xff]  }
 0x105   : > { %5736 = vmatprep.subr.bf16.mxu1 %v9515_v4  ;;  %v9597_v4 = vld [vmem:[#allocation5 + $0x1060] ss:$72 sps:$4 sm:$0xff]  }
 0x107   : > { %5696 = vmatpush2.bf16.msra.mxu0 %v9510_v5  ;;  %v9602_v5 = vld [vmem:[#allocation5 + $0x6d4] ss:$72 sps:$4 sm:$0xff]  }
 0x108   : > { %5737 = vmatpush2.bf16.msra.mxu1 %v9513_v6  ;;  %5697 = vmatprep.subr.bf16.mxu0 %v9518_v7  ;;  %v9605_v6 = vld [vmem:[#allocation5 + $0xfd4] ss:$72 sps:$4 sm:$0xff]   ;;  %v9600_v7 = vld [vmem:[#allocation5 + $0x6d0] ss:$72 sps:$4 sm:$0xff]  }
 0x109   : > { %5738 = vmatprep.subr.bf16.mxu1 %v9521_v10  ;;  %v9603_v10 = vld [vmem:[#allocation5 + $0xfd0] ss:$72 sps:$4 sm:$0xff]  }
 0x10b   : > { %5698 = vmatpush2.bf16.msra.mxu0 %v9516_v11  ;;  %v9608_v11 = vld [vmem:[#allocation5 + $0x644] ss:$72 sps:$4 sm:$0xff]  }
 0x10c   : > { %5739 = vmatpush2.bf16.msra.mxu1 %v9519_v12  ;;  %5699 = vmatprep.subr.bf16.mxu0 %v9524_v13  ;;  %v9611_v12 = vld [vmem:[#allocation5 + $0xf44] ss:$72 sps:$4 sm:$0xff]   ;;  %v9606_v13 = vld [vmem:[#allocation5 + $0x640] ss:$72 sps:$4 sm:$0xff]  }
 0x10d   : > { %5740 = vmatprep.subr.bf16.mxu1 %v9527_v14  ;;  %v9609_v14 = vld [vmem:[#allocation5 + $0xf40] ss:$72 sps:$4 sm:$0xff]  }
 0x10f   : > { %5700 = vmatpush2.bf16.msra.mxu0 %v9522_v15  ;;  %v9614_v15 = vld [vmem:[#allocation5 + $0x5b4] ss:$72 sps:$4 sm:$0xff]  }
 0x110   : > { %5741 = vmatpush2.bf16.msra.mxu1 %v9525_v16  ;;  %5701 = vmatprep.subr.bf16.mxu0 %v9530_v18  ;;  %v9617_v16 = vld [vmem:[#allocation5 + $0xeb4] ss:$72 sps:$4 sm:$0xff]   ;;  %v9612_v18 = vld [vmem:[#allocation5 + $0x5b0] ss:$72 sps:$4 sm:$0xff]  }
 0x111   : > { %5742 = vmatprep.subr.bf16.mxu1 %v9533_v19  ;;  %v9615_v19 = vld [vmem:[#allocation5 + $0xeb0] ss:$72 sps:$4 sm:$0xff]  }
 0x113   : > { %5702 = vmatpush2.bf16.msra.mxu0 %v9528_v20  ;;  %v9620_v20 = vld [vmem:[#allocation5 + $0x524] ss:$72 sps:$4 sm:$0xff]  }
 0x114   : > { %5743 = vmatpush2.bf16.msra.mxu1 %v9531_v21  ;;  %5753 = vmatprep.subr.bf16.mxu0 %v9536_v22  ;;  %v1097_v21 = vlaneseq  ;;  %v9623_v22 = vld [vmem:[#allocation5 + $0xe24] ss:$72 sps:$4 sm:$0xff]  }
 0x115   : > { %5794 = vmatprep.subr.bf16.mxu1 %v9539_v23  ;;  %v9618_v23 = vld [vmem:[#allocation5 + $0x520] ss:$72 sps:$4 sm:$0xff]  }
 0x116   : > { %5704 = vmatmul.mubr.bf16.vlgmr.msra.gmra.mxu0 %v10918_v9 }
 0x117   : > { %5745 = vmatmul.mubr.bf16.vlgmr.msra.gmra.mxu1 %v10928_v17  ;;  %5754 = vmatpush1.bf16.msra.mxu0 %v9534_v24  ;;  %v9621_v24 = vld [vmem:[#allocation5 + $0xe20] ss:$72 sps:$4 sm:$0xff]  }
 0x118   : > { %5795 = vmatpush1.bf16.msra.mxu1 %v9537_v25  ;;  %5755 = vmatprep.subr.bf16.mxu0 %v9542_v26  ;;  %v9626_v25 = vld [vmem:[#allocation5 + $0x494] ss:$72 sps:$4 sm:$0xff]   ;;  %v10938_v26 = vshrl.u32 %v1097_v21, 7  ;;  %v9680_v21 = vld [vmem:[#allocation5 + $0x1a84] ss:$72 sps:$4 sm:$0xff]  }
 0x119   : > { %5796 = vmatprep.subr.bf16.mxu1 %v9545_v27  ;;  %5785 = vmatprep.mubr.bf16.mxu0 %v10907_v49  ;;  %v9629_v27 = vld [vmem:[#allocation5 + $0xd94] ss:$72 sps:$4 sm:$0xff]  }
 0x11a   : > { %5826 = vmatprep.mubr.bf16.mxu1 %v10910_v52 }
 0x11b   : > { %5756 = vmatpush1.bf16.msra.mxu0 %v9540_v28  ;;  %v9624_v28 = vld [vmem:[#allocation5 + $0x490] ss:$72 sps:$4 sm:$0xff]  }
 0x11c   : > { %5797 = vmatpush1.bf16.msra.mxu1 %v9543_v29  ;;  %5757 = vmatprep.subr.bf16.mxu0 %v9548_v30  ;;  %v9627_v29 = vld [vmem:[#allocation5 + $0xd90] ss:$72 sps:$4 sm:$0xff]   ;;  %v1091_v30 = vld [vmem:[#allocation7] sm:$0xff] }
 0x11d   : > { %5798 = vmatprep.subr.bf16.mxu1 %v9551_v31  ;;  %v10941_v31 = vsub.s32 0, %v10938_v26 }
 0x11f   : > { %5758 = vmatpush1.bf16.msra.mxu0 %v9546_v32  ;;  %v9632_v32 = vld [vmem:[#allocation5 + $0x1604] ss:$72 sps:$4 sm:$0xff]  }
 0x120   : > { %5799 = vmatpush1.bf16.msra.mxu1 %v9549_v33  ;;  %5759 = vmatprep.subr.bf16.mxu0 %v9554_v34  ;;  %v9635_v33 = vld [vmem:[#allocation5 + $0x40c] ss:$72 sps:$4 sm:$0xff]   ;;  %v10944_v34 = vsub.s32 1, %v10938_v26 }
 0x121   : > { %5800 = vmatprep.subr.bf16.mxu1 %v9557_v36  ;;  %v9630_v36 = vld [vmem:[#allocation5 + $0x1600] ss:$72 sps:$4 sm:$0xff]  }
 0x123   : > { %5760 = vmatpush1.bf16.msra.mxu0 %v9552_v37  ;;  %v1100_v37 = vrot.slane %v1091_v30, %v10941_v31 }
 0x124   : > { %5801 = vmatpush1.bf16.msra.mxu1 %v9555_v38  ;;  %5761 = vmatprep.subr.bf16.mxu0 %v9560_v39  ;;  %v9633_v38 = vld [vmem:[#allocation5 + $0x408] ss:$72 sps:$4 sm:$0xff]   ;;  %v9638_v39 = vld [vmem:[#allocation5 + $0x1574] ss:$72 sps:$4 sm:$0xff]  }
 0x125   : > { %5802 = vmatprep.subr.bf16.mxu1 %v9563_v40  ;;  %v9641_v40 = vld [vmem:[#allocation5 + $0x37c] ss:$72 sps:$4 sm:$0xff]  }
 0x127   : > { %5762 = vmatpush1.bf16.msra.mxu0 %v9558_v41  ;;  %v1104_v41 = vrot.slane %v1091_v30, %v10944_v34  ;;  %v9692_v30 = vld [vmem:[#allocation5 + $0x1964] ss:$72 sps:$4 sm:$0xff]  }
 0x128   : > { %5803 = vmatpush1.bf16.msra.mxu1 %v9561_v42  ;;  %5763 = vmatprep.subr.bf16.mxu0 %v9566_v43 }
 0x129   : > { %5804 = vmatprep.subr.bf16.mxu1 %v9569_v44  ;;  %v9636_v44 = vld [vmem:[#allocation5 + $0x1570] ss:$72 sps:$4 sm:$0xff]  }
 0x12b   : > { %5764 = vmatpush1.bf16.msra.mxu0 %v9564_v45 }
 0x12c   : > { %5805 = vmatpush1.bf16.msra.mxu1 %v9567_v46  ;;  %5765 = vmatprep.subr.bf16.mxu0 %v9572_v47  ;;  %v9639_v46 = vld [vmem:[#allocation5 + $0x378] ss:$72 sps:$4 sm:$0xff]   ;;  %v9644_v47 = vld [vmem:[#allocation5 + $0x14e4] ss:$72 sps:$4 sm:$0xff]  }
 0x12d   : > { %5806 = vmatprep.subr.bf16.mxu1 %v9575_v48 }
 0x12f   : > { %5766 = vmatpush1.bf16.msra.mxu0 %v9570_v50 }
 0x130   : > { %5807 = vmatpush1.bf16.msra.mxu1 %v9573_v51  ;;  %5767 = vmatprep.subr.bf16.mxu0 %v9578_v53  ;;  %v9647_v51 = vld [vmem:[#allocation5 + $0x2ec] ss:$72 sps:$4 sm:$0xff]  }
 0x131   : > { %5808 = vmatprep.subr.bf16.mxu1 %v9581_v54 }
 0x133   : > { %5768 = vmatpush1.bf16.msra.mxu0 %v9576_v55 }
 0x134   : > { %5809 = vmatpush1.bf16.msra.mxu1 %v9579_v56  ;;  %5769 = vmatprep.subr.bf16.mxu0 %v9584_v57  ;;  %v9642_v56 = vld [vmem:[#allocation5 + $0x14e0] ss:$72 sps:$4 sm:$0xff]  }
 0x135   : > { %5810 = vmatprep.subr.bf16.mxu1 %v9587_v58  ;;  %v9645_v57 = vld [vmem:[#allocation5 + $0x2e8] ss:$72 sps:$4 sm:$0xff]  }
 0x137   : > { %5770 = vmatpush2.bf16.msra.mxu0 %v9582_v59 }
 0x138   : > { %5811 = vmatpush2.bf16.msra.mxu1 %v9585_v60  ;;  %5771 = vmatprep.subr.bf16.mxu0 %v9590_v61  ;;  %v9650_v61 = vld [vmem:[#allocation5 + $0x1454] ss:$72 sps:$4 sm:$0xff]  }
 0x139   : > { %5812 = vmatprep.subr.bf16.mxu1 %v9593_v62  ;;  %v9653_v62 = vld [vmem:[#allocation5 + $0x25c] ss:$72 sps:$4 sm:$0xff]  }
 0x13b   : > { %5772 = vmatpush2.bf16.msra.mxu0 %v9588_v63 }
 0x13c   : > { %5813 = vmatpush2.bf16.msra.mxu1 %v9591_v0  ;;  %5773 = vmatprep.subr.bf16.mxu0 %v9596_v1  ;;  %v9648_v0 = vld [vmem:[#allocation5 + $0x1450] ss:$72 sps:$4 sm:$0xff]  }
 0x13d   : > { %5814 = vmatprep.subr.bf16.mxu1 %v9599_v2  ;;  %v9651_v1 = vld [vmem:[#allocation5 + $0x258] ss:$72 sps:$4 sm:$0xff]   ;;  %v9656_v2 = vld [vmem:[#allocation5 + $0x13c4] ss:$72 sps:$4 sm:$0xff]  }
 0x13f   : > { %5774 = vmatpush2.bf16.msra.mxu0 %v9594_v3  ;;  %v9659_v3 = vld [vmem:[#allocation5 + $0x1cc] ss:$72 sps:$4 sm:$0xff]  }
 0x140   : > { %5815 = vmatpush2.bf16.msra.mxu1 %v9597_v4  ;;  %5775 = vmatprep.subr.bf16.mxu0 %v9602_v5  ;;  %v9654_v4 = vld [vmem:[#allocation5 + $0x13c0] ss:$72 sps:$4 sm:$0xff]  }
 0x141   : > { %5816 = vmatprep.subr.bf16.mxu1 %v9605_v6  ;;  %v9657_v5 = vld [vmem:[#allocation5 + $0x1c8] ss:$72 sps:$4 sm:$0xff]   ;;  %v9662_v6 = vld [vmem:[#allocation5 + $0x1334] ss:$72 sps:$4 sm:$0xff]  }
 0x143   : > { %5776 = vmatpush2.bf16.msra.mxu0 %v9600_v7  ;;  %v9665_v7 = vld [vmem:[#allocation5 + $0x13c] ss:$72 sps:$4 sm:$0xff]  }
 0x144   : > { %5817 = vmatpush2.bf16.msra.mxu1 %v9603_v10  ;;  %5777 = vmatprep.subr.bf16.mxu0 %v9608_v11  ;;  %v9660_v10 = vld [vmem:[#allocation5 + $0x1330] ss:$72 sps:$4 sm:$0xff]  }
 0x145   : > { %5818 = vmatprep.subr.bf16.mxu1 %v9611_v12  ;;  %v9663_v11 = vld [vmem:[#allocation5 + $0x138] ss:$72 sps:$4 sm:$0xff]   ;;  %v9668_v12 = vld [vmem:[#allocation5 + $0x12a4] ss:$72 sps:$4 sm:$0xff]  }
 0x147   : > { %5778 = vmatpush2.bf16.msra.mxu0 %v9606_v13  ;;  %v9671_v13 = vld [vmem:[#allocation5 + $0xac] ss:$72 sps:$4 sm:$0xff]  }
 0x148   : > { %5819 = vmatpush2.bf16.msra.mxu1 %v9609_v14  ;;  %5779 = vmatprep.subr.bf16.mxu0 %v9614_v15  ;;  %v9666_v14 = vld [vmem:[#allocation5 + $0x12a0] ss:$72 sps:$4 sm:$0xff]  }
 0x149   : > { %5820 = vmatprep.subr.bf16.mxu1 %v9617_v16  ;;  %v9669_v15 = vld [vmem:[#allocation5 + $0xa8] ss:$72 sps:$4 sm:$0xff]   ;;  %v9674_v16 = vld [vmem:[#allocation5 + $0x1214] ss:$72 sps:$4 sm:$0xff]  }
 0x14b   : > { %5780 = vmatpush2.bf16.msra.mxu0 %v9612_v18  ;;  %v9677_v18 = vld [vmem:[#allocation5 + $0x1c] ss:$72 sps:$4 sm:$0xff]  }
 0x14c   : > { %5821 = vmatpush2.bf16.msra.mxu1 %v9615_v19  ;;  %5781 = vmatprep.subr.bf16.mxu0 %v9620_v20  ;;  %v9672_v19 = vld [vmem:[#allocation5 + $0x1210] ss:$72 sps:$4 sm:$0xff]  }
 0x14d   : > { %5822 = vmatprep.subr.bf16.mxu1 %v9623_v22  ;;  %v9675_v20 = vld [vmem:[#allocation5 + $0x18] ss:$72 sps:$4 sm:$0xff]   ;;  %v9683_v22 = vld [vmem:[#allocation5 + $0x88c] ss:$72 sps:$4 sm:$0xff]  }
 0x14f   : > { %5782 = vmatpush2.bf16.msra.mxu0 %v9618_v23  ;;  %v9678_v23 = vld [vmem:[#allocation5 + $0x1a80] ss:$72 sps:$4 sm:$0xff]  }
 0x150   : > { %5823 = vmatpush2.bf16.msra.mxu1 %v9621_v24  ;;  %5783 = vmatprep.subr.bf16.mxu0 %v9626_v25  ;;  %v9681_v24 = vld [vmem:[#allocation5 + $0x888] ss:$72 sps:$4 sm:$0xff]   ;;  %v9686_v25 = vld [vmem:[#allocation5 + $0x19f4] ss:$72 sps:$4 sm:$0xff]  }
 0x151   : > { %5824 = vmatprep.subr.bf16.mxu1 %v9629_v27  ;;  %v9689_v27 = vld [vmem:[#allocation5 + $0x7fc] ss:$72 sps:$4 sm:$0xff]  }
 0x153   : > { %5784 = vmatpush2.bf16.msra.mxu0 %v9624_v28  ;;  %v9684_v28 = vld [vmem:[#allocation5 + $0x19f0] ss:$72 sps:$4 sm:$0xff]  }
 0x154   : > { %5825 = vmatpush2.bf16.msra.mxu1 %v9627_v29  ;;  %5835 = vmatprep.subr.bf16.mxu0 %v9632_v32  ;;  %v9687_v29 = vld [vmem:[#allocation5 + $0x7f8] ss:$72 sps:$4 sm:$0xff]   ;;  %v9695_v32 = vld [vmem:[#allocation5 + $0x76c] ss:$72 sps:$4 sm:$0xff]  }
 0x155   : > { %5876 = vmatprep.subr.bf16.mxu1 %v9635_v33  ;;  %v9690_v33 = vld [vmem:[#allocation5 + $0x1960] ss:$72 sps:$4 sm:$0xff]  }
 0x156   : > { %v5541_v42 = vpop.f32.mrf.mxu0  ;;  %5786 = vmatmul.mubr.bf16.vlgmr.msra.gmra.mxu0 %v10916_v8 }
 0x157   : > { %v5582_v43 = vpop.f32.mrf.mxu1  ;;  %5827 = vmatmul.mubr.bf16.vlgmr.msra.gmra.mxu1 %v10918_v9  ;;  %v5542_v45 = vadd.f32 %v5541_v42, %v1100_v37  ;;  %5836 = vmatpush1.bf16.msra.mxu0 %v9630_v36  ;;  %v9693_v36 = vld [vmem:[#allocation5 + $0x768] ss:$72 sps:$4 sm:$0xff]   ;;  %v9698_v37 = vld [vmem:[#allocation5 + $0x18d4] ss:$72 sps:$4 sm:$0xff]  }
 0x158   : > { %5877 = vmatpush1.bf16.msra.mxu1 %v9633_v38  ;;  %v5543_v48 = vpop.f32.mrf.mxu0  ;;  %5837 = vmatprep.subr.bf16.mxu0 %v9638_v39  ;;  %v9701_v38 = vld [vmem:[#allocation5 + $0x6dc] ss:$72 sps:$4 sm:$0xff]   ;;  %v9696_v39 = vld [vmem:[#allocation5 + $0x18d0] ss:$72 sps:$4 sm:$0xff]   ;;  %v9707_v42 = vld [vmem:[#allocation5 + $0x64c] ss:$72 sps:$4 sm:$0xff]  }
 0x159   : > { %v5584_v50 = vpop.f32.mrf.mxu1  ;;  %5878 = vmatprep.subr.bf16.mxu1 %v9641_v40  ;;  %v10950_v53 = vadd.f32 %v5582_v43, %v5542_v45  ;;  %v5544_v54 = vadd.f32 %v5543_v48, %v1104_v41  ;;  %5867 = vmatprep.mubr.bf16.mxu0 %v10924_v35  ;;  %v9699_v40 = vld [vmem:[#allocation5 + $0x6d8] ss:$72 sps:$4 sm:$0xff]   ;;  %v9704_v41 = vld [vmem:[#allocation5 + $0x1844] ss:$72 sps:$4 sm:$0xff]   ;;  %v9710_v45 = vld [vmem:[#allocation5 + $0x17b4] ss:$72 sps:$4 sm:$0xff]  }
 0x15a   : > { %5908 = vmatprep.mubr.bf16.mxu1 %v10907_v49  ;;  %v5545_v58 = vpop.f32.mrf.mxu0  ;;  %v9702_v43 = vld [vmem:[#allocation5 + $0x1840] ss:$72 sps:$4 sm:$0xff]  }
 0x15b   : > { %v5586_v55 = vpop.f32.mrf.mxu1  ;;  %v10954_v59 = vadd.f32 %v5584_v50, %v5544_v54  ;;  %5838 = vmatpush1.bf16.msra.mxu0 %v9636_v44  ;;  %v9705_v44 = vld [vmem:[#allocation5 + $0x648] ss:$72 sps:$4 sm:$0xff]   ;;  %v9711_v48 = vld [vmem:[#allocation5 + $0x5b8] ss:$72 sps:$4 sm:$0xff]   ;;  %v9716_v50 = vld [vmem:[#allocation5 + $0x1724] ss:$72 sps:$4 sm:$0xff]  }
 0x15c   : > { %5879 = vmatpush1.bf16.msra.mxu1 %v9639_v46  ;;  %5839 = vmatprep.subr.bf16.mxu0 %v9644_v47  ;;  %v5546_v63 = vpop.f32.mrf.mxu0  ;;  %v9713_v46 = vld [vmem:[#allocation5 + $0x5bc] ss:$72 sps:$4 sm:$0xff]   ;;  %v9708_v47 = vld [vmem:[#allocation5 + $0x17b0] ss:$72 sps:$4 sm:$0xff]   ;;  %v9714_v54 = vld [vmem:[#allocation5 + $0x1720] ss:$72 sps:$4 sm:$0xff]  }
 0x15d   : > { %v5587_v60 = vpop.f32.mrf.mxu1  ;;  %5880 = vmatprep.subr.bf16.mxu1 %v9647_v51  ;;  %v9719_v51 = vld [vmem:[#allocation5 + $0x52c] ss:$72 sps:$4 sm:$0xff]   ;;  %v9717_v55 = vld [vmem:[#allocation5 + $0x528] ss:$72 sps:$4 sm:$0xff]  }
 0x15e   : > { %v9720_v58 = vld [vmem:[#allocation5 + $0x1690] ss:$72 sps:$4 sm:$0xff]  }
 0x15f   : > { %5840 = vmatpush1.bf16.msra.mxu0 %v9642_v56  ;;  %v9722_v56 = vld [vmem:[#allocation5 + $0x1694] ss:$72 sps:$4 sm:$0xff]   ;;  %v9723_v60 = vld [vmem:[#allocation5 + $0x498] ss:$72 sps:$4 sm:$0xff]   ;;  %v9726_v63 = vld [vmem:[#allocation5 + $0xd08] ss:$72 sps:$4 sm:$0xff]  }
 0x160   : > { %5881 = vmatpush1.bf16.msra.mxu1 %v9645_v57  ;;  %5841 = vmatprep.subr.bf16.mxu0 %v9650_v61  ;;  %v9725_v57 = vld [vmem:[#allocation5 + $0x49c] ss:$72 sps:$4 sm:$0xff]   ;;  %v9728_v61 = vld [vmem:[#allocation5 + $0xd0c] ss:$72 sps:$4 sm:$0xff]  }
 0x161   : > { %5882 = vmatprep.subr.bf16.mxu1 %v9653_v62  ;;  %v9731_v62 = vld [vmem:[#allocation5 + $0x160c] ss:$72 sps:$4 sm:$0xff]  }
 0x163   : > { %5842 = vmatpush1.bf16.msra.mxu0 %v9648_v0  ;;  %v9729_v0 = vld [vmem:[#allocation5 + $0x1608] ss:$72 sps:$4 sm:$0xff]  }
 0x164   : > { %5883 = vmatpush1.bf16.msra.mxu1 %v9651_v1  ;;  %5843 = vmatprep.subr.bf16.mxu0 %v9656_v2  ;;  %v9734_v1 = vld [vmem:[#allocation5 + $0xc7c] ss:$72 sps:$4 sm:$0xff]  }
 0x165   : > { %5884 = vmatprep.subr.bf16.mxu1 %v9659_v3  ;;  %v9737_v2 = vld [vmem:[#allocation5 + $0x157c] ss:$72 sps:$4 sm:$0xff]   ;;  %v9732_v3 = vld [vmem:[#allocation5 + $0xc78] ss:$72 sps:$4 sm:$0xff]  }
 0x167   : > { %5844 = vmatpush1.bf16.msra.mxu0 %v9654_v4  ;;  %v9735_v4 = vld [vmem:[#allocation5 + $0x1578] ss:$72 sps:$4 sm:$0xff]  }
 0x168   : > { %5885 = vmatpush1.bf16.msra.mxu1 %v9657_v5  ;;  %5845 = vmatprep.subr.bf16.mxu0 %v9662_v6 }
 0x169   : > { %5886 = vmatprep.subr.bf16.mxu1 %v9665_v7 }
 0x16b   : > { %5846 = vmatpush1.bf16.msra.mxu0 %v9660_v10 }
 0x16c   : > { %5887 = vmatpush1.bf16.msra.mxu1 %v9663_v11  ;;  %5847 = vmatprep.subr.bf16.mxu0 %v9668_v12  ;;  %v9740_v12 = vld [vmem:[#allocation5 + $0xbec] ss:$72 sps:$4 sm:$0xff]  }
 0x16d   : > { %5888 = vmatprep.subr.bf16.mxu1 %v9671_v13  ;;  %v9743_v13 = vld [vmem:[#allocation5 + $0x14ec] ss:$72 sps:$4 sm:$0xff]  }
 0x16f   : > { %5848 = vmatpush1.bf16.msra.mxu0 %v9666_v14 }
 0x170   : > { %5889 = vmatpush1.bf16.msra.mxu1 %v9669_v15  ;;  %5849 = vmatprep.subr.bf16.mxu0 %v9674_v16  ;;  %v9738_v15 = vld [vmem:[#allocation5 + $0xbe8] ss:$72 sps:$4 sm:$0xff]  }
 0x171   : > { %5890 = vmatprep.subr.bf16.mxu1 %v9677_v18  ;;  %v9741_v16 = vld [vmem:[#allocation5 + $0x14e8] ss:$72 sps:$4 sm:$0xff]  }
 0x173   : > { %5850 = vmatpush1.bf16.msra.mxu0 %v9672_v19 }
 0x174   : > { %5891 = vmatpush1.bf16.msra.mxu1 %v9675_v20  ;;  %5851 = vmatprep.subr.bf16.mxu0 %v9680_v21  ;;  %v9746_v20 = vld [vmem:[#allocation5 + $0xb5c] ss:$72 sps:$4 sm:$0xff]  }
 0x175   : > { %5892 = vmatprep.subr.bf16.mxu1 %v9683_v22  ;;  %v9749_v21 = vld [vmem:[#allocation5 + $0x145c] ss:$72 sps:$4 sm:$0xff]  }
 0x177   : > { %5852 = vmatpush2.bf16.msra.mxu0 %v9678_v23  ;;  %v9747_v23 = vld [vmem:[#allocation5 + $0x1458] ss:$72 sps:$4 sm:$0xff]  }
 0x178   : > { %5893 = vmatpush2.bf16.msra.mxu1 %v9681_v24  ;;  %5853 = vmatprep.subr.bf16.mxu0 %v9686_v25  ;;  %v9752_v24 = vld [vmem:[#allocation5 + $0xacc] ss:$72 sps:$4 sm:$0xff]  }
 0x179   : > { %5894 = vmatprep.subr.bf16.mxu1 %v9689_v27  ;;  %v9755_v25 = vld [vmem:[#allocation5 + $0x13cc] ss:$72 sps:$4 sm:$0xff]   ;;  %v9750_v27 = vld [vmem:[#allocation5 + $0xac8] ss:$72 sps:$4 sm:$0xff]  }
 0x17b   : > { %5854 = vmatpush2.bf16.msra.mxu0 %v9684_v28  ;;  %v9753_v28 = vld [vmem:[#allocation5 + $0x13c8] ss:$72 sps:$4 sm:$0xff]  }
 0x17c   : > { %5895 = vmatpush2.bf16.msra.mxu1 %v9687_v29  ;;  %5855 = vmatprep.subr.bf16.mxu0 %v9692_v30  ;;  %v9758_v29 = vld [vmem:[#allocation5 + $0xa3c] ss:$72 sps:$4 sm:$0xff]  }
 0x17d   : > { %5896 = vmatprep.subr.bf16.mxu1 %v9695_v32  ;;  %v9761_v30 = vld [vmem:[#allocation5 + $0x133c] ss:$72 sps:$4 sm:$0xff]   ;;  %v9756_v32 = vld [vmem:[#allocation5 + $0xa38] ss:$72 sps:$4 sm:$0xff]  }
 0x17f   : > { %5856 = vmatpush2.bf16.msra.mxu0 %v9690_v33  ;;  %v9759_v33 = vld [vmem:[#allocation5 + $0x1338] ss:$72 sps:$4 sm:$0xff]  }
 0x180   : > { %5897 = vmatpush2.bf16.msra.mxu1 %v9693_v36  ;;  %5857 = vmatprep.subr.bf16.mxu0 %v9698_v37  ;;  %v9764_v36 = vld [vmem:[#allocation5 + $0x9ac] ss:$72 sps:$4 sm:$0xff]  }
 0x181   : > { %5898 = vmatprep.subr.bf16.mxu1 %v9701_v38  ;;  %v9767_v37 = vld [vmem:[#allocation5 + $0x12ac] ss:$72 sps:$4 sm:$0xff]   ;;  %v9762_v38 = vld [vmem:[#allocation5 + $0x9a8] ss:$72 sps:$4 sm:$0xff]  }
 0x183   : > { %5858 = vmatpush2.bf16.msra.mxu0 %v9696_v39  ;;  %v9765_v39 = vld [vmem:[#allocation5 + $0x12a8] ss:$72 sps:$4 sm:$0xff]  }
 0x184   : > { %5899 = vmatpush2.bf16.msra.mxu1 %v9699_v40  ;;  %5859 = vmatprep.subr.bf16.mxu0 %v9704_v41  ;;  %v9770_v40 = vld [vmem:[#allocation5 + $0x91c] ss:$72 sps:$4 sm:$0xff]  }
 0x185   : > { %5900 = vmatprep.subr.bf16.mxu1 %v9707_v42  ;;  %v9773_v41 = vld [vmem:[#allocation5 + $0x121c] ss:$72 sps:$4 sm:$0xff]   ;;  %v9768_v42 = vld [vmem:[#allocation5 + $0x918] ss:$72 sps:$4 sm:$0xff]  }
 0x187   : > { %5860 = vmatpush2.bf16.msra.mxu0 %v9702_v43  ;;  %v9771_v43 = vld [vmem:[#allocation5 + $0x1218] ss:$72 sps:$4 sm:$0xff]  }
 0x188   : > { %5901 = vmatpush2.bf16.msra.mxu1 %v9705_v44  ;;  %5861 = vmatprep.subr.bf16.mxu0 %v9710_v45  ;;  %v9776_v44 = vld [vmem:[#allocation5 + $0x118c] ss:$72 sps:$4 sm:$0xff]  }
 0x189   : > { %5902 = vmatprep.subr.bf16.mxu1 %v9713_v46  ;;  %v9779_v45 = vld [vmem:[#allocation5 + $0x1a8c] ss:$72 sps:$4 sm:$0xff]   ;;  %v9774_v46 = vld [vmem:[#allocation5 + $0x1188] ss:$72 sps:$4 sm:$0xff]  }
 0x18b   : > { %5862 = vmatpush2.bf16.msra.mxu0 %v9708_v47  ;;  %v9777_v47 = vld [vmem:[#allocation5 + $0x1a88] ss:$72 sps:$4 sm:$0xff]  }
 0x18c   : > { %5903 = vmatpush2.bf16.msra.mxu1 %v9711_v48  ;;  %5863 = vmatprep.subr.bf16.mxu0 %v9716_v50  ;;  %v9782_v48 = vld [vmem:[#allocation5 + $0x10fc] ss:$72 sps:$4 sm:$0xff]  }
 0x18d   : > { %5904 = vmatprep.subr.bf16.mxu1 %v9719_v51  ;;  %v9785_v50 = vld [vmem:[#allocation5 + $0x19fc] ss:$72 sps:$4 sm:$0xff]   ;;  %v9780_v51 = vld [vmem:[#allocation5 + $0x10f8] ss:$72 sps:$4 sm:$0xff]  }
 0x18f   : > { %5864 = vmatpush2.bf16.msra.mxu0 %v9714_v54  ;;  %v9783_v54 = vld [vmem:[#allocation5 + $0x19f8] ss:$72 sps:$4 sm:$0xff]  }
 0x190   : > { %5905 = vmatpush2.bf16.msra.mxu1 %v9717_v55  ;;  %5865 = vmatprep.subr.bf16.mxu0 %v9722_v56  ;;  %v9788_v55 = vld [vmem:[#allocation5 + $0x106c] ss:$72 sps:$4 sm:$0xff]  }
 0x191   : > { %5906 = vmatprep.subr.bf16.mxu1 %v9725_v57  ;;  %v9791_v56 = vld [vmem:[#allocation5 + $0x196c] ss:$72 sps:$4 sm:$0xff]   ;;  %v9786_v57 = vld [vmem:[#allocation5 + $0x1068] ss:$72 sps:$4 sm:$0xff]  }
 0x193   : > { %5866 = vmatpush2.bf16.msra.mxu0 %v9720_v58  ;;  %v9789_v58 = vld [vmem:[#allocation5 + $0x1968] ss:$72 sps:$4 sm:$0xff]  }
 0x194   : > { %5907 = vmatpush2.bf16.msra.mxu1 %v9723_v60  ;;  %5917 = vmatprep.subr.bf16.mxu0 %v9728_v61  ;;  %v9794_v60 = vld [vmem:[#allocation5 + $0xfdc] ss:$72 sps:$4 sm:$0xff]  }
 0x195   : > { %5958 = vmatprep.subr.bf16.mxu1 %v9731_v62  ;;  %v9797_v61 = vld [vmem:[#allocation5 + $0x18dc] ss:$72 sps:$4 sm:$0xff]   ;;  %v9792_v62 = vld [vmem:[#allocation5 + $0xfd8] ss:$72 sps:$4 sm:$0xff]  }
 0x196   : > { %v5623_v5 = vpop.f32.mrf.mxu0  ;;  %5868 = vmatmul.mubr.bf16.vlgmr.msra.gmra.mxu0 %v10928_v17 }
 0x197   : > { %v10956_v6 = vpop.f32.mrf.mxu1  ;;  %5909 = vmatmul.mubr.bf16.vlgmr.msra.gmra.mxu1 %v10916_v8  ;;  %v10961_v7 = vadd.f32 %v5623_v5, %v10950_v53  ;;  %5918 = vmatpush1.bf16.msra.mxu0 %v9726_v63  ;;  %v9795_v63 = vld [vmem:[#allocation5 + $0x18d8] ss:$72 sps:$4 sm:$0xff]   ;;  %v9809_v5 = vld [vmem:[#allocation5 + $0x17bc] ss:$72 sps:$4 sm:$0xff]  }
 0x198   : > { %5959 = vmatpush1.bf16.msra.mxu1 %v9729_v0  ;;  %v5625_v10 = vpop.f32.mrf.mxu0  ;;  %5919 = vmatprep.subr.bf16.mxu0 %v9734_v1  ;;  %v9800_v0 = vld [vmem:[#allocation5 + $0xf4c] ss:$72 sps:$4 sm:$0xff]  }
 0x199   : > { %v10963_v11 = vpop.f32.mrf.mxu1  ;;  %5960 = vmatprep.subr.bf16.mxu1 %v9737_v2  ;;  %v10966_v14 = vadd.f32 %v5625_v10, %v10954_v59  ;;  %5949 = vmatprep.mubr.bf16.mxu0 %v10910_v52  ;;  %v9744_v59 = vld [vmem:[#allocation5 + $0xb58] ss:$72 sps:$4 sm:$0xff]   ;;  %v9803_v1 = vld [vmem:[#allocation5 + $0x184c] ss:$72 sps:$4 sm:$0xff]   ;;  %v9798_v2 = vld [vmem:[#allocation5 + $0xf48] ss:$72 sps:$4 sm:$0xff]  }
 0x19a   : > { %5990 = vmatprep.mubr.bf16.mxu1 %v10924_v35  ;;  %v5627_v18 = vpop.f32.mrf.mxu0  ;;  %v9804_v10 = vld [vmem:[#allocation5 + $0xeb8] ss:$72 sps:$4 sm:$0xff]  }
 0x19b   : > { %v5668_v53 = vpop.f32.mrf.mxu1  ;;  %5920 = vmatpush1.bf16.msra.mxu0 %v9732_v3  ;;  %v9801_v3 = vld [vmem:[#allocation5 + $0x1848] ss:$72 sps:$4 sm:$0xff]   ;;  %v9818_v18 = vld [vmem:[#allocation5 + $0xd9c] ss:$72 sps:$4 sm:$0xff]  }
 0x19c   : > { %5961 = vmatpush1.bf16.msra.mxu1 %v9735_v4  ;;  %5921 = vmatprep.subr.bf16.mxu0 %v9740_v12  ;;  %v5628_v22 = vpop.f32.mrf.mxu0  ;;  %v9806_v4 = vld [vmem:[#allocation5 + $0xebc] ss:$72 sps:$4 sm:$0xff]   ;;  %v9807_v12 = vld [vmem:[#allocation5 + $0x17b8] ss:$72 sps:$4 sm:$0xff]   ;;  %v9813_v53 = vld [vmem:[#allocation5 + $0x1728] ss:$72 sps:$4 sm:$0xff]  }
 0x19d   : > { %v5669_v19 = vpop.f32.mrf.mxu1  ;;  %5962 = vmatprep.subr.bf16.mxu1 %v9743_v13  ;;  %v9812_v13 = vld [vmem:[#allocation5 + $0xe2c] ss:$72 sps:$4 sm:$0xff]   ;;  %v9816_v22 = vld [vmem:[#allocation5 + $0xd98] ss:$72 sps:$4 sm:$0xff]  }
 0x19e   : > { %v9821_v19 = vld [vmem:[#allocation5 + $0x169c] ss:$72 sps:$4 sm:$0xff]  }
 0x19f   : > { %5922 = vmatpush1.bf16.msra.mxu0 %v9738_v15  ;;  %v9815_v15 = vld [vmem:[#allocation5 + $0x172c] ss:$72 sps:$4 sm:$0xff]  }
 0x1a0   : > { %5963 = vmatpush1.bf16.msra.mxu1 %v9741_v16  ;;  %5923 = vmatprep.subr.bf16.mxu0 %v9746_v20  ;;  %v9810_v16 = vld [vmem:[#allocation5 + $0xe28] ss:$72 sps:$4 sm:$0xff]   ;;  %v1107_v20 = vsub.s32 2, %v10938_v26 }
 0x1a1   : > { %5964 = vmatprep.subr.bf16.mxu1 %v9749_v21  ;;  %v1111_v21 = vsub.s32 3, %v10938_v26 }
 0x1a3   : > { %5924 = vmatpush1.bf16.msra.mxu0 %v9744_v59  ;;  %v9819_v59 = vld [vmem:[#allocation5 + $0x1698] ss:$72 sps:$4 sm:$0xff]  }
 0x1a4   : > { %5965 = vmatpush1.bf16.msra.mxu1 %v9747_v23  ;;  %5925 = vmatprep.subr.bf16.mxu0 %v9752_v24  ;;  %v9824_v23 = vld [vmem:[#allocation5 + $0x414] ss:$72 sps:$4 sm:$0xff]  }
 0x1a5   : > { %5966 = vmatprep.subr.bf16.mxu1 %v9755_v25  ;;  %v9827_v24 = vld [vmem:[#allocation5 + $0xd14] ss:$72 sps:$4 sm:$0xff]   ;;  %v10972_v25 = vld [vmem:[#allocation7] sm:$0xff] }
 0x1a7   : > { %5926 = vmatpush1.bf16.msra.mxu0 %v9750_v27  ;;  %v1108_v27 = vrot.slane %v10972_v25, %v1107_v20 }
 0x1a8   : > { %5967 = vmatpush1.bf16.msra.mxu1 %v9753_v28  ;;  %5927 = vmatprep.subr.bf16.mxu0 %v9758_v29  ;;  %v9822_v28 = vld [vmem:[#allocation5 + $0x410] ss:$72 sps:$4 sm:$0xff]  }
 0x1a9   : > { %5968 = vmatprep.subr.bf16.mxu1 %v9761_v30  ;;  %v9825_v29 = vld [vmem:[#allocation5 + $0xd10] ss:$72 sps:$4 sm:$0xff]   ;;  %v1112_v30 = vrot.slane %v10972_v25, %v1111_v21 }
 0x1ab   : > { %5928 = vmatpush1.bf16.msra.mxu0 %v9756_v32  ;;  %v9830_v32 = vld [vmem:[#allocation5 + $0x384] ss:$72 sps:$4 sm:$0xff]  }
 0x1ac   : > { %5969 = vmatpush1.bf16.msra.mxu1 %v9759_v33  ;;  %5929 = vmatprep.subr.bf16.mxu0 %v9764_v36  ;;  %v9833_v33 = vld [vmem:[#allocation5 + $0xc84] ss:$72 sps:$4 sm:$0xff]   ;;  %v5665_v36 = vadd.f32 %v10956_v6, %v1108_v27 }
 0x1ad   : > { %5970 = vmatprep.subr.bf16.mxu1 %v9767_v37  ;;  %v9828_v37 = vld [vmem:[#allocation5 + $0x380] ss:$72 sps:$4 sm:$0xff]   ;;  %v9878_v27 = vld [vmem:[#allocation5 + $0x804] ss:$72 sps:$4 sm:$0xff]  }
 0x1af   : > { %5930 = vmatpush1.bf16.msra.mxu0 %v9762_v38  ;;  %v9831_v38 = vld [vmem:[#allocation5 + $0xc80] ss:$72 sps:$4 sm:$0xff]  }
 0x1b0   : > { %5971 = vmatpush1.bf16.msra.mxu1 %v9765_v39  ;;  %5931 = vmatprep.subr.bf16.mxu0 %v9770_v40 }
 0x1b1   : > { %5972 = vmatprep.subr.bf16.mxu1 %v9773_v41  ;;  %v5667_v41 = vadd.f32 %v10963_v11, %v1112_v30  ;;  %v9879_v30 = vld [vmem:[#allocation5 + $0x1100] ss:$72 sps:$4 sm:$0xff]  }
 0x1b3   : > { %5932 = vmatpush1.bf16.msra.mxu0 %v9768_v42 }
 0x1b4   : > { %5973 = vmatpush1.bf16.msra.mxu1 %v9771_v43  ;;  %5933 = vmatprep.subr.bf16.mxu0 %v9776_v44 }
 0x1b5   : > { %5974 = vmatprep.subr.bf16.mxu1 %v9779_v45  ;;  %v9836_v45 = vld [vmem:[#allocation5 + $0x2f4] ss:$72 sps:$4 sm:$0xff]  }
 0x1b7   : > { %5934 = vmatpush2.bf16.msra.mxu0 %v9774_v46  ;;  %v9839_v46 = vld [vmem:[#allocation5 + $0xbf4] ss:$72 sps:$4 sm:$0xff]  }
 0x1b8   : > { %5975 = vmatpush2.bf16.msra.mxu1 %v9777_v47  ;;  %5935 = vmatprep.subr.bf16.mxu0 %v9782_v48  ;;  %v9834_v48 = vld [vmem:[#allocation5 + $0x2f0] ss:$72 sps:$4 sm:$0xff]  }
 0x1b9   : > { %5976 = vmatprep.subr.bf16.mxu1 %v9785_v50  ;;  %v9837_v50 = vld [vmem:[#allocation5 + $0xbf0] ss:$72 sps:$4 sm:$0xff]  }
 0x1bb   : > { %5936 = vmatpush2.bf16.msra.mxu0 %v9780_v51 }
 0x1bc   : > { %5977 = vmatpush2.bf16.msra.mxu1 %v9783_v54  ;;  %5937 = vmatprep.subr.bf16.mxu0 %v9788_v55 }
 0x1bd   : > { %5978 = vmatprep.subr.bf16.mxu1 %v9791_v56  ;;  %v9842_v56 = vld [vmem:[#allocation5 + $0x264] ss:$72 sps:$4 sm:$0xff]  }
 0x1bf   : > { %5938 = vmatpush2.bf16.msra.mxu0 %v9786_v57  ;;  %v9845_v57 = vld [vmem:[#allocation5 + $0xb64] ss:$72 sps:$4 sm:$0xff]  }
 0x1c0   : > { %5979 = vmatpush2.bf16.msra.mxu1 %v9789_v58  ;;  %5939 = vmatprep.subr.bf16.mxu0 %v9794_v60  ;;  %v9840_v60 = vld [vmem:[#allocation5 + $0x260] ss:$72 sps:$4 sm:$0xff]  }
 0x1c1   : > { %5980 = vmatprep.subr.bf16.mxu1 %v9797_v61  ;;  %v9843_v61 = vld [vmem:[#allocation5 + $0xb60] ss:$72 sps:$4 sm:$0xff]  }
 0x1c3   : > { %5940 = vmatpush2.bf16.msra.mxu0 %v9792_v62  ;;  %v9848_v62 = vld [vmem:[#allocation5 + $0x1d4] ss:$72 sps:$4 sm:$0xff]  }
 0x1c4   : > { %5981 = vmatpush2.bf16.msra.mxu1 %v9795_v63  ;;  %5941 = vmatprep.subr.bf16.mxu0 %v9800_v0  ;;  %v9851_v63 = vld [vmem:[#allocation5 + $0xad4] ss:$72 sps:$4 sm:$0xff]   ;;  %v9846_v0 = vld [vmem:[#allocation5 + $0x1d0] ss:$72 sps:$4 sm:$0xff]  }
 0x1c5   : > { %5982 = vmatprep.subr.bf16.mxu1 %v9803_v1  ;;  %v9849_v1 = vld [vmem:[#allocation5 + $0xad0] ss:$72 sps:$4 sm:$0xff]  }
 0x1c7   : > { %5942 = vmatpush2.bf16.msra.mxu0 %v9798_v2  ;;  %v9854_v2 = vld [vmem:[#allocation5 + $0x144] ss:$72 sps:$4 sm:$0xff]  }
 0x1c8   : > { %5983 = vmatpush2.bf16.msra.mxu1 %v9801_v3  ;;  %5943 = vmatprep.subr.bf16.mxu0 %v9806_v4  ;;  %v9857_v3 = vld [vmem:[#allocation5 + $0xa44] ss:$72 sps:$4 sm:$0xff]   ;;  %v9852_v4 = vld [vmem:[#allocation5 + $0x140] ss:$72 sps:$4 sm:$0xff]  }
 0x1c9   : > { %5984 = vmatprep.subr.bf16.mxu1 %v9809_v5  ;;  %v9855_v5 = vld [vmem:[#allocation5 + $0xa40] ss:$72 sps:$4 sm:$0xff]  }
 0x1cb   : > { %5944 = vmatpush2.bf16.msra.mxu0 %v9804_v10  ;;  %v9860_v10 = vld [vmem:[#allocation5 + $0xb4] ss:$72 sps:$4 sm:$0xff]  }
 0x1cc   : > { %5985 = vmatpush2.bf16.msra.mxu1 %v9807_v12  ;;  %5945 = vmatprep.subr.bf16.mxu0 %v9812_v13  ;;  %v9863_v12 = vld [vmem:[#allocation5 + $0x9b4] ss:$72 sps:$4 sm:$0xff]   ;;  %v9858_v13 = vld [vmem:[#allocation5 + $0xb0] ss:$72 sps:$4 sm:$0xff]  }
 0x1cd   : > { %5986 = vmatprep.subr.bf16.mxu1 %v9815_v15  ;;  %v9861_v15 = vld [vmem:[#allocation5 + $0x9b0] ss:$72 sps:$4 sm:$0xff]  }
 0x1cf   : > { %5946 = vmatpush2.bf16.msra.mxu0 %v9810_v16  ;;  %v9866_v16 = vld [vmem:[#allocation5 + $0x24] ss:$72 sps:$4 sm:$0xff]  }
 0x1d0   : > { %5987 = vmatpush2.bf16.msra.mxu1 %v9813_v53  ;;  %5947 = vmatprep.subr.bf16.mxu0 %v9818_v18  ;;  %v9869_v53 = vld [vmem:[#allocation5 + $0x924] ss:$72 sps:$4 sm:$0xff]   ;;  %v9864_v18 = vld [vmem:[#allocation5 + $0x20] ss:$72 sps:$4 sm:$0xff]  }
 0x1d1   : > { %5988 = vmatprep.subr.bf16.mxu1 %v9821_v19  ;;  %v9867_v19 = vld [vmem:[#allocation5 + $0x920] ss:$72 sps:$4 sm:$0xff]  }
 0x1d3   : > { %5948 = vmatpush2.bf16.msra.mxu0 %v9816_v22  ;;  %v9872_v22 = vld [vmem:[#allocation5 + $0x894] ss:$72 sps:$4 sm:$0xff]  }
 0x1d4   : > { %5989 = vmatpush2.bf16.msra.mxu1 %v9819_v59  ;;  %5999 = vmatprep.subr.bf16.mxu0 %v9824_v23  ;;  %v9875_v59 = vld [vmem:[#allocation5 + $0x1194] ss:$72 sps:$4 sm:$0xff]   ;;  %v9870_v23 = vld [vmem:[#allocation5 + $0x890] ss:$72 sps:$4 sm:$0xff]  }
 0x1d5   : > { %6040 = vmatprep.subr.bf16.mxu1 %v9827_v24  ;;  %v9873_v24 = vld [vmem:[#allocation5 + $0x1190] ss:$72 sps:$4 sm:$0xff]  }
 0x1d6   : > { %v5705_v39 = vpop.f32.mrf.mxu0  ;;  %5950 = vmatmul.mubr.bf16.vlgmr.msra.gmra.mxu0 %v10918_v9 }
 0x1d7   : > { %v5746_v40 = vpop.f32.mrf.mxu1  ;;  %5991 = vmatmul.mubr.bf16.vlgmr.msra.gmra.mxu1 %v10928_v17  ;;  %v5706_v42 = vadd.f32 %v5705_v39, %v5665_v36  ;;  %6000 = vmatpush1.bf16.msra.mxu0 %v9822_v28  ;;  %v9881_v28 = vld [vmem:[#allocation5 + $0x1104] ss:$72 sps:$4 sm:$0xff]   ;;  %v9882_v36 = vld [vmem:[#allocation5 + $0x770] ss:$72 sps:$4 sm:$0xff]  }
 0x1d8   : > { %6041 = vmatpush1.bf16.msra.mxu1 %v9825_v29  ;;  %v5707_v43 = vpop.f32.mrf.mxu0  ;;  %6001 = vmatprep.subr.bf16.mxu0 %v9830_v32  ;;  %v9876_v29 = vld [vmem:[#allocation5 + $0x800] ss:$72 sps:$4 sm:$0xff]   ;;  %v9884_v32 = vld [vmem:[#allocation5 + $0x774] ss:$72 sps:$4 sm:$0xff]   ;;  %v9893_v39 = vld [vmem:[#allocation5 + $0xfe4] ss:$72 sps:$4 sm:$0xff]  }
 0x1d9   : > { %v5748_v44 = vpop.f32.mrf.mxu1  ;;  %6042 = vmatprep.subr.bf16.mxu1 %v9833_v33  ;;  %v10984_v6 = vadd.f32 %v5746_v40, %v5706_v42  ;;  %v5708_v47 = vadd.f32 %v5707_v43, %v5667_v41  ;;  %6031 = vmatprep.mubr.bf16.mxu0 %v10907_v49  ;;  %v9887_v33 = vld [vmem:[#allocation5 + $0x1074] ss:$72 sps:$4 sm:$0xff]   ;;  %v9888_v40 = vld [vmem:[#allocation5 + $0x6e0] ss:$72 sps:$4 sm:$0xff]  }
 0x1da   : > { %6072 = vmatprep.mubr.bf16.mxu1 %v10910_v52  ;;  %v5709_v11 = vpop.f32.mrf.mxu0  ;;  %v9891_v41 = vld [vmem:[#allocation5 + $0xfe0] ss:$72 sps:$4 sm:$0xff]   ;;  %v9896_v42 = vld [vmem:[#allocation5 + $0x654] ss:$72 sps:$4 sm:$0xff]  }
 0x1db   : > { %v5750_v51 = vpop.f32.mrf.mxu1  ;;  %v10988_v54 = vadd.f32 %v5748_v44, %v5708_v47  ;;  %6002 = vmatpush1.bf16.msra.mxu0 %v9828_v37  ;;  %v9885_v37 = vld [vmem:[#allocation5 + $0x1070] ss:$72 sps:$4 sm:$0xff]   ;;  %v9899_v43 = vld [vmem:[#allocation5 + $0xf54] ss:$72 sps:$4 sm:$0xff]   ;;  %v9905_v47 = vld [vmem:[#allocation5 + $0xec4] ss:$72 sps:$4 sm:$0xff]  }
 0x1dc   : > { %6043 = vmatpush1.bf16.msra.mxu1 %v9831_v38  ;;  %6003 = vmatprep.subr.bf16.mxu0 %v9836_v45  ;;  %v5710_v58 = vpop.f32.mrf.mxu0  ;;  %v9890_v38 = vld [vmem:[#allocation5 + $0x6e4] ss:$72 sps:$4 sm:$0xff]   ;;  %v9894_v44 = vld [vmem:[#allocation5 + $0x650] ss:$72 sps:$4 sm:$0xff]   ;;  %v9908_v51 = vld [vmem:[#allocation5 + $0x534] ss:$72 sps:$4 sm:$0xff]  }
 0x1dd   : > { %v5751_v55 = vpop.f32.mrf.mxu1  ;;  %6044 = vmatprep.subr.bf16.mxu1 %v9839_v46  ;;  %v9897_v45 = vld [vmem:[#allocation5 + $0xf50] ss:$72 sps:$4 sm:$0xff]   ;;  %v9902_v46 = vld [vmem:[#allocation5 + $0x5c4] ss:$72 sps:$4 sm:$0xff]   ;;  %v9911_v11 = vld [vmem:[#allocation5 + $0xe34] ss:$72 sps:$4 sm:$0xff]  }
 0x1de   : > { %v9906_v55 = vld [vmem:[#allocation5 + $0x530] ss:$72 sps:$4 sm:$0xff]   ;;  %v9917_v58 = vld [vmem:[#allocation5 + $0xda4] ss:$72 sps:$4 sm:$0xff]  }
 0x1df   : > { %6004 = vmatpush1.bf16.msra.mxu0 %v9834_v48  ;;  %v9900_v48 = vld [vmem:[#allocation5 + $0x5c0] ss:$72 sps:$4 sm:$0xff]  }
 0x1e0   : > { %6045 = vmatpush1.bf16.msra.mxu1 %v9837_v50  ;;  %6005 = vmatprep.subr.bf16.mxu0 %v9842_v56  ;;  %v9903_v50 = vld [vmem:[#allocation5 + $0xec0] ss:$72 sps:$4 sm:$0xff]   ;;  %v9909_v56 = vld [vmem:[#allocation5 + $0xe30] ss:$72 sps:$4 sm:$0xff]  }
 0x1e1   : > { %6046 = vmatprep.subr.bf16.mxu1 %v9845_v57  ;;  %v9914_v57 = vld [vmem:[#allocation5 + $0x4a4] ss:$72 sps:$4 sm:$0xff]  }
 0x1e3   : > { %6006 = vmatpush1.bf16.msra.mxu0 %v9840_v60  ;;  %v9912_v60 = vld [vmem:[#allocation5 + $0x4a0] ss:$72 sps:$4 sm:$0xff]  }
 0x1e4   : > { %6047 = vmatpush1.bf16.msra.mxu1 %v9843_v61  ;;  %6007 = vmatprep.subr.bf16.mxu0 %v9848_v62  ;;  %v9915_v61 = vld [vmem:[#allocation5 + $0xda0] ss:$72 sps:$4 sm:$0xff]   ;;  %v1115_v62 = vsub.s32 4, %v10938_v26 }
 0x1e5   : > { %6048 = vmatprep.subr.bf16.mxu1 %v9851_v63  ;;  %v9920_v63 = vld [vmem:[#allocation5 + $0x1614] ss:$72 sps:$4 sm:$0xff]  }
 0x1e7   : > { %6008 = vmatpush1.bf16.msra.mxu0 %v9846_v0  ;;  %v9923_v0 = vld [vmem:[#allocation5 + $0x41c] ss:$72 sps:$4 sm:$0xff]  }
 0x1e8   : > { %6049 = vmatpush1.bf16.msra.mxu1 %v9849_v1  ;;  %6009 = vmatprep.subr.bf16.mxu0 %v9854_v2  ;;  %v9918_v1 = vld [vmem:[#allocation5 + $0x1610] ss:$72 sps:$4 sm:$0xff]  }
 0x1e9   : > { %6050 = vmatprep.subr.bf16.mxu1 %v9857_v3  ;;  %v9921_v2 = vld [vmem:[#allocation5 + $0x418] ss:$72 sps:$4 sm:$0xff]   ;;  %v1119_v3 = vsub.s32 5, %v10938_v26 }
 0x1eb   : > { %6010 = vmatpush1.bf16.msra.mxu0 %v9852_v4  ;;  %v1116_v4 = vrot.slane %v10972_v25, %v1115_v62 }
 0x1ec   : > { %6051 = vmatpush1.bf16.msra.mxu1 %v9855_v5  ;;  %6011 = vmatprep.subr.bf16.mxu0 %v9860_v10  ;;  %v9926_v5 = vld [vmem:[#allocation5 + $0x1584] ss:$72 sps:$4 sm:$0xff]  }
 0x1ed   : > { %6052 = vmatprep.subr.bf16.mxu1 %v9863_v12  ;;  %v9929_v10 = vld [vmem:[#allocation5 + $0x38c] ss:$72 sps:$4 sm:$0xff]   ;;  %v1120_v12 = vrot.slane %v10972_v25, %v1119_v3 }
 0x1ef   : > { %6012 = vmatpush1.bf16.msra.mxu0 %v9858_v13  ;;  %v9924_v13 = vld [vmem:[#allocation5 + $0x1580] ss:$72 sps:$4 sm:$0xff]  }
 0x1f0   : > { %6053 = vmatpush1.bf16.msra.mxu1 %v9861_v15  ;;  %6013 = vmatprep.subr.bf16.mxu0 %v9866_v16  ;;  %v9927_v15 = vld [vmem:[#allocation5 + $0x388] ss:$72 sps:$4 sm:$0xff]  }
 0x1f1   : > { %6054 = vmatprep.subr.bf16.mxu1 %v9869_v53 }
 0x1f3   : > { %6014 = vmatpush1.bf16.msra.mxu0 %v9864_v18 }
 0x1f4   : > { %6055 = vmatpush1.bf16.msra.mxu1 %v9867_v19  ;;  %6015 = vmatprep.subr.bf16.mxu0 %v9872_v22 }
 0x1f5   : > { %6056 = vmatprep.subr.bf16.mxu1 %v9875_v59  ;;  %v9932_v59 = vld [vmem:[#allocation5 + $0x14f4] ss:$72 sps:$4 sm:$0xff]  }
 0x1f7   : > { %6016 = vmatpush2.bf16.msra.mxu0 %v9870_v23  ;;  %v9935_v23 = vld [vmem:[#allocation5 + $0x2fc] ss:$72 sps:$4 sm:$0xff]  }
 0x1f8   : > { %6057 = vmatpush2.bf16.msra.mxu1 %v9873_v24  ;;  %6017 = vmatprep.subr.bf16.mxu0 %v9878_v27  ;;  %v9930_v27 = vld [vmem:[#allocation5 + $0x14f0] ss:$72 sps:$4 sm:$0xff]  }
 0x1f9   : > { %6058 = vmatprep.subr.bf16.mxu1 %v9881_v28  ;;  %v9933_v28 = vld [vmem:[#allocation5 + $0x2f8] ss:$72 sps:$4 sm:$0xff]  }
 0x1fb   : > { %6018 = vmatpush2.bf16.msra.mxu0 %v9876_v29 }
 0x1fc   : > { %6059 = vmatpush2.bf16.msra.mxu1 %v9879_v30  ;;  %6019 = vmatprep.subr.bf16.mxu0 %v9884_v32 }
 0x1fd   : > { %6060 = vmatprep.subr.bf16.mxu1 %v9887_v33 }
 0x1ff   : > { %6020 = vmatpush2.bf16.msra.mxu0 %v9882_v36  ;;  %v9938_v36 = vld [vmem:[#allocation5 + $0x1464] ss:$72 sps:$4 sm:$0xff]  }
 0x200   : > { %6061 = vmatpush2.bf16.msra.mxu1 %v9885_v37  ;;  %6021 = vmatprep.subr.bf16.mxu0 %v9890_v38  ;;  %v9941_v37 = vld [vmem:[#allocation5 + $0x26c] ss:$72 sps:$4 sm:$0xff]  }
 0x201   : > { %6062 = vmatprep.subr.bf16.mxu1 %v9893_v39  ;;  %v9936_v39 = vld [vmem:[#allocation5 + $0x1460] ss:$72 sps:$4 sm:$0xff]  }
 0x203   : > { %6022 = vmatpush2.bf16.msra.mxu0 %v9888_v40  ;;  %v9939_v40 = vld [vmem:[#allocation5 + $0x268] ss:$72 sps:$4 sm:$0xff]  }
 0x204   : > { %6063 = vmatpush2.bf16.msra.mxu1 %v9891_v41  ;;  %6023 = vmatprep.subr.bf16.mxu0 %v9896_v42  ;;  %v9944_v41 = vld [vmem:[#allocation5 + $0x13d4] ss:$72 sps:$4 sm:$0xff]  }
 0x205   : > { %6064 = vmatprep.subr.bf16.mxu1 %v9899_v43  ;;  %v9947_v42 = vld [vmem:[#allocation5 + $0x1dc] ss:$72 sps:$4 sm:$0xff]   ;;  %v9942_v43 = vld [vmem:[#allocation5 + $0x13d0] ss:$72 sps:$4 sm:$0xff]  }
 0x207   : > { %6024 = vmatpush2.bf16.msra.mxu0 %v9894_v44  ;;  %v9945_v44 = vld [vmem:[#allocation5 + $0x1d8] ss:$72 sps:$4 sm:$0xff]  }
 0x208   : > { %6065 = vmatpush2.bf16.msra.mxu1 %v9897_v45  ;;  %6025 = vmatprep.subr.bf16.mxu0 %v9902_v46  ;;  %v9950_v45 = vld [vmem:[#allocation5 + $0x1344] ss:$72 sps:$4 sm:$0xff]  }
 0x209   : > { %6066 = vmatprep.subr.bf16.mxu1 %v9905_v47  ;;  %v9953_v46 = vld [vmem:[#allocation5 + $0x14c] ss:$72 sps:$4 sm:$0xff]   ;;  %v9948_v47 = vld [vmem:[#allocation5 + $0x1340] ss:$72 sps:$4 sm:$0xff]  }
 0x20b   : > { %6026 = vmatpush2.bf16.msra.mxu0 %v9900_v48  ;;  %v9951_v48 = vld [vmem:[#allocation5 + $0x148] ss:$72 sps:$4 sm:$0xff]  }
 0x20c   : > { %6067 = vmatpush2.bf16.msra.mxu1 %v9903_v50  ;;  %6027 = vmatprep.subr.bf16.mxu0 %v9908_v51  ;;  %v9956_v50 = vld [vmem:[#allocation5 + $0x12b4] ss:$72 sps:$4 sm:$0xff]  }
 0x20d   : > { %6068 = vmatprep.subr.bf16.mxu1 %v9911_v11  ;;  %v9959_v51 = vld [vmem:[#allocation5 + $0xbc] ss:$72 sps:$4 sm:$0xff]   ;;  %v9954_v11 = vld [vmem:[#allocation5 + $0x12b0] ss:$72 sps:$4 sm:$0xff]  }
 0x20f   : > { %6028 = vmatpush2.bf16.msra.mxu0 %v9906_v55  ;;  %v9957_v55 = vld [vmem:[#allocation5 + $0xb8] ss:$72 sps:$4 sm:$0xff]  }
 0x210   : > { %6069 = vmatpush2.bf16.msra.mxu1 %v9909_v56  ;;  %6029 = vmatprep.subr.bf16.mxu0 %v9914_v57  ;;  %v9962_v56 = vld [vmem:[#allocation5 + $0x1224] ss:$72 sps:$4 sm:$0xff]  }
 0x211   : > { %6070 = vmatprep.subr.bf16.mxu1 %v9917_v58  ;;  %v9965_v57 = vld [vmem:[#allocation5 + $0x2c] ss:$72 sps:$4 sm:$0xff]   ;;  %v9960_v58 = vld [vmem:[#allocation5 + $0x1220] ss:$72 sps:$4 sm:$0xff]  }
 0x213   : > { %6030 = vmatpush2.bf16.msra.mxu0 %v9912_v60  ;;  %v9963_v60 = vld [vmem:[#allocation5 + $0x28] ss:$72 sps:$4 sm:$0xff]  }
 0x214   : > { %6071 = vmatpush2.bf16.msra.mxu1 %v9915_v61  ;;  %6081 = vmatprep.subr.bf16.mxu0 %v9920_v63  ;;  %v9968_v61 = vld [vmem:[#allocation5 + $0x1a94] ss:$72 sps:$4 sm:$0xff]  }
 0x215   : > { %6122 = vmatprep.subr.bf16.mxu1 %v9923_v0  ;;  %v9971_v63 = vld [vmem:[#allocation5 + $0x89c] ss:$72 sps:$4 sm:$0xff]   ;;  %v9966_v0 = vld [vmem:[#allocation5 + $0x1a90] ss:$72 sps:$4 sm:$0xff]  }
 0x216   : > { %v5787_v16 = vpop.f32.mrf.mxu0  ;;  %6032 = vmatmul.mubr.bf16.vlgmr.msra.gmra.mxu0 %v10916_v8 }
 0x217   : > { %v5828_v53 = vpop.f32.mrf.mxu1  ;;  %6073 = vmatmul.mubr.bf16.vlgmr.msra.gmra.mxu1 %v10918_v9  ;;  %v5788_v18 = vadd.f32 %v5787_v16, %v1116_v4  ;;  %6082 = vmatpush1.bf16.msra.mxu0 %v9918_v1  ;;  %v9969_v1 = vld [vmem:[#allocation5 + $0x898] ss:$72 sps:$4 sm:$0xff]   ;;  %v9977_v4 = vld [vmem:[#allocation5 + $0x80c] ss:$72 sps:$4 sm:$0xff]  }
 0x218   : > { %6123 = vmatpush1.bf16.msra.mxu1 %v9921_v2  ;;  %v5789_v19 = vpop.f32.mrf.mxu0  ;;  %6083 = vmatprep.subr.bf16.mxu0 %v9926_v5  ;;  %v9974_v2 = vld [vmem:[#allocation5 + $0x1a04] ss:$72 sps:$4 sm:$0xff]   ;;  %v9972_v5 = vld [vmem:[#allocation5 + $0x1a00] ss:$72 sps:$4 sm:$0xff]  }
 0x219   : > { %v5830_v22 = vpop.f32.mrf.mxu1  ;;  %6124 = vmatprep.subr.bf16.mxu1 %v9929_v10  ;;  %v11000_v24 = vadd.f32 %v5828_v53, %v5788_v18  ;;  %v5790_v25 = vadd.f32 %v5789_v19, %v1120_v12  ;;  %6113 = vmatprep.mubr.bf16.mxu0 %v10924_v35  ;;  %v9975_v10 = vld [vmem:[#allocation5 + $0x808] ss:$72 sps:$4 sm:$0xff]   ;;  %v9980_v12 = vld [vmem:[#allocation5 + $0x1974] ss:$72 sps:$4 sm:$0xff]   ;;  %v9981_v16 = vld [vmem:[#allocation5 + $0x778] ss:$72 sps:$4 sm:$0xff]  }
 0x21a   : > { %6154 = vmatprep.mubr.bf16.mxu1 %v10907_v49  ;;  %v5791_v30 = vpop.f32.mrf.mxu0  ;;  %v9986_v53 = vld [vmem:[#allocation5 + $0x18e4] ss:$72 sps:$4 sm:$0xff]   ;;  %v9984_v19 = vld [vmem:[#allocation5 + $0x18e0] ss:$72 sps:$4 sm:$0xff]  }
 0x21b   : > { %v5832_v29 = vpop.f32.mrf.mxu1  ;;  %v11004_v32 = vadd.f32 %v5830_v22, %v5790_v25  ;;  %6084 = vmatpush1.bf16.msra.mxu0 %v9924_v13  ;;  %v9983_v13 = vld [vmem:[#allocation5 + $0x77c] ss:$72 sps:$4 sm:$0xff]   ;;  %v9989_v18 = vld [vmem:[#allocation5 + $0x6ec] ss:$72 sps:$4 sm:$0xff]   ;;  %v9987_v22 = vld [vmem:[#allocation5 + $0x6e8] ss:$72 sps:$4 sm:$0xff]  }
 0x21c   : > { %6125 = vmatpush1.bf16.msra.mxu1 %v9927_v15  ;;  %6085 = vmatprep.subr.bf16.mxu0 %v9932_v59  ;;  %v5792_v38 = vpop.f32.mrf.mxu0  ;;  %v9978_v15 = vld [vmem:[#allocation5 + $0x1970] ss:$72 sps:$4 sm:$0xff]   ;;  %v9992_v59 = vld [vmem:[#allocation5 + $0x1854] ss:$72 sps:$4 sm:$0xff]   ;;  %v9996_v30 = vld [vmem:[#allocation5 + $0x17c0] ss:$72 sps:$4 sm:$0xff]  }
 0x21d   : > { %v5833_v33 = vpop.f32.mrf.mxu1  ;;  %6126 = vmatprep.subr.bf16.mxu1 %v9935_v23  ;;  %v9995_v23 = vld [vmem:[#allocation5 + $0x65c] ss:$72 sps:$4 sm:$0xff]   ;;  %v9990_v25 = vld [vmem:[#allocation5 + $0x1850] ss:$72 sps:$4 sm:$0xff]   ;;  %v10001_v29 = vld [vmem:[#allocation5 + $0x5cc] ss:$72 sps:$4 sm:$0xff]  }
 0x21e   : > { %v9999_v33 = vld [vmem:[#allocation5 + $0x5c8] ss:$72 sps:$4 sm:$0xff]  }
 0x21f   : > { %6086 = vmatpush1.bf16.msra.mxu0 %v9930_v27  ;;  %v9993_v27 = vld [vmem:[#allocation5 + $0x658] ss:$72 sps:$4 sm:$0xff]  }
 0x220   : > { %6127 = vmatpush1.bf16.msra.mxu1 %v9933_v28  ;;  %6087 = vmatprep.subr.bf16.mxu0 %v9938_v36  ;;  %v9998_v28 = vld [vmem:[#allocation5 + $0x17c4] ss:$72 sps:$4 sm:$0xff]   ;;  %v10004_v36 = vld [vmem:[#allocation5 + $0x1734] ss:$72 sps:$4 sm:$0xff]   ;;  %v10002_v38 = vld [vmem:[#allocation5 + $0x1730] ss:$72 sps:$4 sm:$0xff]  }
 0x221   : > { %6128 = vmatprep.subr.bf16.mxu1 %v9941_v37  ;;  %v10007_v37 = vld [vmem:[#allocation5 + $0x53c] ss:$72 sps:$4 sm:$0xff]  }
 0x223   : > { %6088 = vmatpush1.bf16.msra.mxu0 %v9936_v39  ;;  %v10005_v39 = vld [vmem:[#allocation5 + $0x538] ss:$72 sps:$4 sm:$0xff]  }
 0x224   : > { %6129 = vmatpush1.bf16.msra.mxu1 %v9939_v40  ;;  %6089 = vmatprep.subr.bf16.mxu0 %v9944_v41  ;;  %v10010_v40 = vld [vmem:[#allocation5 + $0x16a4] ss:$72 sps:$4 sm:$0xff]  }
 0x225   : > { %6130 = vmatprep.subr.bf16.mxu1 %v9947_v42  ;;  %v10013_v41 = vld [vmem:[#allocation5 + $0x4ac] ss:$72 sps:$4 sm:$0xff]   ;;  %v10008_v42 = vld [vmem:[#allocation5 + $0x16a0] ss:$72 sps:$4 sm:$0xff]  }
 0x227   : > { %6090 = vmatpush1.bf16.msra.mxu0 %v9942_v43  ;;  %v10011_v43 = vld [vmem:[#allocation5 + $0x4a8] ss:$72 sps:$4 sm:$0xff]  }
 0x228   : > { %6131 = vmatpush1.bf16.msra.mxu1 %v9945_v44  ;;  %6091 = vmatprep.subr.bf16.mxu0 %v9950_v45  ;;  %v10016_v44 = vld [vmem:[#allocation5 + $0xd1c] ss:$72 sps:$4 sm:$0xff]  }
 0x229   : > { %6132 = vmatprep.subr.bf16.mxu1 %v9953_v46  ;;  %v10019_v45 = vld [vmem:[#allocation5 + $0x161c] ss:$72 sps:$4 sm:$0xff]   ;;  %v10014_v46 = vld [vmem:[#allocation5 + $0xd18] ss:$72 sps:$4 sm:$0xff]  }
 0x22b   : > { %6092 = vmatpush1.bf16.msra.mxu0 %v9948_v47  ;;  %v10017_v47 = vld [vmem:[#allocation5 + $0x1618] ss:$72 sps:$4 sm:$0xff]  }
 0x22c   : > { %6133 = vmatpush1.bf16.msra.mxu1 %v9951_v48  ;;  %6093 = vmatprep.subr.bf16.mxu0 %v9956_v50  ;;  %v10022_v48 = vld [vmem:[#allocation5 + $0xc8c] ss:$72 sps:$4 sm:$0xff]  }
 0x22d   : > { %6134 = vmatprep.subr.bf16.mxu1 %v9959_v51  ;;  %v10025_v50 = vld [vmem:[#allocation5 + $0x158c] ss:$72 sps:$4 sm:$0xff]  }
 0x22f   : > { %6094 = vmatpush1.bf16.msra.mxu0 %v9954_v11 }
 0x230   : > { %6135 = vmatpush1.bf16.msra.mxu1 %v9957_v55  ;;  %6095 = vmatprep.subr.bf16.mxu0 %v9962_v56  ;;  %v10020_v56 = vld [vmem:[#allocation5 + $0xc88] ss:$72 sps:$4 sm:$0xff]  }
 0x231   : > { %6136 = vmatprep.subr.bf16.mxu1 %v9965_v57  ;;  %v10023_v57 = vld [vmem:[#allocation5 + $0x1588] ss:$72 sps:$4 sm:$0xff]  }
 0x233   : > { %6096 = vmatpush1.bf16.msra.mxu0 %v9960_v58 }
 0x234   : > { %6137 = vmatpush1.bf16.msra.mxu1 %v9963_v60  ;;  %6097 = vmatprep.subr.bf16.mxu0 %v9968_v61  ;;  %v10028_v61 = vld [vmem:[#allocation5 + $0xbfc] ss:$72 sps:$4 sm:$0xff]  }
 0x235   : > { %6138 = vmatprep.subr.bf16.mxu1 %v9971_v63  ;;  %v10031_v63 = vld [vmem:[#allocation5 + $0x14fc] ss:$72 sps:$4 sm:$0xff]  }
 0x237   : > { %6098 = vmatpush2.bf16.msra.mxu0 %v9966_v0 }
 0x238   : > { %6139 = vmatpush2.bf16.msra.mxu1 %v9969_v1  ;;  %6099 = vmatprep.subr.bf16.mxu0 %v9974_v2  ;;  %v10026_v2 = vld [vmem:[#allocation5 + $0xbf8] ss:$72 sps:$4 sm:$0xff]  }
 0x239   : > { %6140 = vmatprep.subr.bf16.mxu1 %v9977_v4  ;;  %v10029_v4 = vld [vmem:[#allocation5 + $0x14f8] ss:$72 sps:$4 sm:$0xff]  }
 0x23b   : > { %6100 = vmatpush2.bf16.msra.mxu0 %v9972_v5 }
 0x23c   : > { %6141 = vmatpush2.bf16.msra.mxu1 %v9975_v10  ;;  %6101 = vmatprep.subr.bf16.mxu0 %v9980_v12  ;;  %v10034_v10 = vld [vmem:[#allocation5 + $0xb6c] ss:$72 sps:$4 sm:$0xff]  }
 0x23d   : > { %6142 = vmatprep.subr.bf16.mxu1 %v9983_v13  ;;  %v10037_v12 = vld [vmem:[#allocation5 + $0x146c] ss:$72 sps:$4 sm:$0xff]  }
 0x23f   : > { %6102 = vmatpush2.bf16.msra.mxu0 %v9978_v15  ;;  %v10035_v15 = vld [vmem:[#allocation5 + $0x1468] ss:$72 sps:$4 sm:$0xff]  }
 0x240   : > { %6143 = vmatpush2.bf16.msra.mxu1 %v9981_v16  ;;  %6103 = vmatprep.subr.bf16.mxu0 %v9986_v53  ;;  %v10040_v16 = vld [vmem:[#allocation5 + $0xadc] ss:$72 sps:$4 sm:$0xff]  }
 0x241   : > { %6144 = vmatprep.subr.bf16.mxu1 %v9989_v18  ;;  %v10043_v53 = vld [vmem:[#allocation5 + $0x13dc] ss:$72 sps:$4 sm:$0xff]   ;;  %v10038_v18 = vld [vmem:[#allocation5 + $0xad8] ss:$72 sps:$4 sm:$0xff]  }
 0x243   : > { %6104 = vmatpush2.bf16.msra.mxu0 %v9984_v19  ;;  %v10041_v19 = vld [vmem:[#allocation5 + $0x13d8] ss:$72 sps:$4 sm:$0xff]  }
 0x244   : > { %6145 = vmatpush2.bf16.msra.mxu1 %v9987_v22  ;;  %6105 = vmatprep.subr.bf16.mxu0 %v9992_v59  ;;  %v10046_v22 = vld [vmem:[#allocation5 + $0xa4c] ss:$72 sps:$4 sm:$0xff]  }
 0x245   : > { %6146 = vmatprep.subr.bf16.mxu1 %v9995_v23  ;;  %v10049_v59 = vld [vmem:[#allocation5 + $0x134c] ss:$72 sps:$4 sm:$0xff]   ;;  %v10044_v23 = vld [vmem:[#allocation5 + $0xa48] ss:$72 sps:$4 sm:$0xff]  }
 0x247   : > { %6106 = vmatpush2.bf16.msra.mxu0 %v9990_v25  ;;  %v10047_v25 = vld [vmem:[#allocation5 + $0x1348] ss:$72 sps:$4 sm:$0xff]  }
 0x248   : > { %6147 = vmatpush2.bf16.msra.mxu1 %v9993_v27  ;;  %6107 = vmatprep.subr.bf16.mxu0 %v9998_v28  ;;  %v10052_v27 = vld [vmem:[#allocation5 + $0x9bc] ss:$72 sps:$4 sm:$0xff]  }
 0x249   : > { %6148 = vmatprep.subr.bf16.mxu1 %v10001_v29  ;;  %v10055_v28 = vld [vmem:[#allocation5 + $0x12bc] ss:$72 sps:$4 sm:$0xff]   ;;  %v10050_v29 = vld [vmem:[#allocation5 + $0x9b8] ss:$72 sps:$4 sm:$0xff]  }
 0x24b   : > { %6108 = vmatpush2.bf16.msra.mxu0 %v9996_v30  ;;  %v10053_v30 = vld [vmem:[#allocation5 + $0x12b8] ss:$72 sps:$4 sm:$0xff]  }
 0x24c   : > { %6149 = vmatpush2.bf16.msra.mxu1 %v9999_v33  ;;  %6109 = vmatprep.subr.bf16.mxu0 %v10004_v36  ;;  %v10058_v33 = vld [vmem:[#allocation5 + $0x92c] ss:$72 sps:$4 sm:$0xff]  }
 0x24d   : > { %6150 = vmatprep.subr.bf16.mxu1 %v10007_v37  ;;  %v10061_v36 = vld [vmem:[#allocation5 + $0x122c] ss:$72 sps:$4 sm:$0xff]   ;;  %v10056_v37 = vld [vmem:[#allocation5 + $0x928] ss:$72 sps:$4 sm:$0xff]  }
 0x24f   : > { %6110 = vmatpush2.bf16.msra.mxu0 %v10002_v38  ;;  %v10059_v38 = vld [vmem:[#allocation5 + $0x1228] ss:$72 sps:$4 sm:$0xff]  }
 0x250   : > { %6151 = vmatpush2.bf16.msra.mxu1 %v10005_v39  ;;  %6111 = vmatprep.subr.bf16.mxu0 %v10010_v40  ;;  %v10064_v39 = vld [vmem:[#allocation5 + $0x119c] ss:$72 sps:$4 sm:$0xff]  }
 0x251   : > { %6152 = vmatprep.subr.bf16.mxu1 %v10013_v41  ;;  %v10067_v40 = vld [vmem:[#allocation5 + $0x1a9c] ss:$72 sps:$4 sm:$0xff]   ;;  %v10062_v41 = vld [vmem:[#allocation5 + $0x1198] ss:$72 sps:$4 sm:$0xff]  }
 0x253   : > { %6112 = vmatpush2.bf16.msra.mxu0 %v10008_v42  ;;  %v10065_v42 = vld [vmem:[#allocation5 + $0x1a98] ss:$72 sps:$4 sm:$0xff]  }
 0x254   : > { %6153 = vmatpush2.bf16.msra.mxu1 %v10011_v43  ;;  %6163 = vmatprep.subr.bf16.mxu0 %v10016_v44  ;;  %v10070_v43 = vld [vmem:[#allocation5 + $0x110c] ss:$72 sps:$4 sm:$0xff]  }
 0x255   : > { %6204 = vmatprep.subr.bf16.mxu1 %v10019_v45  ;;  %v10073_v44 = vld [vmem:[#allocation5 + $0x1a0c] ss:$72 sps:$4 sm:$0xff]   ;;  %v10068_v45 = vld [vmem:[#allocation5 + $0x1108] ss:$72 sps:$4 sm:$0xff]  }
 0x256   : > { %v5869_v51 = vpop.f32.mrf.mxu0  ;;  %6114 = vmatmul.mubr.bf16.vlgmr.msra.gmra.mxu0 %v10928_v17 }
 0x257   : > { %v11006_v11 = vpop.f32.mrf.mxu1  ;;  %6155 = vmatmul.mubr.bf16.vlgmr.msra.gmra.mxu1 %v10916_v8  ;;  %v11011_v55 = vadd.f32 %v5869_v51, %v11000_v24  ;;  %6164 = vmatpush1.bf16.msra.mxu0 %v10014_v46  ;;  %v10071_v46 = vld [vmem:[#allocation5 + $0x1a08] ss:$72 sps:$4 sm:$0xff]   ;;  %v10077_v51 = vld [vmem:[#allocation5 + $0x1978] ss:$72 sps:$4 sm:$0xff]  }
 0x258   : > { %6205 = vmatpush1.bf16.msra.mxu1 %v10017_v47  ;;  %v5871_v58 = vpop.f32.mrf.mxu0  ;;  %6165 = vmatprep.subr.bf16.mxu0 %v10022_v48  ;;  %v10076_v47 = vld [vmem:[#allocation5 + $0x107c] ss:$72 sps:$4 sm:$0xff]  }
 0x259   : > { %v11013_v60 = vpop.f32.mrf.mxu1  ;;  %6206 = vmatprep.subr.bf16.mxu1 %v10025_v50  ;;  %v11016_v0 = vadd.f32 %v5871_v58, %v11004_v32  ;;  %6195 = vmatprep.mubr.bf16.mxu0 %v10910_v52  ;;  %v10032_v32 = vld [vmem:[#allocation5 + $0xb68] ss:$72 sps:$4 sm:$0xff]   ;;  %v10079_v48 = vld [vmem:[#allocation5 + $0x197c] ss:$72 sps:$4 sm:$0xff]   ;;  %v10074_v50 = vld [vmem:[#allocation5 + $0x1078] ss:$72 sps:$4 sm:$0xff]  }
 0x25a   : > { %6236 = vmatprep.mubr.bf16.mxu1 %v10924_v35  ;;  %v5873_v1 = vpop.f32.mrf.mxu0  ;;  %v10080_v58 = vld [vmem:[#allocation5 + $0xfe8] ss:$72 sps:$4 sm:$0xff]  }
 0x25b   : > { %v5914_v24 = vpop.f32.mrf.mxu1  ;;  %6166 = vmatpush1.bf16.msra.mxu0 %v10020_v56  ;;  %v10082_v56 = vld [vmem:[#allocation5 + $0xfec] ss:$72 sps:$4 sm:$0xff]   ;;  %v10086_v1 = vld [vmem:[#allocation5 + $0xf58] ss:$72 sps:$4 sm:$0xff]  }
 0x25c   : > { %6207 = vmatpush1.bf16.msra.mxu1 %v10023_v57  ;;  %6167 = vmatprep.subr.bf16.mxu0 %v10028_v61  ;;  %v5874_v13 = vpop.f32.mrf.mxu0  ;;  %v10085_v57 = vld [vmem:[#allocation5 + $0x18ec] ss:$72 sps:$4 sm:$0xff]   ;;  %v10083_v61 = vld [vmem:[#allocation5 + $0x18e8] ss:$72 sps:$4 sm:$0xff]   ;;  %v10091_v24 = vld [vmem:[#allocation5 + $0x185c] ss:$72 sps:$4 sm:$0xff]  }
 0x25d   : > { %v5915_v5 = vpop.f32.mrf.mxu1  ;;  %6208 = vmatprep.subr.bf16.mxu1 %v10031_v63  ;;  %v10088_v63 = vld [vmem:[#allocation5 + $0xf5c] ss:$72 sps:$4 sm:$0xff]  }
 0x25e   : > { %v10097_v5 = vld [vmem:[#allocation5 + $0x17cc] ss:$72 sps:$4 sm:$0xff]   ;;  %v10100_v13 = vld [vmem:[#allocation5 + $0xe3c] ss:$72 sps:$4 sm:$0xff]  }
 0x25f   : > { %6168 = vmatpush1.bf16.msra.mxu0 %v10026_v2  ;;  %v10089_v2 = vld [vmem:[#allocation5 + $0x1858] ss:$72 sps:$4 sm:$0xff]  }
 0x260   : > { %6209 = vmatpush1.bf16.msra.mxu1 %v10029_v4  ;;  %6169 = vmatprep.subr.bf16.mxu0 %v10034_v10  ;;  %v10094_v4 = vld [vmem:[#allocation5 + $0xecc] ss:$72 sps:$4 sm:$0xff]   ;;  %v10092_v10 = vld [vmem:[#allocation5 + $0xec8] ss:$72 sps:$4 sm:$0xff]  }
 0x261   : > { %6210 = vmatprep.subr.bf16.mxu1 %v10037_v12  ;;  %v10095_v12 = vld [vmem:[#allocation5 + $0x17c8] ss:$72 sps:$4 sm:$0xff]  }
 0x263   : > { %6170 = vmatpush1.bf16.msra.mxu0 %v10032_v32  ;;  %v10103_v32 = vld [vmem:[#allocation5 + $0x173c] ss:$72 sps:$4 sm:$0xff]  }
 0x264   : > { %6211 = vmatpush1.bf16.msra.mxu1 %v10035_v15  ;;  %6171 = vmatprep.subr.bf16.mxu0 %v10040_v16  ;;  %v10098_v15 = vld [vmem:[#allocation5 + $0xe38] ss:$72 sps:$4 sm:$0xff]  }
 0x265   : > { %6212 = vmatprep.subr.bf16.mxu1 %v10043_v53  ;;  %v10101_v16 = vld [vmem:[#allocation5 + $0x1738] ss:$72 sps:$4 sm:$0xff]   ;;  %v10106_v53 = vld [vmem:[#allocation5 + $0xdac] ss:$72 sps:$4 sm:$0xff]  }
 0x267   : > { %6172 = vmatpush1.bf16.msra.mxu0 %v10038_v18  ;;  %v10109_v18 = vld [vmem:[#allocation5 + $0x16ac] ss:$72 sps:$4 sm:$0xff]  }
 0x268   : > { %6213 = vmatpush1.bf16.msra.mxu1 %v10041_v19  ;;  %6173 = vmatprep.subr.bf16.mxu0 %v10046_v22  ;;  %v1123_v19 = vsub.s32 6, %v10938_v26  ;;  %v1127_v22 = vsub.s32 7, %v10938_v26 }
 0x269   : > { %6214 = vmatprep.subr.bf16.mxu1 %v10049_v59  ;;  %v10104_v59 = vld [vmem:[#allocation5 + $0xda8] ss:$72 sps:$4 sm:$0xff]  }
 0x26b   : > { %6174 = vmatpush1.bf16.msra.mxu0 %v10044_v23  ;;  %v10107_v23 = vld [vmem:[#allocation5 + $0x16a8] ss:$72 sps:$4 sm:$0xff]  }
 0x26c   : > { %6215 = vmatpush1.bf16.msra.mxu1 %v10047_v25  ;;  %6175 = vmatprep.subr.bf16.mxu0 %v10052_v27  ;;  %v10112_v25 = vld [vmem:[#allocation5 + $0x424] ss:$72 sps:$4 sm:$0xff]  }
 0x26d   : > { %6216 = vmatprep.subr.bf16.mxu1 %v10055_v28  ;;  %v10115_v27 = vld [vmem:[#allocation5 + $0xd24] ss:$72 sps:$4 sm:$0xff]  }
 0x26e   : > { %v10591_v28 = vld [vmem:[#allocation7] sm:$0xff] }
 0x26f   : > { %6176 = vmatpush1.bf16.msra.mxu0 %v10050_v29  ;;  %v1124_v29 = vrot.slane %v10591_v28, %v1123_v19 }
 0x270   : > { %6217 = vmatpush1.bf16.msra.mxu1 %v10053_v30  ;;  %6177 = vmatprep.subr.bf16.mxu0 %v10058_v33  ;;  %v1128_v30 = vrot.slane %v10591_v28, %v1127_v22  ;;  %v10110_v33 = vld [vmem:[#allocation5 + $0x420] ss:$72 sps:$4 sm:$0xff]  }
 0x271   : > { %6218 = vmatprep.subr.bf16.mxu1 %v10061_v36  ;;  %v10113_v36 = vld [vmem:[#allocation5 + $0xd20] ss:$72 sps:$4 sm:$0xff]  }
 0x272   : > { %v10149_v28 = vld [vmem:[#allocation5 + $0x9c0] ss:$72 sps:$4 sm:$0xff]  }
 0x273   : > { %6178 = vmatpush1.bf16.msra.mxu0 %v10056_v37  ;;  %v10118_v37 = vld [vmem:[#allocation5 + $0x394] ss:$72 sps:$4 sm:$0xff]  }
 0x274   : > { %6219 = vmatpush1.bf16.msra.mxu1 %v10059_v38  ;;  %6179 = vmatprep.subr.bf16.mxu0 %v10064_v39  ;;  %v10121_v38 = vld [vmem:[#allocation5 + $0xc94] ss:$72 sps:$4 sm:$0xff]   ;;  %v5911_v39 = vadd.f32 %v11006_v11, %v1124_v29 }
 0x275   : > { %6220 = vmatprep.subr.bf16.mxu1 %v10067_v40  ;;  %v10154_v29 = vld [vmem:[#allocation5 + $0x34] ss:$72 sps:$4 sm:$0xff]  }
 0x277   : > { %6180 = vmatpush2.bf16.msra.mxu0 %v10062_v41 }
 0x278   : > { %6221 = vmatpush2.bf16.msra.mxu1 %v10065_v42  ;;  %6181 = vmatprep.subr.bf16.mxu0 %v10070_v43  ;;  %v5913_v42 = vadd.f32 %v11013_v60, %v1128_v30  ;;  %v10157_v30 = vld [vmem:[#allocation5 + $0x934] ss:$72 sps:$4 sm:$0xff]  }
 0x279   : > { %6222 = vmatprep.subr.bf16.mxu1 %v10073_v44  ;;  %v10116_v44 = vld [vmem:[#allocation5 + $0x390] ss:$72 sps:$4 sm:$0xff]  }
 0x27b   : > { %6182 = vmatpush2.bf16.msra.mxu0 %v10068_v45  ;;  %v10119_v45 = vld [vmem:[#allocation5 + $0xc90] ss:$72 sps:$4 sm:$0xff]  }
 0x27c   : > { %6223 = vmatpush2.bf16.msra.mxu1 %v10071_v46  ;;  %6183 = vmatprep.subr.bf16.mxu0 %v10076_v47 }
 0x27d   : > { %6224 = vmatprep.subr.bf16.mxu1 %v10079_v48  ;;  %v10124_v48 = vld [vmem:[#allocation5 + $0x304] ss:$72 sps:$4 sm:$0xff]  }
 0x27f   : > { %6184 = vmatpush2.bf16.msra.mxu0 %v10074_v50  ;;  %v10127_v50 = vld [vmem:[#allocation5 + $0xc04] ss:$72 sps:$4 sm:$0xff]  }
 0x280   : > { %6225 = vmatpush2.bf16.msra.mxu1 %v10077_v51  ;;  %6185 = vmatprep.subr.bf16.mxu0 %v10082_v56 }
 0x281   : > { %6226 = vmatprep.subr.bf16.mxu1 %v10085_v57 }
 0x283   : > { %6186 = vmatpush2.bf16.msra.mxu0 %v10080_v58 }
 0x284   : > { %6227 = vmatpush2.bf16.msra.mxu1 %v10083_v61  ;;  %6187 = vmatprep.subr.bf16.mxu0 %v10088_v63  ;;  %v10122_v61 = vld [vmem:[#allocation5 + $0x300] ss:$72 sps:$4 sm:$0xff]  }
 0x285   : > { %6228 = vmatprep.subr.bf16.mxu1 %v10091_v24  ;;  %v10125_v63 = vld [vmem:[#allocation5 + $0xc00] ss:$72 sps:$4 sm:$0xff]  }
 0x287   : > { %6188 = vmatpush2.bf16.msra.mxu0 %v10086_v1  ;;  %v10130_v1 = vld [vmem:[#allocation5 + $0x274] ss:$72 sps:$4 sm:$0xff]  }
 0x288   : > { %6229 = vmatpush2.bf16.msra.mxu1 %v10089_v2  ;;  %6189 = vmatprep.subr.bf16.mxu0 %v10094_v4  ;;  %v10133_v2 = vld [vmem:[#allocation5 + $0xb74] ss:$72 sps:$4 sm:$0xff]  }
 0x289   : > { %6230 = vmatprep.subr.bf16.mxu1 %v10097_v5  ;;  %v11040_v5 = vpack.c.bf16 %v10961_v7, %v10961_v7  ;;  %v10145_v7 = vld [vmem:[#allocation5 + $0xa54] ss:$72 sps:$4 sm:$0xff]  }
 0x28b   : > { %6190 = vmatpush2.bf16.msra.mxu0 %v10092_v10  ;;  %v10128_v10 = vld [vmem:[#allocation5 + $0x270] ss:$72 sps:$4 sm:$0xff]  }
 0x28c   : > { %6231 = vmatpush2.bf16.msra.mxu1 %v10095_v12  ;;  %6191 = vmatprep.subr.bf16.mxu0 %v10100_v13  ;;  %v10131_v12 = vld [vmem:[#allocation5 + $0xb70] ss:$72 sps:$4 sm:$0xff]   ;;  %v10136_v13 = vld [vmem:[#allocation5 + $0x1e4] ss:$72 sps:$4 sm:$0xff]  }
 0x28d   : > { %6232 = vmatprep.subr.bf16.mxu1 %v10103_v32  ;;  %v10139_v32 = vld [vmem:[#allocation5 + $0xae4] ss:$72 sps:$4 sm:$0xff]  }
 0x28f   : > { %6192 = vmatpush2.bf16.msra.mxu0 %v10098_v15  ;;  %v10134_v15 = vld [vmem:[#allocation5 + $0x1e0] ss:$72 sps:$4 sm:$0xff]  }
 0x290   : > { %6233 = vmatpush2.bf16.msra.mxu1 %v10101_v16  ;;  %6193 = vmatprep.subr.bf16.mxu0 %v10106_v53  ;;  %v10137_v16 = vld [vmem:[#allocation5 + $0xae0] ss:$72 sps:$4 sm:$0xff]   ;;  %v10142_v53 = vld [vmem:[#allocation5 + $0x154] ss:$72 sps:$4 sm:$0xff]  }
 0x291   : > { %6234 = vmatprep.subr.bf16.mxu1 %v10109_v18  ;;  %v10140_v18 = vld [vmem:[#allocation5 + $0x150] ss:$72 sps:$4 sm:$0xff]  }
 0x293   : > { %6194 = vmatpush2.bf16.msra.mxu0 %v10104_v59  ;;  %v10143_v59 = vld [vmem:[#allocation5 + $0xa50] ss:$72 sps:$4 sm:$0xff]  }
 0x294   : > { %6235 = vmatpush2.bf16.msra.mxu1 %v10107_v23  ;;  %6245 = vmatprep.subr.bf16.mxu0 %v10112_v25  ;;  %v10148_v23 = vld [vmem:[#allocation5 + $0xc4] ss:$72 sps:$4 sm:$0xff]  }
 0x295   : > { %6286 = vmatprep.subr.bf16.mxu1 %v10115_v27  ;;  %v10151_v25 = vld [vmem:[#allocation5 + $0x9c4] ss:$72 sps:$4 sm:$0xff]   ;;  %v10146_v27 = vld [vmem:[#allocation5 + $0xc0] ss:$72 sps:$4 sm:$0xff]  }
 0x296   : > { %v5951_v40 = vpop.f32.mrf.mxu0  ;;  %6196 = vmatmul.mubr.bf16.vlgmr.msra.gmra.mxu0 %v10918_v9 }
 0x297   : > { %v5992_v41 = vpop.f32.mrf.mxu1  ;;  %6237 = vmatmul.mubr.bf16.vlgmr.msra.gmra.mxu1 %v10928_v17  ;;  %v5952_v43 = vadd.f32 %v5951_v40, %v5911_v39  ;;  %6246 = vmatpush1.bf16.msra.mxu0 %v10110_v33  ;;  %v10152_v33 = vld [vmem:[#allocation5 + $0x30] ss:$72 sps:$4 sm:$0xff]   ;;  %v10158_v39 = vld [vmem:[#allocation5 + $0x8a0] ss:$72 sps:$4 sm:$0xff]  }
 0x298   : > { %6287 = vmatpush1.bf16.msra.mxu1 %v10113_v36  ;;  %v5953_v46 = vpop.f32.mrf.mxu0  ;;  %6247 = vmatprep.subr.bf16.mxu0 %v10118_v37  ;;  %v10155_v36 = vld [vmem:[#allocation5 + $0x930] ss:$72 sps:$4 sm:$0xff]   ;;  %v10160_v37 = vld [vmem:[#allocation5 + $0x8a4] ss:$72 sps:$4 sm:$0xff]   ;;  %v10161_v40 = vld [vmem:[#allocation5 + $0x11a0] ss:$72 sps:$4 sm:$0xff]  }
 0x299   : > { %v5994_v47 = vpop.f32.mrf.mxu1  ;;  %6288 = vmatprep.subr.bf16.mxu1 %v10121_v38  ;;  %v5993_v11 = vadd.f32 %v5992_v41, %v5952_v43  ;;  %v5954_v51 = vadd.f32 %v5953_v46, %v5913_v42  ;;  %6277 = vmatprep.mubr.bf16.mxu0 %v10907_v49  ;;  %v10163_v38 = vld [vmem:[#allocation5 + $0x11a4] ss:$72 sps:$4 sm:$0xff]   ;;  %v10166_v41 = vld [vmem:[#allocation5 + $0x814] ss:$72 sps:$4 sm:$0xff]   ;;  %v10164_v43 = vld [vmem:[#allocation5 + $0x810] ss:$72 sps:$4 sm:$0xff]  }
 0x29a   : > { %6318 = vmatprep.mubr.bf16.mxu1 %v10910_v52  ;;  %v5955_v57 = vpop.f32.mrf.mxu0  ;;  %v10169_v42 = vld [vmem:[#allocation5 + $0x1114] ss:$72 sps:$4 sm:$0xff]   ;;  %v10175_v46 = vld [vmem:[#allocation5 + $0x1084] ss:$72 sps:$4 sm:$0xff]  }
 0x29b   : > { %v5996_v56 = vpop.f32.mrf.mxu1  ;;  %v11032_v60 = vpack.c.bf16 %v5993_v11, %v5993_v11  ;;  %v11034_v58 = vadd.f32 %v5994_v47, %v5954_v51  ;;  %6248 = vmatpush1.bf16.msra.mxu0 %v10116_v44  ;;  %v10167_v44 = vld [vmem:[#allocation5 + $0x1110] ss:$72 sps:$4 sm:$0xff]   ;;  %v10170_v47 = vld [vmem:[#allocation5 + $0x780] ss:$72 sps:$4 sm:$0xff]   ;;  %v10181_v11 = vld [vmem:[#allocation5 + $0xff4] ss:$72 sps:$4 sm:$0xff]  }
 0x29c   : > { %6289 = vmatpush1.bf16.msra.mxu1 %v10119_v45  ;;  %6249 = vmatprep.subr.bf16.mxu0 %v10124_v48  ;;  %v5956_v4 = vpop.f32.mrf.mxu0  ;;  %v10172_v45 = vld [vmem:[#allocation5 + $0x784] ss:$72 sps:$4 sm:$0xff]   ;;  %v10173_v48 = vld [vmem:[#allocation5 + $0x1080] ss:$72 sps:$4 sm:$0xff]   ;;  %v10176_v51 = vld [vmem:[#allocation5 + $0x6f0] ss:$72 sps:$4 sm:$0xff]  }
 0x29d   : > { %v5997_v24 = vpop.f32.mrf.mxu1  ;;  %6290 = vmatprep.subr.bf16.mxu1 %v10127_v50  ;;  %6729 = vrot.lane.b32.xlu1 %v11032_v60, %s10748_s18  ;;  %v10178_v50 = vld [vmem:[#allocation5 + $0x6f4] ss:$72 sps:$4 sm:$0xff]   ;;  %v10179_v56 = vld [vmem:[#allocation5 + $0xff0] ss:$72 sps:$4 sm:$0xff]   ;;  %v10184_v57 = vld [vmem:[#allocation5 + $0x664] ss:$72 sps:$4 sm:$0xff]  }
 0x29e   : > { %v10185_v24 = vld [vmem:[#allocation5 + $0xf60] ss:$72 sps:$4 sm:$0xff]   ;;  %v10188_v4 = vld [vmem:[#allocation5 + $0x5d0] ss:$72 sps:$4 sm:$0xff]  }
 0x29f   : > { %6250 = vmatpush1.bf16.msra.mxu0 %v10122_v61  ;;  %v10187_v61 = vld [vmem:[#allocation5 + $0xf64] ss:$72 sps:$4 sm:$0xff]  }
 0x2a0   : > { %6291 = vmatpush1.bf16.msra.mxu1 %v10125_v63  ;;  %6251 = vmatprep.subr.bf16.mxu0 %v10130_v1  ;;  %v10182_v63 = vld [vmem:[#allocation5 + $0x660] ss:$72 sps:$4 sm:$0xff]   ;;  %v10190_v1 = vld [vmem:[#allocation5 + $0x5d4] ss:$72 sps:$4 sm:$0xff]  }
 0x2a1   : > { %6292 = vmatprep.subr.bf16.mxu1 %v10133_v2  ;;  %6726 = vrot.lane.b32.xlu1 %v11040_v5, %s10748_s18  ;;  %v10193_v2 = vld [vmem:[#allocation5 + $0xed4] ss:$72 sps:$4 sm:$0xff]  }
 0x2a3   : > { %6252 = vmatpush1.bf16.msra.mxu0 %v10128_v10  ;;  %v10191_v10 = vld [vmem:[#allocation5 + $0xed0] ss:$72 sps:$4 sm:$0xff]  }
 0x2a4   : > { %6293 = vmatpush1.bf16.msra.mxu1 %v10131_v12  ;;  %6253 = vmatprep.subr.bf16.mxu0 %v10136_v13  ;;  %v10196_v12 = vld [vmem:[#allocation5 + $0x544] ss:$72 sps:$4 sm:$0xff]  }
 0x2a5   : > { %6294 = vmatprep.subr.bf16.mxu1 %v10139_v32  ;;  %v10199_v13 = vld [vmem:[#allocation5 + $0xe44] ss:$72 sps:$4 sm:$0xff]   ;;  %v10194_v32 = vld [vmem:[#allocation5 + $0x540] ss:$72 sps:$4 sm:$0xff]  }
 0x2a7   : > { %6254 = vmatpush1.bf16.msra.mxu0 %v10134_v15  ;;  %v10197_v15 = vld [vmem:[#allocation5 + $0xe40] ss:$72 sps:$4 sm:$0xff]  }
 0x2a8   : > { %6295 = vmatpush1.bf16.msra.mxu1 %v10137_v16  ;;  %6255 = vmatprep.subr.bf16.mxu0 %v10142_v53  ;;  %v10202_v16 = vld [vmem:[#allocation5 + $0x4b4] ss:$72 sps:$4 sm:$0xff]  }
 0x2a9   : > { %6296 = vmatprep.subr.bf16.mxu1 %v10145_v7  ;;  %v10205_v53 = vld [vmem:[#allocation5 + $0xdb4] ss:$72 sps:$4 sm:$0xff]   ;;  %v10200_v7 = vld [vmem:[#allocation5 + $0x4b0] ss:$72 sps:$4 sm:$0xff]  }
 0x2ab   : > { %6256 = vmatpush1.bf16.msra.mxu0 %v10140_v18  ;;  %v10203_v18 = vld [vmem:[#allocation5 + $0xdb0] ss:$72 sps:$4 sm:$0xff]  }
 0x2ac   : > { %6297 = vmatpush1.bf16.msra.mxu1 %v10143_v59  ;;  %6257 = vmatprep.subr.bf16.mxu0 %v10148_v23  ;;  %v11044_v59 = vld [vmem:[#allocation7 + $0x8] sm:$0xff] }
 0x2ad   : > { %6298 = vmatprep.subr.bf16.mxu1 %v10151_v25  ;;  %v10208_v23 = vld [vmem:[#allocation5 + $0x1624] ss:$72 sps:$4 sm:$0xff]  }
 0x2ae   : > { %v10211_v25 = vld [vmem:[#allocation5 + $0x42c] ss:$72 sps:$4 sm:$0xff]  }
 0x2af   : > { %6258 = vmatpush1.bf16.msra.mxu0 %v10146_v27  ;;  %v1132_v27 = vrot.slane %v11044_v59, %v10941_v31 }
 0x2b0   : > { %6299 = vmatpush1.bf16.msra.mxu1 %v10149_v28  ;;  %6259 = vmatprep.subr.bf16.mxu0 %v10154_v29  ;;  %v10206_v28 = vld [vmem:[#allocation5 + $0x1620] ss:$72 sps:$4 sm:$0xff]  }
 0x2b1   : > { %6300 = vmatprep.subr.bf16.mxu1 %v10157_v30  ;;  %v10209_v29 = vld [vmem:[#allocation5 + $0x428] ss:$72 sps:$4 sm:$0xff]   ;;  %v10214_v30 = vld [vmem:[#allocation5 + $0x1594] ss:$72 sps:$4 sm:$0xff]  }
 0x2b3   : > { %6260 = vmatpush1.bf16.msra.mxu0 %v10152_v33  ;;  %v10217_v33 = vld [vmem:[#allocation5 + $0x39c] ss:$72 sps:$4 sm:$0xff]  }
 0x2b4   : > { %6301 = vmatpush1.bf16.msra.mxu1 %v10155_v36  ;;  %6261 = vmatprep.subr.bf16.mxu0 %v10160_v37  ;;  %v1136_v36 = vrot.slane %v11044_v59, %v10944_v34 }
 0x2b5   : > { %6302 = vmatprep.subr.bf16.mxu1 %v10163_v38 }
 0x2b7   : > { %6262 = vmatpush2.bf16.msra.mxu0 %v10158_v39 }
 0x2b8   : > { %6303 = vmatpush2.bf16.msra.mxu1 %v10161_v40  ;;  %6263 = vmatprep.subr.bf16.mxu0 %v10166_v41  ;;  %v10212_v40 = vld [vmem:[#allocation5 + $0x1590] ss:$72 sps:$4 sm:$0xff]  }
 0x2b9   : > { %6304 = vmatprep.subr.bf16.mxu1 %v10169_v42  ;;  %v10215_v41 = vld [vmem:[#allocation5 + $0x398] ss:$72 sps:$4 sm:$0xff]  }
 0x2bb   : > { %6264 = vmatpush2.bf16.msra.mxu0 %v10164_v43 }
 0x2bc   : > { %6305 = vmatpush2.bf16.msra.mxu1 %v10167_v44  ;;  %6265 = vmatprep.subr.bf16.mxu0 %v10172_v45  ;;  %v10220_v44 = vld [vmem:[#allocation5 + $0x1504] ss:$72 sps:$4 sm:$0xff]  }
 0x2bd   : > { %6306 = vmatprep.subr.bf16.mxu1 %v10175_v46  ;;  %v10223_v45 = vld [vmem:[#allocation5 + $0x30c] ss:$72 sps:$4 sm:$0xff]  }
 0x2bf   : > { %6266 = vmatpush2.bf16.msra.mxu0 %v10170_v47 }
 0x2c0   : > { %6307 = vmatpush2.bf16.msra.mxu1 %v10173_v48  ;;  %6267 = vmatprep.subr.bf16.mxu0 %v10178_v50 }
 0x2c1   : > { %6308 = vmatprep.subr.bf16.mxu1 %v10181_v11 }
 0x2c3   : > { %6268 = vmatpush2.bf16.msra.mxu0 %v10176_v51  ;;  %v10218_v51 = vld [vmem:[#allocation5 + $0x1500] ss:$72 sps:$4 sm:$0xff]  }
 0x2c4   : > { %6309 = vmatpush2.bf16.msra.mxu1 %v10179_v56  ;;  %6269 = vmatprep.subr.bf16.mxu0 %v10184_v57  ;;  %v10221_v56 = vld [vmem:[#allocation5 + $0x308] ss:$72 sps:$4 sm:$0xff]  }
 0x2c5   : > { %6310 = vmatprep.subr.bf16.mxu1 %v10187_v61  ;;  %v10226_v61 = vld [vmem:[#allocation5 + $0x1474] ss:$72 sps:$4 sm:$0xff]  }
 0x2c7   : > { %6270 = vmatpush2.bf16.msra.mxu0 %v10182_v63  ;;  %v10229_v63 = vld [vmem:[#allocation5 + $0x27c] ss:$72 sps:$4 sm:$0xff]  }
 0x2c8   : > { %6311 = vmatpush2.bf16.msra.mxu1 %v10185_v24  ;;  %6271 = vmatprep.subr.bf16.mxu0 %v10190_v1  ;;  %v10224_v1 = vld [vmem:[#allocation5 + $0x1470] ss:$72 sps:$4 sm:$0xff]  }
 0x2c9   : > { %6312 = vmatprep.subr.bf16.mxu1 %v10193_v2  ;;  %v10227_v2 = vld [vmem:[#allocation5 + $0x278] ss:$72 sps:$4 sm:$0xff]  }
 0x2cb   : > { %6272 = vmatpush2.bf16.msra.mxu0 %v10188_v4  ;;  %v10232_v4 = vld [vmem:[#allocation5 + $0x13e4] ss:$72 sps:$4 sm:$0xff]  }
 0x2cc   : > { %6313 = vmatpush2.bf16.msra.mxu1 %v10191_v10  ;;  %6273 = vmatprep.subr.bf16.mxu0 %v10196_v12  ;;  %v10235_v10 = vld [vmem:[#allocation5 + $0x1ec] ss:$72 sps:$4 sm:$0xff]   ;;  %v10230_v12 = vld [vmem:[#allocation5 + $0x13e0] ss:$72 sps:$4 sm:$0xff]  }
 0x2cd   : > { %6314 = vmatprep.subr.bf16.mxu1 %v10199_v13  ;;  %v10233_v13 = vld [vmem:[#allocation5 + $0x1e8] ss:$72 sps:$4 sm:$0xff]  }
 0x2cf   : > { %6274 = vmatpush2.bf16.msra.mxu0 %v10194_v32  ;;  %v10238_v32 = vld [vmem:[#allocation5 + $0x1354] ss:$72 sps:$4 sm:$0xff]  }
 0x2d0   : > { %6315 = vmatpush2.bf16.msra.mxu1 %v10197_v15  ;;  %6275 = vmatprep.subr.bf16.mxu0 %v10202_v16  ;;  %v10241_v15 = vld [vmem:[#allocation5 + $0x15c] ss:$72 sps:$4 sm:$0xff]   ;;  %v10236_v16 = vld [vmem:[#allocation5 + $0x1350] ss:$72 sps:$4 sm:$0xff]  }
 0x2d1   : > { %6316 = vmatprep.subr.bf16.mxu1 %v10205_v53  ;;  %v10239_v53 = vld [vmem:[#allocation5 + $0x158] ss:$72 sps:$4 sm:$0xff]  }
 0x2d3   : > { %6276 = vmatpush2.bf16.msra.mxu0 %v10200_v7  ;;  %v10244_v7 = vld [vmem:[#allocation5 + $0x12c4] ss:$72 sps:$4 sm:$0xff]  }
 0x2d4   : > { %6317 = vmatpush2.bf16.msra.mxu1 %v10203_v18  ;;  %6327 = vmatprep.subr.bf16.mxu0 %v10208_v23  ;;  %v10247_v18 = vld [vmem:[#allocation5 + $0xcc] ss:$72 sps:$4 sm:$0xff]   ;;  %v10242_v23 = vld [vmem:[#allocation5 + $0x12c0] ss:$72 sps:$4 sm:$0xff]  }
 0x2d5   : > { %6368 = vmatprep.subr.bf16.mxu1 %v10211_v25  ;;  %v10245_v25 = vld [vmem:[#allocation5 + $0xc8] ss:$72 sps:$4 sm:$0xff]  }
 0x2d6   : > { %v6033_v37 = vpop.f32.mrf.mxu0  ;;  %6278 = vmatmul.mubr.bf16.vlgmr.msra.gmra.mxu0 %v10916_v8 }
 0x2d7   : > { %v6074_v38 = vpop.f32.mrf.mxu1  ;;  %6319 = vmatmul.mubr.bf16.vlgmr.msra.gmra.mxu1 %v10918_v9  ;;  %v6034_v39 = vadd.f32 %v6033_v37, %v1132_v27  ;;  %6328 = vmatpush1.bf16.msra.mxu0 %v10206_v28  ;;  %v10250_v27 = vld [vmem:[#allocation5 + $0x1234] ss:$72 sps:$4 sm:$0xff]   ;;  %v10254_v37 = vld [vmem:[#allocation5 + $0x1aa0] ss:$72 sps:$4 sm:$0xff]  }
 0x2d8   : > { %6369 = vmatpush1.bf16.msra.mxu1 %v10209_v29  ;;  %v6035_v42 = vpop.f32.mrf.mxu0  ;;  %6329 = vmatprep.subr.bf16.mxu0 %v10214_v30  ;;  %v10253_v28 = vld [vmem:[#allocation5 + $0x3c] ss:$72 sps:$4 sm:$0xff]   ;;  %v10248_v29 = vld [vmem:[#allocation5 + $0x1230] ss:$72 sps:$4 sm:$0xff]  }
 0x2d9   : > { %v6076_v43 = vpop.f32.mrf.mxu1  ;;  %6370 = vmatprep.subr.bf16.mxu1 %v10217_v33  ;;  %v11052_v46 = vadd.f32 %v6074_v38, %v6034_v39  ;;  %v6036_v47 = vadd.f32 %v6035_v42, %v1136_v36  ;;  %6359 = vmatprep.mubr.bf16.mxu0 %v10924_v35  ;;  %v10251_v30 = vld [vmem:[#allocation5 + $0x38] ss:$72 sps:$4 sm:$0xff]   ;;  %v10256_v33 = vld [vmem:[#allocation5 + $0x1aa4] ss:$72 sps:$4 sm:$0xff]   ;;  %v10257_v38 = vld [vmem:[#allocation5 + $0x8a8] ss:$72 sps:$4 sm:$0xff]  }
 0x2da   : > { %6400 = vmatprep.mubr.bf16.mxu1 %v10907_v49  ;;  %v6037_v50 = vpop.f32.mrf.mxu0  ;;  %v10259_v36 = vld [vmem:[#allocation5 + $0x8ac] ss:$72 sps:$4 sm:$0xff]   ;;  %v10263_v42 = vld [vmem:[#allocation5 + $0x818] ss:$72 sps:$4 sm:$0xff]  }
 0x2db   : > { %v6078_v48 = vpop.f32.mrf.mxu1  ;;  %v11056_v11 = vadd.f32 %v6076_v43, %v6036_v47  ;;  %6330 = vmatpush1.bf16.msra.mxu0 %v10212_v40  ;;  %v10262_v39 = vld [vmem:[#allocation5 + $0x1a14] ss:$72 sps:$4 sm:$0xff]   ;;  %v10268_v43 = vld [vmem:[#allocation5 + $0x1984] ss:$72 sps:$4 sm:$0xff]   ;;  %v10269_v47 = vld [vmem:[#allocation5 + $0x788] ss:$72 sps:$4 sm:$0xff]  }
 0x2dc   : > { %6371 = vmatpush1.bf16.msra.mxu1 %v10215_v41  ;;  %6331 = vmatprep.subr.bf16.mxu0 %v10220_v44  ;;  %v6038_v24 = vpop.f32.mrf.mxu0  ;;  %v10265_v40 = vld [vmem:[#allocation5 + $0x81c] ss:$72 sps:$4 sm:$0xff]   ;;  %v10260_v41 = vld [vmem:[#allocation5 + $0x1a10] ss:$72 sps:$4 sm:$0xff]   ;;  %v10271_v44 = vld [vmem:[#allocation5 + $0x78c] ss:$72 sps:$4 sm:$0xff]  }
 0x2dd   : > { %v6079_v57 = vpop.f32.mrf.mxu1  ;;  %6372 = vmatprep.subr.bf16.mxu1 %v10223_v45  ;;  %v10266_v45 = vld [vmem:[#allocation5 + $0x1980] ss:$72 sps:$4 sm:$0xff]   ;;  %v10274_v48 = vld [vmem:[#allocation5 + $0x18f4] ss:$72 sps:$4 sm:$0xff]  }
 0x2de   : > { %v10277_v50 = vld [vmem:[#allocation5 + $0x6fc] ss:$72 sps:$4 sm:$0xff]   ;;  %v10281_v24 = vld [vmem:[#allocation5 + $0x668] ss:$72 sps:$4 sm:$0xff]  }
 0x2df   : > { %6332 = vmatpush1.bf16.msra.mxu0 %v10218_v51  ;;  %v10272_v51 = vld [vmem:[#allocation5 + $0x18f0] ss:$72 sps:$4 sm:$0xff]   ;;  %v10280_v57 = vld [vmem:[#allocation5 + $0x1864] ss:$72 sps:$4 sm:$0xff]  }
 0x2e0   : > { %6373 = vmatpush1.bf16.msra.mxu1 %v10221_v56  ;;  %6333 = vmatprep.subr.bf16.mxu0 %v10226_v61  ;;  %v10275_v56 = vld [vmem:[#allocation5 + $0x6f8] ss:$72 sps:$4 sm:$0xff]   ;;  %v10283_v61 = vld [vmem:[#allocation5 + $0x66c] ss:$72 sps:$4 sm:$0xff]  }
 0x2e1   : > { %6374 = vmatprep.subr.bf16.mxu1 %v10229_v63  ;;  %v10278_v63 = vld [vmem:[#allocation5 + $0x1860] ss:$72 sps:$4 sm:$0xff]  }
 0x2e3   : > { %6334 = vmatpush1.bf16.msra.mxu0 %v10224_v1  ;;  %v10286_v1 = vld [vmem:[#allocation5 + $0x17d4] ss:$72 sps:$4 sm:$0xff]  }
 0x2e4   : > { %6375 = vmatpush1.bf16.msra.mxu1 %v10227_v2  ;;  %6335 = vmatprep.subr.bf16.mxu0 %v10232_v4  ;;  %v10289_v2 = vld [vmem:[#allocation5 + $0x5dc] ss:$72 sps:$4 sm:$0xff]   ;;  %v10284_v4 = vld [vmem:[#allocation5 + $0x17d0] ss:$72 sps:$4 sm:$0xff]  }
 0x2e5   : > { %6376 = vmatprep.subr.bf16.mxu1 %v10235_v10  ;;  %v10287_v10 = vld [vmem:[#allocation5 + $0x5d8] ss:$72 sps:$4 sm:$0xff]  }
 0x2e7   : > { %6336 = vmatpush1.bf16.msra.mxu0 %v10230_v12  ;;  %v10292_v12 = vld [vmem:[#allocation5 + $0x1744] ss:$72 sps:$4 sm:$0xff]  }
 0x2e8   : > { %6377 = vmatpush1.bf16.msra.mxu1 %v10233_v13  ;;  %6337 = vmatprep.subr.bf16.mxu0 %v10238_v32  ;;  %v10295_v13 = vld [vmem:[#allocation5 + $0x54c] ss:$72 sps:$4 sm:$0xff]   ;;  %v10290_v32 = vld [vmem:[#allocation5 + $0x1740] ss:$72 sps:$4 sm:$0xff]  }
 0x2e9   : > { %6378 = vmatprep.subr.bf16.mxu1 %v10241_v15  ;;  %v10293_v15 = vld [vmem:[#allocation5 + $0x548] ss:$72 sps:$4 sm:$0xff]  }
 0x2eb   : > { %6338 = vmatpush1.bf16.msra.mxu0 %v10236_v16  ;;  %v10298_v16 = vld [vmem:[#allocation5 + $0x16b4] ss:$72 sps:$4 sm:$0xff]  }
 0x2ec   : > { %6379 = vmatpush1.bf16.msra.mxu1 %v10239_v53  ;;  %6339 = vmatprep.subr.bf16.mxu0 %v10244_v7  ;;  %v10301_v53 = vld [vmem:[#allocation5 + $0x4bc] ss:$72 sps:$4 sm:$0xff]   ;;  %v10296_v7 = vld [vmem:[#allocation5 + $0x16b0] ss:$72 sps:$4 sm:$0xff]  }
 0x2ed   : > { %6380 = vmatprep.subr.bf16.mxu1 %v10247_v18  ;;  %v10299_v18 = vld [vmem:[#allocation5 + $0x4b8] ss:$72 sps:$4 sm:$0xff]  }
 0x2ef   : > { %6340 = vmatpush1.bf16.msra.mxu0 %v10242_v23  ;;  %v10304_v23 = vld [vmem:[#allocation5 + $0xd2c] ss:$72 sps:$4 sm:$0xff]  }
 0x2f0   : > { %6381 = vmatpush1.bf16.msra.mxu1 %v10245_v25  ;;  %6341 = vmatprep.subr.bf16.mxu0 %v10250_v27  ;;  %v10307_v25 = vld [vmem:[#allocation5 + $0x162c] ss:$72 sps:$4 sm:$0xff]   ;;  %v10302_v27 = vld [vmem:[#allocation5 + $0xd28] ss:$72 sps:$4 sm:$0xff]  }
 0x2f1   : > { %6382 = vmatprep.subr.bf16.mxu1 %v10253_v28  ;;  %v10305_v28 = vld [vmem:[#allocation5 + $0x1628] ss:$72 sps:$4 sm:$0xff]  }
 0x2f3   : > { %6342 = vmatpush1.bf16.msra.mxu0 %v10248_v29  ;;  %v10310_v29 = vld [vmem:[#allocation5 + $0xc9c] ss:$72 sps:$4 sm:$0xff]  }
 0x2f4   : > { %6383 = vmatpush1.bf16.msra.mxu1 %v10251_v30  ;;  %6343 = vmatprep.subr.bf16.mxu0 %v10256_v33  ;;  %v10313_v30 = vld [vmem:[#allocation5 + $0x159c] ss:$72 sps:$4 sm:$0xff]  }
 0x2f5   : > { %6384 = vmatprep.subr.bf16.mxu1 %v10259_v36 }
 0x2f7   : > { %6344 = vmatpush2.bf16.msra.mxu0 %v10254_v37 }
 0x2f8   : > { %6385 = vmatpush2.bf16.msra.mxu1 %v10257_v38  ;;  %6345 = vmatprep.subr.bf16.mxu0 %v10262_v39  ;;  %v10308_v38 = vld [vmem:[#allocation5 + $0xc98] ss:$72 sps:$4 sm:$0xff]  }
 0x2f9   : > { %6386 = vmatprep.subr.bf16.mxu1 %v10265_v40  ;;  %v10311_v39 = vld [vmem:[#allocation5 + $0x1598] ss:$72 sps:$4 sm:$0xff]  }
 0x2fb   : > { %6346 = vmatpush2.bf16.msra.mxu0 %v10260_v41 }
 0x2fc   : > { %6387 = vmatpush2.bf16.msra.mxu1 %v10263_v42  ;;  %6347 = vmatprep.subr.bf16.mxu0 %v10268_v43  ;;  %v10316_v42 = vld [vmem:[#allocation5 + $0xc0c] ss:$72 sps:$4 sm:$0xff]  }
 0x2fd   : > { %6388 = vmatprep.subr.bf16.mxu1 %v10271_v44  ;;  %v10319_v43 = vld [vmem:[#allocation5 + $0x150c] ss:$72 sps:$4 sm:$0xff]  }
 0x2ff   : > { %6348 = vmatpush2.bf16.msra.mxu0 %v10266_v45 }
 0x300   : > { %6389 = vmatpush2.bf16.msra.mxu1 %v10269_v47  ;;  %6349 = vmatprep.subr.bf16.mxu0 %v10274_v48  ;;  %v10314_v47 = vld [vmem:[#allocation5 + $0xc08] ss:$72 sps:$4 sm:$0xff]  }
 0x301   : > { %6390 = vmatprep.subr.bf16.mxu1 %v10277_v50  ;;  %v10317_v48 = vld [vmem:[#allocation5 + $0x1508] ss:$72 sps:$4 sm:$0xff]  }
 0x303   : > { %6350 = vmatpush2.bf16.msra.mxu0 %v10272_v51  ;;  %v10322_v51 = vld [vmem:[#allocation5 + $0xb7c] ss:$72 sps:$4 sm:$0xff]  }
 0x304   : > { %6391 = vmatpush2.bf16.msra.mxu1 %v10275_v56  ;;  %6351 = vmatprep.subr.bf16.mxu0 %v10280_v57  ;;  %v10325_v56 = vld [vmem:[#allocation5 + $0x147c] ss:$72 sps:$4 sm:$0xff]  }
 0x305   : > { %6392 = vmatprep.subr.bf16.mxu1 %v10283_v61  ;;  %v10323_v61 = vld [vmem:[#allocation5 + $0x1478] ss:$72 sps:$4 sm:$0xff]  }
 0x307   : > { %6352 = vmatpush2.bf16.msra.mxu0 %v10278_v63  ;;  %v10328_v63 = vld [vmem:[#allocation5 + $0xaec] ss:$72 sps:$4 sm:$0xff]  }
 0x308   : > { %6393 = vmatpush2.bf16.msra.mxu1 %v10281_v24  ;;  %6353 = vmatprep.subr.bf16.mxu0 %v10286_v1  ;;  %v10331_v24 = vld [vmem:[#allocation5 + $0x13ec] ss:$72 sps:$4 sm:$0xff]   ;;  %v10326_v1 = vld [vmem:[#allocation5 + $0xae8] ss:$72 sps:$4 sm:$0xff]  }
 0x309   : > { %6394 = vmatprep.subr.bf16.mxu1 %v10289_v2  ;;  %v10329_v2 = vld [vmem:[#allocation5 + $0x13e8] ss:$72 sps:$4 sm:$0xff]  }
 0x30b   : > { %6354 = vmatpush2.bf16.msra.mxu0 %v10284_v4  ;;  %v10334_v4 = vld [vmem:[#allocation5 + $0xa5c] ss:$72 sps:$4 sm:$0xff]  }
 0x30c   : > { %6395 = vmatpush2.bf16.msra.mxu1 %v10287_v10  ;;  %6355 = vmatprep.subr.bf16.mxu0 %v10292_v12  ;;  %v10337_v10 = vld [vmem:[#allocation5 + $0x135c] ss:$72 sps:$4 sm:$0xff]   ;;  %v10332_v12 = vld [vmem:[#allocation5 + $0xa58] ss:$72 sps:$4 sm:$0xff]  }
 0x30d   : > { %6396 = vmatprep.subr.bf16.mxu1 %v10295_v13  ;;  %v10335_v13 = vld [vmem:[#allocation5 + $0x1358] ss:$72 sps:$4 sm:$0xff]  }
 0x30f   : > { %6356 = vmatpush2.bf16.msra.mxu0 %v10290_v32  ;;  %v10340_v32 = vld [vmem:[#allocation5 + $0x9cc] ss:$72 sps:$4 sm:$0xff]  }
 0x310   : > { %6397 = vmatpush2.bf16.msra.mxu1 %v10293_v15  ;;  %6357 = vmatprep.subr.bf16.mxu0 %v10298_v16  ;;  %v10343_v15 = vld [vmem:[#allocation5 + $0x12cc] ss:$72 sps:$4 sm:$0xff]   ;;  %v10338_v16 = vld [vmem:[#allocation5 + $0x9c8] ss:$72 sps:$4 sm:$0xff]  }
 0x311   : > { %6398 = vmatprep.subr.bf16.mxu1 %v10301_v53  ;;  %v10341_v53 = vld [vmem:[#allocation5 + $0x12c8] ss:$72 sps:$4 sm:$0xff]  }
 0x313   : > { %6358 = vmatpush2.bf16.msra.mxu0 %v10296_v7  ;;  %v10346_v7 = vld [vmem:[#allocation5 + $0x93c] ss:$72 sps:$4 sm:$0xff]  }
 0x314   : > { %6399 = vmatpush2.bf16.msra.mxu1 %v10299_v18  ;;  %6409 = vmatprep.subr.bf16.mxu0 %v10304_v23  ;;  %v10349_v18 = vld [vmem:[#allocation5 + $0x123c] ss:$72 sps:$4 sm:$0xff]   ;;  %v10344_v23 = vld [vmem:[#allocation5 + $0x938] ss:$72 sps:$4 sm:$0xff]  }
 0x315   : > { %6450 = vmatprep.subr.bf16.mxu1 %v10307_v25  ;;  %v10347_v25 = vld [vmem:[#allocation5 + $0x1238] ss:$72 sps:$4 sm:$0xff]  }
 0x316   : > { %v6115_v33 = vpop.f32.mrf.mxu0  ;;  %6360 = vmatmul.mubr.bf16.vlgmr.msra.gmra.mxu0 %v10928_v17 }
 0x317   : > { %v11058_v36 = vpop.f32.mrf.mxu1  ;;  %6401 = vmatmul.mubr.bf16.vlgmr.msra.gmra.mxu1 %v10916_v8  ;;  %v11063_v37 = vadd.f32 %v6115_v33, %v11052_v46  ;;  %6410 = vmatpush1.bf16.msra.mxu0 %v10302_v27  ;;  %v10352_v27 = vld [vmem:[#allocation5 + $0x11ac] ss:$72 sps:$4 sm:$0xff]   ;;  %v10358_v33 = vld [vmem:[#allocation5 + $0x111c] ss:$72 sps:$4 sm:$0xff]  }
 0x318   : > { %6451 = vmatpush1.bf16.msra.mxu1 %v10305_v28  ;;  %v6117_v40 = vpop.f32.mrf.mxu0  ;;  %6411 = vmatprep.subr.bf16.mxu0 %v10310_v29  ;;  %v10355_v28 = vld [vmem:[#allocation5 + $0x1aac] ss:$72 sps:$4 sm:$0xff]   ;;  %v10350_v29 = vld [vmem:[#allocation5 + $0x11a8] ss:$72 sps:$4 sm:$0xff]  }
 0x319   : > { %v11065_v41 = vpop.f32.mrf.mxu1  ;;  %6452 = vmatprep.subr.bf16.mxu1 %v10313_v30  ;;  %v11068_v44 = vadd.f32 %v6117_v40, %v11056_v11  ;;  %6441 = vmatprep.mubr.bf16.mxu0 %v10910_v52  ;;  %v10320_v11 = vld [vmem:[#allocation5 + $0xb78] ss:$72 sps:$4 sm:$0xff]   ;;  %v10353_v30 = vld [vmem:[#allocation5 + $0x1aa8] ss:$72 sps:$4 sm:$0xff]  }
 0x31a   : > { %6482 = vmatprep.mubr.bf16.mxu1 %v10924_v35  ;;  %v6119_v45 = vpop.f32.mrf.mxu0  ;;  %v10359_v40 = vld [vmem:[#allocation5 + $0x1a18] ss:$72 sps:$4 sm:$0xff]  }
 0x31b   : > { %v6160_v46 = vpop.f32.mrf.mxu1  ;;  %6412 = vmatpush1.bf16.msra.mxu0 %v10308_v38  ;;  %v10361_v38 = vld [vmem:[#allocation5 + $0x1a1c] ss:$72 sps:$4 sm:$0xff]   ;;  %v10365_v45 = vld [vmem:[#allocation5 + $0x1988] ss:$72 sps:$4 sm:$0xff]  }
 0x31c   : > { %6453 = vmatpush1.bf16.msra.mxu1 %v10311_v39  ;;  %6413 = vmatprep.subr.bf16.mxu0 %v10316_v42  ;;  %v6120_v57 = vpop.f32.mrf.mxu0  ;;  %v10356_v39 = vld [vmem:[#allocation5 + $0x1118] ss:$72 sps:$4 sm:$0xff]   ;;  %v10364_v42 = vld [vmem:[#allocation5 + $0x108c] ss:$72 sps:$4 sm:$0xff]   ;;  %v10362_v46 = vld [vmem:[#allocation5 + $0x1088] ss:$72 sps:$4 sm:$0xff]  }
 0x31d   : > { %v6161_v50 = vpop.f32.mrf.mxu1  ;;  %6454 = vmatprep.subr.bf16.mxu1 %v10319_v43  ;;  %v10367_v43 = vld [vmem:[#allocation5 + $0x198c] ss:$72 sps:$4 sm:$0xff]  }
 0x31e   : > { %v10368_v50 = vld [vmem:[#allocation5 + $0xff8] ss:$72 sps:$4 sm:$0xff]   ;;  %v10379_v57 = vld [vmem:[#allocation5 + $0x186c] ss:$72 sps:$4 sm:$0xff]  }
 0x31f   : > { %6414 = vmatpush1.bf16.msra.mxu0 %v10314_v47  ;;  %v10370_v47 = vld [vmem:[#allocation5 + $0xffc] ss:$72 sps:$4 sm:$0xff]  }
 0x320   : > { %6455 = vmatpush1.bf16.msra.mxu1 %v10317_v48  ;;  %6415 = vmatprep.subr.bf16.mxu0 %v10322_v51  ;;  %v10373_v48 = vld [vmem:[#allocation5 + $0x18fc] ss:$72 sps:$4 sm:$0xff]   ;;  %v10371_v51 = vld [vmem:[#allocation5 + $0x18f8] ss:$72 sps:$4 sm:$0xff]  }
 0x321   : > { %6456 = vmatprep.subr.bf16.mxu1 %v10325_v56  ;;  %v10376_v56 = vld [vmem:[#allocation5 + $0xf6c] ss:$72 sps:$4 sm:$0xff]  }
 0x323   : > { %6416 = vmatpush1.bf16.msra.mxu0 %v10320_v11  ;;  %v10374_v11 = vld [vmem:[#allocation5 + $0xf68] ss:$72 sps:$4 sm:$0xff]  }
 0x324   : > { %6457 = vmatpush1.bf16.msra.mxu1 %v10323_v61  ;;  %6417 = vmatprep.subr.bf16.mxu0 %v10328_v63  ;;  %v10377_v61 = vld [vmem:[#allocation5 + $0x1868] ss:$72 sps:$4 sm:$0xff]   ;;  %v10382_v63 = vld [vmem:[#allocation5 + $0xedc] ss:$72 sps:$4 sm:$0xff]  }
 0x325   : > { %6458 = vmatprep.subr.bf16.mxu1 %v10331_v24  ;;  %v10385_v24 = vld [vmem:[#allocation5 + $0x17dc] ss:$72 sps:$4 sm:$0xff]  }
 0x327   : > { %6418 = vmatpush1.bf16.msra.mxu0 %v10326_v1  ;;  %v10380_v1 = vld [vmem:[#allocation5 + $0xed8] ss:$72 sps:$4 sm:$0xff]  }
 0x328   : > { %6459 = vmatpush1.bf16.msra.mxu1 %v10329_v2  ;;  %6419 = vmatprep.subr.bf16.mxu0 %v10334_v4  ;;  %v10383_v2 = vld [vmem:[#allocation5 + $0x17d8] ss:$72 sps:$4 sm:$0xff]   ;;  %v10388_v4 = vld [vmem:[#allocation5 + $0xe4c] ss:$72 sps:$4 sm:$0xff]  }
 0x329   : > { %6460 = vmatprep.subr.bf16.mxu1 %v10337_v10  ;;  %v10391_v10 = vld [vmem:[#allocation5 + $0x174c] ss:$72 sps:$4 sm:$0xff]  }
 0x32b   : > { %6420 = vmatpush1.bf16.msra.mxu0 %v10332_v12  ;;  %v10386_v12 = vld [vmem:[#allocation5 + $0xe48] ss:$72 sps:$4 sm:$0xff]  }
 0x32c   : > { %6461 = vmatpush1.bf16.msra.mxu1 %v10335_v13  ;;  %6421 = vmatprep.subr.bf16.mxu0 %v10340_v32  ;;  %v10389_v13 = vld [vmem:[#allocation5 + $0x1748] ss:$72 sps:$4 sm:$0xff]   ;;  %v10394_v32 = vld [vmem:[#allocation5 + $0xdbc] ss:$72 sps:$4 sm:$0xff]  }
 0x32d   : > { %6462 = vmatprep.subr.bf16.mxu1 %v10343_v15  ;;  %v10397_v15 = vld [vmem:[#allocation5 + $0x16bc] ss:$72 sps:$4 sm:$0xff]  }
 0x32f   : > { %6422 = vmatpush1.bf16.msra.mxu0 %v10338_v16  ;;  %v10392_v16 = vld [vmem:[#allocation5 + $0xdb8] ss:$72 sps:$4 sm:$0xff]  }
 0x330   : > { %6463 = vmatpush1.bf16.msra.mxu1 %v10341_v53  ;;  %6423 = vmatprep.subr.bf16.mxu0 %v10346_v7  ;;  %v10395_v53 = vld [vmem:[#allocation5 + $0x16b8] ss:$72 sps:$4 sm:$0xff]   ;;  %v10400_v7 = vld [vmem:[#allocation5 + $0x434] ss:$72 sps:$4 sm:$0xff]  }
 0x331   : > { %6464 = vmatprep.subr.bf16.mxu1 %v10349_v18  ;;  %v10403_v18 = vld [vmem:[#allocation5 + $0xd34] ss:$72 sps:$4 sm:$0xff]  }
 0x333   : > { %6424 = vmatpush1.bf16.msra.mxu0 %v10344_v23  ;;  %v1140_v23 = vrot.slane %v11044_v59, %v1107_v20 }
 0x334   : > { %6465 = vmatpush1.bf16.msra.mxu1 %v10347_v25  ;;  %6425 = vmatprep.subr.bf16.mxu0 %v10352_v27  ;;  %v1144_v25 = vrot.slane %v11044_v59, %v1111_v21  ;;  %v10398_v27 = vld [vmem:[#allocation5 + $0x430] ss:$72 sps:$4 sm:$0xff]   ;;  %v10404_v21 = vld [vmem:[#allocation5 + $0x3a0] ss:$72 sps:$4 sm:$0xff]  }
 0x335   : > { %6466 = vmatprep.subr.bf16.mxu1 %v10355_v28  ;;  %v10401_v28 = vld [vmem:[#allocation5 + $0xd30] ss:$72 sps:$4 sm:$0xff]  }
 0x336   : > { %v6159_v20 = vadd.f32 %v11065_v41, %v1144_v25  ;;  %v10445_v25 = vld [vmem:[#allocation5 + $0x944] ss:$72 sps:$4 sm:$0xff]  }
 0x337   : > { %6426 = vmatpush2.bf16.msra.mxu0 %v10350_v29  ;;  %v10406_v29 = vld [vmem:[#allocation5 + $0x3a4] ss:$72 sps:$4 sm:$0xff]  }
 0x338   : > { %6467 = vmatpush2.bf16.msra.mxu1 %v10353_v30  ;;  %6427 = vmatprep.subr.bf16.mxu0 %v10358_v33  ;;  %v10409_v30 = vld [vmem:[#allocation5 + $0xca4] ss:$72 sps:$4 sm:$0xff]   ;;  %v6157_v33 = vadd.f32 %v11058_v36, %v1140_v23 }
 0x339   : > { %6468 = vmatprep.subr.bf16.mxu1 %v10361_v38  ;;  %v10442_v23 = vld [vmem:[#allocation5 + $0x44] ss:$72 sps:$4 sm:$0xff]  }
 0x33b   : > { %6428 = vmatpush2.bf16.msra.mxu0 %v10356_v39 }
 0x33c   : > { %6469 = vmatpush2.bf16.msra.mxu1 %v10359_v40  ;;  %6429 = vmatprep.subr.bf16.mxu0 %v10364_v42  ;;  %v10407_v42 = vld [vmem:[#allocation5 + $0xca0] ss:$72 sps:$4 sm:$0xff]  }
 0x33d   : > { %6470 = vmatprep.subr.bf16.mxu1 %v10367_v43 }
 0x33f   : > { %6430 = vmatpush2.bf16.msra.mxu0 %v10362_v46 }
 0x340   : > { %6471 = vmatpush2.bf16.msra.mxu1 %v10365_v45  ;;  %6431 = vmatprep.subr.bf16.mxu0 %v10370_v47  ;;  %v10412_v45 = vld [vmem:[#allocation5 + $0x314] ss:$72 sps:$4 sm:$0xff]  }
 0x341   : > { %6472 = vmatprep.subr.bf16.mxu1 %v10373_v48  ;;  %v10415_v47 = vld [vmem:[#allocation5 + $0xc14] ss:$72 sps:$4 sm:$0xff]  }
 0x343   : > { %6432 = vmatpush2.bf16.msra.mxu0 %v10368_v50 }
 0x344   : > { %6473 = vmatpush2.bf16.msra.mxu1 %v10371_v51  ;;  %6433 = vmatprep.subr.bf16.mxu0 %v10376_v56  ;;  %v10410_v56 = vld [vmem:[#allocation5 + $0x310] ss:$72 sps:$4 sm:$0xff]  }
 0x345   : > { %6474 = vmatprep.subr.bf16.mxu1 %v10379_v57  ;;  %v10413_v57 = vld [vmem:[#allocation5 + $0xc10] ss:$72 sps:$4 sm:$0xff]  }
 0x347   : > { %6434 = vmatpush2.bf16.msra.mxu0 %v10374_v11 }
 0x348   : > { %6475 = vmatpush2.bf16.msra.mxu1 %v10377_v61  ;;  %6435 = vmatprep.subr.bf16.mxu0 %v10382_v63  ;;  %v10418_v61 = vld [vmem:[#allocation5 + $0x284] ss:$72 sps:$4 sm:$0xff]  }
 0x349   : > { %6476 = vmatprep.subr.bf16.mxu1 %v10385_v24  ;;  %v10421_v63 = vld [vmem:[#allocation5 + $0xb84] ss:$72 sps:$4 sm:$0xff]  }
 0x34b   : > { %6436 = vmatpush2.bf16.msra.mxu0 %v10380_v1  ;;  %v10416_v1 = vld [vmem:[#allocation5 + $0x280] ss:$72 sps:$4 sm:$0xff]  }
 0x34c   : > { %6477 = vmatpush2.bf16.msra.mxu1 %v10383_v2  ;;  %6437 = vmatprep.subr.bf16.mxu0 %v10388_v4  ;;  %v10427_v2 = vld [vmem:[#allocation5 + $0xaf4] ss:$72 sps:$4 sm:$0xff]   ;;  %v10422_v4 = vld [vmem:[#allocation5 + $0x1f0] ss:$72 sps:$4 sm:$0xff]  }
 0x34d   : > { %6478 = vmatprep.subr.bf16.mxu1 %v10391_v10  ;;  %v10425_v10 = vld [vmem:[#allocation5 + $0xaf0] ss:$72 sps:$4 sm:$0xff]  }
 0x34f   : > { %6438 = vmatpush2.bf16.msra.mxu0 %v10386_v12  ;;  %v10430_v12 = vld [vmem:[#allocation5 + $0x164] ss:$72 sps:$4 sm:$0xff]  }
 0x350   : > { %6479 = vmatpush2.bf16.msra.mxu1 %v10389_v13  ;;  %6439 = vmatprep.subr.bf16.mxu0 %v10394_v32  ;;  %v10433_v13 = vld [vmem:[#allocation5 + $0xa64] ss:$72 sps:$4 sm:$0xff]   ;;  %v10428_v32 = vld [vmem:[#allocation5 + $0x160] ss:$72 sps:$4 sm:$0xff]  }
 0x351   : > { %6480 = vmatprep.subr.bf16.mxu1 %v10397_v15  ;;  %v10431_v15 = vld [vmem:[#allocation5 + $0xa60] ss:$72 sps:$4 sm:$0xff]  }
 0x353   : > { %6440 = vmatpush2.bf16.msra.mxu0 %v10392_v16  ;;  %v10436_v16 = vld [vmem:[#allocation5 + $0xd4] ss:$72 sps:$4 sm:$0xff]  }
 0x354   : > { %6481 = vmatpush2.bf16.msra.mxu1 %v10395_v53  ;;  %6491 = vmatprep.subr.bf16.mxu0 %v10400_v7  ;;  %v10439_v53 = vld [vmem:[#allocation5 + $0x9d4] ss:$72 sps:$4 sm:$0xff]   ;;  %v10434_v7 = vld [vmem:[#allocation5 + $0xd0] ss:$72 sps:$4 sm:$0xff]  }
 0x355   : > { %6532 = vmatprep.subr.bf16.mxu1 %v10403_v18  ;;  %v10437_v18 = vld [vmem:[#allocation5 + $0x9d0] ss:$72 sps:$4 sm:$0xff]  }
 0x356   : > { %v6197_v38 = vpop.f32.mrf.mxu0  ;;  %6442 = vmatmul.mubr.bf16.vlgmr.msra.gmra.mxu0 %v10918_v9 }
 0x357   : > { %v6238_v39 = vpop.f32.mrf.mxu1  ;;  %6483 = vmatmul.mubr.bf16.vlgmr.msra.gmra.mxu1 %v10928_v17  ;;  %v6198_v40 = vadd.f32 %v6197_v38, %v6157_v33  ;;  %6492 = vmatpush1.bf16.msra.mxu0 %v10398_v27  ;;  %v10440_v27 = vld [vmem:[#allocation5 + $0x40] ss:$72 sps:$4 sm:$0xff]   ;;  %v10446_v33 = vld [vmem:[#allocation5 + $0x8b0] ss:$72 sps:$4 sm:$0xff]  }
 0x358   : > { %6533 = vmatpush1.bf16.msra.mxu1 %v10401_v28  ;;  %v6199_v43 = vpop.f32.mrf.mxu0  ;;  %6493 = vmatprep.subr.bf16.mxu0 %v10406_v29  ;;  %v10443_v28 = vld [vmem:[#allocation5 + $0x940] ss:$72 sps:$4 sm:$0xff]   ;;  %v10448_v29 = vld [vmem:[#allocation5 + $0x8b4] ss:$72 sps:$4 sm:$0xff]   ;;  %v10449_v38 = vld [vmem:[#allocation5 + $0x11b0] ss:$72 sps:$4 sm:$0xff]  }
 0x359   : > { %v6240_v46 = vpop.f32.mrf.mxu1  ;;  %6534 = vmatprep.subr.bf16.mxu1 %v10409_v30  ;;  %v11082_v36 = vadd.f32 %v6238_v39, %v6198_v40  ;;  %v6200_v48 = vadd.f32 %v6199_v43, %v6159_v20  ;;  %6523 = vmatprep.mubr.bf16.mxu0 %v10907_v49  ;;  %v10419_v49 = vld [vmem:[#allocation5 + $0xb80] ss:$72 sps:$4 sm:$0xff]   ;;  %v10451_v30 = vld [vmem:[#allocation5 + $0x11b4] ss:$72 sps:$4 sm:$0xff]   ;;  %v10454_v39 = vld [vmem:[#allocation5 + $0x824] ss:$72 sps:$4 sm:$0xff]  }
 0x35a   : > { %6564 = vmatprep.mubr.bf16.mxu1 %v10910_v52  ;;  %v6201_v41 = vpop.f32.mrf.mxu0  ;;  %v10424_v52 = vld [vmem:[#allocation5 + $0x1f4] ss:$72 sps:$4 sm:$0xff]   ;;  %v10457_v20 = vld [vmem:[#allocation5 + $0x1124] ss:$72 sps:$4 sm:$0xff]   ;;  %v10452_v40 = vld [vmem:[#allocation5 + $0x820] ss:$72 sps:$4 sm:$0xff]  }
 0x35b   : > { %v6242_v50 = vpop.f32.mrf.mxu1  ;;  %v11086_v51 = vadd.f32 %v6240_v46, %v6200_v48  ;;  %6494 = vmatpush1.bf16.msra.mxu0 %v10404_v21  ;;  %v10455_v21 = vld [vmem:[#allocation5 + $0x1120] ss:$72 sps:$4 sm:$0xff]   ;;  %v10463_v43 = vld [vmem:[#allocation5 + $0x1094] ss:$72 sps:$4 sm:$0xff]   ;;  %v10458_v46 = vld [vmem:[#allocation5 + $0x790] ss:$72 sps:$4 sm:$0xff]  }
 0x35c   : > { %6535 = vmatpush1.bf16.msra.mxu1 %v10407_v42  ;;  %6495 = vmatprep.subr.bf16.mxu0 %v10412_v45  ;;  %v6202_v24 = vpop.f32.mrf.mxu0  ;;  %v10460_v42 = vld [vmem:[#allocation5 + $0x794] ss:$72 sps:$4 sm:$0xff]   ;;  %v10461_v45 = vld [vmem:[#allocation5 + $0x1090] ss:$72 sps:$4 sm:$0xff]   ;;  %v10469_v48 = vld [vmem:[#allocation5 + $0x1004] ss:$72 sps:$4 sm:$0xff]  }
 0x35d   : > { %v6243_v11 = vpop.f32.mrf.mxu1  ;;  %6536 = vmatprep.subr.bf16.mxu1 %v10415_v47  ;;  %v10466_v47 = vld [vmem:[#allocation5 + $0x704] ss:$72 sps:$4 sm:$0xff]   ;;  %v10464_v50 = vld [vmem:[#allocation5 + $0x700] ss:$72 sps:$4 sm:$0xff]  }
 0x35e   : > { %v10467_v41 = vld [vmem:[#allocation5 + $0x1000] ss:$72 sps:$4 sm:$0xff]   ;;  %v10470_v11 = vld [vmem:[#allocation5 + $0x670] ss:$72 sps:$4 sm:$0xff]   ;;  %v10481_v24 = vld [vmem:[#allocation5 + $0xee4] ss:$72 sps:$4 sm:$0xff]  }
 0x35f   : > { %6496 = vmatpush1.bf16.msra.mxu0 %v10410_v56  ;;  %v10472_v56 = vld [vmem:[#allocation5 + $0x674] ss:$72 sps:$4 sm:$0xff]  }
 0x360   : > { %6537 = vmatpush1.bf16.msra.mxu1 %v10413_v57  ;;  %6497 = vmatprep.subr.bf16.mxu0 %v10418_v61  ;;  %v10475_v57 = vld [vmem:[#allocation5 + $0xf74] ss:$72 sps:$4 sm:$0xff]   ;;  %v10473_v61 = vld [vmem:[#allocation5 + $0xf70] ss:$72 sps:$4 sm:$0xff]  }
 0x361   : > { %6538 = vmatprep.subr.bf16.mxu1 %v10421_v63  ;;  %v10478_v63 = vld [vmem:[#allocation5 + $0x5e4] ss:$72 sps:$4 sm:$0xff]  }
 0x363   : > { %6498 = vmatpush1.bf16.msra.mxu0 %v10416_v1  ;;  %v10476_v1 = vld [vmem:[#allocation5 + $0x5e0] ss:$72 sps:$4 sm:$0xff]  }
 0x364   : > { %6539 = vmatpush1.bf16.msra.mxu1 %v10419_v49  ;;  %6499 = vmatprep.subr.bf16.mxu0 %v10424_v52  ;;  %v10479_v49 = vld [vmem:[#allocation5 + $0xee0] ss:$72 sps:$4 sm:$0xff]   ;;  %v10484_v52 = vld [vmem:[#allocation5 + $0x554] ss:$72 sps:$4 sm:$0xff]  }
 0x365   : > { %6540 = vmatprep.subr.bf16.mxu1 %v10427_v2  ;;  %v10487_v2 = vld [vmem:[#allocation5 + $0xe54] ss:$72 sps:$4 sm:$0xff]  }
 0x367   : > { %6500 = vmatpush1.bf16.msra.mxu0 %v10422_v4  ;;  %v10482_v4 = vld [vmem:[#allocation5 + $0x550] ss:$72 sps:$4 sm:$0xff]  }
 0x368   : > { %6541 = vmatpush1.bf16.msra.mxu1 %v10425_v10  ;;  %6501 = vmatprep.subr.bf16.mxu0 %v10430_v12  ;;  %v10485_v10 = vld [vmem:[#allocation5 + $0xe50] ss:$72 sps:$4 sm:$0xff]   ;;  %v10490_v12 = vld [vmem:[#allocation5 + $0x4c4] ss:$72 sps:$4 sm:$0xff]  }
 0x369   : > { %6542 = vmatprep.subr.bf16.mxu1 %v10433_v13  ;;  %v10493_v13 = vld [vmem:[#allocation5 + $0xdc4] ss:$72 sps:$4 sm:$0xff]  }
 0x36b   : > { %6502 = vmatpush1.bf16.msra.mxu0 %v10428_v32  ;;  %v10488_v32 = vld [vmem:[#allocation5 + $0x4c0] ss:$72 sps:$4 sm:$0xff]  }
 0x36c   : > { %6543 = vmatpush1.bf16.msra.mxu1 %v10431_v15  ;;  %6503 = vmatprep.subr.bf16.mxu0 %v10436_v16  ;;  %v10491_v15 = vld [vmem:[#allocation5 + $0xdc0] ss:$72 sps:$4 sm:$0xff]   ;;  %v10496_v16 = vld [vmem:[#allocation5 + $0x1634] ss:$72 sps:$4 sm:$0xff]  }
 0x36d   : > { %6544 = vmatprep.subr.bf16.mxu1 %v10439_v53  ;;  %v10494_v53 = vld [vmem:[#allocation5 + $0x1630] ss:$72 sps:$4 sm:$0xff]  }
 0x36f   : > { %6504 = vmatpush1.bf16.msra.mxu0 %v10434_v7  ;;  %v10749_v7 = vmov 0.0  }
 0x370   : > { %6545 = vmatpush1.bf16.msra.mxu1 %v10437_v18  ;;  %6505 = vmatprep.subr.bf16.mxu0 %v10442_v23  ;;  %v10499_v18 = vld [vmem:[#allocation5 + $0x15a4] ss:$72 sps:$4 sm:$0xff]   ;;  %v1152_v23 = vrot.slane %v11044_v59, %v1119_v3  ;;  %v10502_v3 = vld [vmem:[#allocation5 + $0x1514] ss:$72 sps:$4 sm:$0xff]  }
 0x371   : > { %6546 = vmatprep.subr.bf16.mxu1 %v10445_v25  ;;  %v6622_v25 = vsel %vm6617_vm0, %v11032_v60, 0 }
 0x373   : > { %6506 = vmatpush1.bf16.msra.mxu0 %v10440_v27 }
 0x374   : > { %6547 = vmatpush1.bf16.msra.mxu1 %v10443_v28  ;;  %6507 = vmatprep.subr.bf16.mxu0 %v10448_v29  ;;  %v10497_v29 = vld [vmem:[#allocation5 + $0x15a0] ss:$72 sps:$4 sm:$0xff]  }
 0x375   : > { %6548 = vmatprep.subr.bf16.mxu1 %v10451_v30 }
 0x377   : > { %6508 = vmatpush2.bf16.msra.mxu0 %v10446_v33 }
 0x378   : > { %6549 = vmatpush2.bf16.msra.mxu1 %v10449_v38  ;;  %6509 = vmatprep.subr.bf16.mxu0 %v10454_v39 }
 0x379   : > { %6550 = vmatprep.subr.bf16.mxu1 %v10457_v20  ;;  %v10505_v20 = vld [vmem:[#allocation5 + $0x1484] ss:$72 sps:$4 sm:$0xff]  }
 0x37b   : > { %6510 = vmatpush2.bf16.msra.mxu0 %v10452_v40 }
 0x37c   : > { %6551 = vmatpush2.bf16.msra.mxu1 %v10455_v21  ;;  %6511 = vmatprep.subr.bf16.mxu0 %v10460_v42  ;;  %v10503_v21 = vld [vmem:[#allocation5 + $0x1480] ss:$72 sps:$4 sm:$0xff]   ;;  %v10506_v42 = vld [vmem:[#allocation5 + $0x13f0] ss:$72 sps:$4 sm:$0xff]  }
 0x37d   : > { %6552 = vmatprep.subr.bf16.mxu1 %v10463_v43  ;;  %v10511_v43 = vld [vmem:[#allocation5 + $0x1364] ss:$72 sps:$4 sm:$0xff]  }
 0x37f   : > { %6512 = vmatpush2.bf16.msra.mxu0 %v10458_v46  ;;  %v10509_v46 = vld [vmem:[#allocation5 + $0x1360] ss:$72 sps:$4 sm:$0xff]  }
 0x380   : > { %6553 = vmatpush2.bf16.msra.mxu1 %v10461_v45  ;;  %6513 = vmatprep.subr.bf16.mxu0 %v10466_v47  ;;  %v10514_v45 = vld [vmem:[#allocation5 + $0x12d4] ss:$72 sps:$4 sm:$0xff]   ;;  %v10512_v47 = vld [vmem:[#allocation5 + $0x12d0] ss:$72 sps:$4 sm:$0xff]  }
 0x381   : > { %6554 = vmatprep.subr.bf16.mxu1 %v10469_v48  ;;  %v10517_v48 = vld [vmem:[#allocation5 + $0x1244] ss:$72 sps:$4 sm:$0xff]  }
 0x383   : > { %6514 = vmatpush2.bf16.msra.mxu0 %v10464_v50  ;;  %v10520_v50 = vld [vmem:[#allocation5 + $0x1ab4] ss:$72 sps:$4 sm:$0xff]  }
 0x384   : > { %6555 = vmatpush2.bf16.msra.mxu1 %v10467_v41  ;;  %6515 = vmatprep.subr.bf16.mxu0 %v10472_v56  ;;  %v10518_v41 = vld [vmem:[#allocation5 + $0x1ab0] ss:$72 sps:$4 sm:$0xff]   ;;  %v10523_v56 = vld [vmem:[#allocation5 + $0x1a24] ss:$72 sps:$4 sm:$0xff]  }
 0x385   : > { %6556 = vmatprep.subr.bf16.mxu1 %v10475_v57  ;;  %v10521_v57 = vld [vmem:[#allocation5 + $0x1a20] ss:$72 sps:$4 sm:$0xff]  }
 0x387   : > { %6516 = vmatpush2.bf16.msra.mxu0 %v10470_v11  ;;  %v10526_v11 = vld [vmem:[#allocation5 + $0x1994] ss:$72 sps:$4 sm:$0xff]  }
 0x388   : > { %6557 = vmatpush2.bf16.msra.mxu1 %v10473_v61  ;;  %6517 = vmatprep.subr.bf16.mxu0 %v10478_v63  ;;  %v10524_v61 = vld [vmem:[#allocation5 + $0x1990] ss:$72 sps:$4 sm:$0xff]   ;;  %v10529_v63 = vld [vmem:[#allocation5 + $0x1904] ss:$72 sps:$4 sm:$0xff]  }
 0x389   : > { %6558 = vmatprep.subr.bf16.mxu1 %v10481_v24  ;;  %v10527_v24 = vld [vmem:[#allocation5 + $0x1900] ss:$72 sps:$4 sm:$0xff]  }
 0x38b   : > { %6518 = vmatpush2.bf16.msra.mxu0 %v10476_v1  ;;  %v10532_v1 = vld [vmem:[#allocation5 + $0x1874] ss:$72 sps:$4 sm:$0xff]  }
 0x38c   : > { %6559 = vmatpush2.bf16.msra.mxu1 %v10479_v49  ;;  %6519 = vmatprep.subr.bf16.mxu0 %v10484_v52  ;;  %v10530_v49 = vld [vmem:[#allocation5 + $0x1870] ss:$72 sps:$4 sm:$0xff]   ;;  %v10535_v52 = vld [vmem:[#allocation5 + $0x17e4] ss:$72 sps:$4 sm:$0xff]  }
 0x38d   : > { %6560 = vmatprep.subr.bf16.mxu1 %v10487_v2  ;;  %v10533_v2 = vld [vmem:[#allocation5 + $0x17e0] ss:$72 sps:$4 sm:$0xff]  }
 0x38f   : > { %6520 = vmatpush2.bf16.msra.mxu0 %v10482_v4  ;;  %v10538_v4 = vld [vmem:[#allocation5 + $0x1754] ss:$72 sps:$4 sm:$0xff]  }
 0x390   : > { %6561 = vmatpush2.bf16.msra.mxu1 %v10485_v10  ;;  %6521 = vmatprep.subr.bf16.mxu0 %v10490_v12  ;;  %v10536_v10 = vld [vmem:[#allocation5 + $0x1750] ss:$72 sps:$4 sm:$0xff]   ;;  %v10541_v12 = vld [vmem:[#allocation5 + $0x16c4] ss:$72 sps:$4 sm:$0xff]  }
 0x391   : > { %6562 = vmatprep.subr.bf16.mxu1 %v10493_v13  ;;  %v10592_v13 = vld [vmem:[#allocation7 + $0x8] sm:$0xff] }
 0x393   : > { %6522 = vmatpush2.bf16.msra.mxu0 %v10488_v32  ;;  %v1148_v32 = vrot.slane %v10592_v13, %v1115_v62 }
 0x394   : > { %6563 = vmatpush2.bf16.msra.mxu1 %v10491_v15  ;;  %6573 = vmatprep.subr.bf16.mxu0 %v10496_v16  ;;  %v10539_v15 = vld [vmem:[#allocation5 + $0x16c0] ss:$72 sps:$4 sm:$0xff]  }
 0x395   : > { %9026 = vmatprep.subr.bf16.mxu1 %v10749_v7 }
 0x396   : > { %v11094_v27 = vpop.f32.mrf.mxu0  ;;  %6524 = vmatmul.mubr.bf16.vlgmr.msra.gmra.mxu0 %v10916_v8 }
 0x397   : > { %v11096_v28 = vpop.f32.mrf.mxu1  ;;  %6565 = vmatmul.mubr.bf16.vlgmr.msra.gmra.mxu1 %v10918_v9  ;;  %6574 = vmatpush1.bf16.msra.mxu0 %v10494_v53  ;;  %v10500_v9 = vld [vmem:[#allocation5 + $0x1510] ss:$72 sps:$4 sm:$0xff]   ;;  %v6280_v16 = vadd.f32 %v11094_v27, %v1148_v32  ;;  %v11115_v53 = vpack.c.bf16 %v11063_v37, %v11063_v37 }
 0x398   : > { %9027 = vmatpush3.bf16.xpose.msra.mxu1 %v6622_v25  ;;  %v6281_v30 = vpop.f32.mrf.mxu0  ;;  %6575 = vmatprep.subr.bf16.mxu0 %v10499_v18 }
 0x399   : > { %v6322_v33 = vpop.f32.mrf.mxu1  ;;  %9028 = vmatprep.mubr.msk.bf16.mxu1 %vm10750_vm1, %v10749_v7  ;;  %v6282_v60 = vadd.f32 %v6281_v30, %v1152_v23  ;;  %6605 = vmatprep.mubr.bf16.mxu0 %v10924_v35  ;;  %v10508_v35 = vld [vmem:[#allocation5 + $0x13f4] ss:$72 sps:$4 sm:$0xff]   ;;  %v6321_v18 = vadd.f32 %v11096_v28, %v6280_v16  ;;  %v7077_v23 = vsel %vm6617_vm0, %v11115_v53, 0 }
 0x39a   : > { %9032 = vmatprep.subr.bf16.mxu1 %v10749_v7  ;;  %v6283_v8 = vpop.f32.mrf.mxu0 }
 0x39b   : > { %v6324_v59 = vpop.f32.mrf.mxu1  ;;  %v11104_v38 = vadd.f32 %v6322_v33, %v6282_v60  ;;  %6576 = vmatpush1.bf16.msra.mxu0 %v10497_v29  ;;  %v11134_v60 = vpack.c.bf16 %v10984_v6, %v10984_v6 }
 0x39c   : > { %6577 = vmatprep.subr.bf16.mxu0 %v10502_v3  ;;  %v6284_v40 = vpop.f32.mrf.mxu0 }
 0x39d   : > { %v6325_v39 = vpop.f32.mrf.mxu1 }
 0x39f   : > { %9029 = vmatmul.mubr.msk.bf16.vlgmr.msra.gmra.mxu1 %vm6617_vm0, %v11040_v5  ;;  %6578 = vmatpush1.bf16.msra.mxu0 %v10500_v9  ;;  %v10515_v5 = vld [vmem:[#allocation5 + $0x1240] ss:$72 sps:$4 sm:$0xff]   ;;  %v1160_v9 = vrot.slane %v10592_v13, %v1127_v22 }
 0x3a0   : > { %9034 = vmatprep.mubr.msk.bf16.mxu1 %vm10750_vm1, %v10749_v7  ;;  %6579 = vmatprep.subr.bf16.mxu0 %v10505_v20 }
 0x3a3   : > { %6580 = vmatpush1.bf16.msra.mxu0 %v10503_v21 }
 0x3a4   : > { %6581 = vmatprep.subr.bf16.mxu0 %v10508_v35 }
 0x3a7   : > { %6582 = vmatpush1.bf16.msra.mxu0 %v10506_v42 }
 0x3a8   : > { %6583 = vmatprep.subr.bf16.mxu0 %v10511_v43 }
 0x3ab   : > { %6584 = vmatpush1.bf16.msra.mxu0 %v10509_v46 }
 0x3ac   : > { %6585 = vmatprep.subr.bf16.mxu0 %v10514_v45 }
 0x3af   : > { %6586 = vmatpush1.bf16.msra.mxu0 %v10512_v47 }
 0x3b0   : > { %6587 = vmatprep.subr.bf16.mxu0 %v10517_v48 }
 0x3b3   : > { %6588 = vmatpush1.bf16.msra.mxu0 %v10515_v5 }
 0x3b4   : > { %6589 = vmatprep.subr.bf16.mxu0 %v10520_v50 }
 0x3b7   : > { %6590 = vmatpush2.bf16.msra.mxu0 %v10518_v41 }
 0x3b8   : > { %6591 = vmatprep.subr.bf16.mxu0 %v10523_v56 }
 0x3bb   : > { %6592 = vmatpush2.bf16.msra.mxu0 %v10521_v57 }
 0x3bc   : > { %6593 = vmatprep.subr.bf16.mxu0 %v10526_v11 }
 0x3bf   : > { %6594 = vmatpush2.bf16.msra.mxu0 %v10524_v61 }
 0x3c0   : > { %6595 = vmatprep.subr.bf16.mxu0 %v10529_v63 }
 0x3c3   : > { %6596 = vmatpush2.bf16.msra.mxu0 %v10527_v24 }
 0x3c4   : > { %6597 = vmatprep.subr.bf16.mxu0 %v10532_v1 }
 0x3c7   : > { %6598 = vmatpush2.bf16.msra.mxu0 %v10530_v49 }
 0x3c8   : > { %6599 = vmatprep.subr.bf16.mxu0 %v10535_v52 }
 0x3cb   : > { %6600 = vmatpush2.bf16.msra.mxu0 %v10533_v2 }
 0x3cc   : > { %6601 = vmatprep.subr.bf16.mxu0 %v10538_v4 }
 0x3cf   : > { %6602 = vmatpush2.bf16.msra.mxu0 %v10536_v10 }
 0x3d0   : > { %6603 = vmatprep.subr.bf16.mxu0 %v10541_v12 }
 0x3d3   : > { %6604 = vmatpush2.bf16.msra.mxu0 %v10539_v15 }
 0x3d4   : > { %9074 = vmatprep.subr.bf16.mxu0 %v10749_v7 }
 0x3d6   : > { %v6361_v25 = vpop.f32.mrf.mxu0  ;;  %6606 = vmatmul.mubr.bf16.vlgmr.msra.gmra.mxu0 %v10928_v17 }
 0x3d7   : > { %v6402_v29 = vpop.f32.mrf.mxu1  ;;  %v6362_v62 = vadd.f32 %v6361_v25, %v6321_v18  ;;  %9075 = vmatpush3.bf16.xpose.msra.mxu0 %v7077_v23  ;;  %9076 = vmatprep.mubr.msk.bf16.mxu0 %vm10750_vm1, %v10749_v7 }
 0x3d8   : > { %v6363_v37 = vpop.f32.mrf.mxu0  ;;  %9086 = vmatprep.subr.bf16.mxu0 %v10749_v7 }
 0x3d9   : > { %v6404_v27 = vpop.f32.mrf.mxu1  ;;  %v11125_v30 = vpack.c.bf16 %v6362_v62, %v6362_v62  ;;  %v11128_v28 = vadd.f32 %v6363_v37, %v11104_v38  ;;  %v1156_v38 = vrot.slane %v10592_v13, %v1123_v19  ;;  %v1093_v19 = vld [vmem:[#allocation7 + $0x10] sm:$0x3] }
 0x3da   : > { %v6365_v3 = vpop.f32.mrf.mxu0  ;;  %v6405_v40 = vadd.f32 %v6404_v27, %v1160_v9  ;;  %v1164_v26 = vrot.slane %v1093_v19, %v10941_v31  ;;  %v1168_v22 = vrot.slane %v1093_v19, %v10944_v34 }
 0x3db   : > { %v6406_v33 = vpop.f32.mrf.mxu1  ;;  %v6682_v17 = vsel %vm6680_vm2, %v11125_v30, 0  ;;  %v6403_v39 = vadd.f32 %v6402_v29, %v1156_v38 }
 0x3dc   : > { %9033 = vmatpush3.bf16.msra.mxu1 %v6682_v17  ;;  %v6366_v8 = vpop.f32.mrf.mxu0 }
 0x3dd   : > { %v6407_v59 = vpop.f32.mrf.mxu1  ;;  %9038 = vmatprep.subr.bf16.mxu1 %v10749_v7 }
 0x3de   : > { %9077 = vmatmul.mubr.msk.bf16.vlgmr.msra.gmra.mxu0 %vm6617_vm0, %v11134_v60 }
 0x3df   : > { %9088 = vmatprep.mubr.msk.bf16.mxu0 %vm10750_vm1, %v10749_v7 }
 0x416   : > { %v6443_v6 = vpop.f32.mrf.mxu0 }
 0x417   : > { %v6484_v20 = vpop.f32.mrf.mxu1  ;;  %v6444_v21 = vadd.f32 %v6443_v6, %v6403_v39  ;;  %v6730_v6 = vpop.permute.xlu1 %6729 }
 0x418   : > { %v6445_v35 = vpop.f32.mrf.mxu0 }
 0x419   : > { %v6486_v42 = vpop.f32.mrf.mxu1  ;;  %v11145_v43 = vadd.f32 %v6484_v20, %v6444_v21  ;;  %v6446_v46 = vadd.f32 %v6445_v35, %v6405_v40  ;;  %v6735_v40 = vsel %vm6617_vm0, %v6730_v6, 0 }
 0x41a   : > { %v6447_v47 = vpop.f32.mrf.mxu0 }
 0x41b   : > { %v6488_v45 = vpop.f32.mrf.mxu1  ;;  %v11147_v48 = vadd.f32 %v6486_v42, %v6446_v46  ;;  %v6727_v21 = vpop.permute.xlu1 %6726 }
 0x41c   : > { %v6448_v50 = vpop.f32.mrf.mxu0 }
 0x41d   : > { %v6489_v5 = vpop.f32.mrf.mxu1 }
 0x456   : > { %v6525_v41 = vpop.f32.mrf.mxu0 }
 0x457   : > { %v6566_v56 = vpop.f32.mrf.mxu1  ;;  %v6526_v57 = vadd.f32 %v6525_v41, %v1164_v26 }
 0x458   : > { %v6527_v11 = vpop.f32.mrf.mxu0 }
 0x459   : > { %v6568_v61 = vpop.f32.mrf.mxu1  ;;  %v6567_v63 = vadd.f32 %v6566_v56, %v6526_v57  ;;  %v6528_v24 = vadd.f32 %v6527_v11, %v1168_v22 }
 0x45a   : > { %v6529_v49 = vpop.f32.mrf.mxu0 }
 0x45b   : > { %v6570_v1 = vpop.f32.mrf.mxu1  ;;  %v6569_v52 = vadd.f32 %v6568_v61, %v6528_v24 }
 0x45c   : > { %v6530_v4 = vpop.f32.mrf.mxu0 }
 0x45d   : > { %v6571_v2 = vpop.f32.mrf.mxu1  ;;  %v11188_v4 = vpack.c.bf16 %v11128_v28, %v11128_v28 }
 0x45f   : > { %v6658_v10 = vpop.f32.mrf.mxu1 }
 0x460   : > { %v6665_v12 = vsel %vm6664_vm3, %v6658_v10, -inf }
 0x461   : > { %6666 = vmax.xlane.f32.xlu0 %v6665_v12  ;;  %v9030_v31 = vpop.f32.mrf.mxu1 }
 0x463   : > { %v6661_v13 = vpop.f32.mrf.mxu1 }
 0x465   : > { %v9031_v34 = vpop.f32.mrf.mxu1 }
 0x496   : > { %v6607_v32 = vpop.f32.mrf.mxu0 }
 0x497   : > { %v11152_v15 = vadd.f32 %v6607_v32, %v6567_v63 }
 0x498   : > { %v6609_v16 = vpop.f32.mrf.mxu0 }
 0x499   : > { %v11154_v18 = vadd.f32 %v6609_v16, %v6569_v52 }
 0x49a   : > { %v6611_v23 = vpop.f32.mrf.mxu0 }
 0x49c   : > { %v6612_v25 = vpop.f32.mrf.mxu0 }
 0x49d   : > { %v11204_v25 = vpack.c.bf16 %v11086_v51, %v11086_v51  ;;  %v7297_v51 = vpack.c.bf16 %v11068_v44, %v11068_v44  ;;  %v7748_v44 = vpack.c.bf16 %v11016_v0, %v11016_v0 }
 0x49e   : > { %v11156_v29 = vpop.f32.mrf.mxu0 }
 0x49f   : > { %v7303_v0 = vsel %vm6617_vm0, %v7297_v51, 0 }
 0x4a0   : > { %v9078_v62 = vpop.f32.mrf.mxu0 }
 0x4a2   : > { %v7116_v37 = vpop.f32.mrf.mxu0 }
 0x4a4   : > { %v9079_v27 = vpop.f32.mrf.mxu0 }
 0x4ea   : > { %v6667_v33 = vpop.xlane.xlu0 %6666 }
 0x4eb   : > { %v6668_v3 = vsub.f32 %v6658_v10, %v6667_v33  ;;  %v6844_v10 = vpack.c.bf16 %v10966_v14, %v10966_v14 }
 0x4ed   : > { %v6669_v17 = vmul.f32 1.442695, %v6668_v3 }
 0x4ef   : > { %10542 = vpow2.f32 %v6669_v17  ;;  %v7296_v17 = vpack.c.bf16 %v10988_v54, %v10988_v54  ;;  %v7119_v54 = vsel %vm6664_vm3, %v11156_v29, -inf }
 0x4fc   : > { %v10543_v59 = vpop.eup %10542 }
 0x4fd   : > { %v6671_v8 = vsel %vm6664_vm3, %v10543_v59, 0.0 }
 0x4fe   : > { %6672 = vadd.xlane.f32.xlu0 %v6671_v8 }
 0x587   : > { %v6673_v38 = vpop.xlane.xlu0 %6672 }
 0x588   : > { %10544 = vrcp.f32 %v6673_v38 }
 0x595   : > { %v10545_v9 = vpop.eup %10544 }
 0x596   : > { %v6675_v39 = vmul.f32 %v10545_v9, %v10543_v59  ;;  %v7523_v59 = vpack.c.bf16 %v11082_v36, %v11082_v36 }
 0x598   : > { %v6676_v20 = vpack.c.bf16 %v6675_v39, %v6675_v39 }
 0x59a   : > { %9035 = vmatmul.mubr.msk.bf16.vlgmr.msra.gmra.mxu1 %vm6664_vm3, %v6676_v20 }
 0x59b   : > { %9039 = vmatpush3.bf16.xpose.msra.mxu1 %v6735_v40  ;;  %9040 = vmatprep.mubr.msk.bf16.mxu1 %vm10750_vm1, %v10749_v7 }
 0x59c   : > { %9044 = vmatprep.subr.bf16.mxu1 %v10749_v7 }
 0x5a2   : > { %9041 = vmatmul.mubr.msk.bf16.vlgmr.msra.gmra.mxu1 %vm6617_vm0, %v6727_v21 }
 0x5a3   : > { %9046 = vmatprep.mubr.msk.bf16.mxu1 %vm10750_vm1, %v10749_v7 }
 0x65a   : > { %v6718_v35 = vpop.f32.mrf.mxu1 }
 0x65b   : > { %6724 = vst.msk [vmem:[%s11169_s20] sm:$0xff] %vm6617_vm0, %v6718_v35 }
 0x65c   : > { %v9036_v42 = vpop.f32.mrf.mxu1 }
 0x65e   : > { %v6721_v46 = vpop.f32.mrf.mxu1 }
 0x65f   : > { %v7529_v46 = vsel %vm6617_vm0, %v7523_v59, 0 }
 0x660   : > { %v9037_v45 = vpop.f32.mrf.mxu1 }
 0x662   : > { %v6771_v47 = vpop.f32.mrf.mxu1 }
 0x663   : > { %v6777_v5 = vsel %vm6664_vm3, %v6771_v47, -inf }
 0x664   : > { %6778 = vmax.xlane.f32.xlu0 %v6777_v5  ;;  %v9042_v50 = vpop.f32.mrf.mxu1 }
 0x665   : > { %v7755_v50 = vsel %vm6617_vm0, %v11204_v25, 0 }
 0x666   : > { %v6774_v19 = vpop.f32.mrf.mxu1 }
 0x668   : > { %v9043_v26 = vpop.f32.mrf.mxu1 }
 0x67a   : > { %6790 = vrot.lane.b32.xlu0 %v11125_v30, %s10748_s18  ;;  %v6845_v30 = vpack.c.bf16 %v11034_v58, %v11034_v58  ;;  %v6909_v58 = vsel %vm6680_vm2, %v11188_v4, 0 }
 0x67c   : > { %v6851_v2 = vsel %vm6617_vm0, %v6845_v30, 0 }
 0x6ed   : > { %v6779_v22 = vpop.xlane.xlu0 %6778 }
 0x6ee   : > { %v6780_v41 = vsub.f32 %v6771_v47, %v6779_v22 }
 0x6f0   : > { %v6781_v56 = vmul.f32 1.442695, %v6780_v41 }
 0x6f1   : > { %v6791_v57 = vpop.permute.xlu0 %6790 }
 0x6f2   : > { %10546 = vpow2.f32 %v6781_v56  ;;  %v6796_v11 = vsel %vm6680_vm2, %v6791_v57, 0 }
 0x6f3   : > { %9045 = vmatpush3.bf16.msra.mxu1 %v6796_v11 }
 0x6f4   : > { %9050 = vmatprep.subr.bf16.mxu1 %v10749_v7 }
 0x6ff   : > { %v10547_v61 = vpop.eup %10546 }
 0x700   : > { %v6783_v63 = vsel %vm6664_vm3, %v10547_v61, 0.0 }
 0x701   : > { %6784 = vadd.xlane.f32.xlu1 %v6783_v63 }
 0x78a   : > { %v6785_v24 = vpop.xlane.xlu1 %6784 }
 0x78b   : > { %10548 = vrcp.f32 %v6785_v24 }
 0x798   : > { %v10549_v1 = vpop.eup %10548 }
 0x799   : > { %v6787_v49 = vmul.f32 %v10549_v1, %v10547_v61 }
 0x79b   : > { %v6788_v52 = vpack.c.bf16 %v6787_v49, %v6787_v49 }
 0x79d   : > { %9047 = vmatmul.mubr.msk.bf16.vlgmr.msra.gmra.mxu1 %vm6664_vm3, %v6788_v52 }
 0x79e   : > { %9051 = vmatpush3.bf16.xpose.msra.mxu1 %v6851_v2  ;;  %9052 = vmatprep.mubr.msk.bf16.mxu1 %vm10750_vm1, %v10749_v7 }
 0x79f   : > { %9056 = vmatprep.subr.bf16.mxu1 %v10749_v7 }
 0x7a5   : > { %9053 = vmatmul.mubr.msk.bf16.vlgmr.msra.gmra.mxu1 %vm6617_vm0, %v6844_v10 }
 0x7a6   : > { %9057 = vmatpush3.bf16.msra.mxu1 %v6909_v58  ;;  %9058 = vmatprep.mubr.msk.bf16.mxu1 %vm10750_vm1, %v10749_v7 }
 0x7a7   : > { %9062 = vmatprep.subr.bf16.mxu1 %v10749_v7 }
 0x85d   : > { %v11198_v12 = vpop.f32.mrf.mxu1 }
 0x85f   : > { %v9048_v31 = vpop.f32.mrf.mxu1 }
 0x861   : > { %v6835_v13 = vpop.f32.mrf.mxu1 }
 0x863   : > { %v9049_v28 = vpop.f32.mrf.mxu1 }
 0x865   : > { %v6887_v34 = vpop.f32.mrf.mxu1 }
 0x866   : > { %v6893_v32 = vsel %vm6664_vm3, %v6887_v34, -inf }
 0x867   : > { %6894 = vmax.xlane.f32.xlu0 %v6893_v32  ;;  %v9054_v14 = vpop.f32.mrf.mxu1 }
 0x869   : > { %v6890_v16 = vpop.f32.mrf.mxu1 }
 0x86b   : > { %v9055_v23 = vpop.f32.mrf.mxu1 }
 0x87d   : > { %6953 = vrot.lane.b32.xlu0 %v6844_v10, %s10748_s18 }
 0x881   : > { %7860 = vrot.lane.b32.xlu0 %v11204_v25, %s10748_s18 }
 0x8f0   : > { %v6895_v62 = vpop.xlane.xlu0 %6894 }
 0x8f1   : > { %v6896_v37 = vsub.f32 %v6887_v34, %v6895_v62 }
 0x8f3   : > { %v6897_v27 = vmul.f32 1.442695, %v6896_v37 }
 0x8f4   : > { %v6954_v35 = vpop.permute.xlu0 %6953 }
 0x8f5   : > { %10550 = vpow2.f32 %v6897_v27 }
 0x8f8   : > { %v7861_v19 = vpop.permute.xlu0 %7860 }
 0x8f9   : > { %v7866_v26 = vsel %vm6617_vm0, %v7861_v19, 0 }
 0x902   : > { %v10551_v33 = vpop.eup %10550 }
 0x903   : > { %v6899_v3 = vsel %vm6664_vm3, %v10551_v33, 0.0 }
 0x904   : > { %6900 = vadd.xlane.f32.xlu1 %v6899_v3 }
 0x915   : > { %6956 = vrot.lane.b32.xlu1 %v6845_v30, %s10748_s18 }
 0x919   : > { %7182 = vrot.lane.b32.xlu1 %v11115_v53, %s10748_s18  ;;  %v7522_v53 = vpack.c.bf16 %v11011_v55, %v11011_v55 }
 0x91d   : > { %7179 = vrot.lane.b32.xlu1 %v11134_v60, %s10748_s18 }
 0x921   : > { %7408 = vrot.lane.b32.xlu1 %v7297_v51, %s10748_s18 }
 0x925   : > { %7405 = vrot.lane.b32.xlu1 %v7296_v17, %s10748_s18 }
 0x929   : > { %7634 = vrot.lane.b32.xlu1 %v7523_v59, %s10748_s18 }
 0x92d   : > { %7631 = vrot.lane.b32.xlu1 %v7522_v53, %s10748_s18 }
 0x931   : > { %7857 = vrot.lane.b32.xlu1 %v7748_v44, %s10748_s18 }
 0x955   : > { %7120 = vmax.xlane.f32.xlu1 %v7119_v54 }
 0x98d   : > { %v6901_v60 = vpop.xlane.xlu1 %6900 }
 0x98e   : > { %10552 = vrcp.f32 %v6901_v60 }
 0x991   : > { %v6957_v8 = vpop.permute.xlu1 %6956 }
 0x992   : > { %v6962_v20 = vsel %vm6617_vm0, %v6957_v8, 0 }
 0x995   : > { %v7183_v36 = vpop.permute.xlu1 %7182 }
 0x996   : > { %v7188_v38 = vsel %vm6617_vm0, %v7183_v36, 0 }
 0x997   : > { %9087 = vmatpush3.bf16.xpose.msra.mxu0 %v7188_v38 }
 0x998   : > { %9098 = vmatprep.subr.bf16.mxu0 %v10749_v7 }
 0x999   : > { %v7180_v39 = vpop.permute.xlu1 %7179 }
 0x99b   : > { %v10553_v55 = vpop.eup %10552 }
 0x99c   : > { %v6903_v9 = vmul.f32 %v10553_v55, %v10551_v33 }
 0x99d   : > { %v7409_v40 = vpop.permute.xlu1 %7408 }
 0x99e   : > { %9089 = vmatmul.mubr.msk.bf16.vlgmr.msra.gmra.mxu0 %vm6617_vm0, %v7180_v39  ;;  %v6904_v6 = vpack.c.bf16 %v6903_v9, %v6903_v9  ;;  %v7414_v21 = vsel %vm6617_vm0, %v7409_v40, 0 }
 0x99f   : > { %9099 = vmatpush3.bf16.xpose.msra.mxu0 %v7303_v0  ;;  %9100 = vmatprep.mubr.msk.bf16.mxu0 %vm10750_vm1, %v10749_v7 }
 0x9a0   : > { %9059 = vmatmul.mubr.msk.bf16.vlgmr.msra.gmra.mxu1 %vm6664_vm3, %v6904_v6  ;;  %9110 = vmatprep.subr.bf16.mxu0 %v10749_v7 }
 0x9a1   : > { %9063 = vmatpush3.bf16.xpose.msra.mxu1 %v6962_v20  ;;  %9064 = vmatprep.mubr.msk.bf16.mxu1 %vm10750_vm1, %v10749_v7  ;;  %v7406_v42 = vpop.permute.xlu1 %7405 }
 0x9a2   : > { %9068 = vmatprep.subr.bf16.mxu1 %v10749_v7 }
 0x9a5   : > { %v7635_v45 = vpop.permute.xlu1 %7634 }
 0x9a6   : > { %9101 = vmatmul.mubr.msk.bf16.vlgmr.msra.gmra.mxu0 %vm6617_vm0, %v7296_v17  ;;  %v7640_v47 = vsel %vm6617_vm0, %v7635_v45, 0 }
 0x9a7   : > { %9111 = vmatpush3.bf16.xpose.msra.mxu0 %v7414_v21  ;;  %9112 = vmatprep.mubr.msk.bf16.mxu0 %vm10750_vm1, %v10749_v7 }
 0x9a8   : > { %9065 = vmatmul.mubr.msk.bf16.vlgmr.msra.gmra.mxu1 %vm6617_vm0, %v6954_v35  ;;  %9122 = vmatprep.subr.bf16.mxu0 %v10749_v7 }
 0x9a9   : > { %9070 = vmatprep.mubr.msk.bf16.mxu1 %vm10750_vm1, %v10749_v7  ;;  %v7632_v5 = vpop.permute.xlu1 %7631 }
 0x9ad   : > { %v7858_v22 = vpop.permute.xlu1 %7857 }
 0x9ae   : > { %9113 = vmatmul.mubr.msk.bf16.vlgmr.msra.gmra.mxu0 %vm6617_vm0, %v7406_v42 }
 0x9af   : > { %9123 = vmatpush3.bf16.xpose.msra.mxu0 %v7529_v46  ;;  %9124 = vmatprep.mubr.msk.bf16.mxu0 %vm10750_vm1, %v10749_v7 }
 0x9b0   : > { %9134 = vmatprep.subr.bf16.mxu0 %v10749_v7 }
 0x9b6   : > { %9125 = vmatmul.mubr.msk.bf16.vlgmr.msra.gmra.mxu0 %vm6617_vm0, %v7522_v53 }
 0x9b7   : > { %9135 = vmatpush3.bf16.xpose.msra.mxu0 %v7640_v47  ;;  %9136 = vmatprep.mubr.msk.bf16.mxu0 %vm10750_vm1, %v10749_v7 }
 0x9b8   : > { %9146 = vmatprep.subr.bf16.mxu0 %v10749_v7 }
 0x9be   : > { %9137 = vmatmul.mubr.msk.bf16.vlgmr.msra.gmra.mxu0 %vm6617_vm0, %v7632_v5 }
 0x9bf   : > { %9147 = vmatpush3.bf16.xpose.msra.mxu0 %v7755_v50  ;;  %9148 = vmatprep.mubr.msk.bf16.mxu0 %vm10750_vm1, %v10749_v7 }
 0x9c0   : > { %9158 = vmatprep.subr.bf16.mxu0 %v10749_v7 }
 0x9c6   : > { %9149 = vmatmul.mubr.msk.bf16.vlgmr.msra.gmra.mxu0 %vm6617_vm0, %v7748_v44 }
 0x9c7   : > { %9159 = vmatpush3.bf16.xpose.msra.mxu0 %v7866_v26  ;;  %9160 = vmatprep.mubr.msk.bf16.mxu0 %vm10750_vm1, %v10749_v7 }
 0x9ce   : > { %9161 = vmatmul.mubr.msk.bf16.vlgmr.msra.gmra.mxu0 %vm6617_vm0, %v7858_v22 }
 0x9de   : > { %v7121_v33 = vpop.xlane.xlu1 %7120 }
 0x9df   : > { %v7122_v17 = vsub.f32 %v11156_v29, %v7121_v33 }
 0x9e1   : > { %v7123_v44 = vmul.f32 1.442695, %v7122_v17 }
 0x9e3   : > { %10554 = vpow2.f32 %v7123_v44  ;;  %v11338_v44 = vpack.c.bf16 %v11154_v18, %v11154_v18 }
 0x9f0   : > { %v11292_v20 = vpop.eup %10554 }
 0x9f1   : > { %v7125_v35 = vsel %vm6664_vm3, %v11292_v20, 0.0 }
 0xa5e   : > { %v11272_v41 = vpop.f32.mrf.mxu0 }
 0xa5f   : > { %v7230_v28 = vsel %vm6664_vm3, %v11272_v41, -inf }
 0xa60   : > { %v6945_v56 = vpop.f32.mrf.mxu1  ;;  %v9090_v57 = vpop.f32.mrf.mxu0 }
 0xa61   : > { %6951 = vst.msk [vmem:[%s11169_s20 + $0x8] sm:$0xff] %vm6617_vm0, %v6945_v56 }
 0xa62   : > { %v9060_v11 = vpop.f32.mrf.mxu1  ;;  %v7227_v61 = vpop.f32.mrf.mxu0 }
 0xa64   : > { %v6948_v63 = vpop.f32.mrf.mxu1  ;;  %v9091_v24 = vpop.f32.mrf.mxu0 }
 0xa66   : > { %v9061_v1 = vpop.f32.mrf.mxu1  ;;  %v11276_v30 = vpop.f32.mrf.mxu0 }
 0xa67   : > { %v7345_v23 = vsel %vm6664_vm3, %v11276_v30, -inf }
 0xa68   : > { %v6998_v49 = vpop.f32.mrf.mxu1  ;;  %v9102_v52 = vpop.f32.mrf.mxu0 }
 0xa69   : > { %v7004_v2 = vsel %vm6664_vm3, %v6998_v49, -inf }
 0xa6a   : > { %v7342_v10 = vpop.f32.mrf.mxu0  ;;  %7005 = vmax.xlane.f32.xlu0 %v7004_v2  ;;  %v9066_v58 = vpop.f32.mrf.mxu1 }
 0xa6c   : > { %v7001_v31 = vpop.f32.mrf.mxu1  ;;  %v9103_v13 = vpop.f32.mrf.mxu0 }
 0xa6e   : > { %v7450_v34 = vpop.f32.mrf.mxu0  ;;  %7231 = vmax.xlane.f32.xlu0 %v7230_v28  ;;  %v9067_v32 = vpop.f32.mrf.mxu1 }
 0xa6f   : > { %v7456_v14 = vsel %vm6664_vm3, %v7450_v34, -inf }
 0xa70   : > { %7457 = vmax.xlane.f32.xlu1 %v7456_v14  ;;  %v9114_v16 = vpop.f32.mrf.mxu0 }
 0xa72   : > { %v7453_v25 = vpop.f32.mrf.mxu0  ;;  %7346 = vmax.xlane.f32.xlu0 %v7345_v23 }
 0xa74   : > { %v9115_v62 = vpop.f32.mrf.mxu0 }
 0xa76   : > { %v7565_v37 = vpop.f32.mrf.mxu0 }
 0xa77   : > { %v7571_v27 = vsel %vm6664_vm3, %v7565_v37, -inf }
 0xa78   : > { %v9126_v3 = vpop.f32.mrf.mxu0  ;;  %7572 = vmax.xlane.f32.xlu0 %v7571_v27 }
 0xa7a   : > { %v7568_v51 = vpop.f32.mrf.mxu0 }
 0xa7c   : > { %v9127_v59 = vpop.f32.mrf.mxu0 }
 0xa7e   : > { %v11286_v53 = vpop.f32.mrf.mxu0 }
 0xa7f   : > { %v7682_v54 = vsel %vm6664_vm3, %v11286_v53, -inf }
 0xa80   : > { %7683 = vmax.xlane.f32.xlu1 %v7682_v54  ;;  %v9138_v60 = vpop.f32.mrf.mxu0  ;;  %v7524_v54 = vpack.c.bf16 %v11152_v15, %v11152_v15 }
 0xa82   : > { %v7679_v8 = vpop.f32.mrf.mxu0 }
 0xa84   : > { %v9139_v36 = vpop.f32.mrf.mxu0 }
 0xa86   : > { %v7791_v38 = vpop.f32.mrf.mxu0 }
 0xa87   : > { %v7797_v55 = vsel %vm6664_vm3, %v7791_v38, -inf }
 0xa88   : > { %v9150_v9 = vpop.f32.mrf.mxu0  ;;  %7798 = vmax.xlane.f32.xlu0 %v7797_v55 }
 0xa8a   : > { %v7794_v39 = vpop.f32.mrf.mxu0 }
 0xa8c   : > { %v9151_v0 = vpop.f32.mrf.mxu0 }
 0xa8e   : > { %v7902_v29 = vpop.f32.mrf.mxu0 }
 0xa8f   : > { %v7908_v6 = vsel %vm6664_vm3, %v7902_v29, -inf }
 0xa90   : > { %7909 = vmax.xlane.f32.xlu1 %v7908_v6  ;;  %v9162_v40 = vpop.f32.mrf.mxu0 }
 0xa92   : > { %v7905_v21 = vpop.f32.mrf.mxu0 }
 0xa94   : > { %7126 = vadd.xlane.f32.xlu1 %v7125_v35  ;;  %v9163_v42 = vpop.f32.mrf.mxu0 }
 0xaf3   : > { %v7006_v46 = vpop.xlane.xlu0 %7005 }
 0xaf4   : > { %v7007_v45 = vsub.f32 %v6998_v49, %v7006_v46 }
 0xaf6   : > { %v7008_v19 = vmul.f32 1.442695, %v7007_v45 }
 0xaf7   : > { %v7232_v47 = vpop.xlane.xlu0 %7231 }
 0xaf8   : > { %v7233_v5 = vsub.f32 %v11272_v41, %v7232_v47 }
 0xaf9   : > { %v7458_v50 = vpop.xlane.xlu1 %7457 }
 0xafa   : > { %v7234_v26 = vmul.f32 1.442695, %v7233_v5  ;;  %v7459_v22 = vsub.f32 %v7450_v34, %v7458_v50  ;;  %v7072_v34 = vpack.c.bf16 %v11145_v43, %v11145_v43 }
 0xafb   : > { %v7347_v56 = vpop.xlane.xlu0 %7346 }
 0xafc   : > { %10556 = vpow2.f32 %v7234_v26  ;;  %v7348_v57 = vsub.f32 %v11276_v30, %v7347_v56  ;;  %v7460_v11 = vmul.f32 1.442695, %v7459_v22 }
 0xafd   : > { %10558 = vpow2.f32 %v7008_v19 }
 0xafe   : > { %v7349_v61 = vmul.f32 1.442695, %v7348_v57 }
 0xb00   : > { %10560 = vpow2.f32 %v7349_v61 }
 0xb01   : > { %v7573_v63 = vpop.xlane.xlu0 %7572  ;;  %10562 = vpow2.f32 %v7460_v11 }
 0xb02   : > { %v7574_v24 = vsub.f32 %v7565_v37, %v7573_v63 }
 0xb04   : > { %v7575_v1 = vmul.f32 1.442695, %v7574_v24 }
 0xb06   : > { %10564 = vpow2.f32 %v7575_v1  ;;  %v7587_v1 = vsel %vm6680_vm2, %v7524_v54, 0 }
 0xb09   : > { %v11298_v49 = vpop.eup %10556  ;;  %v7684_v32 = vpop.xlane.xlu1 %7683 }
 0xb0a   : > { %v7236_v41 = vsel %vm6664_vm3, %v11298_v49, 0.0  ;;  %v10559_v52 = vpop.eup %10558  ;;  %v7685_v14 = vsub.f32 %v11286_v53, %v7684_v32  ;;  %v7298_v53 = vpack.c.bf16 %v11147_v48, %v11147_v48 }
 0xb0b   : > { %7237 = vadd.xlane.f32.xlu0 %v7236_v41  ;;  %v7010_v30 = vsel %vm6664_vm3, %v10559_v52, 0.0 }
 0xb0c   : > { %v7686_v16 = vmul.f32 1.442695, %v7685_v14  ;;  %v7361_v5 = vsel %vm6680_vm2, %v7298_v53, 0 }
 0xb0d   : > { %v11302_v2 = vpop.eup %10560 }
 0xb0e   : > { %v7351_v10 = vsel %vm6664_vm3, %v11302_v2, 0.0  ;;  %v11307_v58 = vpop.eup %10562  ;;  %10566 = vpow2.f32 %v7686_v16 }
 0xb0f   : > { %7011 = vadd.xlane.f32.xlu0 %v7010_v30  ;;  %7352 = vadd.xlane.f32.xlu1 %v7351_v10  ;;  %v7462_v31 = vsel %vm6664_vm3, %v11307_v58, 0.0 }
 0xb11   : > { %v7799_v23 = vpop.xlane.xlu0 %7798 }
 0xb12   : > { %v7800_v25 = vsub.f32 %v7791_v38, %v7799_v23 }
 0xb13   : > { %v11311_v13 = vpop.eup %10564  ;;  %7463 = vadd.xlane.f32.xlu1 %v7462_v31 }
 0xb14   : > { %v7577_v28 = vsel %vm6664_vm3, %v11311_v13, 0.0  ;;  %v7801_v37 = vmul.f32 1.442695, %v7800_v25 }
 0xb16   : > { %10568 = vpow2.f32 %v7801_v37 }
 0xb17   : > { %7578 = vadd.xlane.f32.xlu1 %v7577_v28 }
 0xb19   : > { %v7910_v62 = vpop.xlane.xlu1 %7909 }
 0xb1a   : > { %v7911_v27 = vsub.f32 %v7902_v29, %v7910_v62 }
 0xb1b   : > { %v11321_v3 = vpop.eup %10566 }
 0xb1c   : > { %v7912_v33 = vmul.f32 1.442695, %v7911_v27  ;;  %v7688_v43 = vsel %vm6664_vm3, %v11321_v3, 0.0 }
 0xb1d   : > { %v7127_v48 = vpop.xlane.xlu1 %7126 }
 0xb1e   : > { %10570 = vpow2.f32 %v7912_v33 }
 0xb25   : > { %7017 = vrot.lane.b32.xlu0 %v11188_v4, %s10748_s18  ;;  %v11325_v4 = vpop.eup %10568 }
 0xb26   : > { %v7803_v51 = vsel %vm6664_vm3, %v11325_v4, 0.0 }
 0xb28   : > { %7243 = vrot.lane.b32.xlu1 %v7072_v34, %s10748_s18 }
 0xb2b   : > { %v11329_v17 = vpop.eup %10570 }
 0xb2c   : > { %v7914_v59 = vsel %vm6664_vm3, %v11329_v17, 0.0 }
 0xb44   : > { %7689 = vadd.xlane.f32.xlu0 %v7688_v43 }
 0xb4c   : > { %7804 = vadd.xlane.f32.xlu1 %v7803_v51 }
 0xb50   : > { %7915 = vadd.xlane.f32.xlu1 %v7914_v59 }
 0xb5a   : > { %7469 = vrot.lane.b32.xlu0 %v7298_v53, %s10748_s18 }
 0xb5e   : > { %7921 = vrot.lane.b32.xlu0 %v11338_v44, %s10748_s18 }
 0xb61   : > { %7695 = vrot.lane.b32.xlu1 %v7524_v54, %s10748_s18 }
 0xb62   : > { %6839 = vrot.lane.b32.xlu0 %v11198_v12, %s10748_s18  ;;  %v7135_v12 = vsel %vm6680_vm2, %v7072_v34, 0  ;;  %v7813_v34 = vsel %vm6680_vm2, %v11338_v44, 0 }
 0xb94   : > { %v7238_v60 = vpop.xlane.xlu0 %7237 }
 0xb98   : > { %v7012_v8 = vpop.xlane.xlu0 %7011  ;;  %v7353_v18 = vpop.xlane.xlu1 %7352 }
 0xb99   : > { %10572 = vrcp.f32 %v7012_v8 }
 0xb9a   : > { %10574 = vrcp.f32 %v7127_v48 }
 0xb9b   : > { %10576 = vrcp.f32 %v7238_v60 }
 0xb9c   : > { %v7018_v36 = vpop.permute.xlu0 %7017  ;;  %v7464_v55 = vpop.xlane.xlu1 %7463  ;;  %10578 = vrcp.f32 %v7353_v18 }
 0xb9d   : > { %v7023_v38 = vsel %vm6680_vm2, %v7018_v36, 0  ;;  %10580 = vrcp.f32 %v7464_v55 }
 0xb9e   : > { %9069 = vmatpush3.bf16.msra.mxu1 %v7023_v38 }
 0xb9f   : > { %9080 = vmatprep.subr.bf16.mxu1 %v10749_v7 }
 0xba0   : > { %v7579_v29 = vpop.xlane.xlu1 %7578 }
 0xba1   : > { %10582 = vrcp.f32 %v7579_v29 }
 0xba4   : > { %v7244_v40 = vpop.permute.xlu1 %7243 }
 0xba5   : > { %v7249_v42 = vsel %vm6680_vm2, %v7244_v40, 0 }
 0xba6   : > { %v10573_v15 = vpop.eup %10572 }
 0xba7   : > { %v7014_v9 = vmul.f32 %v10573_v15, %v10559_v52  ;;  %v10575_v0 = vpop.eup %10574 }
 0xba8   : > { %v7129_v6 = vmul.f32 %v10575_v0, %v11292_v20  ;;  %v10577_v35 = vpop.eup %10576 }
 0xba9   : > { %v7015_v39 = vpack.c.bf16 %v7014_v9, %v7014_v9  ;;  %v7240_v46 = vmul.f32 %v10577_v35, %v11298_v49  ;;  %v10579_v47 = vpop.eup %10578 }
 0xbaa   : > { %v7130_v21 = vpack.c.bf16 %v7129_v6, %v7129_v6  ;;  %v7355_v20 = vmul.f32 %v10579_v47, %v11302_v2  ;;  %v10581_v19 = vpop.eup %10580 }
 0xbab   : > { %9071 = vmatmul.mubr.msk.bf16.vlgmr.msra.gmra.mxu1 %vm6664_vm3, %v7015_v39  ;;  %v7241_v45 = vpack.c.bf16 %v7240_v46, %v7240_v46  ;;  %v7466_v22 = vmul.f32 %v10581_v19, %v11307_v58 }
 0xbac   : > { %9081 = vmatpush3.bf16.msra.mxu1 %v7135_v12  ;;  %9082 = vmatprep.mubr.msk.bf16.mxu1 %vm10750_vm1, %v10749_v7  ;;  %v7356_v50 = vpack.c.bf16 %v7355_v20, %v7355_v20 }
 0xbad   : > { %9092 = vmatprep.subr.bf16.mxu1 %v10749_v7  ;;  %v7467_v11 = vpack.c.bf16 %v7466_v22, %v7466_v22 }
 0xbae   : > { %v10583_v61 = vpop.eup %10582 }
 0xbaf   : > { %v7581_v49 = vmul.f32 %v10583_v61, %v11311_v13 }
 0xbb1   : > { %v7582_v2 = vpack.c.bf16 %v7581_v49, %v7581_v49 }
 0xbb3   : > { %9083 = vmatmul.mubr.msk.bf16.vlgmr.msra.gmra.mxu1 %vm6664_vm3, %v7130_v21 }
 0xbb4   : > { %9093 = vmatpush3.bf16.msra.mxu1 %v7249_v42  ;;  %9094 = vmatprep.mubr.msk.bf16.mxu1 %vm10750_vm1, %v10749_v7 }
 0xbb5   : > { %9104 = vmatprep.subr.bf16.mxu1 %v10749_v7 }
 0xbbb   : > { %9095 = vmatmul.mubr.msk.bf16.vlgmr.msra.gmra.mxu1 %vm6664_vm3, %v7241_v45 }
 0xbbc   : > { %9105 = vmatpush3.bf16.msra.mxu1 %v7361_v5  ;;  %9106 = vmatprep.mubr.msk.bf16.mxu1 %vm10750_vm1, %v10749_v7 }
 0xbbd   : > { %9116 = vmatprep.subr.bf16.mxu1 %v10749_v7 }
 0xbc3   : > { %9107 = vmatmul.mubr.msk.bf16.vlgmr.msra.gmra.mxu1 %vm6664_vm3, %v7356_v50 }
 0xbc4   : > { %9118 = vmatprep.mubr.msk.bf16.mxu1 %vm10750_vm1, %v10749_v7 }
 0xbcd   : > { %v7690_v26 = vpop.xlane.xlu0 %7689 }
 0xbce   : > { %10584 = vrcp.f32 %v7690_v26 }
 0xbd1   : > { %v7470_v56 = vpop.permute.xlu0 %7469 }
 0xbd2   : > { %v7475_v57 = vsel %vm6680_vm2, %v7470_v56, 0 }
 0xbd3   : > { %9117 = vmatpush3.bf16.msra.mxu1 %v7475_v57 }
 0xbd4   : > { %9128 = vmatprep.subr.bf16.mxu1 %v10749_v7 }
 0xbd5   : > { %v7805_v63 = vpop.xlane.xlu1 %7804  ;;  %v7922_v24 = vpop.permute.xlu0 %7921 }
 0xbd6   : > { %9119 = vmatmul.mubr.msk.bf16.vlgmr.msra.gmra.mxu1 %vm6664_vm3, %v7467_v11  ;;  %10586 = vrcp.f32 %v7805_v63  ;;  %v7927_v23 = vsel %vm6680_vm2, %v7922_v24, 0 }
 0xbd7   : > { %9129 = vmatpush3.bf16.msra.mxu1 %v7587_v1  ;;  %9130 = vmatprep.mubr.msk.bf16.mxu1 %vm10750_vm1, %v10749_v7 }
 0xbd8   : > { %9140 = vmatprep.subr.bf16.mxu1 %v10749_v7 }
 0xbd9   : > { %v7916_v41 = vpop.xlane.xlu1 %7915  ;;  %v6840_v52 = vpop.permute.xlu0 %6839 }
 0xbda   : > { %6843 = vst.msk [vmem:[%s11169_s20] sm:$0xff] %vm6842_vm4, %v6840_v52  ;;  %10588 = vrcp.f32 %v7916_v41 }
 0xbdb   : > { %v10585_v30 = vpop.eup %10584 }
 0xbdc   : > { %v7692_v31 = vmul.f32 %v10585_v30, %v11321_v3 }
 0xbdd   : > { %v7696_v10 = vpop.permute.xlu1 %7695 }
 0xbde   : > { %v7701_v58 = vsel %vm6680_vm2, %v7696_v10, 0  ;;  %9131 = vmatmul.mubr.msk.bf16.vlgmr.msra.gmra.mxu1 %vm6664_vm3, %v7582_v2  ;;  %v7693_v13 = vpack.c.bf16 %v7692_v31, %v7692_v31 }
 0xbdf   : > { %9141 = vmatpush3.bf16.msra.mxu1 %v7701_v58  ;;  %9142 = vmatprep.mubr.msk.bf16.mxu1 %vm10750_vm1, %v10749_v7 }
 0xbe0   : > { %9152 = vmatprep.subr.bf16.mxu1 %v10749_v7 }
 0xbe3   : > { %v10587_v28 = vpop.eup %10586 }
 0xbe4   : > { %v7807_v32 = vmul.f32 %v10587_v28, %v11325_v4 }
 0xbe6   : > { %9143 = vmatmul.mubr.msk.bf16.vlgmr.msra.gmra.mxu1 %vm6664_vm3, %v7693_v13  ;;  %v7808_v14 = vpack.c.bf16 %v7807_v32, %v7807_v32 }
 0xbe7   : > { %9153 = vmatpush3.bf16.msra.mxu1 %v7813_v34  ;;  %9154 = vmatprep.mubr.msk.bf16.mxu1 %vm10750_vm1, %v10749_v7  ;;  %v10589_v16 = vpop.eup %10588 }
 0xbe8   : > { %9164 = vmatprep.subr.bf16.mxu1 %v10749_v7  ;;  %v7918_v25 = vmul.f32 %v10589_v16, %v11329_v17 }
 0xbea   : > { %v7919_v62 = vpack.c.bf16 %v7918_v25, %v7918_v25 }
 0xbee   : > { %9155 = vmatmul.mubr.msk.bf16.vlgmr.msra.gmra.mxu1 %vm6664_vm3, %v7808_v14 }
 0xbef   : > { %9165 = vmatpush3.bf16.msra.mxu1 %v7927_v23  ;;  %9166 = vmatprep.mubr.msk.bf16.mxu1 %vm10750_vm1, %v10749_v7 }
 0xbf6   : > { %9167 = vmatmul.mubr.msk.bf16.vlgmr.msra.gmra.mxu1 %vm6664_vm3, %v7919_v62 }
 0xc6b   : > { %v7059_v37 = vpop.f32.mrf.mxu1 }
 0xc6c   : > { %7066 = vrot.lane.b32.xlu0 %v7059_v37, %s10748_s18 }
 0xc6d   : > { %v9072_v27 = vpop.f32.mrf.mxu1 }
 0xc6f   : > { %v7062_v33 = vpop.f32.mrf.mxu1 }
 0xc71   : > { %v9073_v3 = vpop.f32.mrf.mxu1 }
 0xc73   : > { %v7171_v43 = vpop.f32.mrf.mxu1 }
 0xc74   : > { %7177 = vst.msk [vmem:[%s11169_s20 + $0x10] sm:$0xff] %vm6617_vm0, %v7171_v43 }
 0xc75   : > { %v9084_v4 = vpop.f32.mrf.mxu1 }
 0xc77   : > { %v7174_v51 = vpop.f32.mrf.mxu1 }
 0xc79   : > { %v9085_v59 = vpop.f32.mrf.mxu1 }
 0xc7b   : > { %v7285_v53 = vpop.f32.mrf.mxu1 }
 0xc7c   : > { %7292 = vrot.lane.b32.xlu1 %v7285_v53, %s10748_s18 }
 0xc7d   : > { %v9096_v7 = vpop.f32.mrf.mxu1 }
 0xc7f   : > { %v7288_v17 = vpop.f32.mrf.mxu1 }
 0xc81   : > { %v9097_v44 = vpop.f32.mrf.mxu1 }
 0xc83   : > { %v7397_v54 = vpop.f32.mrf.mxu1 }
 0xc84   : > { %7403 = vst.msk [vmem:[%s11169_s20 + $0x18] sm:$0xff] %vm6617_vm0, %v7397_v54 }
 0xc85   : > { %v9108_v60 = vpop.f32.mrf.mxu1 }
 0xc87   : > { %v7400_v8 = vpop.f32.mrf.mxu1 }
 0xc89   : > { %v9109_v48 = vpop.f32.mrf.mxu1 }
 0xc96   : > { %v7511_v36 = vpop.f32.mrf.mxu1 }
 0xc97   : > { %7518 = vrot.lane.b32.xlu0 %v7511_v36, %s10748_s18 }
 0xc98   : > { %v9120_v38 = vpop.f32.mrf.mxu1 }
 0xc9a   : > { %v7514_v18 = vpop.f32.mrf.mxu1 }
 0xc9c   : > { %v9121_v55 = vpop.f32.mrf.mxu1 }
 0xc9e   : > { %v7623_v15 = vpop.f32.mrf.mxu1 }
 0xc9f   : > { %7629 = vst.msk [vmem:[%s11169_s20 + $0x20] sm:$0xff] %vm6617_vm0, %v7623_v15 }
 0xca0   : > { %v9132_v9 = vpop.f32.mrf.mxu1 }
 0xca2   : > { %v7626_v39 = vpop.f32.mrf.mxu1 }
 0xca4   : > { %v9133_v0 = vpop.f32.mrf.mxu1 }
 0xca6   : > { %v7737_v29 = vpop.f32.mrf.mxu1 }
 0xca7   : > { %7744 = vrot.lane.b32.xlu1 %v7737_v29, %s10748_s18 }
 0xca8   : > { %v9144_v12 = vpop.f32.mrf.mxu1 }
 0xcaa   : > { %v7740_v6 = vpop.f32.mrf.mxu1 }
 0xcac   : > { %v9145_v40 = vpop.f32.mrf.mxu1 }
 0xcae   : > { %v7849_v21 = vpop.f32.mrf.mxu1 }
 0xcaf   : > { %7855 = vst.msk [vmem:[%s11169_s20 + $0x28] sm:$0xff] %vm6617_vm0, %v7849_v21 }
 0xcb0   : > { %v9156_v35 = vpop.f32.mrf.mxu1 }
 0xcb2   : > { %v7852_v42 = vpop.f32.mrf.mxu1 }
 0xcb4   : > { %v9157_v46 = vpop.f32.mrf.mxu1 }
 0xcb6   : > { %v7963_v45 = vpop.f32.mrf.mxu1 }
 0xcb7   : > { %7970 = vrot.lane.b32.xlu0 %v7963_v45, %s10748_s18 }
 0xcb8   : > { %v9168_v47 = vpop.f32.mrf.mxu1 }
 0xcba   : > { %v7966_v5 = vpop.f32.mrf.mxu1 }
 0xcbc   : > { %v9169_v20 = vpop.f32.mrf.mxu1 }
 0xcde   : > { %v7067_v50 = vpop.permute.xlu0 %7066 }
 0xcdf   : > { %7069 = vst.msk [vmem:[%s11169_s20 + $0x8] sm:$0xff] %vm6842_vm4, %v7067_v50 }
 0xcee   : > { %v7293_v19 = vpop.permute.xlu1 %7292 }
 0xcef   : > { %7295 = vst.msk [vmem:[%s11169_s20 + $0x10] sm:$0xff] %vm6842_vm4, %v7293_v19 }
 0xd09   : > { %v7519_v26 = vpop.permute.xlu0 %7518 }
 0xd0a   : > { %7521 = vst.msk [vmem:[%s11169_s20 + $0x18] sm:$0xff] %vm6842_vm4, %v7519_v26 }
 0xd19   : > { %v7745_v22 = vpop.permute.xlu1 %7744 }
 0xd1a   : > { %7747 = vst.msk [vmem:[%s11169_s20 + $0x20] sm:$0xff] %vm6842_vm4, %v7745_v22 }
 0xd29   : > { %v7971_v56 = vpop.permute.xlu0 %7970 }
 0xd2a   : > { %7973 = vst.msk [vmem:[%s11169_s20 + $0x28] sm:$0xff] %vm6842_vm4, %v7971_v56 }
 0xd2b   : > { %10686 = shalt.err (!%p10683_p9)
}
 0xd2c   : > { %s10687_s17 = scalar_lea.hbm %s11426_s5, 768  ;;  %s10691_s25 = scalar_lea.hbm %s11468_s3, 1536 }
 0xd2d   : > { %p10688_p13 = scmp.ne.s32.totalorder %s11426_s5, %s10687_s17  ;;  %p10692_p4 = scmp.lt.s32.totalorder %s11426_s5, %s11468_s3 }
 0xd2e   : > { %p10693_p8 = scmp.lt.s32.totalorder %s10691_s25, %s10687_s17 }
 0xd2f   : > { %p10689_p5 = pnand %p10688_p13, %p11484_p0 }
 0xd30   : > { %p10694_p3 = por %p10693_p8, %p10692_p4 }
 0xd31   : > { %p10690_p10 = pneg %p10689_p5 }
 0xd33   : > { %p10695_p11 = pnand %p10694_p3, %p10690_p10 }
 0xd35   : > { %10698 = shalt.err (!%p10695_p11)
}
 0xd36   : > { %9184 = dma.vmem_to_hbm [thread:$0]  (%p11484_p0), %s7990_s26, 768, %s11426_s5, %s7975_s6  }
 0xd37 PF: > { %s8001_s4 = sand.u32 1, %s10729_s12   ;;  %p11485_p1 = scmp.ne.s32.totalorder %s11474_s19, 0 }
 0xd38   : > { %p11486_p2 = scmp.ge.s32.totalorder %s10741_s15, 2  ;;  %s8002_s18 = scalar_lea.sflag [#allocation4], %s8001_s4 }
 0xd3a   : > { %p9198_p6 = pnand %p11486_p2, %p11485_p1 }
 0xd3c   : > { %p9199_p12 = pneg %p9198_p6 }
 0xd3e   : > { %10724 = dma.done.wait (%p9199_p12), %s8002_s18, 768  }
 0xd3f   : > { %10726 = vsyncadd (%p9199_p12), %s8002_s18, 4294966528  ;;  %p17_p7 = scmp.ge.s32.totalorder %s10844_s7, 4   ;;  %s11487_s12 = smov %s10733_s13 }
 0xd40   : > { %s11488_s13 = smov %s10737_s14  ;;  %s11489_s14 = smov %s10860_s11 }
 0xd41   : > { %s11490_s15 = smov %s10844_s7  ;;  %19 = sbr.rel (!%p17_p7) target bundleno = 6 (0x6), region = 85 }
 0xd46   :  { %8007 = vsyncpa [#allocation3], 1 }
 0xd47   :  { %8009 = vsyncpa [#allocation3 + $0x1], 1 }
 0xd48   :  { %8010 = vsyncpa [#allocation6], 1 }
 0xd49   :  { %8011 = vsyncpa [#allocation4], 1 }
 0xd4a   :  { %8013 = vsyncpa [#allocation4 + $0x1], 1 }

// kernel: tpu_custom_call.1
= control target key start
LH: loop header
LB: loop body
LE: loop exit
PB: predicated region body
PF: predicated region fallthrough
CT: control target
= control target key end

     0   :  { %8 = vsyncpa [#allocation3], 0  ;;  %s11465_s0 = inlined_call_operand.hbm [shape: f32[2,8,768], index: 0, kind: input, shape index: {}]   ;;  %s11466_s1 = inlined_call_operand.hbm [shape: bf16[768,2304], index: 1, kind: input, shape index: {}]   ;;  %s11467_s2 = inlined_call_operand.hbm [shape: f32[1,2304], index: 2, kind: input, shape index: {}]   ;;  %s11468_s3 = inlined_call_operand.hbm [shape: f32[2,8,768], index: 3, kind: output, shape index: {}]  }
   0x1   :  { %10 = vsyncpa [#allocation3 + $0x1], 0 }
   0x2   :  { %11 = vsyncpa [#allocation6], 0 }
   0x3   :  { %12 = vsyncpa [#allocation4], 0 }
   0x4   :  { %14 = vsyncpa [#allocation4 + $0x1], 0  ;;  %s10772_s12 = smov 0   ;;  %s10774_s13 = smov 0  }
   0x5   :  { %s10776_s14 = smov 0   ;;  %s10778_s15 = smov 0  }
   0x6 LB: > { %s10793_s16 = sadd.s32 4294967295, %s10741_s15   ;;  %s8078_s17 = sadd.s32 4294967294, %s10741_s15   ;;  %s10741_s15 = sphi %s10778_s15, %s11490_s15   ;;  %s10737_s14 = sphi %s10776_s14, %s11489_s14   ;;  %s10733_s13 = sphi %s10774_s13, %s11488_s13   ;;  %s10729_s12 = sphi %s10772_s12, %s11487_s12  }
   0x7   : > { %p40_p0 = scmp.ne.s32.totalorder %s10733_s13, %s10729_s12  ;;  %p11469_p1 = scmp.eq.s32.totalorder %s10793_s16, 0 }
   0x8   : > { %p112_p3 = scmp.eq.s32.totalorder %s8078_s17, 1  ;;  %p8079_p5 = scmp.ge.s32.totalorder %s10741_s15, 1 }
   0x9   : > { %p10802_p4 = por %p11469_p1, %p40_p0  ;;  %p119_p7 = scmp.lt.s32.totalorder %s10741_s15, 3 }
   0xa   : > { %p10807_p6 = por %p112_p3, %p40_p0  ;;  %s10743_s21 = smov [#allocation5]  }
   0xb   : > { %s11473_s18 = scalar_select %p10802_p4, 1, 0 }
   0xc   : > { %s11474_s19 = scalar_select %p10807_p6, 1, 0 }
   0xd   : > { %p10812_p8 = pnand %p8079_p5, %p119_p7  ;;  %s131_s22 = sshll.u32 %s10743_s21, 4  ;;  %s132_s22 = int_to_ptr.vmem [resolvable:$true] %s131_s22 }
   0xe   : > { %s10744_s24 = smov [#allocation7]   ;;  %s10604_s26 = scalar_lea.vmem %s132_s22, 110592 }
   0xf   : > { %s11475_s20 = scalar_select %p10812_p8, 1, 0 }
  0x10   : > { %p9186_p9 = pneg %p10812_p8  ;;  %s145_s25 = sshll.u32 %s10744_s24, 4  ;;  %s146_s25 = int_to_ptr.vmem [resolvable:$true] %s145_s25 }
  0x11   : > { %p10605_p13 = scmp.ne.s32.totalorder %s132_s22, %s10604_s26  ;;  %p10612_p5 = scmp.lt.s32.totalorder %s132_s22, %s132_s22 }
  0x12   : > { %p10821_p11 = pnand %p9186_p9, %p11469_p1  ;;  %p10613_p7 = scmp.lt.s32.totalorder %s10604_s26, %s10604_s26 }
  0x14   : > { %p10595_p12 = pneg %p10821_p11  ;;  %p10614_p10 = por %p10613_p7, %p10612_p5 }
  0x16   : > { %p10607_p0 = pnand %p10605_p13, %p10595_p12 }
  0x18   : > { %p10608_p3 = pneg %p10607_p0 }
  0x1a   : > { %p10615_p9 = pnand %p10614_p10, %p10608_p3 }
  0x1c   : > { %10618 = shalt.err (!%p10615_p9)
}
  0x1d   : > { %s10745_s27 = smov 1152   ;;  %s10746_s28 = smov 72  }
  0x1e   : > { %9189 = dma.hbm_to_vmem [thread:$0]  (!%p10821_p11), %s11466_s1, 110592, %s132_s22, [#allocation6], %s10745_s27, %s10745_s27, %s10746_s28  }
  0x1f   : > { %s10630_s4 = scalar_lea.vmem %s146_s25, 288  ;;  %p10638_p2 = scmp.lt.s32.totalorder %s146_s25, %s146_s25 }
  0x20   : > { %p10631_p1 = scmp.ne.s32.totalorder %s146_s25, %s10630_s4  ;;  %p10639_p6 = scmp.lt.s32.totalorder %s10630_s4, %s10630_s4 }
  0x22   : > { %p10633_p13 = pnand %p10631_p1, %p10595_p12  ;;  %p10640_p5 = por %p10639_p6, %p10638_p2 }
  0x24   : > { %p10634_p0 = pneg %p10633_p13 }
  0x26   : > { %p10641_p10 = pnand %p10640_p5, %p10634_p0 }
  0x28   : > { %10644 = shalt.err (!%p10641_p10)
}
  0x29   : > { %9192 = dma.hbm_to_vmem [thread:$0]  (!%p10821_p11), %s11467_s2, 288, %s146_s25, [#allocation6]  }
  0x2a   : > { %s10844_s7 = sadd.s32 1, %s10741_s15   ;;  %s27_s8 = sadd.s32 1, %s10737_s14 }
  0x2b   : > { %s24_s9 = ssub.s32 %s10741_s15, %s10844_s7  ;;  %p34_p1 = scmp.ne.s32.totalorder %s10737_s14, %s10733_s13 }
  0x2c   : > { %p25_p2 = scmp.eq.s32.totalorder %s24_s9, 0  ;;  %p35_p6 = scmp.eq.s32.totalorder %s10741_s15, 0 }
  0x2d   : > { %p11477_p12 = scmp.eq.s32.totalorder %s10793_s16, 1  ;;  %p9203_p7 = scmp.lt.s32.totalorder %s10741_s15, 2 }
  0x2e   : > { %s10860_s11 = scalar_select %p25_p2, %s10737_s14, %s27_s8  }
  0x2f   : > { %p10854_p3 = por %p11477_p12, %p34_p1  ;;  %p36_p9 = por %p35_p6, %p34_p1 }
  0x30   : > { %s156_s17 = sand.u32 1, %s10737_s14   ;;  %s9171_s22 = smul.u32 768, %s10741_s15 }
  0x31   : > { %s11478_s10 = scalar_select %p10854_p3, 1, 0 }
  0x32   : > { %s9170_s21 = smul.u32 48, %s156_s17  ;;  %p10864_p11 = pnand %p9203_p7, %p36_p9 }
  0x33   : > { %s10871_s26 = scalar_lea.hbm %s11465_s0, %s9171_s22  ;;  %s157_s29 = scalar_lea.sflag [#allocation3], %s156_s17 }
  0x34   : > { %s160_s27 = scalar_lea.vmem [#allocation2], %s9170_s21  ;;  %s10645_s30 = scalar_lea.hbm %s10871_s26, 768 }
  0x35   : > { %s168_s28 = sshll.u32 %s160_s27, 4  ;;  %p10646_p13 = scmp.ne.s32.totalorder %s10871_s26, %s10645_s30  ;;  %s169_s28 = int_to_ptr.vmem [resolvable:$true] %s168_s28 }
  0x36   : > { %p10647_p0 = pneg %p10864_p11  ;;  %s10650_s6 = scalar_lea.hbm %s11465_s0, 1536 }
  0x37   : > { %p10651_p1 = scmp.lt.s32.totalorder %s10871_s26, %s11465_s0  ;;  %p10652_p2 = scmp.lt.s32.totalorder %s10650_s6, %s10645_s30 }
  0x38   : > { %p10648_p5 = pnand %p10647_p0, %p10646_p13 }
  0x39   : > { %p10653_p6 = por %p10652_p2, %p10651_p1 }
  0x3a   : > { %p10649_p10 = pneg %p10648_p5 }
  0x3c   : > { %p10654_p12 = pnand %p10653_p6, %p10649_p10 }
  0x3e   : > { %10657 = shalt.err (!%p10654_p12)
}
  0x3f   : > { %s10658_s21 = scalar_lea.vmem %s169_s28, 768  ;;  %s10747_s17 = smov [#allocation2]  }
  0x40   : > { %p10659_p7 = scmp.ne.s32.totalorder %s169_s28, %s10658_s21  ;;  %s10663_s22 = sshll.u32 %s10747_s17, 4  ;;  %s10664_s22 = int_to_ptr.vmem [resolvable:$false] %s10663_s22 }
  0x41   : > { %s10665_s24 = scalar_lea.vmem %s10664_s22, 1536  ;;  %p10666_p13 = scmp.lt.s32.totalorder %s169_s28, %s10664_s22 }
  0x42   : > { %p10661_p9 = pnand %p10659_p7, %p10647_p0  ;;  %p10667_p5 = scmp.lt.s32.totalorder %s10665_s24, %s10658_s21 }
  0x44   : > { %p10662_p3 = pneg %p10661_p9  ;;  %p10668_p4 = por %p10667_p5, %p10666_p13 }
  0x46   : > { %p10669_p8 = pnand %p10668_p4, %p10662_p3 }
  0x48   : > { %10672 = shalt.err (!%p10669_p8)
}
  0x49   : > { %9196 = dma.hbm_to_vmem [thread:$0]  (!%p10864_p11), %s10871_s26, 768, %s169_s28, %s157_s29  }
  0x4a   : > { %p11480_p10 = scmp.ne.s32.totalorder %s11475_s20, 0 }
  0x4b   : > { %s10890_s25 = sand.u32 (!%p11480_p10), 1, %s10733_s13   ;;  %p11481_p4 = scmp.ne.s32.totalorder (!%p11480_p10), %s11473_s18, 0 }
  0x4c   : > { %177 = sbr.rel (%p11480_p10) target bundleno = 3383 (0xd37), region = 32  ;;  %s180_s30 = scalar_lea.sflag (!%p11480_p10), [#allocation3], %s10890_s25 }
  0x4d   : > { %s9172_s27 = smul.u32 (!%p11480_p10), 48, %s10890_s25 }
  0x4f   : > { %s10896_s4 = scalar_lea.vmem (!%p11480_p10), [#allocation2], %s9172_s27 }
  0x51   : > { %10716 = dma.done.wait (%p11481_p4), %s180_s30, 768  }
  0x52   : > { %10718 = vsyncadd (%p11481_p4), %s180_s30, 4294966528  ;;  %p11482_p8 = scmp.eq.s32.totalorder %s10793_s16, 0 }
  0x54   : > { %10720 = dma.done.wait (%p11482_p8), [#allocation6], 110880   ;;  %p11483_p3 = pmov %p11482_p8 }
  0x55   : > { %v9246_v0 = vld [vmem:[#allocation5 + $0x3f4] ss:$72 sps:$4 sm:$0xff]   ;;  %v9250_v2 = vld [vmem:[#allocation5 + $0x3f0] ss:$72 sps:$4 sm:$0xff]   ;;  %v9252_v4 = vld [vmem:[#allocation5 + $0x364] ss:$72 sps:$4 sm:$0xff]  }
  0x56   : > { %10722 = vsyncadd (%p11483_p3), [#allocation6], 4294856416  ;;  %v9248_v1 = vld [vmem:[#allocation5 + $0xcf4] ss:$72 sps:$4 sm:$0xff]   ;;  %5507 = vmatprep.subr.bf16.mxu0 %v9246_v0  ;;  %v9251_v3 = vld [vmem:[#allocation5 + $0xcf0] ss:$72 sps:$4 sm:$0xff]  }
  0x57   : > { %5548 = vmatprep.subr.bf16.mxu1 %v9248_v1  ;;  %5508 = vmatpush1.bf16.msra.mxu0 %v9250_v2  ;;  %v9254_v5 = vld [vmem:[#allocation5 + $0xc64] ss:$72 sps:$4 sm:$0xff]   ;;  %v9256_v6 = vld [vmem:[#allocation5 + $0x360] ss:$72 sps:$4 sm:$0xff]   ;;  %v9258_v8 = vld [vmem:[#allocation5 + $0x2d4] ss:$72 sps:$4 sm:$0xff]  }
  0x58   : > { %5549 = vmatpush1.bf16.msra.mxu1 %v9251_v3  ;;  %5509 = vmatprep.subr.bf16.mxu0 %v9252_v4  ;;  %v9257_v7 = vld [vmem:[#allocation5 + $0xc60] ss:$72 sps:$4 sm:$0xff]   ;;  %v9260_v9 = vld [vmem:[#allocation5 + $0xbd4] ss:$72 sps:$4 sm:$0xff]   ;;  %v9262_v10 = vld [vmem:[#allocation5 + $0x2d0] ss:$72 sps:$4 sm:$0xff]  }
  0x59   : > { %5550 = vmatprep.subr.bf16.mxu1 %v9254_v5  ;;  %v9263_v11 = vld [vmem:[#allocation5 + $0xbd0] ss:$72 sps:$4 sm:$0xff]   ;;  %v9264_v12 = vld [vmem:[#allocation5 + $0x244] ss:$72 sps:$4 sm:$0xff]   ;;  %v9268_v14 = vld [vmem:[#allocation5 + $0x240] ss:$72 sps:$4 sm:$0xff]  }
  0x5a   : > { %v9266_v13 = vld [vmem:[#allocation5 + $0xb44] ss:$72 sps:$4 sm:$0xff]   ;;  %v9269_v15 = vld [vmem:[#allocation5 + $0xb40] ss:$72 sps:$4 sm:$0xff]   ;;  %v9270_v16 = vld [vmem:[#allocation5 + $0x1b4] ss:$72 sps:$4 sm:$0xff]  }
  0x5b   : > { %5510 = vmatpush1.bf16.msra.mxu0 %v9256_v6  ;;  %v9272_v17 = vld [vmem:[#allocation5 + $0xab4] ss:$72 sps:$4 sm:$0xff]   ;;  %v9274_v18 = vld [vmem:[#allocation5 + $0x1b0] ss:$72 sps:$4 sm:$0xff]   ;;  %v9276_v20 = vld [vmem:[#allocation5 + $0x124] ss:$72 sps:$4 sm:$0xff]  }
  0x5c   : > { %5551 = vmatpush1.bf16.msra.mxu1 %v9257_v7  ;;  %5511 = vmatprep.subr.bf16.mxu0 %v9258_v8  ;;  %v9275_v19 = vld [vmem:[#allocation5 + $0xab0] ss:$72 sps:$4 sm:$0xff]   ;;  %v9278_v21 = vld [vmem:[#allocation5 + $0xa24] ss:$72 sps:$4 sm:$0xff]   ;;  %v9280_v22 = vld [vmem:[#allocation5 + $0x120] ss:$72 sps:$4 sm:$0xff]  }
  0x5d   : > { %5552 = vmatprep.subr.bf16.mxu1 %v9260_v9  ;;  %v9281_v23 = vld [vmem:[#allocation5 + $0xa20] ss:$72 sps:$4 sm:$0xff]   ;;  %v9282_v24 = vld [vmem:[#allocation5 + $0x94] ss:$72 sps:$4 sm:$0xff]   ;;  %v9286_v26 = vld [vmem:[#allocation5 + $0x90] ss:$72 sps:$4 sm:$0xff]  }
  0x5e   : > { %v9284_v25 = vld [vmem:[#allocation5 + $0x994] ss:$72 sps:$4 sm:$0xff]   ;;  %v9287_v27 = vld [vmem:[#allocation5 + $0x990] ss:$72 sps:$4 sm:$0xff]   ;;  %v9288_v28 = vld [vmem:[#allocation5 + $0x4] ss:$72 sps:$4 sm:$0xff]  }
  0x5f   : > { %5512 = vmatpush1.bf16.msra.mxu0 %v9262_v10  ;;  %v9290_v29 = vld [vmem:[#allocation5 + $0x904] ss:$72 sps:$4 sm:$0xff]   ;;  %v9292_v30 = vld [vmem:[#allocation5] ss:$72 sps:$4 sm:$0xff]   ;;  %v9294_v32 = vld [vmem:[#allocation5 + $0x874] ss:$72 sps:$4 sm:$0xff]  }
  0x60   : > { %5553 = vmatpush1.bf16.msra.mxu1 %v9263_v11  ;;  %5513 = vmatprep.subr.bf16.mxu0 %v9264_v12  ;;  %v9293_v31 = vld [vmem:[#allocation5 + $0x900] ss:$72 sps:$4 sm:$0xff]   ;;  %v9296_v33 = vld [vmem:[#allocation5 + $0x1174] ss:$72 sps:$4 sm:$0xff]   ;;  %v9298_v34 = vld [vmem:[#allocation5 + $0x870] ss:$72 sps:$4 sm:$0xff]  }
  0x61   : > { %5554 = vmatprep.subr.bf16.mxu1 %v9266_v13  ;;  %v9299_v35 = vld [vmem:[#allocation5 + $0x1170] ss:$72 sps:$4 sm:$0xff]   ;;  %v9300_v36 = vld [vmem:[#allocation5 + $0x7e4] ss:$72 sps:$4 sm:$0xff]   ;;  %v9304_v38 = vld [vmem:[#allocation5 + $0x7e0] ss:$72 sps:$4 sm:$0xff]  }
  0x62   : > { %v9302_v37 = vld [vmem:[#allocation5 + $0x10e4] ss:$72 sps:$4 sm:$0xff]   ;;  %v9305_v39 = vld [vmem:[#allocation5 + $0x10e0] ss:$72 sps:$4 sm:$0xff]   ;;  %v9306_v40 = vld [vmem:[#allocation5 + $0x754] ss:$72 sps:$4 sm:$0xff]  }
  0x63   : > { %5514 = vmatpush1.bf16.msra.mxu0 %v9268_v14  ;;  %v9308_v41 = vld [vmem:[#allocation5 + $0x1054] ss:$72 sps:$4 sm:$0xff]   ;;  %v9310_v42 = vld [vmem:[#allocation5 + $0x750] ss:$72 sps:$4 sm:$0xff]   ;;  %v9312_v44 = vld [vmem:[#allocation5 + $0x6c4] ss:$72 sps:$4 sm:$0xff]  }
  0x64   : > { %5555 = vmatpush1.bf16.msra.mxu1 %v9269_v15  ;;  %5515 = vmatprep.subr.bf16.mxu0 %v9270_v16  ;;  %v9311_v43 = vld [vmem:[#allocation5 + $0x1050] ss:$72 sps:$4 sm:$0xff]   ;;  %v9314_v45 = vld [vmem:[#allocation5 + $0xfc4] ss:$72 sps:$4 sm:$0xff]   ;;  %v9316_v47 = vld [vmem:[#allocation5 + $0x6c0] ss:$72 sps:$4 sm:$0xff]  }
  0x65   : > { %5556 = vmatprep.subr.bf16.mxu1 %v9272_v17  ;;  %v216_v46 = vld [vmem:[%s10896_s4 + $0x8] sm:$0xff]  ;;  %v218_v50 = vld [vmem:[%s10896_s4 + $0x18] sm:$0xff]  ;;  %v215_v4 = vld [vmem:[%s10896_s4] sm:$0xff]  ;;  %s10748_s18 = smov 64   ;;  %vm6617_vm0 = vcmask 523264   ;;  %vm10750_vm1 = vmmov 0  }
  0x66   : > { %v9317_v48 = vld [vmem:[#allocation5 + $0xfc0] ss:$72 sps:$4 sm:$0xff]   ;;  %v10907_v49 = vpack.c.bf16 %v216_v46, %v216_v46  ;;  %v9318_v51 = vld [vmem:[#allocation5 + $0x634] ss:$72 sps:$4 sm:$0xff]   ;;  %v10910_v52 = vpack.c.bf16 %v218_v50, %v218_v50  ;;  %v9322_v54 = vld [vmem:[#allocation5 + $0x630] ss:$72 sps:$4 sm:$0xff]   ;;  %v10916_v8 = vpack.c.bf16 %v215_v4, %v215_v4 }
  0x67   : > { %5516 = vmatpush1.bf16.msra.mxu0 %v9274_v18  ;;  %v9320_v53 = vld [vmem:[#allocation5 + $0xf34] ss:$72 sps:$4 sm:$0xff]   ;;  %v9323_v55 = vld [vmem:[#allocation5 + $0xf30] ss:$72 sps:$4 sm:$0xff]   ;;  %v9324_v56 = vld [vmem:[#allocation5 + $0x5a4] ss:$72 sps:$4 sm:$0xff]  }
  0x68   : > { %5557 = vmatpush1.bf16.msra.mxu1 %v9275_v19  ;;  %5517 = vmatprep.subr.bf16.mxu0 %v9276_v20  ;;  %v9326_v57 = vld [vmem:[#allocation5 + $0xea4] ss:$72 sps:$4 sm:$0xff]   ;;  %v9328_v58 = vld [vmem:[#allocation5 + $0x5a0] ss:$72 sps:$4 sm:$0xff]   ;;  %v9330_v60 = vld [vmem:[#allocation5 + $0x514] ss:$72 sps:$4 sm:$0xff]  }
  0x69   : > { %5558 = vmatprep.subr.bf16.mxu1 %v9278_v21  ;;  %5539 = vmatprep.mubr.bf16.mxu0 %v10907_v49  ;;  %v9329_v59 = vld [vmem:[#allocation5 + $0xea0] ss:$72 sps:$4 sm:$0xff]   ;;  %v9332_v61 = vld [vmem:[#allocation5 + $0xe14] ss:$72 sps:$4 sm:$0xff]   ;;  %v9334_v62 = vld [vmem:[#allocation5 + $0x510] ss:$72 sps:$4 sm:$0xff]  }
  0x6a   : > { %5580 = vmatprep.mubr.bf16.mxu1 %v10910_v52  ;;  %v9335_v63 = vld [vmem:[#allocation5 + $0xe10] ss:$72 sps:$4 sm:$0xff]   ;;  %v9336_v0 = vld [vmem:[#allocation5 + $0x484] ss:$72 sps:$4 sm:$0xff]   ;;  %v9340_v2 = vld [vmem:[#allocation5 + $0x480] ss:$72 sps:$4 sm:$0xff]  }
  0x6b   : > { %5518 = vmatpush1.bf16.msra.mxu0 %v9280_v22  ;;  %v9338_v1 = vld [vmem:[#allocation5 + $0xd84] ss:$72 sps:$4 sm:$0xff]   ;;  %v9341_v3 = vld [vmem:[#allocation5 + $0xd80] ss:$72 sps:$4 sm:$0xff]   ;;  %v9344_v6 = vld [vmem:[#allocation5 + $0x15f4] ss:$72 sps:$4 sm:$0xff]  }
  0x6c   : > { %5559 = vmatpush1.bf16.msra.mxu1 %v9281_v23  ;;  %5519 = vmatprep.subr.bf16.mxu0 %v9282_v24  ;;  %v217_v5 = vld [vmem:[%s10896_s4 + $0x10] sm:$0xff]  ;;  %vm6680_vm2 = vcmask 1043456   ;;  %vm6664_vm3 = vcmask 64512   ;;  %s11169_s20 = scalar_lea.vmem [#allocation8], %s9172_s27  ;;  %vm6842_vm4 = vcmask 1048064   ;;  %s9173_s23 = smul.u32 768, %s10793_s16 }
  0x6d   : > { %5560 = vmatprep.subr.bf16.mxu1 %v9284_v25  ;;  %v9347_v7 = vld [vmem:[#allocation5 + $0x3fc] ss:$72 sps:$4 sm:$0xff]   ;;  %v10918_v9 = vpack.c.bf16 %v217_v5, %v217_v5  ;;  %v9342_v10 = vld [vmem:[#allocation5 + $0x15f0] ss:$72 sps:$4 sm:$0xff]   ;;  %v9353_v13 = vld [vmem:[#allocation5 + $0x36c] ss:$72 sps:$4 sm:$0xff]  }
  0x6e   : > { %v9345_v11 = vld [vmem:[#allocation5 + $0x3f8] ss:$72 sps:$4 sm:$0xff]   ;;  %v9350_v12 = vld [vmem:[#allocation5 + $0x1564] ss:$72 sps:$4 sm:$0xff]   ;;  %v9351_v15 = vld [vmem:[#allocation5 + $0x368] ss:$72 sps:$4 sm:$0xff]   ;;  %s11426_s5 = scalar_lea.hbm %s11468_s3, %s9173_s23 }
  0x6f   : > { %5520 = vmatpush1.bf16.msra.mxu0 %v9286_v26  ;;  %v9348_v14 = vld [vmem:[#allocation5 + $0x1560] ss:$72 sps:$4 sm:$0xff]   ;;  %v9356_v16 = vld [vmem:[#allocation5 + $0x14d4] ss:$72 sps:$4 sm:$0xff]   ;;  %v9354_v18 = vld [vmem:[#allocation5 + $0x14d0] ss:$72 sps:$4 sm:$0xff]  }
  0x70   : > { %5561 = vmatpush1.bf16.msra.mxu1 %v9287_v27  ;;  %5521 = vmatprep.subr.bf16.mxu0 %v9288_v28  ;;  %v9359_v17 = vld [vmem:[#allocation5 + $0x2dc] ss:$72 sps:$4 sm:$0xff]   ;;  %v9357_v19 = vld [vmem:[#allocation5 + $0x2d8] ss:$72 sps:$4 sm:$0xff]   ;;  %v9365_v21 = vld [vmem:[#allocation5 + $0x24c] ss:$72 sps:$4 sm:$0xff]  }
  0x71   : > { %5562 = vmatprep.subr.bf16.mxu1 %v9290_v29  ;;  %v9362_v20 = vld [vmem:[#allocation5 + $0x1444] ss:$72 sps:$4 sm:$0xff]   ;;  %v9360_v22 = vld [vmem:[#allocation5 + $0x1440] ss:$72 sps:$4 sm:$0xff]   ;;  %v9368_v24 = vld [vmem:[#allocation5 + $0x13b4] ss:$72 sps:$4 sm:$0xff]  }
  0x72   : > { %v9363_v23 = vld [vmem:[#allocation5 + $0x248] ss:$72 sps:$4 sm:$0xff]   ;;  %v9371_v25 = vld [vmem:[#allocation5 + $0x1bc] ss:$72 sps:$4 sm:$0xff]   ;;  %v9369_v27 = vld [vmem:[#allocation5 + $0x1b8] ss:$72 sps:$4 sm:$0xff]  }
  0x73   : > { %5522 = vmatpush1.bf16.msra.mxu0 %v9292_v30  ;;  %v9366_v26 = vld [vmem:[#allocation5 + $0x13b0] ss:$72 sps:$4 sm:$0xff]   ;;  %v9374_v28 = vld [vmem:[#allocation5 + $0x1324] ss:$72 sps:$4 sm:$0xff]   ;;  %v9372_v30 = vld [vmem:[#allocation5 + $0x1320] ss:$72 sps:$4 sm:$0xff]  }
  0x74   : > { %5563 = vmatpush1.bf16.msra.mxu1 %v9293_v31  ;;  %5523 = vmatprep.subr.bf16.mxu0 %v9294_v32  ;;  %v9377_v29 = vld [vmem:[#allocation5 + $0x12c] ss:$72 sps:$4 sm:$0xff]   ;;  %v9375_v31 = vld [vmem:[#allocation5 + $0x128] ss:$72 sps:$4 sm:$0xff]   ;;  %v9431_v5 = vld [vmem:[#allocation5 + $0x51c] ss:$72 sps:$4 sm:$0xff]  }
  0x75   : > { %5564 = vmatprep.subr.bf16.mxu1 %v9296_v33  ;;  %v9380_v32 = vld [vmem:[#allocation5 + $0x1294] ss:$72 sps:$4 sm:$0xff]   ;;  %v9398_v46 = vld [vmem:[#allocation5 + $0x19e4] ss:$72 sps:$4 sm:$0xff]   ;;  %v9399_v50 = vld [vmem:[#allocation5 + $0x7e8] ss:$72 sps:$4 sm:$0xff]  }
  0x76   : > { %v9383_v33 = vld [vmem:[#allocation5 + $0x9c] ss:$72 sps:$4 sm:$0xff]   ;;  %s7989_s26 = sshll.u32 %s11169_s20, 4  ;;  %s7975_s6 = scalar_lea.sflag [#allocation4], %s10890_s25  ;;  %s7990_s26 = int_to_ptr.vmem [resolvable:$true] %s7989_s26 }
  0x77   : > { %5524 = vmatpush2.bf16.msra.mxu0 %v9298_v34  ;;  %v220_v34 = vld [vmem:[%s10896_s4 + $0x28] sm:$0xff]  ;;  %s10673_s8 = scalar_lea.vmem %s7990_s26, 768  ;;  %p11484_p0 = scmp.ne.s32.totalorder %s11478_s10, 0 }
  0x78   : > { %5565 = vmatpush2.bf16.msra.mxu1 %v9299_v35  ;;  %5525 = vmatprep.subr.bf16.mxu0 %v9300_v36  ;;  %v10924_v35 = vpack.c.bf16 %v220_v34, %v220_v34  ;;  %v9378_v36 = vld [vmem:[#allocation5 + $0x1290] ss:$72 sps:$4 sm:$0xff]   ;;  %v9428_v4 = vld [vmem:[#allocation5 + $0x1714] ss:$72 sps:$4 sm:$0xff]   ;;  %p10674_p11 = scmp.ne.s32.totalorder %s7990_s26, %s10673_s8  ;;  %s10751_s9 = smov [#allocation8]  }
  0x79   : > { %5566 = vmatprep.subr.bf16.mxu1 %v9302_v37  ;;  %v9381_v37 = vld [vmem:[#allocation5 + $0x98] ss:$72 sps:$4 sm:$0xff]   ;;  %s10677_s21 = sshll.u32 %s10751_s9, 4  ;;  %s10678_s21 = int_to_ptr.vmem [resolvable:$false] %s10677_s21 }
  0x7a   : > { %v9462_v34 = vld [vmem:[#allocation5 + $0xab8] ss:$72 sps:$4 sm:$0xff]   ;;  %p10675_p1 = pnand %p10674_p11, %p11484_p0  ;;  %s10679_s16 = scalar_lea.vmem %s10678_s21, 1536 }
  0x7b   : > { %5526 = vmatpush2.bf16.msra.mxu0 %v9304_v38  ;;  %v9386_v38 = vld [vmem:[#allocation5 + $0x1204] ss:$72 sps:$4 sm:$0xff]   ;;  %p10680_p6 = scmp.lt.s32.totalorder %s7990_s26, %s10678_s21  ;;  %p10681_p12 = scmp.lt.s32.totalorder %s10679_s16, %s10673_s8 }
  0x7c   : > { %5567 = vmatpush2.bf16.msra.mxu1 %v9305_v39  ;;  %5527 = vmatprep.subr.bf16.mxu0 %v9306_v40  ;;  %v9389_v39 = vld [vmem:[#allocation5 + $0xc] ss:$72 sps:$4 sm:$0xff]   ;;  %v9384_v40 = vld [vmem:[#allocation5 + $0x1200] ss:$72 sps:$4 sm:$0xff]   ;;  %p10676_p2 = pneg %p10675_p1 }
  0x7d   : > { %5568 = vmatprep.subr.bf16.mxu1 %v9308_v41  ;;  %v9387_v41 = vld [vmem:[#allocation5 + $0x8] ss:$72 sps:$4 sm:$0xff]   ;;  %p10682_p7 = por %p10681_p12, %p10680_p6 }
  0x7f   : > { %5528 = vmatpush2.bf16.msra.mxu0 %v9310_v42  ;;  %v9392_v42 = vld [vmem:[#allocation5 + $0x1a74] ss:$72 sps:$4 sm:$0xff]   ;;  %p10683_p9 = pnand %p10682_p7, %p10676_p2 }
  0x80   : > { %5569 = vmatpush2.bf16.msra.mxu1 %v9311_v43  ;;  %5529 = vmatprep.subr.bf16.mxu0 %v9312_v44  ;;  %v9395_v43 = vld [vmem:[#allocation5 + $0x87c] ss:$72 sps:$4 sm:$0xff]   ;;  %v9390_v44 = vld [vmem:[#allocation5 + $0x1a70] ss:$72 sps:$4 sm:$0xff]  }
  0x81   : > { %5570 = vmatprep.subr.bf16.mxu1 %v9314_v45  ;;  %v9393_v45 = vld [vmem:[#allocation5 + $0x878] ss:$72 sps:$4 sm:$0xff]  }
  0x83   : > { %5530 = vmatpush2.bf16.msra.mxu0 %v9316_v47  ;;  %v9401_v47 = vld [vmem:[#allocation5 + $0x7ec] ss:$72 sps:$4 sm:$0xff]  }
  0x84   : > { %5571 = vmatpush2.bf16.msra.mxu1 %v9317_v48  ;;  %5531 = vmatprep.subr.bf16.mxu0 %v9318_v51  ;;  %v9396_v48 = vld [vmem:[#allocation5 + $0x19e0] ss:$72 sps:$4 sm:$0xff]   ;;  %v9404_v51 = vld [vmem:[#allocation5 + $0x1954] ss:$72 sps:$4 sm:$0xff]  }
  0x85   : > { %5572 = vmatprep.subr.bf16.mxu1 %v9320_v53  ;;  %v9407_v53 = vld [vmem:[#allocation5 + $0x75c] ss:$72 sps:$4 sm:$0xff]  }
  0x87   : > { %5532 = vmatpush2.bf16.msra.mxu0 %v9322_v54  ;;  %v9402_v54 = vld [vmem:[#allocation5 + $0x1950] ss:$72 sps:$4 sm:$0xff]  }
  0x88   : > { %5573 = vmatpush2.bf16.msra.mxu1 %v9323_v55  ;;  %5533 = vmatprep.subr.bf16.mxu0 %v9324_v56  ;;  %v9405_v55 = vld [vmem:[#allocation5 + $0x758] ss:$72 sps:$4 sm:$0xff]   ;;  %v9410_v56 = vld [vmem:[#allocation5 + $0x18c4] ss:$72 sps:$4 sm:$0xff]  }
  0x89   : > { %5574 = vmatprep.subr.bf16.mxu1 %v9326_v57  ;;  %v9413_v57 = vld [vmem:[#allocation5 + $0x6cc] ss:$72 sps:$4 sm:$0xff]  }
  0x8b   : > { %5534 = vmatpush2.bf16.msra.mxu0 %v9328_v58  ;;  %v9408_v58 = vld [vmem:[#allocation5 + $0x18c0] ss:$72 sps:$4 sm:$0xff]  }
  0x8c   : > { %5575 = vmatpush2.bf16.msra.mxu1 %v9329_v59  ;;  %5535 = vmatprep.subr.bf16.mxu0 %v9330_v60  ;;  %v9411_v59 = vld [vmem:[#allocation5 + $0x6c8] ss:$72 sps:$4 sm:$0xff]   ;;  %v9416_v60 = vld [vmem:[#allocation5 + $0x1834] ss:$72 sps:$4 sm:$0xff]  }
  0x8d   : > { %5576 = vmatprep.subr.bf16.mxu1 %v9332_v61  ;;  %v9419_v61 = vld [vmem:[#allocation5 + $0x63c] ss:$72 sps:$4 sm:$0xff]  }
  0x8f   : > { %5536 = vmatpush2.bf16.msra.mxu0 %v9334_v62  ;;  %v9414_v62 = vld [vmem:[#allocation5 + $0x1830] ss:$72 sps:$4 sm:$0xff]  }
  0x90   : > { %5577 = vmatpush2.bf16.msra.mxu1 %v9335_v63  ;;  %5537 = vmatprep.subr.bf16.mxu0 %v9336_v0  ;;  %v9417_v63 = vld [vmem:[#allocation5 + $0x638] ss:$72 sps:$4 sm:$0xff]   ;;  %v9422_v0 = vld [vmem:[#allocation5 + $0x17a4] ss:$72 sps:$4 sm:$0xff]  }
  0x91   : > { %5578 = vmatprep.subr.bf16.mxu1 %v9338_v1  ;;  %v9425_v1 = vld [vmem:[#allocation5 + $0x5ac] ss:$72 sps:$4 sm:$0xff]  }
  0x93   : > { %5538 = vmatpush2.bf16.msra.mxu0 %v9340_v2  ;;  %v9420_v2 = vld [vmem:[#allocation5 + $0x17a0] ss:$72 sps:$4 sm:$0xff]  }
  0x94   : > { %5579 = vmatpush2.bf16.msra.mxu1 %v9341_v3  ;;  %5589 = vmatprep.subr.bf16.mxu0 %v9344_v6  ;;  %v9423_v3 = vld [vmem:[#allocation5 + $0x5a8] ss:$72 sps:$4 sm:$0xff]  }
  0x95   : > { %5630 = vmatprep.subr.bf16.mxu1 %v9347_v7  ;;  %v9426_v6 = vld [vmem:[#allocation5 + $0x1710] ss:$72 sps:$4 sm:$0xff]  }
  0x96   : > { %5540 = vmatmul.mubr.bf16.vlgmr.msra.gmra.mxu0 %v10916_v8  ;;  %v9429_v7 = vld [vmem:[#allocation5 + $0x518] ss:$72 sps:$4 sm:$0xff]  }
  0x97   : > { %5581 = vmatmul.mubr.bf16.vlgmr.msra.gmra.mxu1 %v10918_v9  ;;  %5590 = vmatpush1.bf16.msra.mxu0 %v9342_v10  ;;  %v9434_v10 = vld [vmem:[#allocation5 + $0x1684] ss:$72 sps:$4 sm:$0xff]  }
  0x98   : > { %5631 = vmatpush1.bf16.msra.mxu1 %v9345_v11  ;;  %5591 = vmatprep.subr.bf16.mxu0 %v9350_v12  ;;  %v9437_v11 = vld [vmem:[#allocation5 + $0x48c] ss:$72 sps:$4 sm:$0xff]   ;;  %v9432_v12 = vld [vmem:[#allocation5 + $0x1680] ss:$72 sps:$4 sm:$0xff]  }
  0x99   : > { %5632 = vmatprep.subr.bf16.mxu1 %v9353_v13  ;;  %5662 = vmatprep.mubr.bf16.mxu1 %v10907_v49  ;;  %v9435_v13 = vld [vmem:[#allocation5 + $0x488] ss:$72 sps:$4 sm:$0xff]  }
  0x9a   : > { %5621 = vmatprep.mubr.bf16.mxu0 %v10924_v35 }
  0x9b   : > { %5592 = vmatpush1.bf16.msra.mxu0 %v9348_v14  ;;  %v219_v14 = vld [vmem:[%s10896_s4 + $0x20] sm:$0xff] }
  0x9c   : > { %5633 = vmatpush1.bf16.msra.mxu1 %v9351_v15  ;;  %5593 = vmatprep.subr.bf16.mxu0 %v9356_v16  ;;  %v9440_v15 = vld [vmem:[#allocation5 + $0xcfc] ss:$72 sps:$4 sm:$0xff]  }
  0x9d   : > { %5634 = vmatprep.subr.bf16.mxu1 %v9359_v17  ;;  %v9443_v16 = vld [vmem:[#allocation5 + $0x15fc] ss:$72 sps:$4 sm:$0xff]   ;;  %v10928_v17 = vpack.c.bf16 %v219_v14, %v219_v14 }
  0x9e   : > { %v9527_v14 = vld [vmem:[#allocation5 + $0x171c] ss:$72 sps:$4 sm:$0xff]  }
  0x9f   : > { %5594 = vmatpush1.bf16.msra.mxu0 %v9354_v18  ;;  %v9438_v18 = vld [vmem:[#allocation5 + $0xcf8] ss:$72 sps:$4 sm:$0xff]  }
  0xa0   : > { %5635 = vmatpush1.bf16.msra.mxu1 %v9357_v19  ;;  %5595 = vmatprep.subr.bf16.mxu0 %v9362_v20  ;;  %v9441_v19 = vld [vmem:[#allocation5 + $0x15f8] ss:$72 sps:$4 sm:$0xff]   ;;  %v9446_v20 = vld [vmem:[#allocation5 + $0xc6c] ss:$72 sps:$4 sm:$0xff]  }
  0xa1   : > { %5636 = vmatprep.subr.bf16.mxu1 %v9365_v21  ;;  %v9449_v21 = vld [vmem:[#allocation5 + $0x156c] ss:$72 sps:$4 sm:$0xff]  }
  0xa3   : > { %5596 = vmatpush1.bf16.msra.mxu0 %v9360_v22  ;;  %v9444_v22 = vld [vmem:[#allocation5 + $0xc68] ss:$72 sps:$4 sm:$0xff]  }
  0xa4   : > { %5637 = vmatpush1.bf16.msra.mxu1 %v9363_v23  ;;  %5597 = vmatprep.subr.bf16.mxu0 %v9368_v24  ;;  %v9447_v23 = vld [vmem:[#allocation5 + $0x1568] ss:$72 sps:$4 sm:$0xff]   ;;  %v9452_v24 = vld [vmem:[#allocation5 + $0xbdc] ss:$72 sps:$4 sm:$0xff]  }
  0xa5   : > { %5638 = vmatprep.subr.bf16.mxu1 %v9371_v25  ;;  %v9455_v25 = vld [vmem:[#allocation5 + $0x14dc] ss:$72 sps:$4 sm:$0xff]  }
  0xa7   : > { %5598 = vmatpush1.bf16.msra.mxu0 %v9366_v26  ;;  %v9450_v26 = vld [vmem:[#allocation5 + $0xbd8] ss:$72 sps:$4 sm:$0xff]  }
  0xa8   : > { %5639 = vmatpush1.bf16.msra.mxu1 %v9369_v27  ;;  %5599 = vmatprep.subr.bf16.mxu0 %v9374_v28  ;;  %v9453_v27 = vld [vmem:[#allocation5 + $0x14d8] ss:$72 sps:$4 sm:$0xff]   ;;  %v9458_v28 = vld [vmem:[#allocation5 + $0xb4c] ss:$72 sps:$4 sm:$0xff]  }
  0xa9   : > { %5640 = vmatprep.subr.bf16.mxu1 %v9377_v29  ;;  %v9461_v29 = vld [vmem:[#allocation5 + $0x144c] ss:$72 sps:$4 sm:$0xff]  }
  0xab   : > { %5600 = vmatpush1.bf16.msra.mxu0 %v9372_v30  ;;  %v9456_v30 = vld [vmem:[#allocation5 + $0xb48] ss:$72 sps:$4 sm:$0xff]  }
  0xac   : > { %5641 = vmatpush1.bf16.msra.mxu1 %v9375_v31  ;;  %5601 = vmatprep.subr.bf16.mxu0 %v9380_v32  ;;  %v9459_v31 = vld [vmem:[#allocation5 + $0x1448] ss:$72 sps:$4 sm:$0xff]   ;;  %v9464_v32 = vld [vmem:[#allocation5 + $0xabc] ss:$72 sps:$4 sm:$0xff]  }
  0xad   : > { %5642 = vmatprep.subr.bf16.mxu1 %v9383_v33  ;;  %v9467_v33 = vld [vmem:[#allocation5 + $0x13bc] ss:$72 sps:$4 sm:$0xff]  }
  0xaf   : > { %5602 = vmatpush1.bf16.msra.mxu0 %v9378_v36  ;;  %v9465_v36 = vld [vmem:[#allocation5 + $0x13b8] ss:$72 sps:$4 sm:$0xff]  }
  0xb0   : > { %5643 = vmatpush1.bf16.msra.mxu1 %v9381_v37  ;;  %5603 = vmatprep.subr.bf16.mxu0 %v9386_v38  ;;  %v9470_v37 = vld [vmem:[#allocation5 + $0xa2c] ss:$72 sps:$4 sm:$0xff]  }
  0xb1   : > { %5644 = vmatprep.subr.bf16.mxu1 %v9389_v39  ;;  %v9473_v38 = vld [vmem:[#allocation5 + $0x132c] ss:$72 sps:$4 sm:$0xff]   ;;  %v9468_v39 = vld [vmem:[#allocation5 + $0xa28] ss:$72 sps:$4 sm:$0xff]  }
  0xb3   : > { %5604 = vmatpush1.bf16.msra.mxu0 %v9384_v40  ;;  %v9471_v40 = vld [vmem:[#allocation5 + $0x1328] ss:$72 sps:$4 sm:$0xff]  }
  0xb4   : > { %5645 = vmatpush1.bf16.msra.mxu1 %v9387_v41  ;;  %5605 = vmatprep.subr.bf16.mxu0 %v9392_v42  ;;  %v9476_v41 = vld [vmem:[#allocation5 + $0x99c] ss:$72 sps:$4 sm:$0xff]  }
  0xb5   : > { %5646 = vmatprep.subr.bf16.mxu1 %v9395_v43  ;;  %v9479_v42 = vld [vmem:[#allocation5 + $0x129c] ss:$72 sps:$4 sm:$0xff]   ;;  %v9474_v43 = vld [vmem:[#allocation5 + $0x998] ss:$72 sps:$4 sm:$0xff]  }
  0xb7   : > { %5606 = vmatpush2.bf16.msra.mxu0 %v9390_v44  ;;  %v9477_v44 = vld [vmem:[#allocation5 + $0x1298] ss:$72 sps:$4 sm:$0xff]  }
  0xb8   : > { %5647 = vmatpush2.bf16.msra.mxu1 %v9393_v45  ;;  %5607 = vmatprep.subr.bf16.mxu0 %v9398_v46  ;;  %v9482_v45 = vld [vmem:[#allocation5 + $0x90c] ss:$72 sps:$4 sm:$0xff]  }
  0xb9   : > { %5648 = vmatprep.subr.bf16.mxu1 %v9401_v47  ;;  %v9485_v46 = vld [vmem:[#allocation5 + $0x120c] ss:$72 sps:$4 sm:$0xff]   ;;  %v9480_v47 = vld [vmem:[#allocation5 + $0x908] ss:$72 sps:$4 sm:$0xff]  }
  0xbb   : > { %5608 = vmatpush2.bf16.msra.mxu0 %v9396_v48  ;;  %v9483_v48 = vld [vmem:[#allocation5 + $0x1208] ss:$72 sps:$4 sm:$0xff]  }
  0xbc   : > { %5649 = vmatpush2.bf16.msra.mxu1 %v9399_v50  ;;  %5609 = vmatprep.subr.bf16.mxu0 %v9404_v51  ;;  %v9488_v50 = vld [vmem:[#allocation5 + $0x117c] ss:$72 sps:$4 sm:$0xff]  }
  0xbd   : > { %5650 = vmatprep.subr.bf16.mxu1 %v9407_v53  ;;  %v9491_v51 = vld [vmem:[#allocation5 + $0x1a7c] ss:$72 sps:$4 sm:$0xff]   ;;  %v9486_v53 = vld [vmem:[#allocation5 + $0x1178] ss:$72 sps:$4 sm:$0xff]  }
  0xbf   : > { %5610 = vmatpush2.bf16.msra.mxu0 %v9402_v54  ;;  %v9489_v54 = vld [vmem:[#allocation5 + $0x1a78] ss:$72 sps:$4 sm:$0xff]  }
  0xc0   : > { %5651 = vmatpush2.bf16.msra.mxu1 %v9405_v55  ;;  %5611 = vmatprep.subr.bf16.mxu0 %v9410_v56  ;;  %v9494_v55 = vld [vmem:[#allocation5 + $0x10ec] ss:$72 sps:$4 sm:$0xff]  }
  0xc1   : > { %5652 = vmatprep.subr.bf16.mxu1 %v9413_v57  ;;  %v9497_v56 = vld [vmem:[#allocation5 + $0x19ec] ss:$72 sps:$4 sm:$0xff]   ;;  %v9492_v57 = vld [vmem:[#allocation5 + $0x10e8] ss:$72 sps:$4 sm:$0xff]  }
  0xc3   : > { %5612 = vmatpush2.bf16.msra.mxu0 %v9408_v58  ;;  %v9495_v58 = vld [vmem:[#allocation5 + $0x19e8] ss:$72 sps:$4 sm:$0xff]  }
  0xc4   : > { %5653 = vmatpush2.bf16.msra.mxu1 %v9411_v59  ;;  %5613 = vmatprep.subr.bf16.mxu0 %v9416_v60  ;;  %v9500_v59 = vld [vmem:[#allocation5 + $0x105c] ss:$72 sps:$4 sm:$0xff]  }
  0xc5   : > { %5654 = vmatprep.subr.bf16.mxu1 %v9419_v61  ;;  %v9503_v60 = vld [vmem:[#allocation5 + $0x195c] ss:$72 sps:$4 sm:$0xff]   ;;  %v9498_v61 = vld [vmem:[#allocation5 + $0x1058] ss:$72 sps:$4 sm:$0xff]  }
  0xc7   : > { %5614 = vmatpush2.bf16.msra.mxu0 %v9414_v62  ;;  %v9501_v62 = vld [vmem:[#allocation5 + $0x1958] ss:$72 sps:$4 sm:$0xff]  }
  0xc8   : > { %5655 = vmatpush2.bf16.msra.mxu1 %v9417_v63  ;;  %5615 = vmatprep.subr.bf16.mxu0 %v9422_v0  ;;  %v9506_v63 = vld [vmem:[#allocation5 + $0xfcc] ss:$72 sps:$4 sm:$0xff]  }
  0xc9   : > { %5656 = vmatprep.subr.bf16.mxu1 %v9425_v1  ;;  %v9509_v0 = vld [vmem:[#allocation5 + $0x18cc] ss:$72 sps:$4 sm:$0xff]   ;;  %v9504_v1 = vld [vmem:[#allocation5 + $0xfc8] ss:$72 sps:$4 sm:$0xff]  }
  0xcb   : > { %5616 = vmatpush2.bf16.msra.mxu0 %v9420_v2  ;;  %v9507_v2 = vld [vmem:[#allocation5 + $0x18c8] ss:$72 sps:$4 sm:$0xff]  }
  0xcc   : > { %5657 = vmatpush2.bf16.msra.mxu1 %v9423_v3  ;;  %5617 = vmatprep.subr.bf16.mxu0 %v9428_v4  ;;  %v9512_v3 = vld [vmem:[#allocation5 + $0xf3c] ss:$72 sps:$4 sm:$0xff]  }
  0xcd   : > { %5658 = vmatprep.subr.bf16.mxu1 %v9431_v5  ;;  %v9515_v4 = vld [vmem:[#allocation5 + $0x183c] ss:$72 sps:$4 sm:$0xff]   ;;  %v9510_v5 = vld [vmem:[#allocation5 + $0xf38] ss:$72 sps:$4 sm:$0xff]  }
  0xcf   : > { %5618 = vmatpush2.bf16.msra.mxu0 %v9426_v6  ;;  %v9513_v6 = vld [vmem:[#allocation5 + $0x1838] ss:$72 sps:$4 sm:$0xff]  }
  0xd0   : > { %5659 = vmatpush2.bf16.msra.mxu1 %v9429_v7  ;;  %5619 = vmatprep.subr.bf16.mxu0 %v9434_v10  ;;  %v9518_v7 = vld [vmem:[#allocation5 + $0xeac] ss:$72 sps:$4 sm:$0xff]  }
  0xd1   : > { %5660 = vmatprep.subr.bf16.mxu1 %v9437_v11  ;;  %v9521_v10 = vld [vmem:[#allocation5 + $0x17ac] ss:$72 sps:$4 sm:$0xff]   ;;  %v9516_v11 = vld [vmem:[#allocation5 + $0xea8] ss:$72 sps:$4 sm:$0xff]  }
  0xd3   : > { %5620 = vmatpush2.bf16.msra.mxu0 %v9432_v12  ;;  %v9519_v12 = vld [vmem:[#allocation5 + $0x17a8] ss:$72 sps:$4 sm:$0xff]  }
  0xd4   : > { %5661 = vmatpush2.bf16.msra.mxu1 %v9435_v13  ;;  %5671 = vmatprep.subr.bf16.mxu0 %v9440_v15  ;;  %v9524_v13 = vld [vmem:[#allocation5 + $0xe1c] ss:$72 sps:$4 sm:$0xff]   ;;  %v9522_v15 = vld [vmem:[#allocation5 + $0xe18] ss:$72 sps:$4 sm:$0xff]  }
  0xd5   : > { %5712 = vmatprep.subr.bf16.mxu1 %v9443_v16  ;;  %v9525_v16 = vld [vmem:[#allocation5 + $0x1718] ss:$72 sps:$4 sm:$0xff]  }
  0xd6   : > { %5622 = vmatmul.mubr.bf16.vlgmr.msra.gmra.mxu0 %v10928_v17 }
  0xd7   : > { %5663 = vmatmul.mubr.bf16.vlgmr.msra.gmra.mxu1 %v10916_v8  ;;  %5672 = vmatpush1.bf16.msra.mxu0 %v9438_v18  ;;  %v9530_v18 = vld [vmem:[#allocation5 + $0xd8c] ss:$72 sps:$4 sm:$0xff]  }
  0xd8   : > { %5713 = vmatpush1.bf16.msra.mxu1 %v9441_v19  ;;  %5673 = vmatprep.subr.bf16.mxu0 %v9446_v20  ;;  %v9533_v19 = vld [vmem:[#allocation5 + $0x168c] ss:$72 sps:$4 sm:$0xff]   ;;  %v9528_v20 = vld [vmem:[#allocation5 + $0xd88] ss:$72 sps:$4 sm:$0xff]  }
  0xd9   : > { %5714 = vmatprep.subr.bf16.mxu1 %v9449_v21  ;;  %5703 = vmatprep.mubr.bf16.mxu0 %v10910_v52  ;;  %v9531_v21 = vld [vmem:[#allocation5 + $0x1688] ss:$72 sps:$4 sm:$0xff]  }
  0xda   : > { %5744 = vmatprep.mubr.bf16.mxu1 %v10924_v35 }
  0xdb   : > { %5674 = vmatpush1.bf16.msra.mxu0 %v9444_v22  ;;  %v9536_v22 = vld [vmem:[#allocation5 + $0x404] ss:$72 sps:$4 sm:$0xff]  }
  0xdc   : > { %5715 = vmatpush1.bf16.msra.mxu1 %v9447_v23  ;;  %5675 = vmatprep.subr.bf16.mxu0 %v9452_v24  ;;  %v9539_v23 = vld [vmem:[#allocation5 + $0xd04] ss:$72 sps:$4 sm:$0xff]   ;;  %v9534_v24 = vld [vmem:[#allocation5 + $0x400] ss:$72 sps:$4 sm:$0xff]  }
  0xdd   : > { %5716 = vmatprep.subr.bf16.mxu1 %v9455_v25  ;;  %v9537_v25 = vld [vmem:[#allocation5 + $0xd00] ss:$72 sps:$4 sm:$0xff]  }
  0xdf   : > { %5676 = vmatpush1.bf16.msra.mxu0 %v9450_v26  ;;  %v9542_v26 = vld [vmem:[#allocation5 + $0x374] ss:$72 sps:$4 sm:$0xff]  }
  0xe0   : > { %5717 = vmatpush1.bf16.msra.mxu1 %v9453_v27  ;;  %5677 = vmatprep.subr.bf16.mxu0 %v9458_v28  ;;  %v9545_v27 = vld [vmem:[#allocation5 + $0xc74] ss:$72 sps:$4 sm:$0xff]   ;;  %v9540_v28 = vld [vmem:[#allocation5 + $0x370] ss:$72 sps:$4 sm:$0xff]  }
  0xe1   : > { %5718 = vmatprep.subr.bf16.mxu1 %v9461_v29  ;;  %v9543_v29 = vld [vmem:[#allocation5 + $0xc70] ss:$72 sps:$4 sm:$0xff]  }
  0xe3   : > { %5678 = vmatpush1.bf16.msra.mxu0 %v9456_v30  ;;  %v9548_v30 = vld [vmem:[#allocation5 + $0x2e4] ss:$72 sps:$4 sm:$0xff]  }
  0xe4   : > { %5719 = vmatpush1.bf16.msra.mxu1 %v9459_v31  ;;  %5679 = vmatprep.subr.bf16.mxu0 %v9464_v32  ;;  %v9551_v31 = vld [vmem:[#allocation5 + $0xbe4] ss:$72 sps:$4 sm:$0xff]   ;;  %v9546_v32 = vld [vmem:[#allocation5 + $0x2e0] ss:$72 sps:$4 sm:$0xff]  }
  0xe5   : > { %5720 = vmatprep.subr.bf16.mxu1 %v9467_v33  ;;  %v9549_v33 = vld [vmem:[#allocation5 + $0xbe0] ss:$72 sps:$4 sm:$0xff]  }
  0xe7   : > { %5680 = vmatpush1.bf16.msra.mxu0 %v9462_v34  ;;  %v9554_v34 = vld [vmem:[#allocation5 + $0x254] ss:$72 sps:$4 sm:$0xff]  }
  0xe8   : > { %5721 = vmatpush1.bf16.msra.mxu1 %v9465_v36  ;;  %5681 = vmatprep.subr.bf16.mxu0 %v9470_v37  ;;  %v9557_v36 = vld [vmem:[#allocation5 + $0xb54] ss:$72 sps:$4 sm:$0xff]   ;;  %v9552_v37 = vld [vmem:[#allocation5 + $0x250] ss:$72 sps:$4 sm:$0xff]  }
  0xe9   : > { %5722 = vmatprep.subr.bf16.mxu1 %v9473_v38  ;;  %v9555_v38 = vld [vmem:[#allocation5 + $0xb50] ss:$72 sps:$4 sm:$0xff]  }
  0xeb   : > { %5682 = vmatpush1.bf16.msra.mxu0 %v9468_v39  ;;  %v9560_v39 = vld [vmem:[#allocation5 + $0x1c4] ss:$72 sps:$4 sm:$0xff]  }
  0xec   : > { %5723 = vmatpush1.bf16.msra.mxu1 %v9471_v40  ;;  %5683 = vmatprep.subr.bf16.mxu0 %v9476_v41  ;;  %v9563_v40 = vld [vmem:[#allocation5 + $0xac4] ss:$72 sps:$4 sm:$0xff]   ;;  %v9558_v41 = vld [vmem:[#allocation5 + $0x1c0] ss:$72 sps:$4 sm:$0xff]  }
  0xed   : > { %5724 = vmatprep.subr.bf16.mxu1 %v9479_v42  ;;  %v9561_v42 = vld [vmem:[#allocation5 + $0xac0] ss:$72 sps:$4 sm:$0xff]  }
  0xef   : > { %5684 = vmatpush1.bf16.msra.mxu0 %v9474_v43  ;;  %v9566_v43 = vld [vmem:[#allocation5 + $0x134] ss:$72 sps:$4 sm:$0xff]  }
  0xf0   : > { %5725 = vmatpush1.bf16.msra.mxu1 %v9477_v44  ;;  %5685 = vmatprep.subr.bf16.mxu0 %v9482_v45  ;;  %v9569_v44 = vld [vmem:[#allocation5 + $0xa34] ss:$72 sps:$4 sm:$0xff]   ;;  %v9564_v45 = vld [vmem:[#allocation5 + $0x130] ss:$72 sps:$4 sm:$0xff]  }
  0xf1   : > { %5726 = vmatprep.subr.bf16.mxu1 %v9485_v46  ;;  %v9567_v46 = vld [vmem:[#allocation5 + $0xa30] ss:$72 sps:$4 sm:$0xff]  }
  0xf3   : > { %5686 = vmatpush1.bf16.msra.mxu0 %v9480_v47  ;;  %v9572_v47 = vld [vmem:[#allocation5 + $0xa4] ss:$72 sps:$4 sm:$0xff]  }
  0xf4   : > { %5727 = vmatpush1.bf16.msra.mxu1 %v9483_v48  ;;  %5687 = vmatprep.subr.bf16.mxu0 %v9488_v50  ;;  %v9575_v48 = vld [vmem:[#allocation5 + $0x9a4] ss:$72 sps:$4 sm:$0xff]   ;;  %v9570_v50 = vld [vmem:[#allocation5 + $0xa0] ss:$72 sps:$4 sm:$0xff]  }
  0xf5   : > { %5728 = vmatprep.subr.bf16.mxu1 %v9491_v51  ;;  %v9573_v51 = vld [vmem:[#allocation5 + $0x9a0] ss:$72 sps:$4 sm:$0xff]  }
  0xf7   : > { %5688 = vmatpush2.bf16.msra.mxu0 %v9486_v53  ;;  %v9578_v53 = vld [vmem:[#allocation5 + $0x14] ss:$72 sps:$4 sm:$0xff]  }
  0xf8   : > { %5729 = vmatpush2.bf16.msra.mxu1 %v9489_v54  ;;  %5689 = vmatprep.subr.bf16.mxu0 %v9494_v55  ;;  %v9581_v54 = vld [vmem:[#allocation5 + $0x914] ss:$72 sps:$4 sm:$0xff]   ;;  %v9576_v55 = vld [vmem:[#allocation5 + $0x10] ss:$72 sps:$4 sm:$0xff]  }
  0xf9   : > { %5730 = vmatprep.subr.bf16.mxu1 %v9497_v56  ;;  %v9579_v56 = vld [vmem:[#allocation5 + $0x910] ss:$72 sps:$4 sm:$0xff]  }
  0xfb   : > { %5690 = vmatpush2.bf16.msra.mxu0 %v9492_v57  ;;  %v9584_v57 = vld [vmem:[#allocation5 + $0x884] ss:$72 sps:$4 sm:$0xff]  }
  0xfc   : > { %5731 = vmatpush2.bf16.msra.mxu1 %v9495_v58  ;;  %5691 = vmatprep.subr.bf16.mxu0 %v9500_v59  ;;  %v9587_v58 = vld [vmem:[#allocation5 + $0x1184] ss:$72 sps:$4 sm:$0xff]   ;;  %v9582_v59 = vld [vmem:[#allocation5 + $0x880] ss:$72 sps:$4 sm:$0xff]  }
  0xfd   : > { %5732 = vmatprep.subr.bf16.mxu1 %v9503_v60  ;;  %v9585_v60 = vld [vmem:[#allocation5 + $0x1180] ss:$72 sps:$4 sm:$0xff]  }
  0xff   : > { %5692 = vmatpush2.bf16.msra.mxu0 %v9498_v61  ;;  %v9590_v61 = vld [vmem:[#allocation5 + $0x7f4] ss:$72 sps:$4 sm:$0xff]  }
 0x100   : > { %5733 = vmatpush2.bf16.msra.mxu1 %v9501_v62  ;;  %5693 = vmatprep.subr.bf16.mxu0 %v9506_v63  ;;  %v9593_v62 = vld [vmem:[#allocation5 + $0x10f4] ss:$72 sps:$4 sm:$0xff]   ;;  %v9588_v63 = vld [vmem:[#allocation5 + $0x7f0] ss:$72 sps:$4 sm:$0xff]  }
 0x101   : > { %5734 = vmatprep.subr.bf16.mxu1 %v9509_v0  ;;  %v9591_v0 = vld [vmem:[#allocation5 + $0x10f0] ss:$72 sps:$4 sm:$0xff]  }
 0x103   : > { %5694 = vmatpush2.bf16.msra.mxu0 %v9504_v1  ;;  %v9596_v1 = vld [vmem:[#allocation5 + $0x764] ss:$72 sps:$4 sm:$0xff]  }
 0x104   : > { %5735 = vmatpush2.bf16.msra.mxu1 %v9507_v2  ;;  %5695 = vmatprep.subr.bf16.mxu0 %v9512_v3  ;;  %v9599_v2 = vld [vmem:[#allocation5 + $0x1064] ss:$72 sps:$4 sm:$0xff]   ;;  %v9594_v3 = vld [vmem:[#allocation5 + $0x760] ss:$72 sps:$4 sm:$0xff]  }
 0x105   : > { %5736 = vmatprep.subr.bf16.mxu1 %v9515_v4  ;;  %v9597_v4 = vld [vmem:[#allocation5 + $0x1060] ss:$72 sps:$4 sm:$0xff]  }
 0x107   : > { %5696 = vmatpush2.bf16.msra.mxu0 %v9510_v5  ;;  %v9602_v5 = vld [vmem:[#allocation5 + $0x6d4] ss:$72 sps:$4 sm:$0xff]  }
 0x108   : > { %5737 = vmatpush2.bf16.msra.mxu1 %v9513_v6  ;;  %5697 = vmatprep.subr.bf16.mxu0 %v9518_v7  ;;  %v9605_v6 = vld [vmem:[#allocation5 + $0xfd4] ss:$72 sps:$4 sm:$0xff]   ;;  %v9600_v7 = vld [vmem:[#allocation5 + $0x6d0] ss:$72 sps:$4 sm:$0xff]  }
 0x109   : > { %5738 = vmatprep.subr.bf16.mxu1 %v9521_v10  ;;  %v9603_v10 = vld [vmem:[#allocation5 + $0xfd0] ss:$72 sps:$4 sm:$0xff]  }
 0x10b   : > { %5698 = vmatpush2.bf16.msra.mxu0 %v9516_v11  ;;  %v9608_v11 = vld [vmem:[#allocation5 + $0x644] ss:$72 sps:$4 sm:$0xff]  }
 0x10c   : > { %5739 = vmatpush2.bf16.msra.mxu1 %v9519_v12  ;;  %5699 = vmatprep.subr.bf16.mxu0 %v9524_v13  ;;  %v9611_v12 = vld [vmem:[#allocation5 + $0xf44] ss:$72 sps:$4 sm:$0xff]   ;;  %v9606_v13 = vld [vmem:[#allocation5 + $0x640] ss:$72 sps:$4 sm:$0xff]  }
 0x10d   : > { %5740 = vmatprep.subr.bf16.mxu1 %v9527_v14  ;;  %v9609_v14 = vld [vmem:[#allocation5 + $0xf40] ss:$72 sps:$4 sm:$0xff]  }
 0x10f   : > { %5700 = vmatpush2.bf16.msra.mxu0 %v9522_v15  ;;  %v9614_v15 = vld [vmem:[#allocation5 + $0x5b4] ss:$72 sps:$4 sm:$0xff]  }
 0x110   : > { %5741 = vmatpush2.bf16.msra.mxu1 %v9525_v16  ;;  %5701 = vmatprep.subr.bf16.mxu0 %v9530_v18  ;;  %v9617_v16 = vld [vmem:[#allocation5 + $0xeb4] ss:$72 sps:$4 sm:$0xff]   ;;  %v9612_v18 = vld [vmem:[#allocation5 + $0x5b0] ss:$72 sps:$4 sm:$0xff]  }
 0x111   : > { %5742 = vmatprep.subr.bf16.mxu1 %v9533_v19  ;;  %v9615_v19 = vld [vmem:[#allocation5 + $0xeb0] ss:$72 sps:$4 sm:$0xff]  }
 0x113   : > { %5702 = vmatpush2.bf16.msra.mxu0 %v9528_v20  ;;  %v9620_v20 = vld [vmem:[#allocation5 + $0x524] ss:$72 sps:$4 sm:$0xff]  }
 0x114   : > { %5743 = vmatpush2.bf16.msra.mxu1 %v9531_v21  ;;  %5753 = vmatprep.subr.bf16.mxu0 %v9536_v22  ;;  %v1097_v21 = vlaneseq  ;;  %v9623_v22 = vld [vmem:[#allocation5 + $0xe24] ss:$72 sps:$4 sm:$0xff]  }
 0x115   : > { %5794 = vmatprep.subr.bf16.mxu1 %v9539_v23  ;;  %v9618_v23 = vld [vmem:[#allocation5 + $0x520] ss:$72 sps:$4 sm:$0xff]  }
 0x116   : > { %5704 = vmatmul.mubr.bf16.vlgmr.msra.gmra.mxu0 %v10918_v9 }
 0x117   : > { %5745 = vmatmul.mubr.bf16.vlgmr.msra.gmra.mxu1 %v10928_v17  ;;  %5754 = vmatpush1.bf16.msra.mxu0 %v9534_v24  ;;  %v9621_v24 = vld [vmem:[#allocation5 + $0xe20] ss:$72 sps:$4 sm:$0xff]  }
 0x118   : > { %5795 = vmatpush1.bf16.msra.mxu1 %v9537_v25  ;;  %5755 = vmatprep.subr.bf16.mxu0 %v9542_v26  ;;  %v9626_v25 = vld [vmem:[#allocation5 + $0x494] ss:$72 sps:$4 sm:$0xff]   ;;  %v10938_v26 = vshrl.u32 %v1097_v21, 7  ;;  %v9680_v21 = vld [vmem:[#allocation5 + $0x1a84] ss:$72 sps:$4 sm:$0xff]  }
 0x119   : > { %5796 = vmatprep.subr.bf16.mxu1 %v9545_v27  ;;  %5785 = vmatprep.mubr.bf16.mxu0 %v10907_v49  ;;  %v9629_v27 = vld [vmem:[#allocation5 + $0xd94] ss:$72 sps:$4 sm:$0xff]  }
 0x11a   : > { %5826 = vmatprep.mubr.bf16.mxu1 %v10910_v52 }
 0x11b   : > { %5756 = vmatpush1.bf16.msra.mxu0 %v9540_v28  ;;  %v9624_v28 = vld [vmem:[#allocation5 + $0x490] ss:$72 sps:$4 sm:$0xff]  }
 0x11c   : > { %5797 = vmatpush1.bf16.msra.mxu1 %v9543_v29  ;;  %5757 = vmatprep.subr.bf16.mxu0 %v9548_v30  ;;  %v9627_v29 = vld [vmem:[#allocation5 + $0xd90] ss:$72 sps:$4 sm:$0xff]   ;;  %v1091_v30 = vld [vmem:[#allocation7] sm:$0xff] }
 0x11d   : > { %5798 = vmatprep.subr.bf16.mxu1 %v9551_v31  ;;  %v10941_v31 = vsub.s32 0, %v10938_v26 }
 0x11f   : > { %5758 = vmatpush1.bf16.msra.mxu0 %v9546_v32  ;;  %v9632_v32 = vld [vmem:[#allocation5 + $0x1604] ss:$72 sps:$4 sm:$0xff]  }
 0x120   : > { %5799 = vmatpush1.bf16.msra.mxu1 %v9549_v33  ;;  %5759 = vmatprep.subr.bf16.mxu0 %v9554_v34  ;;  %v9635_v33 = vld [vmem:[#allocation5 + $0x40c] ss:$72 sps:$4 sm:$0xff]   ;;  %v10944_v34 = vsub.s32 1, %v10938_v26 }
 0x121   : > { %5800 = vmatprep.subr.bf16.mxu1 %v9557_v36  ;;  %v9630_v36 = vld [vmem:[#allocation5 + $0x1600] ss:$72 sps:$4 sm:$0xff]  }
 0x123   : > { %5760 = vmatpush1.bf16.msra.mxu0 %v9552_v37  ;;  %v1100_v37 = vrot.slane %v1091_v30, %v10941_v31 }
 0x124   : > { %5801 = vmatpush1.bf16.msra.mxu1 %v9555_v38  ;;  %5761 = vmatprep.subr.bf16.mxu0 %v9560_v39  ;;  %v9633_v38 = vld [vmem:[#allocation5 + $0x408] ss:$72 sps:$4 sm:$0xff]   ;;  %v9638_v39 = vld [vmem:[#allocation5 + $0x1574] ss:$72 sps:$4 sm:$0xff]  }
 0x125   : > { %5802 = vmatprep.subr.bf16.mxu1 %v9563_v40  ;;  %v9641_v40 = vld [vmem:[#allocation5 + $0x37c] ss:$72 sps:$4 sm:$0xff]  }
 0x127   : > { %5762 = vmatpush1.bf16.msra.mxu0 %v9558_v41  ;;  %v1104_v41 = vrot.slane %v1091_v30, %v10944_v34  ;;  %v9692_v30 = vld [vmem:[#allocation5 + $0x1964] ss:$72 sps:$4 sm:$0xff]  }
 0x128   : > { %5803 = vmatpush1.bf16.msra.mxu1 %v9561_v42  ;;  %5763 = vmatprep.subr.bf16.mxu0 %v9566_v43 }
 0x129   : > { %5804 = vmatprep.subr.bf16.mxu1 %v9569_v44  ;;  %v9636_v44 = vld [vmem:[#allocation5 + $0x1570] ss:$72 sps:$4 sm:$0xff]  }
 0x12b   : > { %5764 = vmatpush1.bf16.msra.mxu0 %v9564_v45 }
 0x12c   : > { %5805 = vmatpush1.bf16.msra.mxu1 %v9567_v46  ;;  %5765 = vmatprep.subr.bf16.mxu0 %v9572_v47  ;;  %v9639_v46 = vld [vmem:[#allocation5 + $0x378] ss:$72 sps:$4 sm:$0xff]   ;;  %v9644_v47 = vld [vmem:[#allocation5 + $0x14e4] ss:$72 sps:$4 sm:$0xff]  }
 0x12d   : > { %5806 = vmatprep.subr.bf16.mxu1 %v9575_v48 }
 0x12f   : > { %5766 = vmatpush1.bf16.msra.mxu0 %v9570_v50 }
 0x130   : > { %5807 = vmatpush1.bf16.msra.mxu1 %v9573_v51  ;;  %5767 = vmatprep.subr.bf16.mxu0 %v9578_v53  ;;  %v9647_v51 = vld [vmem:[#allocation5 + $0x2ec] ss:$72 sps:$4 sm:$0xff]  }
 0x131   : > { %5808 = vmatprep.subr.bf16.mxu1 %v9581_v54 }
 0x133   : > { %5768 = vmatpush1.bf16.msra.mxu0 %v9576_v55 }
 0x134   : > { %5809 = vmatpush1.bf16.msra.mxu1 %v9579_v56  ;;  %5769 = vmatprep.subr.bf16.mxu0 %v9584_v57  ;;  %v9642_v56 = vld [vmem:[#allocation5 + $0x14e0] ss:$72 sps:$4 sm:$0xff]  }
 0x135   : > { %5810 = vmatprep.subr.bf16.mxu1 %v9587_v58  ;;  %v9645_v57 = vld [vmem:[#allocation5 + $0x2e8] ss:$72 sps:$4 sm:$0xff]  }
 0x137   : > { %5770 = vmatpush2.bf16.msra.mxu0 %v9582_v59 }
 0x138   : > { %5811 = vmatpush2.bf16.msra.mxu1 %v9585_v60  ;;  %5771 = vmatprep.subr.bf16.mxu0 %v9590_v61  ;;  %v9650_v61 = vld [vmem:[#allocation5 + $0x1454] ss:$72 sps:$4 sm:$0xff]  }
 0x139   : > { %5812 = vmatprep.subr.bf16.mxu1 %v9593_v62  ;;  %v9653_v62 = vld [vmem:[#allocation5 + $0x25c] ss:$72 sps:$4 sm:$0xff]  }
 0x13b   : > { %5772 = vmatpush2.bf16.msra.mxu0 %v9588_v63 }
 0x13c   : > { %5813 = vmatpush2.bf16.msra.mxu1 %v9591_v0  ;;  %5773 = vmatprep.subr.bf16.mxu0 %v9596_v1  ;;  %v9648_v0 = vld [vmem:[#allocation5 + $0x1450] ss:$72 sps:$4 sm:$0xff]  }
 0x13d   : > { %5814 = vmatprep.subr.bf16.mxu1 %v9599_v2  ;;  %v9651_v1 = vld [vmem:[#allocation5 + $0x258] ss:$72 sps:$4 sm:$0xff]   ;;  %v9656_v2 = vld [vmem:[#allocation5 + $0x13c4] ss:$72 sps:$4 sm:$0xff]  }
 0x13f   : > { %5774 = vmatpush2.bf16.msra.mxu0 %v9594_v3  ;;  %v9659_v3 = vld [vmem:[#allocation5 + $0x1cc] ss:$72 sps:$4 sm:$0xff]  }
 0x140   : > { %5815 = vmatpush2.bf16.msra.mxu1 %v9597_v4  ;;  %5775 = vmatprep.subr.bf16.mxu0 %v9602_v5  ;;  %v9654_v4 = vld [vmem:[#allocation5 + $0x13c0] ss:$72 sps:$4 sm:$0xff]  }
 0x141   : > { %5816 = vmatprep.subr.bf16.mxu1 %v9605_v6  ;;  %v9657_v5 = vld [vmem:[#allocation5 + $0x1c8] ss:$72 sps:$4 sm:$0xff]   ;;  %v9662_v6 = vld [vmem:[#allocation5 + $0x1334] ss:$72 sps:$4 sm:$0xff]  }
 0x143   : > { %5776 = vmatpush2.bf16.msra.mxu0 %v9600_v7  ;;  %v9665_v7 = vld [vmem:[#allocation5 + $0x13c] ss:$72 sps:$4 sm:$0xff]  }
 0x144   : > { %5817 = vmatpush2.bf16.msra.mxu1 %v9603_v10  ;;  %5777 = vmatprep.subr.bf16.mxu0 %v9608_v11  ;;  %v9660_v10 = vld [vmem:[#allocation5 + $0x1330] ss:$72 sps:$4 sm:$0xff]  }
 0x145   : > { %5818 = vmatprep.subr.bf16.mxu1 %v9611_v12  ;;  %v9663_v11 = vld [vmem:[#allocation5 + $0x138] ss:$72 sps:$4 sm:$0xff]   ;;  %v9668_v12 = vld [vmem:[#allocation5 + $0x12a4] ss:$72 sps:$4 sm:$0xff]  }
 0x147   : > { %5778 = vmatpush2.bf16.msra.mxu0 %v9606_v13  ;;  %v9671_v13 = vld [vmem:[#allocation5 + $0xac] ss:$72 sps:$4 sm:$0xff]  }
 0x148   : > { %5819 = vmatpush2.bf16.msra.mxu1 %v9609_v14  ;;  %5779 = vmatprep.subr.bf16.mxu0 %v9614_v15  ;;  %v9666_v14 = vld [vmem:[#allocation5 + $0x12a0] ss:$72 sps:$4 sm:$0xff]  }
 0x149   : > { %5820 = vmatprep.subr.bf16.mxu1 %v9617_v16  ;;  %v9669_v15 = vld [vmem:[#allocation5 + $0xa8] ss:$72 sps:$4 sm:$0xff]   ;;  %v9674_v16 = vld [vmem:[#allocation5 + $0x1214] ss:$72 sps:$4 sm:$0xff]  }
 0x14b   : > { %5780 = vmatpush2.bf16.msra.mxu0 %v9612_v18  ;;  %v9677_v18 = vld [vmem:[#allocation5 + $0x1c] ss:$72 sps:$4 sm:$0xff]  }
 0x14c   : > { %5821 = vmatpush2.bf16.msra.mxu1 %v9615_v19  ;;  %5781 = vmatprep.subr.bf16.mxu0 %v9620_v20  ;;  %v9672_v19 = vld [vmem:[#allocation5 + $0x1210] ss:$72 sps:$4 sm:$0xff]  }
 0x14d   : > { %5822 = vmatprep.subr.bf16.mxu1 %v9623_v22  ;;  %v9675_v20 = vld [vmem:[#allocation5 + $0x18] ss:$72 sps:$4 sm:$0xff]   ;;  %v9683_v22 = vld [vmem:[#allocation5 + $0x88c] ss:$72 sps:$4 sm:$0xff]  }
 0x14f   : > { %5782 = vmatpush2.bf16.msra.mxu0 %v9618_v23  ;;  %v9678_v23 = vld [vmem:[#allocation5 + $0x1a80] ss:$72 sps:$4 sm:$0xff]  }
 0x150   : > { %5823 = vmatpush2.bf16.msra.mxu1 %v9621_v24  ;;  %5783 = vmatprep.subr.bf16.mxu0 %v9626_v25  ;;  %v9681_v24 = vld [vmem:[#allocation5 + $0x888] ss:$72 sps:$4 sm:$0xff]   ;;  %v9686_v25 = vld [vmem:[#allocation5 + $0x19f4] ss:$72 sps:$4 sm:$0xff]  }
 0x151   : > { %5824 = vmatprep.subr.bf16.mxu1 %v9629_v27  ;;  %v9689_v27 = vld [vmem:[#allocation5 + $0x7fc] ss:$72 sps:$4 sm:$0xff]  }
 0x153   : > { %5784 = vmatpush2.bf16.msra.mxu0 %v9624_v28  ;;  %v9684_v28 = vld [vmem:[#allocation5 + $0x19f0] ss:$72 sps:$4 sm:$0xff]  }
 0x154   : > { %5825 = vmatpush2.bf16.msra.mxu1 %v9627_v29  ;;  %5835 = vmatprep.subr.bf16.mxu0 %v9632_v32  ;;  %v9687_v29 = vld [vmem:[#allocation5 + $0x7f8] ss:$72 sps:$4 sm:$0xff]   ;;  %v9695_v32 = vld [vmem:[#allocation5 + $0x76c] ss:$72 sps:$4 sm:$0xff]  }
 0x155   : > { %5876 = vmatprep.subr.bf16.mxu1 %v9635_v33  ;;  %v9690_v33 = vld [vmem:[#allocation5 + $0x1960] ss:$72 sps:$4 sm:$0xff]  }
 0x156   : > { %v5541_v42 = vpop.f32.mrf.mxu0  ;;  %5786 = vmatmul.mubr.bf16.vlgmr.msra.gmra.mxu0 %v10916_v8 }
 0x157   : > { %v5582_v43 = vpop.f32.mrf.mxu1  ;;  %5827 = vmatmul.mubr.bf16.vlgmr.msra.gmra.mxu1 %v10918_v9  ;;  %v5542_v45 = vadd.f32 %v5541_v42, %v1100_v37  ;;  %5836 = vmatpush1.bf16.msra.mxu0 %v9630_v36  ;;  %v9693_v36 = vld [vmem:[#allocation5 + $0x768] ss:$72 sps:$4 sm:$0xff]   ;;  %v9698_v37 = vld [vmem:[#allocation5 + $0x18d4] ss:$72 sps:$4 sm:$0xff]  }
 0x158   : > { %5877 = vmatpush1.bf16.msra.mxu1 %v9633_v38  ;;  %v5543_v48 = vpop.f32.mrf.mxu0  ;;  %5837 = vmatprep.subr.bf16.mxu0 %v9638_v39  ;;  %v9701_v38 = vld [vmem:[#allocation5 + $0x6dc] ss:$72 sps:$4 sm:$0xff]   ;;  %v9696_v39 = vld [vmem:[#allocation5 + $0x18d0] ss:$72 sps:$4 sm:$0xff]   ;;  %v9707_v42 = vld [vmem:[#allocation5 + $0x64c] ss:$72 sps:$4 sm:$0xff]  }
 0x159   : > { %v5584_v50 = vpop.f32.mrf.mxu1  ;;  %5878 = vmatprep.subr.bf16.mxu1 %v9641_v40  ;;  %v10950_v53 = vadd.f32 %v5582_v43, %v5542_v45  ;;  %v5544_v54 = vadd.f32 %v5543_v48, %v1104_v41  ;;  %5867 = vmatprep.mubr.bf16.mxu0 %v10924_v35  ;;  %v9699_v40 = vld [vmem:[#allocation5 + $0x6d8] ss:$72 sps:$4 sm:$0xff]   ;;  %v9704_v41 = vld [vmem:[#allocation5 + $0x1844] ss:$72 sps:$4 sm:$0xff]   ;;  %v9710_v45 = vld [vmem:[#allocation5 + $0x17b4] ss:$72 sps:$4 sm:$0xff]  }
 0x15a   : > { %5908 = vmatprep.mubr.bf16.mxu1 %v10907_v49  ;;  %v5545_v58 = vpop.f32.mrf.mxu0  ;;  %v9702_v43 = vld [vmem:[#allocation5 + $0x1840] ss:$72 sps:$4 sm:$0xff]  }
 0x15b   : > { %v5586_v55 = vpop.f32.mrf.mxu1  ;;  %v10954_v59 = vadd.f32 %v5584_v50, %v5544_v54  ;;  %5838 = vmatpush1.bf16.msra.mxu0 %v9636_v44  ;;  %v9705_v44 = vld [vmem:[#allocation5 + $0x648] ss:$72 sps:$4 sm:$0xff]   ;;  %v9711_v48 = vld [vmem:[#allocation5 + $0x5b8] ss:$72 sps:$4 sm:$0xff]   ;;  %v9716_v50 = vld [vmem:[#allocation5 + $0x1724] ss:$72 sps:$4 sm:$0xff]  }
 0x15c   : > { %5879 = vmatpush1.bf16.msra.mxu1 %v9639_v46  ;;  %5839 = vmatprep.subr.bf16.mxu0 %v9644_v47  ;;  %v5546_v63 = vpop.f32.mrf.mxu0  ;;  %v9713_v46 = vld [vmem:[#allocation5 + $0x5bc] ss:$72 sps:$4 sm:$0xff]   ;;  %v9708_v47 = vld [vmem:[#allocation5 + $0x17b0] ss:$72 sps:$4 sm:$0xff]   ;;  %v9714_v54 = vld [vmem:[#allocation5 + $0x1720] ss:$72 sps:$4 sm:$0xff]  }
 0x15d   : > { %v5587_v60 = vpop.f32.mrf.mxu1  ;;  %5880 = vmatprep.subr.bf16.mxu1 %v9647_v51  ;;  %v9719_v51 = vld [vmem:[#allocation5 + $0x52c] ss:$72 sps:$4 sm:$0xff]   ;;  %v9717_v55 = vld [vmem:[#allocation5 + $0x528] ss:$72 sps:$4 sm:$0xff]  }
 0x15e   : > { %v9720_v58 = vld [vmem:[#allocation5 + $0x1690] ss:$72 sps:$4 sm:$0xff]  }
 0x15f   : > { %5840 = vmatpush1.bf16.msra.mxu0 %v9642_v56  ;;  %v9722_v56 = vld [vmem:[#allocation5 + $0x1694] ss:$72 sps:$4 sm:$0xff]   ;;  %v9723_v60 = vld [vmem:[#allocation5 + $0x498] ss:$72 sps:$4 sm:$0xff]   ;;  %v9726_v63 = vld [vmem:[#allocation5 + $0xd08] ss:$72 sps:$4 sm:$0xff]  }
 0x160   : > { %5881 = vmatpush1.bf16.msra.mxu1 %v9645_v57  ;;  %5841 = vmatprep.subr.bf16.mxu0 %v9650_v61  ;;  %v9725_v57 = vld [vmem:[#allocation5 + $0x49c] ss:$72 sps:$4 sm:$0xff]   ;;  %v9728_v61 = vld [vmem:[#allocation5 + $0xd0c] ss:$72 sps:$4 sm:$0xff]  }
 0x161   : > { %5882 = vmatprep.subr.bf16.mxu1 %v9653_v62  ;;  %v9731_v62 = vld [vmem:[#allocation5 + $0x160c] ss:$72 sps:$4 sm:$0xff]  }
 0x163   : > { %5842 = vmatpush1.bf16.msra.mxu0 %v9648_v0  ;;  %v9729_v0 = vld [vmem:[#allocation5 + $0x1608] ss:$72 sps:$4 sm:$0xff]  }
 0x164   : > { %5883 = vmatpush1.bf16.msra.mxu1 %v9651_v1  ;;  %5843 = vmatprep.subr.bf16.mxu0 %v9656_v2  ;;  %v9734_v1 = vld [vmem:[#allocation5 + $0xc7c] ss:$72 sps:$4 sm:$0xff]  }
 0x165   : > { %5884 = vmatprep.subr.bf16.mxu1 %v9659_v3  ;;  %v9737_v2 = vld [vmem:[#allocation5 + $0x157c] ss:$72 sps:$4 sm:$0xff]   ;;  %v9732_v3 = vld [vmem:[#allocation5 + $0xc78] ss:$72 sps:$4 sm:$0xff]  }
 0x167   : > { %5844 = vmatpush1.bf16.msra.mxu0 %v9654_v4  ;;  %v9735_v4 = vld [vmem:[#allocation5 + $0x1578] ss:$72 sps:$4 sm:$0xff]  }
 0x168   : > { %5885 = vmatpush1.bf16.msra.mxu1 %v9657_v5  ;;  %5845 = vmatprep.subr.bf16.mxu0 %v9662_v6 }
 0x169   : > { %5886 = vmatprep.subr.bf16.mxu1 %v9665_v7 }
 0x16b   : > { %5846 = vmatpush1.bf16.msra.mxu0 %v9660_v10 }
 0x16c   : > { %5887 = vmatpush1.bf16.msra.mxu1 %v9663_v11  ;;  %5847 = vmatprep.subr.bf16.mxu0 %v9668_v12  ;;  %v9740_v12 = vld [vmem:[#allocation5 + $0xbec] ss:$72 sps:$4 sm:$0xff]  }
 0x16d   : > { %5888 = vmatprep.subr.bf16.mxu1 %v9671_v13  ;;  %v9743_v13 = vld [vmem:[#allocation5 + $0x14ec] ss:$72 sps:$4 sm:$0xff]  }
 0x16f   : > { %5848 = vmatpush1.bf16.msra.mxu0 %v9666_v14 }
 0x170   : > { %5889 = vmatpush1.bf16.msra.mxu1 %v9669_v15  ;;  %5849 = vmatprep.subr.bf16.mxu0 %v9674_v16  ;;  %v9738_v15 = vld [vmem:[#allocation5 + $0xbe8] ss:$72 sps:$4 sm:$0xff]  }
 0x171   : > { %5890 = vmatprep.subr.bf16.mxu1 %v9677_v18  ;;  %v9741_v16 = vld [vmem:[#allocation5 + $0x14e8] ss:$72 sps:$4 sm:$0xff]  }
 0x173   : > { %5850 = vmatpush1.bf16.msra.mxu0 %v9672_v19 }
 0x174   : > { %5891 = vmatpush1.bf16.msra.mxu1 %v9675_v20  ;;  %5851 = vmatprep.subr.bf16.mxu0 %v9680_v21  ;;  %v9746_v20 = vld [vmem:[#allocation5 + $0xb5c] ss:$72 sps:$4 sm:$0xff]  }
 0x175   : > { %5892 = vmatprep.subr.bf16.mxu1 %v9683_v22  ;;  %v9749_v21 = vld [vmem:[#allocation5 + $0x145c] ss:$72 sps:$4 sm:$0xff]  }
 0x177   : > { %5852 = vmatpush2.bf16.msra.mxu0 %v9678_v23  ;;  %v9747_v23 = vld [vmem:[#allocation5 + $0x1458] ss:$72 sps:$4 sm:$0xff]  }
 0x178   : > { %5893 = vmatpush2.bf16.msra.mxu1 %v9681_v24  ;;  %5853 = vmatprep.subr.bf16.mxu0 %v9686_v25  ;;  %v9752_v24 = vld [vmem:[#allocation5 + $0xacc] ss:$72 sps:$4 sm:$0xff]  }
 0x179   : > { %5894 = vmatprep.subr.bf16.mxu1 %v9689_v27  ;;  %v9755_v25 = vld [vmem:[#allocation5 + $0x13cc] ss:$72 sps:$4 sm:$0xff]   ;;  %v9750_v27 = vld [vmem:[#allocation5 + $0xac8] ss:$72 sps:$4 sm:$0xff]  }
 0x17b   : > { %5854 = vmatpush2.bf16.msra.mxu0 %v9684_v28  ;;  %v9753_v28 = vld [vmem:[#allocation5 + $0x13c8] ss:$72 sps:$4 sm:$0xff]  }
 0x17c   : > { %5895 = vmatpush2.bf16.msra.mxu1 %v9687_v29  ;;  %5855 = vmatprep.subr.bf16.mxu0 %v9692_v30  ;;  %v9758_v29 = vld [vmem:[#allocation5 + $0xa3c] ss:$72 sps:$4 sm:$0xff]  }
 0x17d   : > { %5896 = vmatprep.subr.bf16.mxu1 %v9695_v32  ;;  %v9761_v30 = vld [vmem:[#allocation5 + $0x133c] ss:$72 sps:$4 sm:$0xff]   ;;  %v9756_v32 = vld [vmem:[#allocation5 + $0xa38] ss:$72 sps:$4 sm:$0xff]  }
 0x17f   : > { %5856 = vmatpush2.bf16.msra.mxu0 %v9690_v33  ;;  %v9759_v33 = vld [vmem:[#allocation5 + $0x1338] ss:$72 sps:$4 sm:$0xff]  }
 0x180   : > { %5897 = vmatpush2.bf16.msra.mxu1 %v9693_v36  ;;  %5857 = vmatprep.subr.bf16.mxu0 %v9698_v37  ;;  %v9764_v36 = vld [vmem:[#allocation5 + $0x9ac] ss:$72 sps:$4 sm:$0xff]  }
 0x181   : > { %5898 = vmatprep.subr.bf16.mxu1 %v9701_v38  ;;  %v9767_v37 = vld [vmem:[#allocation5 + $0x12ac] ss:$72 sps:$4 sm:$0xff]   ;;  %v9762_v38 = vld [vmem:[#allocation5 + $0x9a8] ss:$72 sps:$4 sm:$0xff]  }
 0x183   : > { %5858 = vmatpush2.bf16.msra.mxu0 %v9696_v39  ;;  %v9765_v39 = vld [vmem:[#allocation5 + $0x12a8] ss:$72 sps:$4 sm:$0xff]  }
 0x184   : > { %5899 = vmatpush2.bf16.msra.mxu1 %v9699_v40  ;;  %5859 = vmatprep.subr.bf16.mxu0 %v9704_v41  ;;  %v9770_v40 = vld [vmem:[#allocation5 + $0x91c] ss:$72 sps:$4 sm:$0xff]  }
 0x185   : > { %5900 = vmatprep.subr.bf16.mxu1 %v9707_v42  ;;  %v9773_v41 = vld [vmem:[#allocation5 + $0x121c] ss:$72 sps:$4 sm:$0xff]   ;;  %v9768_v42 = vld [vmem:[#allocation5 + $0x918] ss:$72 sps:$4 sm:$0xff]  }
 0x187   : > { %5860 = vmatpush2.bf16.msra.mxu0 %v9702_v43  ;;  %v9771_v43 = vld [vmem:[#allocation5 + $0x1218] ss:$72 sps:$4 sm:$0xff]  }
 0x188   : > { %5901 = vmatpush2.bf16.msra.mxu1 %v9705_v44  ;;  %5861 = vmatprep.subr.bf16.mxu0 %v9710_v45  ;;  %v9776_v44 = vld [vmem:[#allocation5 + $0x118c] ss:$72 sps:$4 sm:$0xff]  }
 0x189   : > { %5902 = vmatprep.subr.bf16.mxu1 %v9713_v46  ;;  %v9779_v45 = vld [vmem:[#allocation5 + $0x1a8c] ss:$72 sps:$4 sm:$0xff]   ;;  %v9774_v46 = vld [vmem:[#allocation5 + $0x1188] ss:$72 sps:$4 sm:$0xff]  }
 0x18b   : > { %5862 = vmatpush2.bf16.msra.mxu0 %v9708_v47  ;;  %v9777_v47 = vld [vmem:[#allocation5 + $0x1a88] ss:$72 sps:$4 sm:$0xff]  }
 0x18c   : > { %5903 = vmatpush2.bf16.msra.mxu1 %v9711_v48  ;;  %5863 = vmatprep.subr.bf16.mxu0 %v9716_v50  ;;  %v9782_v48 = vld [vmem:[#allocation5 + $0x10fc] ss:$72 sps:$4 sm:$0xff]  }
 0x18d   : > { %5904 = vmatprep.subr.bf16.mxu1 %v9719_v51  ;;  %v9785_v50 = vld [vmem:[#allocation5 + $0x19fc] ss:$72 sps:$4 sm:$0xff]   ;;  %v9780_v51 = vld [vmem:[#allocation5 + $0x10f8] ss:$72 sps:$4 sm:$0xff]  }
 0x18f   : > { %5864 = vmatpush2.bf16.msra.mxu0 %v9714_v54  ;;  %v9783_v54 = vld [vmem:[#allocation5 + $0x19f8] ss:$72 sps:$4 sm:$0xff]  }
 0x190   : > { %5905 = vmatpush2.bf16.msra.mxu1 %v9717_v55  ;;  %5865 = vmatprep.subr.bf16.mxu0 %v9722_v56  ;;  %v9788_v55 = vld [vmem:[#allocation5 + $0x106c] ss:$72 sps:$4 sm:$0xff]  }
 0x191   : > { %5906 = vmatprep.subr.bf16.mxu1 %v9725_v57  ;;  %v9791_v56 = vld [vmem:[#allocation5 + $0x196c] ss:$72 sps:$4 sm:$0xff]   ;;  %v9786_v57 = vld [vmem:[#allocation5 + $0x1068] ss:$72 sps:$4 sm:$0xff]  }
 0x193   : > { %5866 = vmatpush2.bf16.msra.mxu0 %v9720_v58  ;;  %v9789_v58 = vld [vmem:[#allocation5 + $0x1968] ss:$72 sps:$4 sm:$0xff]  }
 0x194   : > { %5907 = vmatpush2.bf16.msra.mxu1 %v9723_v60  ;;  %5917 = vmatprep.subr.bf16.mxu0 %v9728_v61  ;;  %v9794_v60 = vld [vmem:[#allocation5 + $0xfdc] ss:$72 sps:$4 sm:$0xff]  }
 0x195   : > { %5958 = vmatprep.subr.bf16.mxu1 %v9731_v62  ;;  %v9797_v61 = vld [vmem:[#allocation5 + $0x18dc] ss:$72 sps:$4 sm:$0xff]   ;;  %v9792_v62 = vld [vmem:[#allocation5 + $0xfd8] ss:$72 sps:$4 sm:$0xff]  }
 0x196   : > { %v5623_v5 = vpop.f32.mrf.mxu0  ;;  %5868 = vmatmul.mubr.bf16.vlgmr.msra.gmra.mxu0 %v10928_v17 }
 0x197   : > { %v10956_v6 = vpop.f32.mrf.mxu1  ;;  %5909 = vmatmul.mubr.bf16.vlgmr.msra.gmra.mxu1 %v10916_v8  ;;  %v10961_v7 = vadd.f32 %v5623_v5, %v10950_v53  ;;  %5918 = vmatpush1.bf16.msra.mxu0 %v9726_v63  ;;  %v9795_v63 = vld [vmem:[#allocation5 + $0x18d8] ss:$72 sps:$4 sm:$0xff]   ;;  %v9809_v5 = vld [vmem:[#allocation5 + $0x17bc] ss:$72 sps:$4 sm:$0xff]  }
 0x198   : > { %5959 = vmatpush1.bf16.msra.mxu1 %v9729_v0  ;;  %v5625_v10 = vpop.f32.mrf.mxu0  ;;  %5919 = vmatprep.subr.bf16.mxu0 %v9734_v1  ;;  %v9800_v0 = vld [vmem:[#allocation5 + $0xf4c] ss:$72 sps:$4 sm:$0xff]  }
 0x199   : > { %v10963_v11 = vpop.f32.mrf.mxu1  ;;  %5960 = vmatprep.subr.bf16.mxu1 %v9737_v2  ;;  %v10966_v14 = vadd.f32 %v5625_v10, %v10954_v59  ;;  %5949 = vmatprep.mubr.bf16.mxu0 %v10910_v52  ;;  %v9744_v59 = vld [vmem:[#allocation5 + $0xb58] ss:$72 sps:$4 sm:$0xff]   ;;  %v9803_v1 = vld [vmem:[#allocation5 + $0x184c] ss:$72 sps:$4 sm:$0xff]   ;;  %v9798_v2 = vld [vmem:[#allocation5 + $0xf48] ss:$72 sps:$4 sm:$0xff]  }
 0x19a   : > { %5990 = vmatprep.mubr.bf16.mxu1 %v10924_v35  ;;  %v5627_v18 = vpop.f32.mrf.mxu0  ;;  %v9804_v10 = vld [vmem:[#allocation5 + $0xeb8] ss:$72 sps:$4 sm:$0xff]  }
 0x19b   : > { %v5668_v53 = vpop.f32.mrf.mxu1  ;;  %5920 = vmatpush1.bf16.msra.mxu0 %v9732_v3  ;;  %v9801_v3 = vld [vmem:[#allocation5 + $0x1848] ss:$72 sps:$4 sm:$0xff]   ;;  %v9818_v18 = vld [vmem:[#allocation5 + $0xd9c] ss:$72 sps:$4 sm:$0xff]  }
 0x19c   : > { %5961 = vmatpush1.bf16.msra.mxu1 %v9735_v4  ;;  %5921 = vmatprep.subr.bf16.mxu0 %v9740_v12  ;;  %v5628_v22 = vpop.f32.mrf.mxu0  ;;  %v9806_v4 = vld [vmem:[#allocation5 + $0xebc] ss:$72 sps:$4 sm:$0xff]   ;;  %v9807_v12 = vld [vmem:[#allocation5 + $0x17b8] ss:$72 sps:$4 sm:$0xff]   ;;  %v9813_v53 = vld [vmem:[#allocation5 + $0x1728] ss:$72 sps:$4 sm:$0xff]  }
 0x19d   : > { %v5669_v19 = vpop.f32.mrf.mxu1  ;;  %5962 = vmatprep.subr.bf16.mxu1 %v9743_v13  ;;  %v9812_v13 = vld [vmem:[#allocation5 + $0xe2c] ss:$72 sps:$4 sm:$0xff]   ;;  %v9816_v22 = vld [vmem:[#allocation5 + $0xd98] ss:$72 sps:$4 sm:$0xff]  }
 0x19e   : > { %v9821_v19 = vld [vmem:[#allocation5 + $0x169c] ss:$72 sps:$4 sm:$0xff]  }
 0x19f   : > { %5922 = vmatpush1.bf16.msra.mxu0 %v9738_v15  ;;  %v9815_v15 = vld [vmem:[#allocation5 + $0x172c] ss:$72 sps:$4 sm:$0xff]  }
 0x1a0   : > { %5963 = vmatpush1.bf16.msra.mxu1 %v9741_v16  ;;  %5923 = vmatprep.subr.bf16.mxu0 %v9746_v20  ;;  %v9810_v16 = vld [vmem:[#allocation5 + $0xe28] ss:$72 sps:$4 sm:$0xff]   ;;  %v1107_v20 = vsub.s32 2, %v10938_v26 }
 0x1a1   : > { %5964 = vmatprep.subr.bf16.mxu1 %v9749_v21  ;;  %v1111_v21 = vsub.s32 3, %v10938_v26 }
 0x1a3   : > { %5924 = vmatpush1.bf16.msra.mxu0 %v9744_v59  ;;  %v9819_v59 = vld [vmem:[#allocation5 + $0x1698] ss:$72 sps:$4 sm:$0xff]  }
 0x1a4   : > { %5965 = vmatpush1.bf16.msra.mxu1 %v9747_v23  ;;  %5925 = vmatprep.subr.bf16.mxu0 %v9752_v24  ;;  %v9824_v23 = vld [vmem:[#allocation5 + $0x414] ss:$72 sps:$4 sm:$0xff]  }
 0x1a5   : > { %5966 = vmatprep.subr.bf16.mxu1 %v9755_v25  ;;  %v9827_v24 = vld [vmem:[#allocation5 + $0xd14] ss:$72 sps:$4 sm:$0xff]   ;;  %v10972_v25 = vld [vmem:[#allocation7] sm:$0xff] }
 0x1a7   : > { %5926 = vmatpush1.bf16.msra.mxu0 %v9750_v27  ;;  %v1108_v27 = vrot.slane %v10972_v25, %v1107_v20 }
 0x1a8   : > { %5967 = vmatpush1.bf16.msra.mxu1 %v9753_v28  ;;  %5927 = vmatprep.subr.bf16.mxu0 %v9758_v29  ;;  %v9822_v28 = vld [vmem:[#allocation5 + $0x410] ss:$72 sps:$4 sm:$0xff]  }
 0x1a9   : > { %5968 = vmatprep.subr.bf16.mxu1 %v9761_v30  ;;  %v9825_v29 = vld [vmem:[#allocation5 + $0xd10] ss:$72 sps:$4 sm:$0xff]   ;;  %v1112_v30 = vrot.slane %v10972_v25, %v1111_v21 }
 0x1ab   : > { %5928 = vmatpush1.bf16.msra.mxu0 %v9756_v32  ;;  %v9830_v32 = vld [vmem:[#allocation5 + $0x384] ss:$72 sps:$4 sm:$0xff]  }
 0x1ac   : > { %5969 = vmatpush1.bf16.msra.mxu1 %v9759_v33  ;;  %5929 = vmatprep.subr.bf16.mxu0 %v9764_v36  ;;  %v9833_v33 = vld [vmem:[#allocation5 + $0xc84] ss:$72 sps:$4 sm:$0xff]   ;;  %v5665_v36 = vadd.f32 %v10956_v6, %v1108_v27 }
 0x1ad   : > { %5970 = vmatprep.subr.bf16.mxu1 %v9767_v37  ;;  %v9828_v37 = vld [vmem:[#allocation5 + $0x380] ss:$72 sps:$4 sm:$0xff]   ;;  %v9878_v27 = vld [vmem:[#allocation5 + $0x804] ss:$72 sps:$4 sm:$0xff]  }
 0x1af   : > { %5930 = vmatpush1.bf16.msra.mxu0 %v9762_v38  ;;  %v9831_v38 = vld [vmem:[#allocation5 + $0xc80] ss:$72 sps:$4 sm:$0xff]  }
 0x1b0   : > { %5971 = vmatpush1.bf16.msra.mxu1 %v9765_v39  ;;  %5931 = vmatprep.subr.bf16.mxu0 %v9770_v40 }
 0x1b1   : > { %5972 = vmatprep.subr.bf16.mxu1 %v9773_v41  ;;  %v5667_v41 = vadd.f32 %v10963_v11, %v1112_v30  ;;  %v9879_v30 = vld [vmem:[#allocation5 + $0x1100] ss:$72 sps:$4 sm:$0xff]  }
 0x1b3   : > { %5932 = vmatpush1.bf16.msra.mxu0 %v9768_v42 }
 0x1b4   : > { %5973 = vmatpush1.bf16.msra.mxu1 %v9771_v43  ;;  %5933 = vmatprep.subr.bf16.mxu0 %v9776_v44 }
 0x1b5   : > { %5974 = vmatprep.subr.bf16.mxu1 %v9779_v45  ;;  %v9836_v45 = vld [vmem:[#allocation5 + $0x2f4] ss:$72 sps:$4 sm:$0xff]  }
 0x1b7   : > { %5934 = vmatpush2.bf16.msra.mxu0 %v9774_v46  ;;  %v9839_v46 = vld [vmem:[#allocation5 + $0xbf4] ss:$72 sps:$4 sm:$0xff]  }
 0x1b8   : > { %5975 = vmatpush2.bf16.msra.mxu1 %v9777_v47  ;;  %5935 = vmatprep.subr.bf16.mxu0 %v9782_v48  ;;  %v9834_v48 = vld [vmem:[#allocation5 + $0x2f0] ss:$72 sps:$4 sm:$0xff]  }
 0x1b9   : > { %5976 = vmatprep.subr.bf16.mxu1 %v9785_v50  ;;  %v9837_v50 = vld [vmem:[#allocation5 + $0xbf0] ss:$72 sps:$4 sm:$0xff]  }
 0x1bb   : > { %5936 = vmatpush2.bf16.msra.mxu0 %v9780_v51 }
 0x1bc   : > { %5977 = vmatpush2.bf16.msra.mxu1 %v9783_v54  ;;  %5937 = vmatprep.subr.bf16.mxu0 %v9788_v55 }
 0x1bd   : > { %5978 = vmatprep.subr.bf16.mxu1 %v9791_v56  ;;  %v9842_v56 = vld [vmem:[#allocation5 + $0x264] ss:$72 sps:$4 sm:$0xff]  }
 0x1bf   : > { %5938 = vmatpush2.bf16.msra.mxu0 %v9786_v57  ;;  %v9845_v57 = vld [vmem:[#allocation5 + $0xb64] ss:$72 sps:$4 sm:$0xff]  }
 0x1c0   : > { %5979 = vmatpush2.bf16.msra.mxu1 %v9789_v58  ;;  %5939 = vmatprep.subr.bf16.mxu0 %v9794_v60  ;;  %v9840_v60 = vld [vmem:[#allocation5 + $0x260] ss:$72 sps:$4 sm:$0xff]  }
 0x1c1   : > { %5980 = vmatprep.subr.bf16.mxu1 %v9797_v61  ;;  %v9843_v61 = vld [vmem:[#allocation5 + $0xb60] ss:$72 sps:$4 sm:$0xff]  }
 0x1c3   : > { %5940 = vmatpush2.bf16.msra.mxu0 %v9792_v62  ;;  %v9848_v62 = vld [vmem:[#allocation5 + $0x1d4] ss:$72 sps:$4 sm:$0xff]  }
 0x1c4   : > { %5981 = vmatpush2.bf16.msra.mxu1 %v9795_v63  ;;  %5941 = vmatprep.subr.bf16.mxu0 %v9800_v0  ;;  %v9851_v63 = vld [vmem:[#allocation5 + $0xad4] ss:$72 sps:$4 sm:$0xff]   ;;  %v9846_v0 = vld [vmem:[#allocation5 + $0x1d0] ss:$72 sps:$4 sm:$0xff]  }
 0x1c5   : > { %5982 = vmatprep.subr.bf16.mxu1 %v9803_v1  ;;  %v9849_v1 = vld [vmem:[#allocation5 + $0xad0] ss:$72 sps:$4 sm:$0xff]  }
 0x1c7   : > { %5942 = vmatpush2.bf16.msra.mxu0 %v9798_v2  ;;  %v9854_v2 = vld [vmem:[#allocation5 + $0x144] ss:$72 sps:$4 sm:$0xff]  }
 0x1c8   : > { %5983 = vmatpush2.bf16.msra.mxu1 %v9801_v3  ;;  %5943 = vmatprep.subr.bf16.mxu0 %v9806_v4  ;;  %v9857_v3 = vld [vmem:[#allocation5 + $0xa44] ss:$72 sps:$4 sm:$0xff]   ;;  %v9852_v4 = vld [vmem:[#allocation5 + $0x140] ss:$72 sps:$4 sm:$0xff]  }
 0x1c9   : > { %5984 = vmatprep.subr.bf16.mxu1 %v9809_v5  ;;  %v9855_v5 = vld [vmem:[#allocation5 + $0xa40] ss:$72 sps:$4 sm:$0xff]  }
 0x1cb   : > { %5944 = vmatpush2.bf16.msra.mxu0 %v9804_v10  ;;  %v9860_v10 = vld [vmem:[#allocation5 + $0xb4] ss:$72 sps:$4 sm:$0xff]  }
 0x1cc   : > { %5985 = vmatpush2.bf16.msra.mxu1 %v9807_v12  ;;  %5945 = vmatprep.subr.bf16.mxu0 %v9812_v13  ;;  %v9863_v12 = vld [vmem:[#allocation5 + $0x9b4] ss:$72 sps:$4 sm:$0xff]   ;;  %v9858_v13 = vld [vmem:[#allocation5 + $0xb0] ss:$72 sps:$4 sm:$0xff]  }
 0x1cd   : > { %5986 = vmatprep.subr.bf16.mxu1 %v9815_v15  ;;  %v9861_v15 = vld [vmem:[#allocation5 + $0x9b0] ss:$72 sps:$4 sm:$0xff]  }
 0x1cf   : > { %5946 = vmatpush2.bf16.msra.mxu0 %v9810_v16  ;;  %v9866_v16 = vld [vmem:[#allocation5 + $0x24] ss:$72 sps:$4 sm:$0xff]  }
 0x1d0   : > { %5987 = vmatpush2.bf16.msra.mxu1 %v9813_v53  ;;  %5947 = vmatprep.subr.bf16.mxu0 %v9818_v18  ;;  %v9869_v53 = vld [vmem:[#allocation5 + $0x924] ss:$72 sps:$4 sm:$0xff]   ;;  %v9864_v18 = vld [vmem:[#allocation5 + $0x20] ss:$72 sps:$4 sm:$0xff]  }
 0x1d1   : > { %5988 = vmatprep.subr.bf16.mxu1 %v9821_v19  ;;  %v9867_v19 = vld [vmem:[#allocation5 + $0x920] ss:$72 sps:$4 sm:$0xff]  }
 0x1d3   : > { %5948 = vmatpush2.bf16.msra.mxu0 %v9816_v22  ;;  %v9872_v22 = vld [vmem:[#allocation5 + $0x894] ss:$72 sps:$4 sm:$0xff]  }
 0x1d4   : > { %5989 = vmatpush2.bf16.msra.mxu1 %v9819_v59  ;;  %5999 = vmatprep.subr.bf16.mxu0 %v9824_v23  ;;  %v9875_v59 = vld [vmem:[#allocation5 + $0x1194] ss:$72 sps:$4 sm:$0xff]   ;;  %v9870_v23 = vld [vmem:[#allocation5 + $0x890] ss:$72 sps:$4 sm:$0xff]  }
 0x1d5   : > { %6040 = vmatprep.subr.bf16.mxu1 %v9827_v24  ;;  %v9873_v24 = vld [vmem:[#allocation5 + $0x1190] ss:$72 sps:$4 sm:$0xff]  }
 0x1d6   : > { %v5705_v39 = vpop.f32.mrf.mxu0  ;;  %5950 = vmatmul.mubr.bf16.vlgmr.msra.gmra.mxu0 %v10918_v9 }
 0x1d7   : > { %v5746_v40 = vpop.f32.mrf.mxu1  ;;  %5991 = vmatmul.mubr.bf16.vlgmr.msra.gmra.mxu1 %v10928_v17  ;;  %v5706_v42 = vadd.f32 %v5705_v39, %v5665_v36  ;;  %6000 = vmatpush1.bf16.msra.mxu0 %v9822_v28  ;;  %v9881_v28 = vld [vmem:[#allocation5 + $0x1104] ss:$72 sps:$4 sm:$0xff]   ;;  %v9882_v36 = vld [vmem:[#allocation5 + $0x770] ss:$72 sps:$4 sm:$0xff]  }
 0x1d8   : > { %6041 = vmatpush1.bf16.msra.mxu1 %v9825_v29  ;;  %v5707_v43 = vpop.f32.mrf.mxu0  ;;  %6001 = vmatprep.subr.bf16.mxu0 %v9830_v32  ;;  %v9876_v29 = vld [vmem:[#allocation5 + $0x800] ss:$72 sps:$4 sm:$0xff]   ;;  %v9884_v32 = vld [vmem:[#allocation5 + $0x774] ss:$72 sps:$4 sm:$0xff]   ;;  %v9893_v39 = vld [vmem:[#allocation5 + $0xfe4] ss:$72 sps:$4 sm:$0xff]  }
 0x1d9   : > { %v5748_v44 = vpop.f32.mrf.mxu1  ;;  %6042 = vmatprep.subr.bf16.mxu1 %v9833_v33  ;;  %v10984_v6 = vadd.f32 %v5746_v40, %v5706_v42  ;;  %v5708_v47 = vadd.f32 %v5707_v43, %v5667_v41  ;;  %6031 = vmatprep.mubr.bf16.mxu0 %v10907_v49  ;;  %v9887_v33 = vld [vmem:[#allocation5 + $0x1074] ss:$72 sps:$4 sm:$0xff]   ;;  %v9888_v40 = vld [vmem:[#allocation5 + $0x6e0] ss:$72 sps:$4 sm:$0xff]  }
 0x1da   : > { %6072 = vmatprep.mubr.bf16.mxu1 %v10910_v52  ;;  %v5709_v11 = vpop.f32.mrf.mxu0  ;;  %v9891_v41 = vld [vmem:[#allocation5 + $0xfe0] ss:$72 sps:$4 sm:$0xff]   ;;  %v9896_v42 = vld [vmem:[#allocation5 + $0x654] ss:$72 sps:$4 sm:$0xff]  }
 0x1db   : > { %v5750_v51 = vpop.f32.mrf.mxu1  ;;  %v10988_v54 = vadd.f32 %v5748_v44, %v5708_v47  ;;  %6002 = vmatpush1.bf16.msra.mxu0 %v9828_v37  ;;  %v9885_v37 = vld [vmem:[#allocation5 + $0x1070] ss:$72 sps:$4 sm:$0xff]   ;;  %v9899_v43 = vld [vmem:[#allocation5 + $0xf54] ss:$72 sps:$4 sm:$0xff]   ;;  %v9905_v47 = vld [vmem:[#allocation5 + $0xec4] ss:$72 sps:$4 sm:$0xff]  }
 0x1dc   : > { %6043 = vmatpush1.bf16.msra.mxu1 %v9831_v38  ;;  %6003 = vmatprep.subr.bf16.mxu0 %v9836_v45  ;;  %v5710_v58 = vpop.f32.mrf.mxu0  ;;  %v9890_v38 = vld [vmem:[#allocation5 + $0x6e4] ss:$72 sps:$4 sm:$0xff]   ;;  %v9894_v44 = vld [vmem:[#allocation5 + $0x650] ss:$72 sps:$4 sm:$0xff]   ;;  %v9908_v51 = vld [vmem:[#allocation5 + $0x534] ss:$72 sps:$4 sm:$0xff]  }
 0x1dd   : > { %v5751_v55 = vpop.f32.mrf.mxu1  ;;  %6044 = vmatprep.subr.bf16.mxu1 %v9839_v46  ;;  %v9897_v45 = vld [vmem:[#allocation5 + $0xf50] ss:$72 sps:$4 sm:$0xff]   ;;  %v9902_v46 = vld [vmem:[#allocation5 + $0x5c4] ss:$72 sps:$4 sm:$0xff]   ;;  %v9911_v11 = vld [vmem:[#allocation5 + $0xe34] ss:$72 sps:$4 sm:$0xff]  }
 0x1de   : > { %v9906_v55 = vld [vmem:[#allocation5 + $0x530] ss:$72 sps:$4 sm:$0xff]   ;;  %v9917_v58 = vld [vmem:[#allocation5 + $0xda4] ss:$72 sps:$4 sm:$0xff]  }
 0x1df   : > { %6004 = vmatpush1.bf16.msra.mxu0 %v9834_v48  ;;  %v9900_v48 = vld [vmem:[#allocation5 + $0x5c0] ss:$72 sps:$4 sm:$0xff]  }
 0x1e0   : > { %6045 = vmatpush1.bf16.msra.mxu1 %v9837_v50  ;;  %6005 = vmatprep.subr.bf16.mxu0 %v9842_v56  ;;  %v9903_v50 = vld [vmem:[#allocation5 + $0xec0] ss:$72 sps:$4 sm:$0xff]   ;;  %v9909_v56 = vld [vmem:[#allocation5 + $0xe30] ss:$72 sps:$4 sm:$0xff]  }
 0x1e1   : > { %6046 = vmatprep.subr.bf16.mxu1 %v9845_v57  ;;  %v9914_v57 = vld [vmem:[#allocation5 + $0x4a4] ss:$72 sps:$4 sm:$0xff]  }
 0x1e3   : > { %6006 = vmatpush1.bf16.msra.mxu0 %v9840_v60  ;;  %v9912_v60 = vld [vmem:[#allocation5 + $0x4a0] ss:$72 sps:$4 sm:$0xff]  }
 0x1e4   : > { %6047 = vmatpush1.bf16.msra.mxu1 %v9843_v61  ;;  %6007 = vmatprep.subr.bf16.mxu0 %v9848_v62  ;;  %v9915_v61 = vld [vmem:[#allocation5 + $0xda0] ss:$72 sps:$4 sm:$0xff]   ;;  %v1115_v62 = vsub.s32 4, %v10938_v26 }
 0x1e5   : > { %6048 = vmatprep.subr.bf16.mxu1 %v9851_v63  ;;  %v9920_v63 = vld [vmem:[#allocation5 + $0x1614] ss:$72 sps:$4 sm:$0xff]  }
 0x1e7   : > { %6008 = vmatpush1.bf16.msra.mxu0 %v9846_v0  ;;  %v9923_v0 = vld [vmem:[#allocation5 + $0x41c] ss:$72 sps:$4 sm:$0xff]  }
 0x1e8   : > { %6049 = vmatpush1.bf16.msra.mxu1 %v9849_v1  ;;  %6009 = vmatprep.subr.bf16.mxu0 %v9854_v2  ;;  %v9918_v1 = vld [vmem:[#allocation5 + $0x1610] ss:$72 sps:$4 sm:$0xff]  }
 0x1e9   : > { %6050 = vmatprep.subr.bf16.mxu1 %v9857_v3  ;;  %v9921_v2 = vld [vmem:[#allocation5 + $0x418] ss:$72 sps:$4 sm:$0xff]   ;;  %v1119_v3 = vsub.s32 5, %v10938_v26 }
 0x1eb   : > { %6010 = vmatpush1.bf16.msra.mxu0 %v9852_v4  ;;  %v1116_v4 = vrot.slane %v10972_v25, %v1115_v62 }
 0x1ec   : > { %6051 = vmatpush1.bf16.msra.mxu1 %v9855_v5  ;;  %6011 = vmatprep.subr.bf16.mxu0 %v9860_v10  ;;  %v9926_v5 = vld [vmem:[#allocation5 + $0x1584] ss:$72 sps:$4 sm:$0xff]  }
 0x1ed   : > { %6052 = vmatprep.subr.bf16.mxu1 %v9863_v12  ;;  %v9929_v10 = vld [vmem:[#allocation5 + $0x38c] ss:$72 sps:$4 sm:$0xff]   ;;  %v1120_v12 = vrot.slane %v10972_v25, %v1119_v3 }
 0x1ef   : > { %6012 = vmatpush1.bf16.msra.mxu0 %v9858_v13  ;;  %v9924_v13 = vld [vmem:[#allocation5 + $0x1580] ss:$72 sps:$4 sm:$0xff]  }
 0x1f0   : > { %6053 = vmatpush1.bf16.msra.mxu1 %v9861_v15  ;;  %6013 = vmatprep.subr.bf16.mxu0 %v9866_v16  ;;  %v9927_v15 = vld [vmem:[#allocation5 + $0x388] ss:$72 sps:$4 sm:$0xff]  }
 0x1f1   : > { %6054 = vmatprep.subr.bf16.mxu1 %v9869_v53 }
 0x1f3   : > { %6014 = vmatpush1.bf16.msra.mxu0 %v9864_v18 }
 0x1f4   : > { %6055 = vmatpush1.bf16.msra.mxu1 %v9867_v19  ;;  %6015 = vmatprep.subr.bf16.mxu0 %v9872_v22 }
 0x1f5   : > { %6056 = vmatprep.subr.bf16.mxu1 %v9875_v59  ;;  %v9932_v59 = vld [vmem:[#allocation5 + $0x14f4] ss:$72 sps:$4 sm:$0xff]  }
 0x1f7   : > { %6016 = vmatpush2.bf16.msra.mxu0 %v9870_v23  ;;  %v9935_v23 = vld [vmem:[#allocation5 + $0x2fc] ss:$72 sps:$4 sm:$0xff]  }
 0x1f8   : > { %6057 = vmatpush2.bf16.msra.mxu1 %v9873_v24  ;;  %6017 = vmatprep.subr.bf16.mxu0 %v9878_v27  ;;  %v9930_v27 = vld [vmem:[#allocation5 + $0x14f0] ss:$72 sps:$4 sm:$0xff]  }
 0x1f9   : > { %6058 = vmatprep.subr.bf16.mxu1 %v9881_v28  ;;  %v9933_v28 = vld [vmem:[#allocation5 + $0x2f8] ss:$72 sps:$4 sm:$0xff]  }
 0x1fb   : > { %6018 = vmatpush2.bf16.msra.mxu0 %v9876_v29 }
 0x1fc   : > { %6059 = vmatpush2.bf16.msra.mxu1 %v9879_v30  ;;  %6019 = vmatprep.subr.bf16.mxu0 %v9884_v32 }
 0x1fd   : > { %6060 = vmatprep.subr.bf16.mxu1 %v9887_v33 }
 0x1ff   : > { %6020 = vmatpush2.bf16.msra.mxu0 %v9882_v36  ;;  %v9938_v36 = vld [vmem:[#allocation5 + $0x1464] ss:$72 sps:$4 sm:$0xff]  }
 0x200   : > { %6061 = vmatpush2.bf16.msra.mxu1 %v9885_v37  ;;  %6021 = vmatprep.subr.bf16.mxu0 %v9890_v38  ;;  %v9941_v37 = vld [vmem:[#allocation5 + $0x26c] ss:$72 sps:$4 sm:$0xff]  }
 0x201   : > { %6062 = vmatprep.subr.bf16.mxu1 %v9893_v39  ;;  %v9936_v39 = vld [vmem:[#allocation5 + $0x1460] ss:$72 sps:$4 sm:$0xff]  }
 0x203   : > { %6022 = vmatpush2.bf16.msra.mxu0 %v9888_v40  ;;  %v9939_v40 = vld [vmem:[#allocation5 + $0x268] ss:$72 sps:$4 sm:$0xff]  }
 0x204   : > { %6063 = vmatpush2.bf16.msra.mxu1 %v9891_v41  ;;  %6023 = vmatprep.subr.bf16.mxu0 %v9896_v42  ;;  %v9944_v41 = vld [vmem:[#allocation5 + $0x13d4] ss:$72 sps:$4 sm:$0xff]  }
 0x205   : > { %6064 = vmatprep.subr.bf16.mxu1 %v9899_v43  ;;  %v9947_v42 = vld [vmem:[#allocation5 + $0x1dc] ss:$72 sps:$4 sm:$0xff]   ;;  %v9942_v43 = vld [vmem:[#allocation5 + $0x13d0] ss:$72 sps:$4 sm:$0xff]  }
 0x207   : > { %6024 = vmatpush2.bf16.msra.mxu0 %v9894_v44  ;;  %v9945_v44 = vld [vmem:[#allocation5 + $0x1d8] ss:$72 sps:$4 sm:$0xff]  }
 0x208   : > { %6065 = vmatpush2.bf16.msra.mxu1 %v9897_v45  ;;  %6025 = vmatprep.subr.bf16.mxu0 %v9902_v46  ;;  %v9950_v45 = vld [vmem:[#allocation5 + $0x1344] ss:$72 sps:$4 sm:$0xff]  }
 0x209   : > { %6066 = vmatprep.subr.bf16.mxu1 %v9905_v47  ;;  %v9953_v46 = vld [vmem:[#allocation5 + $0x14c] ss:$72 sps:$4 sm:$0xff]   ;;  %v9948_v47 = vld [vmem:[#allocation5 + $0x1340] ss:$72 sps:$4 sm:$0xff]  }
 0x20b   : > { %6026 = vmatpush2.bf16.msra.mxu0 %v9900_v48  ;;  %v9951_v48 = vld [vmem:[#allocation5 + $0x148] ss:$72 sps:$4 sm:$0xff]  }
 0x20c   : > { %6067 = vmatpush2.bf16.msra.mxu1 %v9903_v50  ;;  %6027 = vmatprep.subr.bf16.mxu0 %v9908_v51  ;;  %v9956_v50 = vld [vmem:[#allocation5 + $0x12b4] ss:$72 sps:$4 sm:$0xff]  }
 0x20d   : > { %6068 = vmatprep.subr.bf16.mxu1 %v9911_v11  ;;  %v9959_v51 = vld [vmem:[#allocation5 + $0xbc] ss:$72 sps:$4 sm:$0xff]   ;;  %v9954_v11 = vld [vmem:[#allocation5 + $0x12b0] ss:$72 sps:$4 sm:$0xff]  }
 0x20f   : > { %6028 = vmatpush2.bf16.msra.mxu0 %v9906_v55  ;;  %v9957_v55 = vld [vmem:[#allocation5 + $0xb8] ss:$72 sps:$4 sm:$0xff]  }
 0x210   : > { %6069 = vmatpush2.bf16.msra.mxu1 %v9909_v56  ;;  %6029 = vmatprep.subr.bf16.mxu0 %v9914_v57  ;;  %v9962_v56 = vld [vmem:[#allocation5 + $0x1224] ss:$72 sps:$4 sm:$0xff]  }
 0x211   : > { %6070 = vmatprep.subr.bf16.mxu1 %v9917_v58  ;;  %v9965_v57 = vld [vmem:[#allocation5 + $0x2c] ss:$72 sps:$4 sm:$0xff]   ;;  %v9960_v58 = vld [vmem:[#allocation5 + $0x1220] ss:$72 sps:$4 sm:$0xff]  }
 0x213   : > { %6030 = vmatpush2.bf16.msra.mxu0 %v9912_v60  ;;  %v9963_v60 = vld [vmem:[#allocation5 + $0x28] ss:$72 sps:$4 sm:$0xff]  }
 0x214   : > { %6071 = vmatpush2.bf16.msra.mxu1 %v9915_v61  ;;  %6081 = vmatprep.subr.bf16.mxu0 %v9920_v63  ;;  %v9968_v61 = vld [vmem:[#allocation5 + $0x1a94] ss:$72 sps:$4 sm:$0xff]  }
 0x215   : > { %6122 = vmatprep.subr.bf16.mxu1 %v9923_v0  ;;  %v9971_v63 = vld [vmem:[#allocation5 + $0x89c] ss:$72 sps:$4 sm:$0xff]   ;;  %v9966_v0 = vld [vmem:[#allocation5 + $0x1a90] ss:$72 sps:$4 sm:$0xff]  }
 0x216   : > { %v5787_v16 = vpop.f32.mrf.mxu0  ;;  %6032 = vmatmul.mubr.bf16.vlgmr.msra.gmra.mxu0 %v10916_v8 }
 0x217   : > { %v5828_v53 = vpop.f32.mrf.mxu1  ;;  %6073 = vmatmul.mubr.bf16.vlgmr.msra.gmra.mxu1 %v10918_v9  ;;  %v5788_v18 = vadd.f32 %v5787_v16, %v1116_v4  ;;  %6082 = vmatpush1.bf16.msra.mxu0 %v9918_v1  ;;  %v9969_v1 = vld [vmem:[#allocation5 + $0x898] ss:$72 sps:$4 sm:$0xff]   ;;  %v9977_v4 = vld [vmem:[#allocation5 + $0x80c] ss:$72 sps:$4 sm:$0xff]  }
 0x218   : > { %6123 = vmatpush1.bf16.msra.mxu1 %v9921_v2  ;;  %v5789_v19 = vpop.f32.mrf.mxu0  ;;  %6083 = vmatprep.subr.bf16.mxu0 %v9926_v5  ;;  %v9974_v2 = vld [vmem:[#allocation5 + $0x1a04] ss:$72 sps:$4 sm:$0xff]   ;;  %v9972_v5 = vld [vmem:[#allocation5 + $0x1a00] ss:$72 sps:$4 sm:$0xff]  }
 0x219   : > { %v5830_v22 = vpop.f32.mrf.mxu1  ;;  %6124 = vmatprep.subr.bf16.mxu1 %v9929_v10  ;;  %v11000_v24 = vadd.f32 %v5828_v53, %v5788_v18  ;;  %v5790_v25 = vadd.f32 %v5789_v19, %v1120_v12  ;;  %6113 = vmatprep.mubr.bf16.mxu0 %v10924_v35  ;;  %v9975_v10 = vld [vmem:[#allocation5 + $0x808] ss:$72 sps:$4 sm:$0xff]   ;;  %v9980_v12 = vld [vmem:[#allocation5 + $0x1974] ss:$72 sps:$4 sm:$0xff]   ;;  %v9981_v16 = vld [vmem:[#allocation5 + $0x778] ss:$72 sps:$4 sm:$0xff]  }
 0x21a   : > { %6154 = vmatprep.mubr.bf16.mxu1 %v10907_v49  ;;  %v5791_v30 = vpop.f32.mrf.mxu0  ;;  %v9986_v53 = vld [vmem:[#allocation5 + $0x18e4] ss:$72 sps:$4 sm:$0xff]   ;;  %v9984_v19 = vld [vmem:[#allocation5 + $0x18e0] ss:$72 sps:$4 sm:$0xff]  }
 0x21b   : > { %v5832_v29 = vpop.f32.mrf.mxu1  ;;  %v11004_v32 = vadd.f32 %v5830_v22, %v5790_v25  ;;  %6084 = vmatpush1.bf16.msra.mxu0 %v9924_v13  ;;  %v9983_v13 = vld [vmem:[#allocation5 + $0x77c] ss:$72 sps:$4 sm:$0xff]   ;;  %v9989_v18 = vld [vmem:[#allocation5 + $0x6ec] ss:$72 sps:$4 sm:$0xff]   ;;  %v9987_v22 = vld [vmem:[#allocation5 + $0x6e8] ss:$72 sps:$4 sm:$0xff]  }
 0x21c   : > { %6125 = vmatpush1.bf16.msra.mxu1 %v9927_v15  ;;  %6085 = vmatprep.subr.bf16.mxu0 %v9932_v59  ;;  %v5792_v38 = vpop.f32.mrf.mxu0  ;;  %v9978_v15 = vld [vmem:[#allocation5 + $0x1970] ss:$72 sps:$4 sm:$0xff]   ;;  %v9992_v59 = vld [vmem:[#allocation5 + $0x1854] ss:$72 sps:$4 sm:$0xff]   ;;  %v9996_v30 = vld [vmem:[#allocation5 + $0x17c0] ss:$72 sps:$4 sm:$0xff]  }
 0x21d   : > { %v5833_v33 = vpop.f32.mrf.mxu1  ;;  %6126 = vmatprep.subr.bf16.mxu1 %v9935_v23  ;;  %v9995_v23 = vld [vmem:[#allocation5 + $0x65c] ss:$72 sps:$4 sm:$0xff]   ;;  %v9990_v25 = vld [vmem:[#allocation5 + $0x1850] ss:$72 sps:$4 sm:$0xff]   ;;  %v10001_v29 = vld [vmem:[#allocation5 + $0x5cc] ss:$72 sps:$4 sm:$0xff]  }
 0x21e   : > { %v9999_v33 = vld [vmem:[#allocation5 + $0x5c8] ss:$72 sps:$4 sm:$0xff]  }
 0x21f   : > { %6086 = vmatpush1.bf16.msra.mxu0 %v9930_v27  ;;  %v9993_v27 = vld [vmem:[#allocation5 + $0x658] ss:$72 sps:$4 sm:$0xff]  }
 0x220   : > { %6127 = vmatpush1.bf16.msra.mxu1 %v9933_v28  ;;  %6087 = vmatprep.subr.bf16.mxu0 %v9938_v36  ;;  %v9998_v28 = vld [vmem:[#allocation5 + $0x17c4] ss:$72 sps:$4 sm:$0xff]   ;;  %v10004_v36 = vld [vmem:[#allocation5 + $0x1734] ss:$72 sps:$4 sm:$0xff]   ;;  %v10002_v38 = vld [vmem:[#allocation5 + $0x1730] ss:$72 sps:$4 sm:$0xff]  }
 0x221   : > { %6128 = vmatprep.subr.bf16.mxu1 %v9941_v37  ;;  %v10007_v37 = vld [vmem:[#allocation5 + $0x53c] ss:$72 sps:$4 sm:$0xff]  }
 0x223   : > { %6088 = vmatpush1.bf16.msra.mxu0 %v9936_v39  ;;  %v10005_v39 = vld [vmem:[#allocation5 + $0x538] ss:$72 sps:$4 sm:$0xff]  }
 0x224   : > { %6129 = vmatpush1.bf16.msra.mxu1 %v9939_v40  ;;  %6089 = vmatprep.subr.bf16.mxu0 %v9944_v41  ;;  %v10010_v40 = vld [vmem:[#allocation5 + $0x16a4] ss:$72 sps:$4 sm:$0xff]  }
 0x225   : > { %6130 = vmatprep.subr.bf16.mxu1 %v9947_v42  ;;  %v10013_v41 = vld [vmem:[#allocation5 + $0x4ac] ss:$72 sps:$4 sm:$0xff]   ;;  %v10008_v42 = vld [vmem:[#allocation5 + $0x16a0] ss:$72 sps:$4 sm:$0xff]  }
 0x227   : > { %6090 = vmatpush1.bf16.msra.mxu0 %v9942_v43  ;;  %v10011_v43 = vld [vmem:[#allocation5 + $0x4a8] ss:$72 sps:$4 sm:$0xff]  }
 0x228   : > { %6131 = vmatpush1.bf16.msra.mxu1 %v9945_v44  ;;  %6091 = vmatprep.subr.bf16.mxu0 %v9950_v45  ;;  %v10016_v44 = vld [vmem:[#allocation5 + $0xd1c] ss:$72 sps:$4 sm:$0xff]  }
 0x229   : > { %6132 = vmatprep.subr.bf16.mxu1 %v9953_v46  ;;  %v10019_v45 = vld [vmem:[#allocation5 + $0x161c] ss:$72 sps:$4 sm:$0xff]   ;;  %v10014_v46 = vld [vmem:[#allocation5 + $0xd18] ss:$72 sps:$4 sm:$0xff]  }
 0x22b   : > { %6092 = vmatpush1.bf16.msra.mxu0 %v9948_v47  ;;  %v10017_v47 = vld [vmem:[#allocation5 + $0x1618] ss:$72 sps:$4 sm:$0xff]  }
 0x22c   : > { %6133 = vmatpush1.bf16.msra.mxu1 %v9951_v48  ;;  %6093 = vmatprep.subr.bf16.mxu0 %v9956_v50  ;;  %v10022_v48 = vld [vmem:[#allocation5 + $0xc8c] ss:$72 sps:$4 sm:$0xff]  }
 0x22d   : > { %6134 = vmatprep.subr.bf16.mxu1 %v9959_v51  ;;  %v10025_v50 = vld [vmem:[#allocation5 + $0x158c] ss:$72 sps:$4 sm:$0xff]  }
 0x22f   : > { %6094 = vmatpush1.bf16.msra.mxu0 %v9954_v11 }
 0x230   : > { %6135 = vmatpush1.bf16.msra.mxu1 %v9957_v55  ;;  %6095 = vmatprep.subr.bf16.mxu0 %v9962_v56  ;;  %v10020_v56 = vld [vmem:[#allocation5 + $0xc88] ss:$72 sps:$4 sm:$0xff]  }
 0x231   : > { %6136 = vmatprep.subr.bf16.mxu1 %v9965_v57  ;;  %v10023_v57 = vld [vmem:[#allocation5 + $0x1588] ss:$72 sps:$4 sm:$0xff]  }
 0x233   : > { %6096 = vmatpush1.bf16.msra.mxu0 %v9960_v58 }
 0x234   : > { %6137 = vmatpush1.bf16.msra.mxu1 %v9963_v60  ;;  %6097 = vmatprep.subr.bf16.mxu0 %v9968_v61  ;;  %v10028_v61 = vld [vmem:[#allocation5 + $0xbfc] ss:$72 sps:$4 sm:$0xff]  }
 0x235   : > { %6138 = vmatprep.subr.bf16.mxu1 %v9971_v63  ;;  %v10031_v63 = vld [vmem:[#allocation5 + $0x14fc] ss:$72 sps:$4 sm:$0xff]  }
 0x237   : > { %6098 = vmatpush2.bf16.msra.mxu0 %v9966_v0 }
 0x238   : > { %6139 = vmatpush2.bf16.msra.mxu1 %v9969_v1  ;;  %6099 = vmatprep.subr.bf16.mxu0 %v9974_v2  ;;  %v10026_v2 = vld [vmem:[#allocation5 + $0xbf8] ss:$72 sps:$4 sm:$0xff]  }
 0x239   : > { %6140 = vmatprep.subr.bf16.mxu1 %v9977_v4  ;;  %v10029_v4 = vld [vmem:[#allocation5 + $0x14f8] ss:$72 sps:$4 sm:$0xff]  }
 0x23b   : > { %6100 = vmatpush2.bf16.msra.mxu0 %v9972_v5 }
 0x23c   : > { %6141 = vmatpush2.bf16.msra.mxu1 %v9975_v10  ;;  %6101 = vmatprep.subr.bf16.mxu0 %v9980_v12  ;;  %v10034_v10 = vld [vmem:[#allocation5 + $0xb6c] ss:$72 sps:$4 sm:$0xff]  }
 0x23d   : > { %6142 = vmatprep.subr.bf16.mxu1 %v9983_v13  ;;  %v10037_v12 = vld [vmem:[#allocation5 + $0x146c] ss:$72 sps:$4 sm:$0xff]  }
 0x23f   : > { %6102 = vmatpush2.bf16.msra.mxu0 %v9978_v15  ;;  %v10035_v15 = vld [vmem:[#allocation5 + $0x1468] ss:$72 sps:$4 sm:$0xff]  }
 0x240   : > { %6143 = vmatpush2.bf16.msra.mxu1 %v9981_v16  ;;  %6103 = vmatprep.subr.bf16.mxu0 %v9986_v53  ;;  %v10040_v16 = vld [vmem:[#allocation5 + $0xadc] ss:$72 sps:$4 sm:$0xff]  }
 0x241   : > { %6144 = vmatprep.subr.bf16.mxu1 %v9989_v18  ;;  %v10043_v53 = vld [vmem:[#allocation5 + $0x13dc] ss:$72 sps:$4 sm:$0xff]   ;;  %v10038_v18 = vld [vmem:[#allocation5 + $0xad8] ss:$72 sps:$4 sm:$0xff]  }
 0x243   : > { %6104 = vmatpush2.bf16.msra.mxu0 %v9984_v19  ;;  %v10041_v19 = vld [vmem:[#allocation5 + $0x13d8] ss:$72 sps:$4 sm:$0xff]  }
 0x244   : > { %6145 = vmatpush2.bf16.msra.mxu1 %v9987_v22  ;;  %6105 = vmatprep.subr.bf16.mxu0 %v9992_v59  ;;  %v10046_v22 = vld [vmem:[#allocation5 + $0xa4c] ss:$72 sps:$4 sm:$0xff]  }
 0x245   : > { %6146 = vmatprep.subr.bf16.mxu1 %v9995_v23  ;;  %v10049_v59 = vld [vmem:[#allocation5 + $0x134c] ss:$72 sps:$4 sm:$0xff]   ;;  %v10044_v23 = vld [vmem:[#allocation5 + $0xa48] ss:$72 sps:$4 sm:$0xff]  }
 0x247   : > { %6106 = vmatpush2.bf16.msra.mxu0 %v9990_v25  ;;  %v10047_v25 = vld [vmem:[#allocation5 + $0x1348] ss:$72 sps:$4 sm:$0xff]  }
 0x248   : > { %6147 = vmatpush2.bf16.msra.mxu1 %v9993_v27  ;;  %6107 = vmatprep.subr.bf16.mxu0 %v9998_v28  ;;  %v10052_v27 = vld [vmem:[#allocation5 + $0x9bc] ss:$72 sps:$4 sm:$0xff]  }
 0x249   : > { %6148 = vmatprep.subr.bf16.mxu1 %v10001_v29  ;;  %v10055_v28 = vld [vmem:[#allocation5 + $0x12bc] ss:$72 sps:$4 sm:$0xff]   ;;  %v10050_v29 = vld [vmem:[#allocation5 + $0x9b8] ss:$72 sps:$4 sm:$0xff]  }
 0x24b   : > { %6108 = vmatpush2.bf16.msra.mxu0 %v9996_v30  ;;  %v10053_v30 = vld [vmem:[#allocation5 + $0x12b8] ss:$72 sps:$4 sm:$0xff]  }
 0x24c   : > { %6149 = vmatpush2.bf16.msra.mxu1 %v9999_v33  ;;  %6109 = vmatprep.subr.bf16.mxu0 %v10004_v36  ;;  %v10058_v33 = vld [vmem:[#allocation5 + $0x92c] ss:$72 sps:$4 sm:$0xff]  }
 0x24d   : > { %6150 = vmatprep.subr.bf16.mxu1 %v10007_v37  ;;  %v10061_v36 = vld [vmem:[#allocation5 + $0x122c] ss:$72 sps:$4 sm:$0xff]   ;;  %v10056_v37 = vld [vmem:[#allocation5 + $0x928] ss:$72 sps:$4 sm:$0xff]  }
 0x24f   : > { %6110 = vmatpush2.bf16.msra.mxu0 %v10002_v38  ;;  %v10059_v38 = vld [vmem:[#allocation5 + $0x1228] ss:$72 sps:$4 sm:$0xff]  }
 0x250   : > { %6151 = vmatpush2.bf16.msra.mxu1 %v10005_v39  ;;  %6111 = vmatprep.subr.bf16.mxu0 %v10010_v40  ;;  %v10064_v39 = vld [vmem:[#allocation5 + $0x119c] ss:$72 sps:$4 sm:$0xff]  }
 0x251   : > { %6152 = vmatprep.subr.bf16.mxu1 %v10013_v41  ;;  %v10067_v40 = vld [vmem:[#allocation5 + $0x1a9c] ss:$72 sps:$4 sm:$0xff]   ;;  %v10062_v41 = vld [vmem:[#allocation5 + $0x1198] ss:$72 sps:$4 sm:$0xff]  }
 0x253   : > { %6112 = vmatpush2.bf16.msra.mxu0 %v10008_v42  ;;  %v10065_v42 = vld [vmem:[#allocation5 + $0x1a98] ss:$72 sps:$4 sm:$0xff]  }
 0x254   : > { %6153 = vmatpush2.bf16.msra.mxu1 %v10011_v43  ;;  %6163 = vmatprep.subr.bf16.mxu0 %v10016_v44  ;;  %v10070_v43 = vld [vmem:[#allocation5 + $0x110c] ss:$72 sps:$4 sm:$0xff]  }
 0x255   : > { %6204 = vmatprep.subr.bf16.mxu1 %v10019_v45  ;;  %v10073_v44 = vld [vmem:[#allocation5 + $0x1a0c] ss:$72 sps:$4 sm:$0xff]   ;;  %v10068_v45 = vld [vmem:[#allocation5 + $0x1108] ss:$72 sps:$4 sm:$0xff]  }
 0x256   : > { %v5869_v51 = vpop.f32.mrf.mxu0  ;;  %6114 = vmatmul.mubr.bf16.vlgmr.msra.gmra.mxu0 %v10928_v17 }
 0x257   : > { %v11006_v11 = vpop.f32.mrf.mxu1  ;;  %6155 = vmatmul.mubr.bf16.vlgmr.msra.gmra.mxu1 %v10916_v8  ;;  %v11011_v55 = vadd.f32 %v5869_v51, %v11000_v24  ;;  %6164 = vmatpush1.bf16.msra.mxu0 %v10014_v46  ;;  %v10071_v46 = vld [vmem:[#allocation5 + $0x1a08] ss:$72 sps:$4 sm:$0xff]   ;;  %v10077_v51 = vld [vmem:[#allocation5 + $0x1978] ss:$72 sps:$4 sm:$0xff]  }
 0x258   : > { %6205 = vmatpush1.bf16.msra.mxu1 %v10017_v47  ;;  %v5871_v58 = vpop.f32.mrf.mxu0  ;;  %6165 = vmatprep.subr.bf16.mxu0 %v10022_v48  ;;  %v10076_v47 = vld [vmem:[#allocation5 + $0x107c] ss:$72 sps:$4 sm:$0xff]  }
 0x259   : > { %v11013_v60 = vpop.f32.mrf.mxu1  ;;  %6206 = vmatprep.subr.bf16.mxu1 %v10025_v50  ;;  %v11016_v0 = vadd.f32 %v5871_v58, %v11004_v32  ;;  %6195 = vmatprep.mubr.bf16.mxu0 %v10910_v52  ;;  %v10032_v32 = vld [vmem:[#allocation5 + $0xb68] ss:$72 sps:$4 sm:$0xff]   ;;  %v10079_v48 = vld [vmem:[#allocation5 + $0x197c] ss:$72 sps:$4 sm:$0xff]   ;;  %v10074_v50 = vld [vmem:[#allocation5 + $0x1078] ss:$72 sps:$4 sm:$0xff]  }
 0x25a   : > { %6236 = vmatprep.mubr.bf16.mxu1 %v10924_v35  ;;  %v5873_v1 = vpop.f32.mrf.mxu0  ;;  %v10080_v58 = vld [vmem:[#allocation5 + $0xfe8] ss:$72 sps:$4 sm:$0xff]  }
 0x25b   : > { %v5914_v24 = vpop.f32.mrf.mxu1  ;;  %6166 = vmatpush1.bf16.msra.mxu0 %v10020_v56  ;;  %v10082_v56 = vld [vmem:[#allocation5 + $0xfec] ss:$72 sps:$4 sm:$0xff]   ;;  %v10086_v1 = vld [vmem:[#allocation5 + $0xf58] ss:$72 sps:$4 sm:$0xff]  }
 0x25c   : > { %6207 = vmatpush1.bf16.msra.mxu1 %v10023_v57  ;;  %6167 = vmatprep.subr.bf16.mxu0 %v10028_v61  ;;  %v5874_v13 = vpop.f32.mrf.mxu0  ;;  %v10085_v57 = vld [vmem:[#allocation5 + $0x18ec] ss:$72 sps:$4 sm:$0xff]   ;;  %v10083_v61 = vld [vmem:[#allocation5 + $0x18e8] ss:$72 sps:$4 sm:$0xff]   ;;  %v10091_v24 = vld [vmem:[#allocation5 + $0x185c] ss:$72 sps:$4 sm:$0xff]  }
 0x25d   : > { %v5915_v5 = vpop.f32.mrf.mxu1  ;;  %6208 = vmatprep.subr.bf16.mxu1 %v10031_v63  ;;  %v10088_v63 = vld [vmem:[#allocation5 + $0xf5c] ss:$72 sps:$4 sm:$0xff]  }
 0x25e   : > { %v10097_v5 = vld [vmem:[#allocation5 + $0x17cc] ss:$72 sps:$4 sm:$0xff]   ;;  %v10100_v13 = vld [vmem:[#allocation5 + $0xe3c] ss:$72 sps:$4 sm:$0xff]  }
 0x25f   : > { %6168 = vmatpush1.bf16.msra.mxu0 %v10026_v2  ;;  %v10089_v2 = vld [vmem:[#allocation5 + $0x1858] ss:$72 sps:$4 sm:$0xff]  }
 0x260   : > { %6209 = vmatpush1.bf16.msra.mxu1 %v10029_v4  ;;  %6169 = vmatprep.subr.bf16.mxu0 %v10034_v10  ;;  %v10094_v4 = vld [vmem:[#allocation5 + $0xecc] ss:$72 sps:$4 sm:$0xff]   ;;  %v10092_v10 = vld [vmem:[#allocation5 + $0xec8] ss:$72 sps:$4 sm:$0xff]  }
 0x261   : > { %6210 = vmatprep.subr.bf16.mxu1 %v10037_v12  ;;  %v10095_v12 = vld [vmem:[#allocation5 + $0x17c8] ss:$72 sps:$4 sm:$0xff]  }
 0x263   : > { %6170 = vmatpush1.bf16.msra.mxu0 %v10032_v32  ;;  %v10103_v32 = vld [vmem:[#allocation5 + $0x173c] ss:$72 sps:$4 sm:$0xff]  }
 0x264   : > { %6211 = vmatpush1.bf16.msra.mxu1 %v10035_v15  ;;  %6171 = vmatprep.subr.bf16.mxu0 %v10040_v16  ;;  %v10098_v15 = vld [vmem:[#allocation5 + $0xe38] ss:$72 sps:$4 sm:$0xff]  }
 0x265   : > { %6212 = vmatprep.subr.bf16.mxu1 %v10043_v53  ;;  %v10101_v16 = vld [vmem:[#allocation5 + $0x1738] ss:$72 sps:$4 sm:$0xff]   ;;  %v10106_v53 = vld [vmem:[#allocation5 + $0xdac] ss:$72 sps:$4 sm:$0xff]  }
 0x267   : > { %6172 = vmatpush1.bf16.msra.mxu0 %v10038_v18  ;;  %v10109_v18 = vld [vmem:[#allocation5 + $0x16ac] ss:$72 sps:$4 sm:$0xff]  }
 0x268   : > { %6213 = vmatpush1.bf16.msra.mxu1 %v10041_v19  ;;  %6173 = vmatprep.subr.bf16.mxu0 %v10046_v22  ;;  %v1123_v19 = vsub.s32 6, %v10938_v26  ;;  %v1127_v22 = vsub.s32 7, %v10938_v26 }
 0x269   : > { %6214 = vmatprep.subr.bf16.mxu1 %v10049_v59  ;;  %v10104_v59 = vld [vmem:[#allocation5 + $0xda8] ss:$72 sps:$4 sm:$0xff]  }
 0x26b   : > { %6174 = vmatpush1.bf16.msra.mxu0 %v10044_v23  ;;  %v10107_v23 = vld [vmem:[#allocation5 + $0x16a8] ss:$72 sps:$4 sm:$0xff]  }
 0x26c   : > { %6215 = vmatpush1.bf16.msra.mxu1 %v10047_v25  ;;  %6175 = vmatprep.subr.bf16.mxu0 %v10052_v27  ;;  %v10112_v25 = vld [vmem:[#allocation5 + $0x424] ss:$72 sps:$4 sm:$0xff]  }
 0x26d   : > { %6216 = vmatprep.subr.bf16.mxu1 %v10055_v28  ;;  %v10115_v27 = vld [vmem:[#allocation5 + $0xd24] ss:$72 sps:$4 sm:$0xff]  }
 0x26e   : > { %v10591_v28 = vld [vmem:[#allocation7] sm:$0xff] }
 0x26f   : > { %6176 = vmatpush1.bf16.msra.mxu0 %v10050_v29  ;;  %v1124_v29 = vrot.slane %v10591_v28, %v1123_v19 }
 0x270   : > { %6217 = vmatpush1.bf16.msra.mxu1 %v10053_v30  ;;  %6177 = vmatprep.subr.bf16.mxu0 %v10058_v33  ;;  %v1128_v30 = vrot.slane %v10591_v28, %v1127_v22  ;;  %v10110_v33 = vld [vmem:[#allocation5 + $0x420] ss:$72 sps:$4 sm:$0xff]  }
 0x271   : > { %6218 = vmatprep.subr.bf16.mxu1 %v10061_v36  ;;  %v10113_v36 = vld [vmem:[#allocation5 + $0xd20] ss:$72 sps:$4 sm:$0xff]  }
 0x272   : > { %v10149_v28 = vld [vmem:[#allocation5 + $0x9c0] ss:$72 sps:$4 sm:$0xff]  }
 0x273   : > { %6178 = vmatpush1.bf16.msra.mxu0 %v10056_v37  ;;  %v10118_v37 = vld [vmem:[#allocation5 + $0x394] ss:$72 sps:$4 sm:$0xff]  }
 0x274   : > { %6219 = vmatpush1.bf16.msra.mxu1 %v10059_v38  ;;  %6179 = vmatprep.subr.bf16.mxu0 %v10064_v39  ;;  %v10121_v38 = vld [vmem:[#allocation5 + $0xc94] ss:$72 sps:$4 sm:$0xff]   ;;  %v5911_v39 = vadd.f32 %v11006_v11, %v1124_v29 }
 0x275   : > { %6220 = vmatprep.subr.bf16.mxu1 %v10067_v40  ;;  %v10154_v29 = vld [vmem:[#allocation5 + $0x34] ss:$72 sps:$4 sm:$0xff]  }
 0x277   : > { %6180 = vmatpush2.bf16.msra.mxu0 %v10062_v41 }
 0x278   : > { %6221 = vmatpush2.bf16.msra.mxu1 %v10065_v42  ;;  %6181 = vmatprep.subr.bf16.mxu0 %v10070_v43  ;;  %v5913_v42 = vadd.f32 %v11013_v60, %v1128_v30  ;;  %v10157_v30 = vld [vmem:[#allocation5 + $0x934] ss:$72 sps:$4 sm:$0xff]  }
 0x279   : > { %6222 = vmatprep.subr.bf16.mxu1 %v10073_v44  ;;  %v10116_v44 = vld [vmem:[#allocation5 + $0x390] ss:$72 sps:$4 sm:$0xff]  }
 0x27b   : > { %6182 = vmatpush2.bf16.msra.mxu0 %v10068_v45  ;;  %v10119_v45 = vld [vmem:[#allocation5 + $0xc90] ss:$72 sps:$4 sm:$0xff]  }
 0x27c   : > { %6223 = vmatpush2.bf16.msra.mxu1 %v10071_v46  ;;  %6183 = vmatprep.subr.bf16.mxu0 %v10076_v47 }
 0x27d   : > { %6224 = vmatprep.subr.bf16.mxu1 %v10079_v48  ;;  %v10124_v48 = vld [vmem:[#allocation5 + $0x304] ss:$72 sps:$4 sm:$0xff]  }
 0x27f   : > { %6184 = vmatpush2.bf16.msra.mxu0 %v10074_v50  ;;  %v10127_v50 = vld [vmem:[#allocation5 + $0xc04] ss:$72 sps:$4 sm:$0xff]  }
 0x280   : > { %6225 = vmatpush2.bf16.msra.mxu1 %v10077_v51  ;;  %6185 = vmatprep.subr.bf16.mxu0 %v10082_v56 }
 0x281   : > { %6226 = vmatprep.subr.bf16.mxu1 %v10085_v57 }
 0x283   : > { %6186 = vmatpush2.bf16.msra.mxu0 %v10080_v58 }
 0x284   : > { %6227 = vmatpush2.bf16.msra.mxu1 %v10083_v61  ;;  %6187 = vmatprep.subr.bf16.mxu0 %v10088_v63  ;;  %v10122_v61 = vld [vmem:[#allocation5 + $0x300] ss:$72 sps:$4 sm:$0xff]  }
 0x285   : > { %6228 = vmatprep.subr.bf16.mxu1 %v10091_v24  ;;  %v10125_v63 = vld [vmem:[#allocation5 + $0xc00] ss:$72 sps:$4 sm:$0xff]  }
 0x287   : > { %6188 = vmatpush2.bf16.msra.mxu0 %v10086_v1  ;;  %v10130_v1 = vld [vmem:[#allocation5 + $0x274] ss:$72 sps:$4 sm:$0xff]  }
 0x288   : > { %6229 = vmatpush2.bf16.msra.mxu1 %v10089_v2  ;;  %6189 = vmatprep.subr.bf16.mxu0 %v10094_v4  ;;  %v10133_v2 = vld [vmem:[#allocation5 + $0xb74] ss:$72 sps:$4 sm:$0xff]  }
 0x289   : > { %6230 = vmatprep.subr.bf16.mxu1 %v10097_v5  ;;  %v11040_v5 = vpack.c.bf16 %v10961_v7, %v10961_v7  ;;  %v10145_v7 = vld [vmem:[#allocation5 + $0xa54] ss:$72 sps:$4 sm:$0xff]  }
 0x28b   : > { %6190 = vmatpush2.bf16.msra.mxu0 %v10092_v10  ;;  %v10128_v10 = vld [vmem:[#allocation5 + $0x270] ss:$72 sps:$4 sm:$0xff]  }
 0x28c   : > { %6231 = vmatpush2.bf16.msra.mxu1 %v10095_v12  ;;  %6191 = vmatprep.subr.bf16.mxu0 %v10100_v13  ;;  %v10131_v12 = vld [vmem:[#allocation5 + $0xb70] ss:$72 sps:$4 sm:$0xff]   ;;  %v10136_v13 = vld [vmem:[#allocation5 + $0x1e4] ss:$72 sps:$4 sm:$0xff]  }
 0x28d   : > { %6232 = vmatprep.subr.bf16.mxu1 %v10103_v32  ;;  %v10139_v32 = vld [vmem:[#allocation5 + $0xae4] ss:$72 sps:$4 sm:$0xff]  }
 0x28f   : > { %6192 = vmatpush2.bf16.msra.mxu0 %v10098_v15  ;;  %v10134_v15 = vld [vmem:[#allocation5 + $0x1e0] ss:$72 sps:$4 sm:$0xff]  }
 0x290   : > { %6233 = vmatpush2.bf16.msra.mxu1 %v10101_v16  ;;  %6193 = vmatprep.subr.bf16.mxu0 %v10106_v53  ;;  %v10137_v16 = vld [vmem:[#allocation5 + $0xae0] ss:$72 sps:$4 sm:$0xff]   ;;  %v10142_v53 = vld [vmem:[#allocation5 + $0x154] ss:$72 sps:$4 sm:$0xff]  }
 0x291   : > { %6234 = vmatprep.subr.bf16.mxu1 %v10109_v18  ;;  %v10140_v18 = vld [vmem:[#allocation5 + $0x150] ss:$72 sps:$4 sm:$0xff]  }
 0x293   : > { %6194 = vmatpush2.bf16.msra.mxu0 %v10104_v59  ;;  %v10143_v59 = vld [vmem:[#allocation5 + $0xa50] ss:$72 sps:$4 sm:$0xff]  }
 0x294   : > { %6235 = vmatpush2.bf16.msra.mxu1 %v10107_v23  ;;  %6245 = vmatprep.subr.bf16.mxu0 %v10112_v25  ;;  %v10148_v23 = vld [vmem:[#allocation5 + $0xc4] ss:$72 sps:$4 sm:$0xff]  }
 0x295   : > { %6286 = vmatprep.subr.bf16.mxu1 %v10115_v27  ;;  %v10151_v25 = vld [vmem:[#allocation5 + $0x9c4] ss:$72 sps:$4 sm:$0xff]   ;;  %v10146_v27 = vld [vmem:[#allocation5 + $0xc0] ss:$72 sps:$4 sm:$0xff]  }
 0x296   : > { %v5951_v40 = vpop.f32.mrf.mxu0  ;;  %6196 = vmatmul.mubr.bf16.vlgmr.msra.gmra.mxu0 %v10918_v9 }
 0x297   : > { %v5992_v41 = vpop.f32.mrf.mxu1  ;;  %6237 = vmatmul.mubr.bf16.vlgmr.msra.gmra.mxu1 %v10928_v17  ;;  %v5952_v43 = vadd.f32 %v5951_v40, %v5911_v39  ;;  %6246 = vmatpush1.bf16.msra.mxu0 %v10110_v33  ;;  %v10152_v33 = vld [vmem:[#allocation5 + $0x30] ss:$72 sps:$4 sm:$0xff]   ;;  %v10158_v39 = vld [vmem:[#allocation5 + $0x8a0] ss:$72 sps:$4 sm:$0xff]  }
 0x298   : > { %6287 = vmatpush1.bf16.msra.mxu1 %v10113_v36  ;;  %v5953_v46 = vpop.f32.mrf.mxu0  ;;  %6247 = vmatprep.subr.bf16.mxu0 %v10118_v37  ;;  %v10155_v36 = vld [vmem:[#allocation5 + $0x930] ss:$72 sps:$4 sm:$0xff]   ;;  %v10160_v37 = vld [vmem:[#allocation5 + $0x8a4] ss:$72 sps:$4 sm:$0xff]   ;;  %v10161_v40 = vld [vmem:[#allocation5 + $0x11a0] ss:$72 sps:$4 sm:$0xff]  }
 0x299   : > { %v5994_v47 = vpop.f32.mrf.mxu1  ;;  %6288 = vmatprep.subr.bf16.mxu1 %v10121_v38  ;;  %v5993_v11 = vadd.f32 %v5992_v41, %v5952_v43  ;;  %v5954_v51 = vadd.f32 %v5953_v46, %v5913_v42  ;;  %6277 = vmatprep.mubr.bf16.mxu0 %v10907_v49  ;;  %v10163_v38 = vld [vmem:[#allocation5 + $0x11a4] ss:$72 sps:$4 sm:$0xff]   ;;  %v10166_v41 = vld [vmem:[#allocation5 + $0x814] ss:$72 sps:$4 sm:$0xff]   ;;  %v10164_v43 = vld [vmem:[#allocation5 + $0x810] ss:$72 sps:$4 sm:$0xff]  }
 0x29a   : > { %6318 = vmatprep.mubr.bf16.mxu1 %v10910_v52  ;;  %v5955_v57 = vpop.f32.mrf.mxu0  ;;  %v10169_v42 = vld [vmem:[#allocation5 + $0x1114] ss:$72 sps:$4 sm:$0xff]   ;;  %v10175_v46 = vld [vmem:[#allocation5 + $0x1084] ss:$72 sps:$4 sm:$0xff]  }
 0x29b   : > { %v5996_v56 = vpop.f32.mrf.mxu1  ;;  %v11032_v60 = vpack.c.bf16 %v5993_v11, %v5993_v11  ;;  %v11034_v58 = vadd.f32 %v5994_v47, %v5954_v51  ;;  %6248 = vmatpush1.bf16.msra.mxu0 %v10116_v44  ;;  %v10167_v44 = vld [vmem:[#allocation5 + $0x1110] ss:$72 sps:$4 sm:$0xff]   ;;  %v10170_v47 = vld [vmem:[#allocation5 + $0x780] ss:$72 sps:$4 sm:$0xff]   ;;  %v10181_v11 = vld [vmem:[#allocation5 + $0xff4] ss:$72 sps:$4 sm:$0xff]  }
 0x29c   : > { %6289 = vmatpush1.bf16.msra.mxu1 %v10119_v45  ;;  %6249 = vmatprep.subr.bf16.mxu0 %v10124_v48  ;;  %v5956_v4 = vpop.f32.mrf.mxu0  ;;  %v10172_v45 = vld [vmem:[#allocation5 + $0x784] ss:$72 sps:$4 sm:$0xff]   ;;  %v10173_v48 = vld [vmem:[#allocation5 + $0x1080] ss:$72 sps:$4 sm:$0xff]   ;;  %v10176_v51 = vld [vmem:[#allocation5 + $0x6f0] ss:$72 sps:$4 sm:$0xff]  }
 0x29d   : > { %v5997_v24 = vpop.f32.mrf.mxu1  ;;  %6290 = vmatprep.subr.bf16.mxu1 %v10127_v50  ;;  %6729 = vrot.lane.b32.xlu1 %v11032_v60, %s10748_s18  ;;  %v10178_v50 = vld [vmem:[#allocation5 + $0x6f4] ss:$72 sps:$4 sm:$0xff]   ;;  %v10179_v56 = vld [vmem:[#allocation5 + $0xff0] ss:$72 sps:$4 sm:$0xff]   ;;  %v10184_v57 = vld [vmem:[#allocation5 + $0x664] ss:$72 sps:$4 sm:$0xff]  }
 0x29e   : > { %v10185_v24 = vld [vmem:[#allocation5 + $0xf60] ss:$72 sps:$4 sm:$0xff]   ;;  %v10188_v4 = vld [vmem:[#allocation5 + $0x5d0] ss:$72 sps:$4 sm:$0xff]  }
 0x29f   : > { %6250 = vmatpush1.bf16.msra.mxu0 %v10122_v61  ;;  %v10187_v61 = vld [vmem:[#allocation5 + $0xf64] ss:$72 sps:$4 sm:$0xff]  }
 0x2a0   : > { %6291 = vmatpush1.bf16.msra.mxu1 %v10125_v63  ;;  %6251 = vmatprep.subr.bf16.mxu0 %v10130_v1  ;;  %v10182_v63 = vld [vmem:[#allocation5 + $0x660] ss:$72 sps:$4 sm:$0xff]   ;;  %v10190_v1 = vld [vmem:[#allocation5 + $0x5d4] ss:$72 sps:$4 sm:$0xff]  }
 0x2a1   : > { %6292 = vmatprep.subr.bf16.mxu1 %v10133_v2  ;;  %6726 = vrot.lane.b32.xlu1 %v11040_v5, %s10748_s18  ;;  %v10193_v2 = vld [vmem:[#allocation5 + $0xed4] ss:$72 sps:$4 sm:$0xff]  }
 0x2a3   : > { %6252 = vmatpush1.bf16.msra.mxu0 %v10128_v10  ;;  %v10191_v10 = vld [vmem:[#allocation5 + $0xed0] ss:$72 sps:$4 sm:$0xff]  }
 0x2a4   : > { %6293 = vmatpush1.bf16.msra.mxu1 %v10131_v12  ;;  %6253 = vmatprep.subr.bf16.mxu0 %v10136_v13  ;;  %v10196_v12 = vld [vmem:[#allocation5 + $0x544] ss:$72 sps:$4 sm:$0xff]  }
 0x2a5   : > { %6294 = vmatprep.subr.bf16.mxu1 %v10139_v32  ;;  %v10199_v13 = vld [vmem:[#allocation5 + $0xe44] ss:$72 sps:$4 sm:$0xff]   ;;  %v10194_v32 = vld [vmem:[#allocation5 + $0x540] ss:$72 sps:$4 sm:$0xff]  }
 0x2a7   : > { %6254 = vmatpush1.bf16.msra.mxu0 %v10134_v15  ;;  %v10197_v15 = vld [vmem:[#allocation5 + $0xe40] ss:$72 sps:$4 sm:$0xff]  }
 0x2a8   : > { %6295 = vmatpush1.bf16.msra.mxu1 %v10137_v16  ;;  %6255 = vmatprep.subr.bf16.mxu0 %v10142_v53  ;;  %v10202_v16 = vld [vmem:[#allocation5 + $0x4b4] ss:$72 sps:$4 sm:$0xff]  }
 0x2a9   : > { %6296 = vmatprep.subr.bf16.mxu1 %v10145_v7  ;;  %v10205_v53 = vld [vmem:[#allocation5 + $0xdb4] ss:$72 sps:$4 sm:$0xff]   ;;  %v10200_v7 = vld [vmem:[#allocation5 + $0x4b0] ss:$72 sps:$4 sm:$0xff]  }
 0x2ab   : > { %6256 = vmatpush1.bf16.msra.mxu0 %v10140_v18  ;;  %v10203_v18 = vld [vmem:[#allocation5 + $0xdb0] ss:$72 sps:$4 sm:$0xff]  }
 0x2ac   : > { %6297 = vmatpush1.bf16.msra.mxu1 %v10143_v59  ;;  %6257 = vmatprep.subr.bf16.mxu0 %v10148_v23  ;;  %v11044_v59 = vld [vmem:[#allocation7 + $0x8] sm:$0xff] }
 0x2ad   : > { %6298 = vmatprep.subr.bf16.mxu1 %v10151_v25  ;;  %v10208_v23 = vld [vmem:[#allocation5 + $0x1624] ss:$72 sps:$4 sm:$0xff]  }
 0x2ae   : > { %v10211_v25 = vld [vmem:[#allocation5 + $0x42c] ss:$72 sps:$4 sm:$0xff]  }
 0x2af   : > { %6258 = vmatpush1.bf16.msra.mxu0 %v10146_v27  ;;  %v1132_v27 = vrot.slane %v11044_v59, %v10941_v31 }
 0x2b0   : > { %6299 = vmatpush1.bf16.msra.mxu1 %v10149_v28  ;;  %6259 = vmatprep.subr.bf16.mxu0 %v10154_v29  ;;  %v10206_v28 = vld [vmem:[#allocation5 + $0x1620] ss:$72 sps:$4 sm:$0xff]  }
 0x2b1   : > { %6300 = vmatprep.subr.bf16.mxu1 %v10157_v30  ;;  %v10209_v29 = vld [vmem:[#allocation5 + $0x428] ss:$72 sps:$4 sm:$0xff]   ;;  %v10214_v30 = vld [vmem:[#allocation5 + $0x1594] ss:$72 sps:$4 sm:$0xff]  }
 0x2b3   : > { %6260 = vmatpush1.bf16.msra.mxu0 %v10152_v33  ;;  %v10217_v33 = vld [vmem:[#allocation5 + $0x39c] ss:$72 sps:$4 sm:$0xff]  }
 0x2b4   : > { %6301 = vmatpush1.bf16.msra.mxu1 %v10155_v36  ;;  %6261 = vmatprep.subr.bf16.mxu0 %v10160_v37  ;;  %v1136_v36 = vrot.slane %v11044_v59, %v10944_v34 }
 0x2b5   : > { %6302 = vmatprep.subr.bf16.mxu1 %v10163_v38 }
 0x2b7   : > { %6262 = vmatpush2.bf16.msra.mxu0 %v10158_v39 }
 0x2b8   : > { %6303 = vmatpush2.bf16.msra.mxu1 %v10161_v40  ;;  %6263 = vmatprep.subr.bf16.mxu0 %v10166_v41  ;;  %v10212_v40 = vld [vmem:[#allocation5 + $0x1590] ss:$72 sps:$4 sm:$0xff]  }
 0x2b9   : > { %6304 = vmatprep.subr.bf16.mxu1 %v10169_v42  ;;  %v10215_v41 = vld [vmem:[#allocation5 + $0x398] ss:$72 sps:$4 sm:$0xff]  }
 0x2bb   : > { %6264 = vmatpush2.bf16.msra.mxu0 %v10164_v43 }
 0x2bc   : > { %6305 = vmatpush2.bf16.msra.mxu1 %v10167_v44  ;;  %6265 = vmatprep.subr.bf16.mxu0 %v10172_v45  ;;  %v10220_v44 = vld [vmem:[#allocation5 + $0x1504] ss:$72 sps:$4 sm:$0xff]  }
 0x2bd   : > { %6306 = vmatprep.subr.bf16.mxu1 %v10175_v46  ;;  %v10223_v45 = vld [vmem:[#allocation5 + $0x30c] ss:$72 sps:$4 sm:$0xff]  }
 0x2bf   : > { %6266 = vmatpush2.bf16.msra.mxu0 %v10170_v47 }
 0x2c0   : > { %6307 = vmatpush2.bf16.msra.mxu1 %v10173_v48  ;;  %6267 = vmatprep.subr.bf16.mxu0 %v10178_v50 }
 0x2c1   : > { %6308 = vmatprep.subr.bf16.mxu1 %v10181_v11 }
 0x2c3   : > { %6268 = vmatpush2.bf16.msra.mxu0 %v10176_v51  ;;  %v10218_v51 = vld [vmem:[#allocation5 + $0x1500] ss:$72 sps:$4 sm:$0xff]  }
 0x2c4   : > { %6309 = vmatpush2.bf16.msra.mxu1 %v10179_v56  ;;  %6269 = vmatprep.subr.bf16.mxu0 %v10184_v57  ;;  %v10221_v56 = vld [vmem:[#allocation5 + $0x308] ss:$72 sps:$4 sm:$0xff]  }
 0x2c5   : > { %6310 = vmatprep.subr.bf16.mxu1 %v10187_v61  ;;  %v10226_v61 = vld [vmem:[#allocation5 + $0x1474] ss:$72 sps:$4 sm:$0xff]  }
 0x2c7   : > { %6270 = vmatpush2.bf16.msra.mxu0 %v10182_v63  ;;  %v10229_v63 = vld [vmem:[#allocation5 + $0x27c] ss:$72 sps:$4 sm:$0xff]  }
 0x2c8   : > { %6311 = vmatpush2.bf16.msra.mxu1 %v10185_v24  ;;  %6271 = vmatprep.subr.bf16.mxu0 %v10190_v1  ;;  %v10224_v1 = vld [vmem:[#allocation5 + $0x1470] ss:$72 sps:$4 sm:$0xff]  }
 0x2c9   : > { %6312 = vmatprep.subr.bf16.mxu1 %v10193_v2  ;;  %v10227_v2 = vld [vmem:[#allocation5 + $0x278] ss:$72 sps:$4 sm:$0xff]  }
 0x2cb   : > { %6272 = vmatpush2.bf16.msra.mxu0 %v10188_v4  ;;  %v10232_v4 = vld [vmem:[#allocation5 + $0x13e4] ss:$72 sps:$4 sm:$0xff]  }
 0x2cc   : > { %6313 = vmatpush2.bf16.msra.mxu1 %v10191_v10  ;;  %6273 = vmatprep.subr.bf16.mxu0 %v10196_v12  ;;  %v10235_v10 = vld [vmem:[#allocation5 + $0x1ec] ss:$72 sps:$4 sm:$0xff]   ;;  %v10230_v12 = vld [vmem:[#allocation5 + $0x13e0] ss:$72 sps:$4 sm:$0xff]  }
 0x2cd   : > { %6314 = vmatprep.subr.bf16.mxu1 %v10199_v13  ;;  %v10233_v13 = vld [vmem:[#allocation5 + $0x1e8] ss:$72 sps:$4 sm:$0xff]  }
 0x2cf   : > { %6274 = vmatpush2.bf16.msra.mxu0 %v10194_v32  ;;  %v10238_v32 = vld [vmem:[#allocation5 + $0x1354] ss:$72 sps:$4 sm:$0xff]  }
 0x2d0   : > { %6315 = vmatpush2.bf16.msra.mxu1 %v10197_v15  ;;  %6275 = vmatprep.subr.bf16.mxu0 %v10202_v16  ;;  %v10241_v15 = vld [vmem:[#allocation5 + $0x15c] ss:$72 sps:$4 sm:$0xff]   ;;  %v10236_v16 = vld [vmem:[#allocation5 + $0x1350] ss:$72 sps:$4 sm:$0xff]  }
 0x2d1   : > { %6316 = vmatprep.subr.bf16.mxu1 %v10205_v53  ;;  %v10239_v53 = vld [vmem:[#allocation5 + $0x158] ss:$72 sps:$4 sm:$0xff]  }
 0x2d3   : > { %6276 = vmatpush2.bf16.msra.mxu0 %v10200_v7  ;;  %v10244_v7 = vld [vmem:[#allocation5 + $0x12c4] ss:$72 sps:$4 sm:$0xff]  }
 0x2d4   : > { %6317 = vmatpush2.bf16.msra.mxu1 %v10203_v18  ;;  %6327 = vmatprep.subr.bf16.mxu0 %v10208_v23  ;;  %v10247_v18 = vld [vmem:[#allocation5 + $0xcc] ss:$72 sps:$4 sm:$0xff]   ;;  %v10242_v23 = vld [vmem:[#allocation5 + $0x12c0] ss:$72 sps:$4 sm:$0xff]  }
 0x2d5   : > { %6368 = vmatprep.subr.bf16.mxu1 %v10211_v25  ;;  %v10245_v25 = vld [vmem:[#allocation5 + $0xc8] ss:$72 sps:$4 sm:$0xff]  }
 0x2d6   : > { %v6033_v37 = vpop.f32.mrf.mxu0  ;;  %6278 = vmatmul.mubr.bf16.vlgmr.msra.gmra.mxu0 %v10916_v8 }
 0x2d7   : > { %v6074_v38 = vpop.f32.mrf.mxu1  ;;  %6319 = vmatmul.mubr.bf16.vlgmr.msra.gmra.mxu1 %v10918_v9  ;;  %v6034_v39 = vadd.f32 %v6033_v37, %v1132_v27  ;;  %6328 = vmatpush1.bf16.msra.mxu0 %v10206_v28  ;;  %v10250_v27 = vld [vmem:[#allocation5 + $0x1234] ss:$72 sps:$4 sm:$0xff]   ;;  %v10254_v37 = vld [vmem:[#allocation5 + $0x1aa0] ss:$72 sps:$4 sm:$0xff]  }
 0x2d8   : > { %6369 = vmatpush1.bf16.msra.mxu1 %v10209_v29  ;;  %v6035_v42 = vpop.f32.mrf.mxu0  ;;  %6329 = vmatprep.subr.bf16.mxu0 %v10214_v30  ;;  %v10253_v28 = vld [vmem:[#allocation5 + $0x3c] ss:$72 sps:$4 sm:$0xff]   ;;  %v10248_v29 = vld [vmem:[#allocation5 + $0x1230] ss:$72 sps:$4 sm:$0xff]  }
 0x2d9   : > { %v6076_v43 = vpop.f32.mrf.mxu1  ;;  %6370 = vmatprep.subr.bf16.mxu1 %v10217_v33  ;;  %v11052_v46 = vadd.f32 %v6074_v38, %v6034_v39  ;;  %v6036_v47 = vadd.f32 %v6035_v42, %v1136_v36  ;;  %6359 = vmatprep.mubr.bf16.mxu0 %v10924_v35  ;;  %v10251_v30 = vld [vmem:[#allocation5 + $0x38] ss:$72 sps:$4 sm:$0xff]   ;;  %v10256_v33 = vld [vmem:[#allocation5 + $0x1aa4] ss:$72 sps:$4 sm:$0xff]   ;;  %v10257_v38 = vld [vmem:[#allocation5 + $0x8a8] ss:$72 sps:$4 sm:$0xff]  }
 0x2da   : > { %6400 = vmatprep.mubr.bf16.mxu1 %v10907_v49  ;;  %v6037_v50 = vpop.f32.mrf.mxu0  ;;  %v10259_v36 = vld [vmem:[#allocation5 + $0x8ac] ss:$72 sps:$4 sm:$0xff]   ;;  %v10263_v42 = vld [vmem:[#allocation5 + $0x818] ss:$72 sps:$4 sm:$0xff]  }
 0x2db   : > { %v6078_v48 = vpop.f32.mrf.mxu1  ;;  %v11056_v11 = vadd.f32 %v6076_v43, %v6036_v47  ;;  %6330 = vmatpush1.bf16.msra.mxu0 %v10212_v40  ;;  %v10262_v39 = vld [vmem:[#allocation5 + $0x1a14] ss:$72 sps:$4 sm:$0xff]   ;;  %v10268_v43 = vld [vmem:[#allocation5 + $0x1984] ss:$72 sps:$4 sm:$0xff]   ;;  %v10269_v47 = vld [vmem:[#allocation5 + $0x788] ss:$72 sps:$4 sm:$0xff]  }
 0x2dc   : > { %6371 = vmatpush1.bf16.msra.mxu1 %v10215_v41  ;;  %6331 = vmatprep.subr.bf16.mxu0 %v10220_v44  ;;  %v6038_v24 = vpop.f32.mrf.mxu0  ;;  %v10265_v40 = vld [vmem:[#allocation5 + $0x81c] ss:$72 sps:$4 sm:$0xff]   ;;  %v10260_v41 = vld [vmem:[#allocation5 + $0x1a10] ss:$72 sps:$4 sm:$0xff]   ;;  %v10271_v44 = vld [vmem:[#allocation5 + $0x78c] ss:$72 sps:$4 sm:$0xff]  }
 0x2dd   : > { %v6079_v57 = vpop.f32.mrf.mxu1  ;;  %6372 = vmatprep.subr.bf16.mxu1 %v10223_v45  ;;  %v10266_v45 = vld [vmem:[#allocation5 + $0x1980] ss:$72 sps:$4 sm:$0xff]   ;;  %v10274_v48 = vld [vmem:[#allocation5 + $0x18f4] ss:$72 sps:$4 sm:$0xff]  }
 0x2de   : > { %v10277_v50 = vld [vmem:[#allocation5 + $0x6fc] ss:$72 sps:$4 sm:$0xff]   ;;  %v10281_v24 = vld [vmem:[#allocation5 + $0x668] ss:$72 sps:$4 sm:$0xff]  }
 0x2df   : > { %6332 = vmatpush1.bf16.msra.mxu0 %v10218_v51  ;;  %v10272_v51 = vld [vmem:[#allocation5 + $0x18f0] ss:$72 sps:$4 sm:$0xff]   ;;  %v10280_v57 = vld [vmem:[#allocation5 + $0x1864] ss:$72 sps:$4 sm:$0xff]  }
 0x2e0   : > { %6373 = vmatpush1.bf16.msra.mxu1 %v10221_v56  ;;  %6333 = vmatprep.subr.bf16.mxu0 %v10226_v61  ;;  %v10275_v56 = vld [vmem:[#allocation5 + $0x6f8] ss:$72 sps:$4 sm:$0xff]   ;;  %v10283_v61 = vld [vmem:[#allocation5 + $0x66c] ss:$72 sps:$4 sm:$0xff]  }
 0x2e1   : > { %6374 = vmatprep.subr.bf16.mxu1 %v10229_v63  ;;  %v10278_v63 = vld [vmem:[#allocation5 + $0x1860] ss:$72 sps:$4 sm:$0xff]  }
 0x2e3   : > { %6334 = vmatpush1.bf16.msra.mxu0 %v10224_v1  ;;  %v10286_v1 = vld [vmem:[#allocation5 + $0x17d4] ss:$72 sps:$4 sm:$0xff]  }
 0x2e4   : > { %6375 = vmatpush1.bf16.msra.mxu1 %v10227_v2  ;;  %6335 = vmatprep.subr.bf16.mxu0 %v10232_v4  ;;  %v10289_v2 = vld [vmem:[#allocation5 + $0x5dc] ss:$72 sps:$4 sm:$0xff]   ;;  %v10284_v4 = vld [vmem:[#allocation5 + $0x17d0] ss:$72 sps:$4 sm:$0xff]  }
 0x2e5   : > { %6376 = vmatprep.subr.bf16.mxu1 %v10235_v10  ;;  %v10287_v10 = vld [vmem:[#allocation5 + $0x5d8] ss:$72 sps:$4 sm:$0xff]  }
 0x2e7   : > { %6336 = vmatpush1.bf16.msra.mxu0 %v10230_v12  ;;  %v10292_v12 = vld [vmem:[#allocation5 + $0x1744] ss:$72 sps:$4 sm:$0xff]  }
 0x2e8   : > { %6377 = vmatpush1.bf16.msra.mxu1 %v10233_v13  ;;  %6337 = vmatprep.subr.bf16.mxu0 %v10238_v32  ;;  %v10295_v13 = vld [vmem:[#allocation5 + $0x54c] ss:$72 sps:$4 sm:$0xff]   ;;  %v10290_v32 = vld [vmem:[#allocation5 + $0x1740] ss:$72 sps:$4 sm:$0xff]  }
 0x2e9   : > { %6378 = vmatprep.subr.bf16.mxu1 %v10241_v15  ;;  %v10293_v15 = vld [vmem:[#allocation5 + $0x548] ss:$72 sps:$4 sm:$0xff]  }
 0x2eb   : > { %6338 = vmatpush1.bf16.msra.mxu0 %v10236_v16  ;;  %v10298_v16 = vld [vmem:[#allocation5 + $0x16b4] ss:$72 sps:$4 sm:$0xff]  }
 0x2ec   : > { %6379 = vmatpush1.bf16.msra.mxu1 %v10239_v53  ;;  %6339 = vmatprep.subr.bf16.mxu0 %v10244_v7  ;;  %v10301_v53 = vld [vmem:[#allocation5 + $0x4bc] ss:$72 sps:$4 sm:$0xff]   ;;  %v10296_v7 = vld [vmem:[#allocation5 + $0x16b0] ss:$72 sps:$4 sm:$0xff]  }
 0x2ed   : > { %6380 = vmatprep.subr.bf16.mxu1 %v10247_v18  ;;  %v10299_v18 = vld [vmem:[#allocation5 + $0x4b8] ss:$72 sps:$4 sm:$0xff]  }
 0x2ef   : > { %6340 = vmatpush1.bf16.msra.mxu0 %v10242_v23  ;;  %v10304_v23 = vld [vmem:[#allocation5 + $0xd2c] ss:$72 sps:$4 sm:$0xff]  }
 0x2f0   : > { %6381 = vmatpush1.bf16.msra.mxu1 %v10245_v25  ;;  %6341 = vmatprep.subr.bf16.mxu0 %v10250_v27  ;;  %v10307_v25 = vld [vmem:[#allocation5 + $0x162c] ss:$72 sps:$4 sm:$0xff]   ;;  %v10302_v27 = vld [vmem:[#allocation5 + $0xd28] ss:$72 sps:$4 sm:$0xff]  }
 0x2f1   : > { %6382 = vmatprep.subr.bf16.mxu1 %v10253_v28  ;;  %v10305_v28 = vld [vmem:[#allocation5 + $0x1628] ss:$72 sps:$4 sm:$0xff]  }
 0x2f3   : > { %6342 = vmatpush1.bf16.msra.mxu0 %v10248_v29  ;;  %v10310_v29 = vld [vmem:[#allocation5 + $0xc9c] ss:$72 sps:$4 sm:$0xff]  }
 0x2f4   : > { %6383 = vmatpush1.bf16.msra.mxu1 %v10251_v30  ;;  %6343 = vmatprep.subr.bf16.mxu0 %v10256_v33  ;;  %v10313_v30 = vld [vmem:[#allocation5 + $0x159c] ss:$72 sps:$4 sm:$0xff]  }
 0x2f5   : > { %6384 = vmatprep.subr.bf16.mxu1 %v10259_v36 }
 0x2f7   : > { %6344 = vmatpush2.bf16.msra.mxu0 %v10254_v37 }
 0x2f8   : > { %6385 = vmatpush2.bf16.msra.mxu1 %v10257_v38  ;;  %6345 = vmatprep.subr.bf16.mxu0 %v10262_v39  ;;  %v10308_v38 = vld [vmem:[#allocation5 + $0xc98] ss:$72 sps:$4 sm:$0xff]  }
 0x2f9   : > { %6386 = vmatprep.subr.bf16.mxu1 %v10265_v40  ;;  %v10311_v39 = vld [vmem:[#allocation5 + $0x1598] ss:$72 sps:$4 sm:$0xff]  }
 0x2fb   : > { %6346 = vmatpush2.bf16.msra.mxu0 %v10260_v41 }
 0x2fc   : > { %6387 = vmatpush2.bf16.msra.mxu1 %v10263_v42  ;;  %6347 = vmatprep.subr.bf16.mxu0 %v10268_v43  ;;  %v10316_v42 = vld [vmem:[#allocation5 + $0xc0c] ss:$72 sps:$4 sm:$0xff]  }
 0x2fd   : > { %6388 = vmatprep.subr.bf16.mxu1 %v10271_v44  ;;  %v10319_v43 = vld [vmem:[#allocation5 + $0x150c] ss:$72 sps:$4 sm:$0xff]  }
 0x2ff   : > { %6348 = vmatpush2.bf16.msra.mxu0 %v10266_v45 }
 0x300   : > { %6389 = vmatpush2.bf16.msra.mxu1 %v10269_v47  ;;  %6349 = vmatprep.subr.bf16.mxu0 %v10274_v48  ;;  %v10314_v47 = vld [vmem:[#allocation5 + $0xc08] ss:$72 sps:$4 sm:$0xff]  }
 0x301   : > { %6390 = vmatprep.subr.bf16.mxu1 %v10277_v50  ;;  %v10317_v48 = vld [vmem:[#allocation5 + $0x1508] ss:$72 sps:$4 sm:$0xff]  }
 0x303   : > { %6350 = vmatpush2.bf16.msra.mxu0 %v10272_v51  ;;  %v10322_v51 = vld [vmem:[#allocation5 + $0xb7c] ss:$72 sps:$4 sm:$0xff]  }
 0x304   : > { %6391 = vmatpush2.bf16.msra.mxu1 %v10275_v56  ;;  %6351 = vmatprep.subr.bf16.mxu0 %v10280_v57  ;;  %v10325_v56 = vld [vmem:[#allocation5 + $0x147c] ss:$72 sps:$4 sm:$0xff]  }
 0x305   : > { %6392 = vmatprep.subr.bf16.mxu1 %v10283_v61  ;;  %v10323_v61 = vld [vmem:[#allocation5 + $0x1478] ss:$72 sps:$4 sm:$0xff]  }
 0x307   : > { %6352 = vmatpush2.bf16.msra.mxu0 %v10278_v63  ;;  %v10328_v63 = vld [vmem:[#allocation5 + $0xaec] ss:$72 sps:$4 sm:$0xff]  }
 0x308   : > { %6393 = vmatpush2.bf16.msra.mxu1 %v10281_v24  ;;  %6353 = vmatprep.subr.bf16.mxu0 %v10286_v1  ;;  %v10331_v24 = vld [vmem:[#allocation5 + $0x13ec] ss:$72 sps:$4 sm:$0xff]   ;;  %v10326_v1 = vld [vmem:[#allocation5 + $0xae8] ss:$72 sps:$4 sm:$0xff]  }
 0x309   : > { %6394 = vmatprep.subr.bf16.mxu1 %v10289_v2  ;;  %v10329_v2 = vld [vmem:[#allocation5 + $0x13e8] ss:$72 sps:$4 sm:$0xff]  }
 0x30b   : > { %6354 = vmatpush2.bf16.msra.mxu0 %v10284_v4  ;;  %v10334_v4 = vld [vmem:[#allocation5 + $0xa5c] ss:$72 sps:$4 sm:$0xff]  }
 0x30c   : > { %6395 = vmatpush2.bf16.msra.mxu1 %v10287_v10  ;;  %6355 = vmatprep.subr.bf16.mxu0 %v10292_v12  ;;  %v10337_v10 = vld [vmem:[#allocation5 + $0x135c] ss:$72 sps:$4 sm:$0xff]   ;;  %v10332_v12 = vld [vmem:[#allocation5 + $0xa58] ss:$72 sps:$4 sm:$0xff]  }
 0x30d   : > { %6396 = vmatprep.subr.bf16.mxu1 %v10295_v13  ;;  %v10335_v13 = vld [vmem:[#allocation5 + $0x1358] ss:$72 sps:$4 sm:$0xff]  }
 0x30f   : > { %6356 = vmatpush2.bf16.msra.mxu0 %v10290_v32  ;;  %v10340_v32 = vld [vmem:[#allocation5 + $0x9cc] ss:$72 sps:$4 sm:$0xff]  }
 0x310   : > { %6397 = vmatpush2.bf16.msra.mxu1 %v10293_v15  ;;  %6357 = vmatprep.subr.bf16.mxu0 %v10298_v16  ;;  %v10343_v15 = vld [vmem:[#allocation5 + $0x12cc] ss:$72 sps:$4 sm:$0xff]   ;;  %v10338_v16 = vld [vmem:[#allocation5 + $0x9c8] ss:$72 sps:$4 sm:$0xff]  }
 0x311   : > { %6398 = vmatprep.subr.bf16.mxu1 %v10301_v53  ;;  %v10341_v53 = vld [vmem:[#allocation5 + $0x12c8] ss:$72 sps:$4 sm:$0xff]  }
 0x313   : > { %6358 = vmatpush2.bf16.msra.mxu0 %v10296_v7  ;;  %v10346_v7 = vld [vmem:[#allocation5 + $0x93c] ss:$72 sps:$4 sm:$0xff]  }
 0x314   : > { %6399 = vmatpush2.bf16.msra.mxu1 %v10299_v18  ;;  %6409 = vmatprep.subr.bf16.mxu0 %v10304_v23  ;;  %v10349_v18 = vld [vmem:[#allocation5 + $0x123c] ss:$72 sps:$4 sm:$0xff]   ;;  %v10344_v23 = vld [vmem:[#allocation5 + $0x938] ss:$72 sps:$4 sm:$0xff]  }
 0x315   : > { %6450 = vmatprep.subr.bf16.mxu1 %v10307_v25  ;;  %v10347_v25 = vld [vmem:[#allocation5 + $0x1238] ss:$72 sps:$4 sm:$0xff]  }
 0x316   : > { %v6115_v33 = vpop.f32.mrf.mxu0  ;;  %6360 = vmatmul.mubr.bf16.vlgmr.msra.gmra.mxu0 %v10928_v17 }
 0x317   : > { %v11058_v36 = vpop.f32.mrf.mxu1  ;;  %6401 = vmatmul.mubr.bf16.vlgmr.msra.gmra.mxu1 %v10916_v8  ;;  %v11063_v37 = vadd.f32 %v6115_v33, %v11052_v46  ;;  %6410 = vmatpush1.bf16.msra.mxu0 %v10302_v27  ;;  %v10352_v27 = vld [vmem:[#allocation5 + $0x11ac] ss:$72 sps:$4 sm:$0xff]   ;;  %v10358_v33 = vld [vmem:[#allocation5 + $0x111c] ss:$72 sps:$4 sm:$0xff]  }
 0x318   : > { %6451 = vmatpush1.bf16.msra.mxu1 %v10305_v28  ;;  %v6117_v40 = vpop.f32.mrf.mxu0  ;;  %6411 = vmatprep.subr.bf16.mxu0 %v10310_v29  ;;  %v10355_v28 = vld [vmem:[#allocation5 + $0x1aac] ss:$72 sps:$4 sm:$0xff]   ;;  %v10350_v29 = vld [vmem:[#allocation5 + $0x11a8] ss:$72 sps:$4 sm:$0xff]  }
 0x319   : > { %v11065_v41 = vpop.f32.mrf.mxu1  ;;  %6452 = vmatprep.subr.bf16.mxu1 %v10313_v30  ;;  %v11068_v44 = vadd.f32 %v6117_v40, %v11056_v11  ;;  %6441 = vmatprep.mubr.bf16.mxu0 %v10910_v52  ;;  %v10320_v11 = vld [vmem:[#allocation5 + $0xb78] ss:$72 sps:$4 sm:$0xff]   ;;  %v10353_v30 = vld [vmem:[#allocation5 + $0x1aa8] ss:$72 sps:$4 sm:$0xff]  }
 0x31a   : > { %6482 = vmatprep.mubr.bf16.mxu1 %v10924_v35  ;;  %v6119_v45 = vpop.f32.mrf.mxu0  ;;  %v10359_v40 = vld [vmem:[#allocation5 + $0x1a18] ss:$72 sps:$4 sm:$0xff]  }
 0x31b   : > { %v6160_v46 = vpop.f32.mrf.mxu1  ;;  %6412 = vmatpush1.bf16.msra.mxu0 %v10308_v38  ;;  %v10361_v38 = vld [vmem:[#allocation5 + $0x1a1c] ss:$72 sps:$4 sm:$0xff]   ;;  %v10365_v45 = vld [vmem:[#allocation5 + $0x1988] ss:$72 sps:$4 sm:$0xff]  }
 0x31c   : > { %6453 = vmatpush1.bf16.msra.mxu1 %v10311_v39  ;;  %6413 = vmatprep.subr.bf16.mxu0 %v10316_v42  ;;  %v6120_v57 = vpop.f32.mrf.mxu0  ;;  %v10356_v39 = vld [vmem:[#allocation5 + $0x1118] ss:$72 sps:$4 sm:$0xff]   ;;  %v10364_v42 = vld [vmem:[#allocation5 + $0x108c] ss:$72 sps:$4 sm:$0xff]   ;;  %v10362_v46 = vld [vmem:[#allocation5 + $0x1088] ss:$72 sps:$4 sm:$0xff]  }
 0x31d   : > { %v6161_v50 = vpop.f32.mrf.mxu1  ;;  %6454 = vmatprep.subr.bf16.mxu1 %v10319_v43  ;;  %v10367_v43 = vld [vmem:[#allocation5 + $0x198c] ss:$72 sps:$4 sm:$0xff]  }
 0x31e   : > { %v10368_v50 = vld [vmem:[#allocation5 + $0xff8] ss:$72 sps:$4 sm:$0xff]   ;;  %v10379_v57 = vld [vmem:[#allocation5 + $0x186c] ss:$72 sps:$4 sm:$0xff]  }
 0x31f   : > { %6414 = vmatpush1.bf16.msra.mxu0 %v10314_v47  ;;  %v10370_v47 = vld [vmem:[#allocation5 + $0xffc] ss:$72 sps:$4 sm:$0xff]  }
 0x320   : > { %6455 = vmatpush1.bf16.msra.mxu1 %v10317_v48  ;;  %6415 = vmatprep.subr.bf16.mxu0 %v10322_v51  ;;  %v10373_v48 = vld [vmem:[#allocation5 + $0x18fc] ss:$72 sps:$4 sm:$0xff]   ;;  %v10371_v51 = vld [vmem:[#allocation5 + $0x18f8] ss:$72 sps:$4 sm:$0xff]  }
 0x321   : > { %6456 = vmatprep.subr.bf16.mxu1 %v10325_v56  ;;  %v10376_v56 = vld [vmem:[#allocation5 + $0xf6c] ss:$72 sps:$4 sm:$0xff]  }
 0x323   : > { %6416 = vmatpush1.bf16.msra.mxu0 %v10320_v11  ;;  %v10374_v11 = vld [vmem:[#allocation5 + $0xf68] ss:$72 sps:$4 sm:$0xff]  }
 0x324   : > { %6457 = vmatpush1.bf16.msra.mxu1 %v10323_v61  ;;  %6417 = vmatprep.subr.bf16.mxu0 %v10328_v63  ;;  %v10377_v61 = vld [vmem:[#allocation5 + $0x1868] ss:$72 sps:$4 sm:$0xff]   ;;  %v10382_v63 = vld [vmem:[#allocation5 + $0xedc] ss:$72 sps:$4 sm:$0xff]  }
 0x325   : > { %6458 = vmatprep.subr.bf16.mxu1 %v10331_v24  ;;  %v10385_v24 = vld [vmem:[#allocation5 + $0x17dc] ss:$72 sps:$4 sm:$0xff]  }
 0x327   : > { %6418 = vmatpush1.bf16.msra.mxu0 %v10326_v1  ;;  %v10380_v1 = vld [vmem:[#allocation5 + $0xed8] ss:$72 sps:$4 sm:$0xff]  }
 0x328   : > { %6459 = vmatpush1.bf16.msra.mxu1 %v10329_v2  ;;  %6419 = vmatprep.subr.bf16.mxu0 %v10334_v4  ;;  %v10383_v2 = vld [vmem:[#allocation5 + $0x17d8] ss:$72 sps:$4 sm:$0xff]   ;;  %v10388_v4 = vld [vmem:[#allocation5 + $0xe4c] ss:$72 sps:$4 sm:$0xff]  }
 0x329   : > { %6460 = vmatprep.subr.bf16.mxu1 %v10337_v10  ;;  %v10391_v10 = vld [vmem:[#allocation5 + $0x174c] ss:$72 sps:$4 sm:$0xff]  }
 0x32b   : > { %6420 = vmatpush1.bf16.msra.mxu0 %v10332_v12  ;;  %v10386_v12 = vld [vmem:[#allocation5 + $0xe48] ss:$72 sps:$4 sm:$0xff]  }
 0x32c   : > { %6461 = vmatpush1.bf16.msra.mxu1 %v10335_v13  ;;  %6421 = vmatprep.subr.bf16.mxu0 %v10340_v32  ;;  %v10389_v13 = vld [vmem:[#allocation5 + $0x1748] ss:$72 sps:$4 sm:$0xff]   ;;  %v10394_v32 = vld [vmem:[#allocation5 + $0xdbc] ss:$72 sps:$4 sm:$0xff]  }
 0x32d   : > { %6462 = vmatprep.subr.bf16.mxu1 %v10343_v15  ;;  %v10397_v15 = vld [vmem:[#allocation5 + $0x16bc] ss:$72 sps:$4 sm:$0xff]  }
 0x32f   : > { %6422 = vmatpush1.bf16.msra.mxu0 %v10338_v16  ;;  %v10392_v16 = vld [vmem:[#allocation5 + $0xdb8] ss:$72 sps:$4 sm:$0xff]  }
 0x330   : > { %6463 = vmatpush1.bf16.msra.mxu1 %v10341_v53  ;;  %6423 = vmatprep.subr.bf16.mxu0 %v10346_v7  ;;  %v10395_v53 = vld [vmem:[#allocation5 + $0x16b8] ss:$72 sps:$4 sm:$0xff]   ;;  %v10400_v7 = vld [vmem:[#allocation5 + $0x434] ss:$72 sps:$4 sm:$0xff]  }
 0x331   : > { %6464 = vmatprep.subr.bf16.mxu1 %v10349_v18  ;;  %v10403_v18 = vld [vmem:[#allocation5 + $0xd34] ss:$72 sps:$4 sm:$0xff]  }
 0x333   : > { %6424 = vmatpush1.bf16.msra.mxu0 %v10344_v23  ;;  %v1140_v23 = vrot.slane %v11044_v59, %v1107_v20 }
 0x334   : > { %6465 = vmatpush1.bf16.msra.mxu1 %v10347_v25  ;;  %6425 = vmatprep.subr.bf16.mxu0 %v10352_v27  ;;  %v1144_v25 = vrot.slane %v11044_v59, %v1111_v21  ;;  %v10398_v27 = vld [vmem:[#allocation5 + $0x430] ss:$72 sps:$4 sm:$0xff]   ;;  %v10404_v21 = vld [vmem:[#allocation5 + $0x3a0] ss:$72 sps:$4 sm:$0xff]  }
 0x335   : > { %6466 = vmatprep.subr.bf16.mxu1 %v10355_v28  ;;  %v10401_v28 = vld [vmem:[#allocation5 + $0xd30] ss:$72 sps:$4 sm:$0xff]  }
 0x336   : > { %v6159_v20 = vadd.f32 %v11065_v41, %v1144_v25  ;;  %v10445_v25 = vld [vmem:[#allocation5 + $0x944] ss:$72 sps:$4 sm:$0xff]  }
 0x337   : > { %6426 = vmatpush2.bf16.msra.mxu0 %v10350_v29  ;;  %v10406_v29 = vld [vmem:[#allocation5 + $0x3a4] ss:$72 sps:$4 sm:$0xff]  }
 0x338   : > { %6467 = vmatpush2.bf16.msra.mxu1 %v10353_v30  ;;  %6427 = vmatprep.subr.bf16.mxu0 %v10358_v33  ;;  %v10409_v30 = vld [vmem:[#allocation5 + $0xca4] ss:$72 sps:$4 sm:$0xff]   ;;  %v6157_v33 = vadd.f32 %v11058_v36, %v1140_v23 }
 0x339   : > { %6468 = vmatprep.subr.bf16.mxu1 %v10361_v38  ;;  %v10442_v23 = vld [vmem:[#allocation5 + $0x44] ss:$72 sps:$4 sm:$0xff]  }
 0x33b   : > { %6428 = vmatpush2.bf16.msra.mxu0 %v10356_v39 }
 0x33c   : > { %6469 = vmatpush2.bf16.msra.mxu1 %v10359_v40  ;;  %6429 = vmatprep.subr.bf16.mxu0 %v10364_v42  ;;  %v10407_v42 = vld [vmem:[#allocation5 + $0xca0] ss:$72 sps:$4 sm:$0xff]  }
 0x33d   : > { %6470 = vmatprep.subr.bf16.mxu1 %v10367_v43 }
 0x33f   : > { %6430 = vmatpush2.bf16.msra.mxu0 %v10362_v46 }
 0x340   : > { %6471 = vmatpush2.bf16.msra.mxu1 %v10365_v45  ;;  %6431 = vmatprep.subr.bf16.mxu0 %v10370_v47  ;;  %v10412_v45 = vld [vmem:[#allocation5 + $0x314] ss:$72 sps:$4 sm:$0xff]  }
 0x341   : > { %6472 = vmatprep.subr.bf16.mxu1 %v10373_v48  ;;  %v10415_v47 = vld [vmem:[#allocation5 + $0xc14] ss:$72 sps:$4 sm:$0xff]  }
 0x343   : > { %6432 = vmatpush2.bf16.msra.mxu0 %v10368_v50 }
 0x344   : > { %6473 = vmatpush2.bf16.msra.mxu1 %v10371_v51  ;;  %6433 = vmatprep.subr.bf16.mxu0 %v10376_v56  ;;  %v10410_v56 = vld [vmem:[#allocation5 + $0x310] ss:$72 sps:$4 sm:$0xff]  }
 0x345   : > { %6474 = vmatprep.subr.bf16.mxu1 %v10379_v57  ;;  %v10413_v57 = vld [vmem:[#allocation5 + $0xc10] ss:$72 sps:$4 sm:$0xff]  }
 0x347   : > { %6434 = vmatpush2.bf16.msra.mxu0 %v10374_v11 }
 0x348   : > { %6475 = vmatpush2.bf16.msra.mxu1 %v10377_v61  ;;  %6435 = vmatprep.subr.bf16.mxu0 %v10382_v63  ;;  %v10418_v61 = vld [vmem:[#allocation5 + $0x284] ss:$72 sps:$4 sm:$0xff]  }
 0x349   : > { %6476 = vmatprep.subr.bf16.mxu1 %v10385_v24  ;;  %v10421_v63 = vld [vmem:[#allocation5 + $0xb84] ss:$72 sps:$4 sm:$0xff]  }
 0x34b   : > { %6436 = vmatpush2.bf16.msra.mxu0 %v10380_v1  ;;  %v10416_v1 = vld [vmem:[#allocation5 + $0x280] ss:$72 sps:$4 sm:$0xff]  }
 0x34c   : > { %6477 = vmatpush2.bf16.msra.mxu1 %v10383_v2  ;;  %6437 = vmatprep.subr.bf16.mxu0 %v10388_v4  ;;  %v10427_v2 = vld [vmem:[#allocation5 + $0xaf4] ss:$72 sps:$4 sm:$0xff]   ;;  %v10422_v4 = vld [vmem:[#allocation5 + $0x1f0] ss:$72 sps:$4 sm:$0xff]  }
 0x34d   : > { %6478 = vmatprep.subr.bf16.mxu1 %v10391_v10  ;;  %v10425_v10 = vld [vmem:[#allocation5 + $0xaf0] ss:$72 sps:$4 sm:$0xff]  }
 0x34f   : > { %6438 = vmatpush2.bf16.msra.mxu0 %v10386_v12  ;;  %v10430_v12 = vld [vmem:[#allocation5 + $0x164] ss:$72 sps:$4 sm:$0xff]  }
 0x350   : > { %6479 = vmatpush2.bf16.msra.mxu1 %v10389_v13  ;;  %6439 = vmatprep.subr.bf16.mxu0 %v10394_v32  ;;  %v10433_v13 = vld [vmem:[#allocation5 + $0xa64] ss:$72 sps:$4 sm:$0xff]   ;;  %v10428_v32 = vld [vmem:[#allocation5 + $0x160] ss:$72 sps:$4 sm:$0xff]  }
 0x351   : > { %6480 = vmatprep.subr.bf16.mxu1 %v10397_v15  ;;  %v10431_v15 = vld [vmem:[#allocation5 + $0xa60] ss:$72 sps:$4 sm:$0xff]  }
 0x353   : > { %6440 = vmatpush2.bf16.msra.mxu0 %v10392_v16  ;;  %v10436_v16 = vld [vmem:[#allocation5 + $0xd4] ss:$72 sps:$4 sm:$0xff]  }
 0x354   : > { %6481 = vmatpush2.bf16.msra.mxu1 %v10395_v53  ;;  %6491 = vmatprep.subr.bf16.mxu0 %v10400_v7  ;;  %v10439_v53 = vld [vmem:[#allocation5 + $0x9d4] ss:$72 sps:$4 sm:$0xff]   ;;  %v10434_v7 = vld [vmem:[#allocation5 + $0xd0] ss:$72 sps:$4 sm:$0xff]  }
 0x355   : > { %6532 = vmatprep.subr.bf16.mxu1 %v10403_v18  ;;  %v10437_v18 = vld [vmem:[#allocation5 + $0x9d0] ss:$72 sps:$4 sm:$0xff]  }
 0x356   : > { %v6197_v38 = vpop.f32.mrf.mxu0  ;;  %6442 = vmatmul.mubr.bf16.vlgmr.msra.gmra.mxu0 %v10918_v9 }
 0x357   : > { %v6238_v39 = vpop.f32.mrf.mxu1  ;;  %6483 = vmatmul.mubr.bf16.vlgmr.msra.gmra.mxu1 %v10928_v17  ;;  %v6198_v40 = vadd.f32 %v6197_v38, %v6157_v33  ;;  %6492 = vmatpush1.bf16.msra.mxu0 %v10398_v27  ;;  %v10440_v27 = vld [vmem:[#allocation5 + $0x40] ss:$72 sps:$4 sm:$0xff]   ;;  %v10446_v33 = vld [vmem:[#allocation5 + $0x8b0] ss:$72 sps:$4 sm:$0xff]  }
 0x358   : > { %6533 = vmatpush1.bf16.msra.mxu1 %v10401_v28  ;;  %v6199_v43 = vpop.f32.mrf.mxu0  ;;  %6493 = vmatprep.subr.bf16.mxu0 %v10406_v29  ;;  %v10443_v28 = vld [vmem:[#allocation5 + $0x940] ss:$72 sps:$4 sm:$0xff]   ;;  %v10448_v29 = vld [vmem:[#allocation5 + $0x8b4] ss:$72 sps:$4 sm:$0xff]   ;;  %v10449_v38 = vld [vmem:[#allocation5 + $0x11b0] ss:$72 sps:$4 sm:$0xff]  }
 0x359   : > { %v6240_v46 = vpop.f32.mrf.mxu1  ;;  %6534 = vmatprep.subr.bf16.mxu1 %v10409_v30  ;;  %v11082_v36 = vadd.f32 %v6238_v39, %v6198_v40  ;;  %v6200_v48 = vadd.f32 %v6199_v43, %v6159_v20  ;;  %6523 = vmatprep.mubr.bf16.mxu0 %v10907_v49  ;;  %v10419_v49 = vld [vmem:[#allocation5 + $0xb80] ss:$72 sps:$4 sm:$0xff]   ;;  %v10451_v30 = vld [vmem:[#allocation5 + $0x11b4] ss:$72 sps:$4 sm:$0xff]   ;;  %v10454_v39 = vld [vmem:[#allocation5 + $0x824] ss:$72 sps:$4 sm:$0xff]  }
 0x35a   : > { %6564 = vmatprep.mubr.bf16.mxu1 %v10910_v52  ;;  %v6201_v41 = vpop.f32.mrf.mxu0  ;;  %v10424_v52 = vld [vmem:[#allocation5 + $0x1f4] ss:$72 sps:$4 sm:$0xff]   ;;  %v10457_v20 = vld [vmem:[#allocation5 + $0x1124] ss:$72 sps:$4 sm:$0xff]   ;;  %v10452_v40 = vld [vmem:[#allocation5 + $0x820] ss:$72 sps:$4 sm:$0xff]  }
 0x35b   : > { %v6242_v50 = vpop.f32.mrf.mxu1  ;;  %v11086_v51 = vadd.f32 %v6240_v46, %v6200_v48  ;;  %6494 = vmatpush1.bf16.msra.mxu0 %v10404_v21  ;;  %v10455_v21 = vld [vmem:[#allocation5 + $0x1120] ss:$72 sps:$4 sm:$0xff]   ;;  %v10463_v43 = vld [vmem:[#allocation5 + $0x1094] ss:$72 sps:$4 sm:$0xff]   ;;  %v10458_v46 = vld [vmem:[#allocation5 + $0x790] ss:$72 sps:$4 sm:$0xff]  }
 0x35c   : > { %6535 = vmatpush1.bf16.msra.mxu1 %v10407_v42  ;;  %6495 = vmatprep.subr.bf16.mxu0 %v10412_v45  ;;  %v6202_v24 = vpop.f32.mrf.mxu0  ;;  %v10460_v42 = vld [vmem:[#allocation5 + $0x794] ss:$72 sps:$4 sm:$0xff]   ;;  %v10461_v45 = vld [vmem:[#allocation5 + $0x1090] ss:$72 sps:$4 sm:$0xff]   ;;  %v10469_v48 = vld [vmem:[#allocation5 + $0x1004] ss:$72 sps:$4 sm:$0xff]  }
 0x35d   : > { %v6243_v11 = vpop.f32.mrf.mxu1  ;;  %6536 = vmatprep.subr.bf16.mxu1 %v10415_v47  ;;  %v10466_v47 = vld [vmem:[#allocation5 + $0x704] ss:$72 sps:$4 sm:$0xff]   ;;  %v10464_v50 = vld [vmem:[#allocation5 + $0x700] ss:$72 sps:$4 sm:$0xff]  }
 0x35e   : > { %v10467_v41 = vld [vmem:[#allocation5 + $0x1000] ss:$72 sps:$4 sm:$0xff]   ;;  %v10470_v11 = vld [vmem:[#allocation5 + $0x670] ss:$72 sps:$4 sm:$0xff]   ;;  %v10481_v24 = vld [vmem:[#allocation5 + $0xee4] ss:$72 sps:$4 sm:$0xff]  }
 0x35f   : > { %6496 = vmatpush1.bf16.msra.mxu0 %v10410_v56  ;;  %v10472_v56 = vld [vmem:[#allocation5 + $0x674] ss:$72 sps:$4 sm:$0xff]  }
 0x360   : > { %6537 = vmatpush1.bf16.msra.mxu1 %v10413_v57  ;;  %6497 = vmatprep.subr.bf16.mxu0 %v10418_v61  ;;  %v10475_v57 = vld [vmem:[#allocation5 + $0xf74] ss:$72 sps:$4 sm:$0xff]   ;;  %v10473_v61 = vld [vmem:[#allocation5 + $0xf70] ss:$72 sps:$4 sm:$0xff]  }
 0x361   : > { %6538 = vmatprep.subr.bf16.mxu1 %v10421_v63  ;;  %v10478_v63 = vld [vmem:[#allocation5 + $0x5e4] ss:$72 sps:$4 sm:$0xff]  }
 0x363   : > { %6498 = vmatpush1.bf16.msra.mxu0 %v10416_v1  ;;  %v10476_v1 = vld [vmem:[#allocation5 + $0x5e0] ss:$72 sps:$4 sm:$0xff]  }
 0x364   : > { %6539 = vmatpush1.bf16.msra.mxu1 %v10419_v49  ;;  %6499 = vmatprep.subr.bf16.mxu0 %v10424_v52  ;;  %v10479_v49 = vld [vmem:[#allocation5 + $0xee0] ss:$72 sps:$4 sm:$0xff]   ;;  %v10484_v52 = vld [vmem:[#allocation5 + $0x554] ss:$72 sps:$4 sm:$0xff]  }
 0x365   : > { %6540 = vmatprep.subr.bf16.mxu1 %v10427_v2  ;;  %v10487_v2 = vld [vmem:[#allocation5 + $0xe54] ss:$72 sps:$4 sm:$0xff]  }
 0x367   : > { %6500 = vmatpush1.bf16.msra.mxu0 %v10422_v4  ;;  %v10482_v4 = vld [vmem:[#allocation5 + $0x550] ss:$72 sps:$4 sm:$0xff]  }
 0x368   : > { %6541 = vmatpush1.bf16.msra.mxu1 %v10425_v10  ;;  %6501 = vmatprep.subr.bf16.mxu0 %v10430_v12  ;;  %v10485_v10 = vld [vmem:[#allocation5 + $0xe50] ss:$72 sps:$4 sm:$0xff]   ;;  %v10490_v12 = vld [vmem:[#allocation5 + $0x4c4] ss:$72 sps:$4 sm:$0xff]  }
 0x369   : > { %6542 = vmatprep.subr.bf16.mxu1 %v10433_v13  ;;  %v10493_v13 = vld [vmem:[#allocation5 + $0xdc4] ss:$72 sps:$4 sm:$0xff]  }
 0x36b   : > { %6502 = vmatpush1.bf16.msra.mxu0 %v10428_v32  ;;  %v10488_v32 = vld [vmem:[#allocation5 + $0x4c0] ss:$72 sps:$4 sm:$0xff]  }
 0x36c   : > { %6543 = vmatpush1.bf16.msra.mxu1 %v10431_v15  ;;  %6503 = vmatprep.subr.bf16.mxu0 %v10436_v16  ;;  %v10491_v15 = vld [vmem:[#allocation5 + $0xdc0] ss:$72 sps:$4 sm:$0xff]   ;;  %v10496_v16 = vld [vmem:[#allocation5 + $0x1634] ss:$72 sps:$4 sm:$0xff]  }
 0x36d   : > { %6544 = vmatprep.subr.bf16.mxu1 %v10439_v53  ;;  %v10494_v53 = vld [vmem:[#allocation5 + $0x1630] ss:$72 sps:$4 sm:$0xff]  }
 0x36f   : > { %6504 = vmatpush1.bf16.msra.mxu0 %v10434_v7  ;;  %v10749_v7 = vmov 0.0  }
 0x370   : > { %6545 = vmatpush1.bf16.msra.mxu1 %v10437_v18  ;;  %6505 = vmatprep.subr.bf16.mxu0 %v10442_v23  ;;  %v10499_v18 = vld [vmem:[#allocation5 + $0x15a4] ss:$72 sps:$4 sm:$0xff]   ;;  %v1152_v23 = vrot.slane %v11044_v59, %v1119_v3  ;;  %v10502_v3 = vld [vmem:[#allocation5 + $0x1514] ss:$72 sps:$4 sm:$0xff]  }
 0x371   : > { %6546 = vmatprep.subr.bf16.mxu1 %v10445_v25  ;;  %v6622_v25 = vsel %vm6617_vm0, %v11032_v60, 0 }
 0x373   : > { %6506 = vmatpush1.bf16.msra.mxu0 %v10440_v27 }
 0x374   : > { %6547 = vmatpush1.bf16.msra.mxu1 %v10443_v28  ;;  %6507 = vmatprep.subr.bf16.mxu0 %v10448_v29  ;;  %v10497_v29 = vld [vmem:[#allocation5 + $0x15a0] ss:$72 sps:$4 sm:$0xff]  }
 0x375   : > { %6548 = vmatprep.subr.bf16.mxu1 %v10451_v30 }
 0x377   : > { %6508 = vmatpush2.bf16.msra.mxu0 %v10446_v33 }
 0x378   : > { %6549 = vmatpush2.bf16.msra.mxu1 %v10449_v38  ;;  %6509 = vmatprep.subr.bf16.mxu0 %v10454_v39 }
 0x379   : > { %6550 = vmatprep.subr.bf16.mxu1 %v10457_v20  ;;  %v10505_v20 = vld [vmem:[#allocation5 + $0x1484] ss:$72 sps:$4 sm:$0xff]  }
 0x37b   : > { %6510 = vmatpush2.bf16.msra.mxu0 %v10452_v40 }
 0x37c   : > { %6551 = vmatpush2.bf16.msra.mxu1 %v10455_v21  ;;  %6511 = vmatprep.subr.bf16.mxu0 %v10460_v42  ;;  %v10503_v21 = vld [vmem:[#allocation5 + $0x1480] ss:$72 sps:$4 sm:$0xff]   ;;  %v10506_v42 = vld [vmem:[#allocation5 + $0x13f0] ss:$72 sps:$4 sm:$0xff]  }
 0x37d   : > { %6552 = vmatprep.subr.bf16.mxu1 %v10463_v43  ;;  %v10511_v43 = vld [vmem:[#allocation5 + $0x1364] ss:$72 sps:$4 sm:$0xff]  }
 0x37f   : > { %6512 = vmatpush2.bf16.msra.mxu0 %v10458_v46  ;;  %v10509_v46 = vld [vmem:[#allocation5 + $0x1360] ss:$72 sps:$4 sm:$0xff]  }
 0x380   : > { %6553 = vmatpush2.bf16.msra.mxu1 %v10461_v45  ;;  %6513 = vmatprep.subr.bf16.mxu0 %v10466_v47  ;;  %v10514_v45 = vld [vmem:[#allocation5 + $0x12d4] ss:$72 sps:$4 sm:$0xff]   ;;  %v10512_v47 = vld [vmem:[#allocation5 + $0x12d0] ss:$72 sps:$4 sm:$0xff]  }
 0x381   : > { %6554 = vmatprep.subr.bf16.mxu1 %v10469_v48  ;;  %v10517_v48 = vld [vmem:[#allocation5 + $0x1244] ss:$72 sps:$4 sm:$0xff]  }
 0x383   : > { %6514 = vmatpush2.bf16.msra.mxu0 %v10464_v50  ;;  %v10520_v50 = vld [vmem:[#allocation5 + $0x1ab4] ss:$72 sps:$4 sm:$0xff]  }
 0x384   : > { %6555 = vmatpush2.bf16.msra.mxu1 %v10467_v41  ;;  %6515 = vmatprep.subr.bf16.mxu0 %v10472_v56  ;;  %v10518_v41 = vld [vmem:[#allocation5 + $0x1ab0] ss:$72 sps:$4 sm:$0xff]   ;;  %v10523_v56 = vld [vmem:[#allocation5 + $0x1a24] ss:$72 sps:$4 sm:$0xff]  }
 0x385   : > { %6556 = vmatprep.subr.bf16.mxu1 %v10475_v57  ;;  %v10521_v57 = vld [vmem:[#allocation5 + $0x1a20] ss:$72 sps:$4 sm:$0xff]  }
 0x387   : > { %6516 = vmatpush2.bf16.msra.mxu0 %v10470_v11  ;;  %v10526_v11 = vld [vmem:[#allocation5 + $0x1994] ss:$72 sps:$4 sm:$0xff]  }
 0x388   : > { %6557 = vmatpush2.bf16.msra.mxu1 %v10473_v61  ;;  %6517 = vmatprep.subr.bf16.mxu0 %v10478_v63  ;;  %v10524_v61 = vld [vmem:[#allocation5 + $0x1990] ss:$72 sps:$4 sm:$0xff]   ;;  %v10529_v63 = vld [vmem:[#allocation5 + $0x1904] ss:$72 sps:$4 sm:$0xff]  }
 0x389   : > { %6558 = vmatprep.subr.bf16.mxu1 %v10481_v24  ;;  %v10527_v24 = vld [vmem:[#allocation5 + $0x1900] ss:$72 sps:$4 sm:$0xff]  }
 0x38b   : > { %6518 = vmatpush2.bf16.msra.mxu0 %v10476_v1  ;;  %v10532_v1 = vld [vmem:[#allocation5 + $0x1874] ss:$72 sps:$4 sm:$0xff]  }
 0x38c   : > { %6559 = vmatpush2.bf16.msra.mxu1 %v10479_v49  ;;  %6519 = vmatprep.subr.bf16.mxu0 %v10484_v52  ;;  %v10530_v49 = vld [vmem:[#allocation5 + $0x1870] ss:$72 sps:$4 sm:$0xff]   ;;  %v10535_v52 = vld [vmem:[#allocation5 + $0x17e4] ss:$72 sps:$4 sm:$0xff]  }
 0x38d   : > { %6560 = vmatprep.subr.bf16.mxu1 %v10487_v2  ;;  %v10533_v2 = vld [vmem:[#allocation5 + $0x17e0] ss:$72 sps:$4 sm:$0xff]  }
 0x38f   : > { %6520 = vmatpush2.bf16.msra.mxu0 %v10482_v4  ;;  %v10538_v4 = vld [vmem:[#allocation5 + $0x1754] ss:$72 sps:$4 sm:$0xff]  }
 0x390   : > { %6561 = vmatpush2.bf16.msra.mxu1 %v10485_v10  ;;  %6521 = vmatprep.subr.bf16.mxu0 %v10490_v12  ;;  %v10536_v10 = vld [vmem:[#allocation5 + $0x1750] ss:$72 sps:$4 sm:$0xff]   ;;  %v10541_v12 = vld [vmem:[#allocation5 + $0x16c4] ss:$72 sps:$4 sm:$0xff]  }
 0x391   : > { %6562 = vmatprep.subr.bf16.mxu1 %v10493_v13  ;;  %v10592_v13 = vld [vmem:[#allocation7 + $0x8] sm:$0xff] }
 0x393   : > { %6522 = vmatpush2.bf16.msra.mxu0 %v10488_v32  ;;  %v1148_v32 = vrot.slane %v10592_v13, %v1115_v62 }
 0x394   : > { %6563 = vmatpush2.bf16.msra.mxu1 %v10491_v15  ;;  %6573 = vmatprep.subr.bf16.mxu0 %v10496_v16  ;;  %v10539_v15 = vld [vmem:[#allocation5 + $0x16c0] ss:$72 sps:$4 sm:$0xff]  }
 0x395   : > { %9026 = vmatprep.subr.bf16.mxu1 %v10749_v7 }
 0x396   : > { %v11094_v27 = vpop.f32.mrf.mxu0  ;;  %6524 = vmatmul.mubr.bf16.vlgmr.msra.gmra.mxu0 %v10916_v8 }
 0x397   : > { %v11096_v28 = vpop.f32.mrf.mxu1  ;;  %6565 = vmatmul.mubr.bf16.vlgmr.msra.gmra.mxu1 %v10918_v9  ;;  %6574 = vmatpush1.bf16.msra.mxu0 %v10494_v53  ;;  %v10500_v9 = vld [vmem:[#allocation5 + $0x1510] ss:$72 sps:$4 sm:$0xff]   ;;  %v6280_v16 = vadd.f32 %v11094_v27, %v1148_v32  ;;  %v11115_v53 = vpack.c.bf16 %v11063_v37, %v11063_v37 }
 0x398   : > { %9027 = vmatpush3.bf16.xpose.msra.mxu1 %v6622_v25  ;;  %v6281_v30 = vpop.f32.mrf.mxu0  ;;  %6575 = vmatprep.subr.bf16.mxu0 %v10499_v18 }
 0x399   : > { %v6322_v33 = vpop.f32.mrf.mxu1  ;;  %9028 = vmatprep.mubr.msk.bf16.mxu1 %vm10750_vm1, %v10749_v7  ;;  %v6282_v60 = vadd.f32 %v6281_v30, %v1152_v23  ;;  %6605 = vmatprep.mubr.bf16.mxu0 %v10924_v35  ;;  %v10508_v35 = vld [vmem:[#allocation5 + $0x13f4] ss:$72 sps:$4 sm:$0xff]   ;;  %v6321_v18 = vadd.f32 %v11096_v28, %v6280_v16  ;;  %v7077_v23 = vsel %vm6617_vm0, %v11115_v53, 0 }
 0x39a   : > { %9032 = vmatprep.subr.bf16.mxu1 %v10749_v7  ;;  %v6283_v8 = vpop.f32.mrf.mxu0 }
 0x39b   : > { %v6324_v59 = vpop.f32.mrf.mxu1  ;;  %v11104_v38 = vadd.f32 %v6322_v33, %v6282_v60  ;;  %6576 = vmatpush1.bf16.msra.mxu0 %v10497_v29  ;;  %v11134_v60 = vpack.c.bf16 %v10984_v6, %v10984_v6 }
 0x39c   : > { %6577 = vmatprep.subr.bf16.mxu0 %v10502_v3  ;;  %v6284_v40 = vpop.f32.mrf.mxu0 }
 0x39d   : > { %v6325_v39 = vpop.f32.mrf.mxu1 }
 0x39f   : > { %9029 = vmatmul.mubr.msk.bf16.vlgmr.msra.gmra.mxu1 %vm6617_vm0, %v11040_v5  ;;  %6578 = vmatpush1.bf16.msra.mxu0 %v10500_v9  ;;  %v10515_v5 = vld [vmem:[#allocation5 + $0x1240] ss:$72 sps:$4 sm:$0xff]   ;;  %v1160_v9 = vrot.slane %v10592_v13, %v1127_v22 }
 0x3a0   : > { %9034 = vmatprep.mubr.msk.bf16.mxu1 %vm10750_vm1, %v10749_v7  ;;  %6579 = vmatprep.subr.bf16.mxu0 %v10505_v20 }
 0x3a3   : > { %6580 = vmatpush1.bf16.msra.mxu0 %v10503_v21 }
 0x3a4   : > { %6581 = vmatprep.subr.bf16.mxu0 %v10508_v35 }
 0x3a7   : > { %6582 = vmatpush1.bf16.msra.mxu0 %v10506_v42 }
 0x3a8   : > { %6583 = vmatprep.subr.bf16.mxu0 %v10511_v43 }
 0x3ab   : > { %6584 = vmatpush1.bf16.msra.mxu0 %v10509_v46 }
 0x3ac   : > { %6585 = vmatprep.subr.bf16.mxu0 %v10514_v45 }
 0x3af   : > { %6586 = vmatpush1.bf16.msra.mxu0 %v10512_v47 }
 0x3b0   : > { %6587 = vmatprep.subr.bf16.mxu0 %v10517_v48 }
 0x3b3   : > { %6588 = vmatpush1.bf16.msra.mxu0 %v10515_v5 }
 0x3b4   : > { %6589 = vmatprep.subr.bf16.mxu0 %v10520_v50 }
 0x3b7   : > { %6590 = vmatpush2.bf16.msra.mxu0 %v10518_v41 }
 0x3b8   : > { %6591 = vmatprep.subr.bf16.mxu0 %v10523_v56 }
 0x3bb   : > { %6592 = vmatpush2.bf16.msra.mxu0 %v10521_v57 }
 0x3bc   : > { %6593 = vmatprep.subr.bf16.mxu0 %v10526_v11 }
 0x3bf   : > { %6594 = vmatpush2.bf16.msra.mxu0 %v10524_v61 }
 0x3c0   : > { %6595 = vmatprep.subr.bf16.mxu0 %v10529_v63 }
 0x3c3   : > { %6596 = vmatpush2.bf16.msra.mxu0 %v10527_v24 }
 0x3c4   : > { %6597 = vmatprep.subr.bf16.mxu0 %v10532_v1 }
 0x3c7   : > { %6598 = vmatpush2.bf16.msra.mxu0 %v10530_v49 }
 0x3c8   : > { %6599 = vmatprep.subr.bf16.mxu0 %v10535_v52 }
 0x3cb   : > { %6600 = vmatpush2.bf16.msra.mxu0 %v10533_v2 }
 0x3cc   : > { %6601 = vmatprep.subr.bf16.mxu0 %v10538_v4 }
 0x3cf   : > { %6602 = vmatpush2.bf16.msra.mxu0 %v10536_v10 }
 0x3d0   : > { %6603 = vmatprep.subr.bf16.mxu0 %v10541_v12 }
 0x3d3   : > { %6604 = vmatpush2.bf16.msra.mxu0 %v10539_v15 }
 0x3d4   : > { %9074 = vmatprep.subr.bf16.mxu0 %v10749_v7 }
 0x3d6   : > { %v6361_v25 = vpop.f32.mrf.mxu0  ;;  %6606 = vmatmul.mubr.bf16.vlgmr.msra.gmra.mxu0 %v10928_v17 }
 0x3d7   : > { %v6402_v29 = vpop.f32.mrf.mxu1  ;;  %v6362_v62 = vadd.f32 %v6361_v25, %v6321_v18  ;;  %9075 = vmatpush3.bf16.xpose.msra.mxu0 %v7077_v23  ;;  %9076 = vmatprep.mubr.msk.bf16.mxu0 %vm10750_vm1, %v10749_v7 }
 0x3d8   : > { %v6363_v37 = vpop.f32.mrf.mxu0  ;;  %9086 = vmatprep.subr.bf16.mxu0 %v10749_v7 }
 0x3d9   : > { %v6404_v27 = vpop.f32.mrf.mxu1  ;;  %v11125_v30 = vpack.c.bf16 %v6362_v62, %v6362_v62  ;;  %v11128_v28 = vadd.f32 %v6363_v37, %v11104_v38  ;;  %v1156_v38 = vrot.slane %v10592_v13, %v1123_v19  ;;  %v1093_v19 = vld [vmem:[#allocation7 + $0x10] sm:$0x3] }
 0x3da   : > { %v6365_v3 = vpop.f32.mrf.mxu0  ;;  %v6405_v40 = vadd.f32 %v6404_v27, %v1160_v9  ;;  %v1164_v26 = vrot.slane %v1093_v19, %v10941_v31  ;;  %v1168_v22 = vrot.slane %v1093_v19, %v10944_v34 }
 0x3db   : > { %v6406_v33 = vpop.f32.mrf.mxu1  ;;  %v6682_v17 = vsel %vm6680_vm2, %v11125_v30, 0  ;;  %v6403_v39 = vadd.f32 %v6402_v29, %v1156_v38 }
 0x3dc   : > { %9033 = vmatpush3.bf16.msra.mxu1 %v6682_v17  ;;  %v6366_v8 = vpop.f32.mrf.mxu0 }
 0x3dd   : > { %v6407_v59 = vpop.f32.mrf.mxu1  ;;  %9038 = vmatprep.subr.bf16.mxu1 %v10749_v7 }
 0x3de   : > { %9077 = vmatmul.mubr.msk.bf16.vlgmr.msra.gmra.mxu0 %vm6617_vm0, %v11134_v60 }
 0x3df   : > { %9088 = vmatprep.mubr.msk.bf16.mxu0 %vm10750_vm1, %v10749_v7 }
 0x416   : > { %v6443_v6 = vpop.f32.mrf.mxu0 }
 0x417   : > { %v6484_v20 = vpop.f32.mrf.mxu1  ;;  %v6444_v21 = vadd.f32 %v6443_v6, %v6403_v39  ;;  %v6730_v6 = vpop.permute.xlu1 %6729 }
 0x418   : > { %v6445_v35 = vpop.f32.mrf.mxu0 }
 0x419   : > { %v6486_v42 = vpop.f32.mrf.mxu1  ;;  %v11145_v43 = vadd.f32 %v6484_v20, %v6444_v21  ;;  %v6446_v46 = vadd.f32 %v6445_v35, %v6405_v40  ;;  %v6735_v40 = vsel %vm6617_vm0, %v6730_v6, 0 }
 0x41a   : > { %v6447_v47 = vpop.f32.mrf.mxu0 }
 0x41b   : > { %v6488_v45 = vpop.f32.mrf.mxu1  ;;  %v11147_v48 = vadd.f32 %v6486_v42, %v6446_v46  ;;  %v6727_v21 = vpop.permute.xlu1 %6726 }
 0x41c   : > { %v6448_v50 = vpop.f32.mrf.mxu0 }
 0x41d   : > { %v6489_v5 = vpop.f32.mrf.mxu1 }
 0x456   : > { %v6525_v41 = vpop.f32.mrf.mxu0 }
 0x457   : > { %v6566_v56 = vpop.f32.mrf.mxu1  ;;  %v6526_v57 = vadd.f32 %v6525_v41, %v1164_v26 }
 0x458   : > { %v6527_v11 = vpop.f32.mrf.mxu0 }
 0x459   : > { %v6568_v61 = vpop.f32.mrf.mxu1  ;;  %v6567_v63 = vadd.f32 %v6566_v56, %v6526_v57  ;;  %v6528_v24 = vadd.f32 %v6527_v11, %v1168_v22 }
 0x45a   : > { %v6529_v49 = vpop.f32.mrf.mxu0 }
 0x45b   : > { %v6570_v1 = vpop.f32.mrf.mxu1  ;;  %v6569_v52 = vadd.f32 %v6568_v61, %v6528_v24 }
 0x45c   : > { %v6530_v4 = vpop.f32.mrf.mxu0 }
 0x45d   : > { %v6571_v2 = vpop.f32.mrf.mxu1  ;;  %v11188_v4 = vpack.c.bf16 %v11128_v28, %v11128_v28 }
 0x45f   : > { %v6658_v10 = vpop.f32.mrf.mxu1 }
 0x460   : > { %v6665_v12 = vsel %vm6664_vm3, %v6658_v10, -inf }
 0x461   : > { %6666 = vmax.xlane.f32.xlu0 %v6665_v12  ;;  %v9030_v31 = vpop.f32.mrf.mxu1 }
 0x463   : > { %v6661_v13 = vpop.f32.mrf.mxu1 }
 0x465   : > { %v9031_v34 = vpop.f32.mrf.mxu1 }
 0x496   : > { %v6607_v32 = vpop.f32.mrf.mxu0 }
 0x497   : > { %v11152_v15 = vadd.f32 %v6607_v32, %v6567_v63 }
 0x498   : > { %v6609_v16 = vpop.f32.mrf.mxu0 }
 0x499   : > { %v11154_v18 = vadd.f32 %v6609_v16, %v6569_v52 }
 0x49a   : > { %v6611_v23 = vpop.f32.mrf.mxu0 }
 0x49c   : > { %v6612_v25 = vpop.f32.mrf.mxu0 }
 0x49d   : > { %v11204_v25 = vpack.c.bf16 %v11086_v51, %v11086_v51  ;;  %v7297_v51 = vpack.c.bf16 %v11068_v44, %v11068_v44  ;;  %v7748_v44 = vpack.c.bf16 %v11016_v0, %v11016_v0 }
 0x49e   : > { %v11156_v29 = vpop.f32.mrf.mxu0 }
 0x49f   : > { %v7303_v0 = vsel %vm6617_vm0, %v7297_v51, 0 }
 0x4a0   : > { %v9078_v62 = vpop.f32.mrf.mxu0 }
 0x4a2   : > { %v7116_v37 = vpop.f32.mrf.mxu0 }
 0x4a4   : > { %v9079_v27 = vpop.f32.mrf.mxu0 }
 0x4ea   : > { %v6667_v33 = vpop.xlane.xlu0 %6666 }
 0x4eb   : > { %v6668_v3 = vsub.f32 %v6658_v10, %v6667_v33  ;;  %v6844_v10 = vpack.c.bf16 %v10966_v14, %v10966_v14 }
 0x4ed   : > { %v6669_v17 = vmul.f32 1.442695, %v6668_v3 }
 0x4ef   : > { %10542 = vpow2.f32 %v6669_v17  ;;  %v7296_v17 = vpack.c.bf16 %v10988_v54, %v10988_v54  ;;  %v7119_v54 = vsel %vm6664_vm3, %v11156_v29, -inf }
 0x4fc   : > { %v10543_v59 = vpop.eup %10542 }
 0x4fd   : > { %v6671_v8 = vsel %vm6664_vm3, %v10543_v59, 0.0 }
 0x4fe   : > { %6672 = vadd.xlane.f32.xlu0 %v6671_v8 }
 0x587   : > { %v6673_v38 = vpop.xlane.xlu0 %6672 }
 0x588   : > { %10544 = vrcp.f32 %v6673_v38 }
 0x595   : > { %v10545_v9 = vpop.eup %10544 }
 0x596   : > { %v6675_v39 = vmul.f32 %v10545_v9, %v10543_v59  ;;  %v7523_v59 = vpack.c.bf16 %v11082_v36, %v11082_v36 }
 0x598   : > { %v6676_v20 = vpack.c.bf16 %v6675_v39, %v6675_v39 }
 0x59a   : > { %9035 = vmatmul.mubr.msk.bf16.vlgmr.msra.gmra.mxu1 %vm6664_vm3, %v6676_v20 }
 0x59b   : > { %9039 = vmatpush3.bf16.xpose.msra.mxu1 %v6735_v40  ;;  %9040 = vmatprep.mubr.msk.bf16.mxu1 %vm10750_vm1, %v10749_v7 }
 0x59c   : > { %9044 = vmatprep.subr.bf16.mxu1 %v10749_v7 }
 0x5a2   : > { %9041 = vmatmul.mubr.msk.bf16.vlgmr.msra.gmra.mxu1 %vm6617_vm0, %v6727_v21 }
 0x5a3   : > { %9046 = vmatprep.mubr.msk.bf16.mxu1 %vm10750_vm1, %v10749_v7 }
 0x65a   : > { %v6718_v35 = vpop.f32.mrf.mxu1 }
 0x65b   : > { %6724 = vst.msk [vmem:[%s11169_s20] sm:$0xff] %vm6617_vm0, %v6718_v35 }
 0x65c   : > { %v9036_v42 = vpop.f32.mrf.mxu1 }
 0x65e   : > { %v6721_v46 = vpop.f32.mrf.mxu1 }
 0x65f   : > { %v7529_v46 = vsel %vm6617_vm0, %v7523_v59, 0 }
 0x660   : > { %v9037_v45 = vpop.f32.mrf.mxu1 }
 0x662   : > { %v6771_v47 = vpop.f32.mrf.mxu1 }
 0x663   : > { %v6777_v5 = vsel %vm6664_vm3, %v6771_v47, -inf }
 0x664   : > { %6778 = vmax.xlane.f32.xlu0 %v6777_v5  ;;  %v9042_v50 = vpop.f32.mrf.mxu1 }
 0x665   : > { %v7755_v50 = vsel %vm6617_vm0, %v11204_v25, 0 }
 0x666   : > { %v6774_v19 = vpop.f32.mrf.mxu1 }
 0x668   : > { %v9043_v26 = vpop.f32.mrf.mxu1 }
 0x67a   : > { %6790 = vrot.lane.b32.xlu0 %v11125_v30, %s10748_s18  ;;  %v6845_v30 = vpack.c.bf16 %v11034_v58, %v11034_v58  ;;  %v6909_v58 = vsel %vm6680_vm2, %v11188_v4, 0 }
 0x67c   : > { %v6851_v2 = vsel %vm6617_vm0, %v6845_v30, 0 }
 0x6ed   : > { %v6779_v22 = vpop.xlane.xlu0 %6778 }
 0x6ee   : > { %v6780_v41 = vsub.f32 %v6771_v47, %v6779_v22 }
 0x6f0   : > { %v6781_v56 = vmul.f32 1.442695, %v6780_v41 }
 0x6f1   : > { %v6791_v57 = vpop.permute.xlu0 %6790 }
 0x6f2   : > { %10546 = vpow2.f32 %v6781_v56  ;;  %v6796_v11 = vsel %vm6680_vm2, %v6791_v57, 0 }
 0x6f3   : > { %9045 = vmatpush3.bf16.msra.mxu1 %v6796_v11 }
 0x6f4   : > { %9050 = vmatprep.subr.bf16.mxu1 %v10749_v7 }
 0x6ff   : > { %v10547_v61 = vpop.eup %10546 }
 0x700   : > { %v6783_v63 = vsel %vm6664_vm3, %v10547_v61, 0.0 }
 0x701   : > { %6784 = vadd.xlane.f32.xlu1 %v6783_v63 }
 0x78a   : > { %v6785_v24 = vpop.xlane.xlu1 %6784 }
 0x78b   : > { %10548 = vrcp.f32 %v6785_v24 }
 0x798   : > { %v10549_v1 = vpop.eup %10548 }
 0x799   : > { %v6787_v49 = vmul.f32 %v10549_v1, %v10547_v61 }
 0x79b   : > { %v6788_v52 = vpack.c.bf16 %v6787_v49, %v6787_v49 }
 0x79d   : > { %9047 = vmatmul.mubr.msk.bf16.vlgmr.msra.gmra.mxu1 %vm6664_vm3, %v6788_v52 }
 0x79e   : > { %9051 = vmatpush3.bf16.xpose.msra.mxu1 %v6851_v2  ;;  %9052 = vmatprep.mubr.msk.bf16.mxu1 %vm10750_vm1, %v10749_v7 }
 0x79f   : > { %9056 = vmatprep.subr.bf16.mxu1 %v10749_v7 }
 0x7a5   : > { %9053 = vmatmul.mubr.msk.bf16.vlgmr.msra.gmra.mxu1 %vm6617_vm0, %v6844_v10 }
 0x7a6   : > { %9057 = vmatpush3.bf16.msra.mxu1 %v6909_v58  ;;  %9058 = vmatprep.mubr.msk.bf16.mxu1 %vm10750_vm1, %v10749_v7 }
 0x7a7   : > { %9062 = vmatprep.subr.bf16.mxu1 %v10749_v7 }
 0x85d   : > { %v11198_v12 = vpop.f32.mrf.mxu1 }
 0x85f   : > { %v9048_v31 = vpop.f32.mrf.mxu1 }
 0x861   : > { %v6835_v13 = vpop.f32.mrf.mxu1 }
 0x863   : > { %v9049_v28 = vpop.f32.mrf.mxu1 }
 0x865   : > { %v6887_v34 = vpop.f32.mrf.mxu1 }
 0x866   : > { %v6893_v32 = vsel %vm6664_vm3, %v6887_v34, -inf }
 0x867   : > { %6894 = vmax.xlane.f32.xlu0 %v6893_v32  ;;  %v9054_v14 = vpop.f32.mrf.mxu1 }
 0x869   : > { %v6890_v16 = vpop.f32.mrf.mxu1 }
 0x86b   : > { %v9055_v23 = vpop.f32.mrf.mxu1 }
 0x87d   : > { %6953 = vrot.lane.b32.xlu0 %v6844_v10, %s10748_s18 }
 0x881   : > { %7860 = vrot.lane.b32.xlu0 %v11204_v25, %s10748_s18 }
 0x8f0   : > { %v6895_v62 = vpop.xlane.xlu0 %6894 }
 0x8f1   : > { %v6896_v37 = vsub.f32 %v6887_v34, %v6895_v62 }
 0x8f3   : > { %v6897_v27 = vmul.f32 1.442695, %v6896_v37 }
 0x8f4   : > { %v6954_v35 = vpop.permute.xlu0 %6953 }
 0x8f5   : > { %10550 = vpow2.f32 %v6897_v27 }
 0x8f8   : > { %v7861_v19 = vpop.permute.xlu0 %7860 }
 0x8f9   : > { %v7866_v26 = vsel %vm6617_vm0, %v7861_v19, 0 }
 0x902   : > { %v10551_v33 = vpop.eup %10550 }
 0x903   : > { %v6899_v3 = vsel %vm6664_vm3, %v10551_v33, 0.0 }
 0x904   : > { %6900 = vadd.xlane.f32.xlu1 %v6899_v3 }
 0x915   : > { %6956 = vrot.lane.b32.xlu1 %v6845_v30, %s10748_s18 }
 0x919   : > { %7182 = vrot.lane.b32.xlu1 %v11115_v53, %s10748_s18  ;;  %v7522_v53 = vpack.c.bf16 %v11011_v55, %v11011_v55 }
 0x91d   : > { %7179 = vrot.lane.b32.xlu1 %v11134_v60, %s10748_s18 }
 0x921   : > { %7408 = vrot.lane.b32.xlu1 %v7297_v51, %s10748_s18 }
 0x925   : > { %7405 = vrot.lane.b32.xlu1 %v7296_v17, %s10748_s18 }
 0x929   : > { %7634 = vrot.lane.b32.xlu1 %v7523_v59, %s10748_s18 }
 0x92d   : > { %7631 = vrot.lane.b32.xlu1 %v7522_v53, %s10748_s18 }
 0x931   : > { %7857 = vrot.lane.b32.xlu1 %v7748_v44, %s10748_s18 }
 0x955   : > { %7120 = vmax.xlane.f32.xlu1 %v7119_v54 }
 0x98d   : > { %v6901_v60 = vpop.xlane.xlu1 %6900 }
 0x98e   : > { %10552 = vrcp.f32 %v6901_v60 }
 0x991   : > { %v6957_v8 = vpop.permute.xlu1 %6956 }
 0x992   : > { %v6962_v20 = vsel %vm6617_vm0, %v6957_v8, 0 }
 0x995   : > { %v7183_v36 = vpop.permute.xlu1 %7182 }
 0x996   : > { %v7188_v38 = vsel %vm6617_vm0, %v7183_v36, 0 }
 0x997   : > { %9087 = vmatpush3.bf16.xpose.msra.mxu0 %v7188_v38 }
 0x998   : > { %9098 = vmatprep.subr.bf16.mxu0 %v10749_v7 }
 0x999   : > { %v7180_v39 = vpop.permute.xlu1 %7179 }
 0x99b   : > { %v10553_v55 = vpop.eup %10552 }
 0x99c   : > { %v6903_v9 = vmul.f32 %v10553_v55, %v10551_v33 }
 0x99d   : > { %v7409_v40 = vpop.permute.xlu1 %7408 }
 0x99e   : > { %9089 = vmatmul.mubr.msk.bf16.vlgmr.msra.gmra.mxu0 %vm6617_vm0, %v7180_v39  ;;  %v6904_v6 = vpack.c.bf16 %v6903_v9, %v6903_v9  ;;  %v7414_v21 = vsel %vm6617_vm0, %v7409_v40, 0 }
 0x99f   : > { %9099 = vmatpush3.bf16.xpose.msra.mxu0 %v7303_v0  ;;  %9100 = vmatprep.mubr.msk.bf16.mxu0 %vm10750_vm1, %v10749_v7 }
 0x9a0   : > { %9059 = vmatmul.mubr.msk.bf16.vlgmr.msra.gmra.mxu1 %vm6664_vm3, %v6904_v6  ;;  %9110 = vmatprep.subr.bf16.mxu0 %v10749_v7 }
 0x9a1   : > { %9063 = vmatpush3.bf16.xpose.msra.mxu1 %v6962_v20  ;;  %9064 = vmatprep.mubr.msk.bf16.mxu1 %vm10750_vm1, %v10749_v7  ;;  %v7406_v42 = vpop.permute.xlu1 %7405 }
 0x9a2   : > { %9068 = vmatprep.subr.bf16.mxu1 %v10749_v7 }
 0x9a5   : > { %v7635_v45 = vpop.permute.xlu1 %7634 }
 0x9a6   : > { %9101 = vmatmul.mubr.msk.bf16.vlgmr.msra.gmra.mxu0 %vm6617_vm0, %v7296_v17  ;;  %v7640_v47 = vsel %vm6617_vm0, %v7635_v45, 0 }
 0x9a7   : > { %9111 = vmatpush3.bf16.xpose.msra.mxu0 %v7414_v21  ;;  %9112 = vmatprep.mubr.msk.bf16.mxu0 %vm10750_vm1, %v10749_v7 }
 0x9a8   : > { %9065 = vmatmul.mubr.msk.bf16.vlgmr.msra.gmra.mxu1 %vm6617_vm0, %v6954_v35  ;;  %9122 = vmatprep.subr.bf16.mxu0 %v10749_v7 }
 0x9a9   : > { %9070 = vmatprep.mubr.msk.bf16.mxu1 %vm10750_vm1, %v10749_v7  ;;  %v7632_v5 = vpop.permute.xlu1 %7631 }
 0x9ad   : > { %v7858_v22 = vpop.permute.xlu1 %7857 }
 0x9ae   : > { %9113 = vmatmul.mubr.msk.bf16.vlgmr.msra.gmra.mxu0 %vm6617_vm0, %v7406_v42 }
 0x9af   : > { %9123 = vmatpush3.bf16.xpose.msra.mxu0 %v7529_v46  ;;  %9124 = vmatprep.mubr.msk.bf16.mxu0 %vm10750_vm1, %v10749_v7 }
 0x9b0   : > { %9134 = vmatprep.subr.bf16.mxu0 %v10749_v7 }
 0x9b6   : > { %9125 = vmatmul.mubr.msk.bf16.vlgmr.msra.gmra.mxu0 %vm6617_vm0, %v7522_v53 }
 0x9b7   : > { %9135 = vmatpush3.bf16.xpose.msra.mxu0 %v7640_v47  ;;  %9136 = vmatprep.mubr.msk.bf16.mxu0 %vm10750_vm1, %v10749_v7 }
 0x9b8   : > { %9146 = vmatprep.subr.bf16.mxu0 %v10749_v7 }
 0x9be   : > { %9137 = vmatmul.mubr.msk.bf16.vlgmr.msra.gmra.mxu0 %vm6617_vm0, %v7632_v5 }
 0x9bf   : > { %9147 = vmatpush3.bf16.xpose.msra.mxu0 %v7755_v50  ;;  %9148 = vmatprep.mubr.msk.bf16.mxu0 %vm10750_vm1, %v10749_v7 }
 0x9c0   : > { %9158 = vmatprep.subr.bf16.mxu0 %v10749_v7 }
 0x9c6   : > { %9149 = vmatmul.mubr.msk.bf16.vlgmr.msra.gmra.mxu0 %vm6617_vm0, %v7748_v44 }
 0x9c7   : > { %9159 = vmatpush3.bf16.xpose.msra.mxu0 %v7866_v26  ;;  %9160 = vmatprep.mubr.msk.bf16.mxu0 %vm10750_vm1, %v10749_v7 }
 0x9ce   : > { %9161 = vmatmul.mubr.msk.bf16.vlgmr.msra.gmra.mxu0 %vm6617_vm0, %v7858_v22 }
 0x9de   : > { %v7121_v33 = vpop.xlane.xlu1 %7120 }
 0x9df   : > { %v7122_v17 = vsub.f32 %v11156_v29, %v7121_v33 }
 0x9e1   : > { %v7123_v44 = vmul.f32 1.442695, %v7122_v17 }
 0x9e3   : > { %10554 = vpow2.f32 %v7123_v44  ;;  %v11338_v44 = vpack.c.bf16 %v11154_v18, %v11154_v18 }
 0x9f0   : > { %v11292_v20 = vpop.eup %10554 }
 0x9f1   : > { %v7125_v35 = vsel %vm6664_vm3, %v11292_v20, 0.0 }
 0xa5e   : > { %v11272_v41 = vpop.f32.mrf.mxu0 }
 0xa5f   : > { %v7230_v28 = vsel %vm6664_vm3, %v11272_v41, -inf }
 0xa60   : > { %v6945_v56 = vpop.f32.mrf.mxu1  ;;  %v9090_v57 = vpop.f32.mrf.mxu0 }
 0xa61   : > { %6951 = vst.msk [vmem:[%s11169_s20 + $0x8] sm:$0xff] %vm6617_vm0, %v6945_v56 }
 0xa62   : > { %v9060_v11 = vpop.f32.mrf.mxu1  ;;  %v7227_v61 = vpop.f32.mrf.mxu0 }
 0xa64   : > { %v6948_v63 = vpop.f32.mrf.mxu1  ;;  %v9091_v24 = vpop.f32.mrf.mxu0 }
 0xa66   : > { %v9061_v1 = vpop.f32.mrf.mxu1  ;;  %v11276_v30 = vpop.f32.mrf.mxu0 }
 0xa67   : > { %v7345_v23 = vsel %vm6664_vm3, %v11276_v30, -inf }
 0xa68   : > { %v6998_v49 = vpop.f32.mrf.mxu1  ;;  %v9102_v52 = vpop.f32.mrf.mxu0 }
 0xa69   : > { %v7004_v2 = vsel %vm6664_vm3, %v6998_v49, -inf }
 0xa6a   : > { %v7342_v10 = vpop.f32.mrf.mxu0  ;;  %7005 = vmax.xlane.f32.xlu0 %v7004_v2  ;;  %v9066_v58 = vpop.f32.mrf.mxu1 }
 0xa6c   : > { %v7001_v31 = vpop.f32.mrf.mxu1  ;;  %v9103_v13 = vpop.f32.mrf.mxu0 }
 0xa6e   : > { %v7450_v34 = vpop.f32.mrf.mxu0  ;;  %7231 = vmax.xlane.f32.xlu0 %v7230_v28  ;;  %v9067_v32 = vpop.f32.mrf.mxu1 }
 0xa6f   : > { %v7456_v14 = vsel %vm6664_vm3, %v7450_v34, -inf }
 0xa70   : > { %7457 = vmax.xlane.f32.xlu1 %v7456_v14  ;;  %v9114_v16 = vpop.f32.mrf.mxu0 }
 0xa72   : > { %v7453_v25 = vpop.f32.mrf.mxu0  ;;  %7346 = vmax.xlane.f32.xlu0 %v7345_v23 }
 0xa74   : > { %v9115_v62 = vpop.f32.mrf.mxu0 }
 0xa76   : > { %v7565_v37 = vpop.f32.mrf.mxu0 }
 0xa77   : > { %v7571_v27 = vsel %vm6664_vm3, %v7565_v37, -inf }
 0xa78   : > { %v9126_v3 = vpop.f32.mrf.mxu0  ;;  %7572 = vmax.xlane.f32.xlu0 %v7571_v27 }
 0xa7a   : > { %v7568_v51 = vpop.f32.mrf.mxu0 }
 0xa7c   : > { %v9127_v59 = vpop.f32.mrf.mxu0 }
 0xa7e   : > { %v11286_v53 = vpop.f32.mrf.mxu0 }
 0xa7f   : > { %v7682_v54 = vsel %vm6664_vm3, %v11286_v53, -inf }
 0xa80   : > { %7683 = vmax.xlane.f32.xlu1 %v7682_v54  ;;  %v9138_v60 = vpop.f32.mrf.mxu0  ;;  %v7524_v54 = vpack.c.bf16 %v11152_v15, %v11152_v15 }
 0xa82   : > { %v7679_v8 = vpop.f32.mrf.mxu0 }
 0xa84   : > { %v9139_v36 = vpop.f32.mrf.mxu0 }
 0xa86   : > { %v7791_v38 = vpop.f32.mrf.mxu0 }
 0xa87   : > { %v7797_v55 = vsel %vm6664_vm3, %v7791_v38, -inf }
 0xa88   : > { %v9150_v9 = vpop.f32.mrf.mxu0  ;;  %7798 = vmax.xlane.f32.xlu0 %v7797_v55 }
 0xa8a   : > { %v7794_v39 = vpop.f32.mrf.mxu0 }
 0xa8c   : > { %v9151_v0 = vpop.f32.mrf.mxu0 }
 0xa8e   : > { %v7902_v29 = vpop.f32.mrf.mxu0 }
 0xa8f   : > { %v7908_v6 = vsel %vm6664_vm3, %v7902_v29, -inf }
 0xa90   : > { %7909 = vmax.xlane.f32.xlu1 %v7908_v6  ;;  %v9162_v40 = vpop.f32.mrf.mxu0 }
 0xa92   : > { %v7905_v21 = vpop.f32.mrf.mxu0 }
 0xa94   : > { %7126 = vadd.xlane.f32.xlu1 %v7125_v35  ;;  %v9163_v42 = vpop.f32.mrf.mxu0 }
 0xaf3   : > { %v7006_v46 = vpop.xlane.xlu0 %7005 }
 0xaf4   : > { %v7007_v45 = vsub.f32 %v6998_v49, %v7006_v46 }
 0xaf6   : > { %v7008_v19 = vmul.f32 1.442695, %v7007_v45 }
 0xaf7   : > { %v7232_v47 = vpop.xlane.xlu0 %7231 }
 0xaf8   : > { %v7233_v5 = vsub.f32 %v11272_v41, %v7232_v47 }
 0xaf9   : > { %v7458_v50 = vpop.xlane.xlu1 %7457 }
 0xafa   : > { %v7234_v26 = vmul.f32 1.442695, %v7233_v5  ;;  %v7459_v22 = vsub.f32 %v7450_v34, %v7458_v50  ;;  %v7072_v34 = vpack.c.bf16 %v11145_v43, %v11145_v43 }
 0xafb   : > { %v7347_v56 = vpop.xlane.xlu0 %7346 }
 0xafc   : > { %10556 = vpow2.f32 %v7234_v26  ;;  %v7348_v57 = vsub.f32 %v11276_v30, %v7347_v56  ;;  %v7460_v11 = vmul.f32 1.442695, %v7459_v22 }
 0xafd   : > { %10558 = vpow2.f32 %v7008_v19 }
 0xafe   : > { %v7349_v61 = vmul.f32 1.442695, %v7348_v57 }
 0xb00   : > { %10560 = vpow2.f32 %v7349_v61 }
 0xb01   : > { %v7573_v63 = vpop.xlane.xlu0 %7572  ;;  %10562 = vpow2.f32 %v7460_v11 }
 0xb02   : > { %v7574_v24 = vsub.f32 %v7565_v37, %v7573_v63 }
 0xb04   : > { %v7575_v1 = vmul.f32 1.442695, %v7574_v24 }
 0xb06   : > { %10564 = vpow2.f32 %v7575_v1  ;;  %v7587_v1 = vsel %vm6680_vm2, %v7524_v54, 0 }
 0xb09   : > { %v11298_v49 = vpop.eup %10556  ;;  %v7684_v32 = vpop.xlane.xlu1 %7683 }
 0xb0a   : > { %v7236_v41 = vsel %vm6664_vm3, %v11298_v49, 0.0  ;;  %v10559_v52 = vpop.eup %10558  ;;  %v7685_v14 = vsub.f32 %v11286_v53, %v7684_v32  ;;  %v7298_v53 = vpack.c.bf16 %v11147_v48, %v11147_v48 }
 0xb0b   : > { %7237 = vadd.xlane.f32.xlu0 %v7236_v41  ;;  %v7010_v30 = vsel %vm6664_vm3, %v10559_v52, 0.0 }
 0xb0c   : > { %v7686_v16 = vmul.f32 1.442695, %v7685_v14  ;;  %v7361_v5 = vsel %vm6680_vm2, %v7298_v53, 0 }
 0xb0d   : > { %v11302_v2 = vpop.eup %10560 }
 0xb0e   : > { %v7351_v10 = vsel %vm6664_vm3, %v11302_v2, 0.0  ;;  %v11307_v58 = vpop.eup %10562  ;;  %10566 = vpow2.f32 %v7686_v16 }
 0xb0f   : > { %7011 = vadd.xlane.f32.xlu0 %v7010_v30  ;;  %7352 = vadd.xlane.f32.xlu1 %v7351_v10  ;;  %v7462_v31 = vsel %vm6664_vm3, %v11307_v58, 0.0 }
 0xb11   : > { %v7799_v23 = vpop.xlane.xlu0 %7798 }
 0xb12   : > { %v7800_v25 = vsub.f32 %v7791_v38, %v7799_v23 }
 0xb13   : > { %v11311_v13 = vpop.eup %10564  ;;  %7463 = vadd.xlane.f32.xlu1 %v7462_v31 }
 0xb14   : > { %v7577_v28 = vsel %vm6664_vm3, %v11311_v13, 0.0  ;;  %v7801_v37 = vmul.f32 1.442695, %v7800_v25 }
 0xb16   : > { %10568 = vpow2.f32 %v7801_v37 }
 0xb17   : > { %7578 = vadd.xlane.f32.xlu1 %v7577_v28 }
 0xb19   : > { %v7910_v62 = vpop.xlane.xlu1 %7909 }
 0xb1a   : > { %v7911_v27 = vsub.f32 %v7902_v29, %v7910_v62 }
 0xb1b   : > { %v11321_v3 = vpop.eup %10566 }
 0xb1c   : > { %v7912_v33 = vmul.f32 1.442695, %v7911_v27  ;;  %v7688_v43 = vsel %vm6664_vm3, %v11321_v3, 0.0 }
 0xb1d   : > { %v7127_v48 = vpop.xlane.xlu1 %7126 }
 0xb1e   : > { %10570 = vpow2.f32 %v7912_v33 }
 0xb25   : > { %7017 = vrot.lane.b32.xlu0 %v11188_v4, %s10748_s18  ;;  %v11325_v4 = vpop.eup %10568 }
 0xb26   : > { %v7803_v51 = vsel %vm6664_vm3, %v11325_v4, 0.0 }
 0xb28   : > { %7243 = vrot.lane.b32.xlu1 %v7072_v34, %s10748_s18 }
 0xb2b   : > { %v11329_v17 = vpop.eup %10570 }
 0xb2c   : > { %v7914_v59 = vsel %vm6664_vm3, %v11329_v17, 0.0 }
 0xb44   : > { %7689 = vadd.xlane.f32.xlu0 %v7688_v43 }
 0xb4c   : > { %7804 = vadd.xlane.f32.xlu1 %v7803_v51 }
 0xb50   : > { %7915 = vadd.xlane.f32.xlu1 %v7914_v59 }
 0xb5a   : > { %7469 = vrot.lane.b32.xlu0 %v7298_v53, %s10748_s18 }
 0xb5e   : > { %7921 = vrot.lane.b32.xlu0 %v11338_v44, %s10748_s18 }
 0xb61   : > { %7695 = vrot.lane.b32.xlu1 %v7524_v54, %s10748_s18 }
 0xb62   : > { %6839 = vrot.lane.b32.xlu0 %v11198_v12, %s10748_s18  ;;  %v7135_v12 = vsel %vm6680_vm2, %v7072_v34, 0  ;;  %v7813_v34 = vsel %vm6680_vm2, %v11338_v44, 0 }
 0xb94   : > { %v7238_v60 = vpop.xlane.xlu0 %7237 }
 0xb98   : > { %v7012_v8 = vpop.xlane.xlu0 %7011  ;;  %v7353_v18 = vpop.xlane.xlu1 %7352 }
 0xb99   : > { %10572 = vrcp.f32 %v7012_v8 }
 0xb9a   : > { %10574 = vrcp.f32 %v7127_v48 }
 0xb9b   : > { %10576 = vrcp.f32 %v7238_v60 }
 0xb9c   : > { %v7018_v36 = vpop.permute.xlu0 %7017  ;;  %v7464_v55 = vpop.xlane.xlu1 %7463  ;;  %10578 = vrcp.f32 %v7353_v18 }
 0xb9d   : > { %v7023_v38 = vsel %vm6680_vm2, %v7018_v36, 0  ;;  %10580 = vrcp.f32 %v7464_v55 }
 0xb9e   : > { %9069 = vmatpush3.bf16.msra.mxu1 %v7023_v38 }
 0xb9f   : > { %9080 = vmatprep.subr.bf16.mxu1 %v10749_v7 }
 0xba0   : > { %v7579_v29 = vpop.xlane.xlu1 %7578 }
 0xba1   : > { %10582 = vrcp.f32 %v7579_v29 }
 0xba4   : > { %v7244_v40 = vpop.permute.xlu1 %7243 }
 0xba5   : > { %v7249_v42 = vsel %vm6680_vm2, %v7244_v40, 0 }
 0xba6   : > { %v10573_v15 = vpop.eup %10572 }
 0xba7   : > { %v7014_v9 = vmul.f32 %v10573_v15, %v10559_v52  ;;  %v10575_v0 = vpop.eup %10574 }
 0xba8   : > { %v7129_v6 = vmul.f32 %v10575_v0, %v11292_v20  ;;  %v10577_v35 = vpop.eup %10576 }
 0xba9   : > { %v7015_v39 = vpack.c.bf16 %v7014_v9, %v7014_v9  ;;  %v7240_v46 = vmul.f32 %v10577_v35, %v11298_v49  ;;  %v10579_v47 = vpop.eup %10578 }
 0xbaa   : > { %v7130_v21 = vpack.c.bf16 %v7129_v6, %v7129_v6  ;;  %v7355_v20 = vmul.f32 %v10579_v47, %v11302_v2  ;;  %v10581_v19 = vpop.eup %10580 }
 0xbab   : > { %9071 = vmatmul.mubr.msk.bf16.vlgmr.msra.gmra.mxu1 %vm6664_vm3, %v7015_v39  ;;  %v7241_v45 = vpack.c.bf16 %v7240_v46, %v7240_v46  ;;  %v7466_v22 = vmul.f32 %v10581_v19, %v11307_v58 }
 0xbac   : > { %9081 = vmatpush3.bf16.msra.mxu1 %v7135_v12  ;;  %9082 = vmatprep.mubr.msk.bf16.mxu1 %vm10750_vm1, %v10749_v7  ;;  %v7356_v50 = vpack.c.bf16 %v7355_v20, %v7355_v20 }
 0xbad   : > { %9092 = vmatprep.subr.bf16.mxu1 %v10749_v7  ;;  %v7467_v11 = vpack.c.bf16 %v7466_v22, %v7466_v22 }
 0xbae   : > { %v10583_v61 = vpop.eup %10582 }
 0xbaf   : > { %v7581_v49 = vmul.f32 %v10583_v61, %v11311_v13 }
 0xbb1   : > { %v7582_v2 = vpack.c.bf16 %v7581_v49, %v7581_v49 }
 0xbb3   : > { %9083 = vmatmul.mubr.msk.bf16.vlgmr.msra.gmra.mxu1 %vm6664_vm3, %v7130_v21 }
 0xbb4   : > { %9093 = vmatpush3.bf16.msra.mxu1 %v7249_v42  ;;  %9094 = vmatprep.mubr.msk.bf16.mxu1 %vm10750_vm1, %v10749_v7 }
 0xbb5   : > { %9104 = vmatprep.subr.bf16.mxu1 %v10749_v7 }
 0xbbb   : > { %9095 = vmatmul.mubr.msk.bf16.vlgmr.msra.gmra.mxu1 %vm6664_vm3, %v7241_v45 }
 0xbbc   : > { %9105 = vmatpush3.bf16.msra.mxu1 %v7361_v5  ;;  %9106 = vmatprep.mubr.msk.bf16.mxu1 %vm10750_vm1, %v10749_v7 }
 0xbbd   : > { %9116 = vmatprep.subr.bf16.mxu1 %v10749_v7 }
 0xbc3   : > { %9107 = vmatmul.mubr.msk.bf16.vlgmr.msra.gmra.mxu1 %vm6664_vm3, %v7356_v50 }
 0xbc4   : > { %9118 = vmatprep.mubr.msk.bf16.mxu1 %vm10750_vm1, %v10749_v7 }
 0xbcd   : > { %v7690_v26 = vpop.xlane.xlu0 %7689 }
 0xbce   : > { %10584 = vrcp.f32 %v7690_v26 }
 0xbd1   : > { %v7470_v56 = vpop.permute.xlu0 %7469 }
 0xbd2   : > { %v7475_v57 = vsel %vm6680_vm2, %v7470_v56, 0 }
 0xbd3   : > { %9117 = vmatpush3.bf16.msra.mxu1 %v7475_v57 }
 0xbd4   : > { %9128 = vmatprep.subr.bf16.mxu1 %v10749_v7 }
 0xbd5   : > { %v7805_v63 = vpop.xlane.xlu1 %7804  ;;  %v7922_v24 = vpop.permute.xlu0 %7921 }
 0xbd6   : > { %9119 = vmatmul.mubr.msk.bf16.vlgmr.msra.gmra.mxu1 %vm6664_vm3, %v7467_v11  ;;  %10586 = vrcp.f32 %v7805_v63  ;;  %v7927_v23 = vsel %vm6680_vm2, %v7922_v24, 0 }
 0xbd7   : > { %9129 = vmatpush3.bf16.msra.mxu1 %v7587_v1  ;;  %9130 = vmatprep.mubr.msk.bf16.mxu1 %vm10750_vm1, %v10749_v7 }
 0xbd8   : > { %9140 = vmatprep.subr.bf16.mxu1 %v10749_v7 }
 0xbd9   : > { %v7916_v41 = vpop.xlane.xlu1 %7915  ;;  %v6840_v52 = vpop.permute.xlu0 %6839 }
 0xbda   : > { %6843 = vst.msk [vmem:[%s11169_s20] sm:$0xff] %vm6842_vm4, %v6840_v52  ;;  %10588 = vrcp.f32 %v7916_v41 }
 0xbdb   : > { %v10585_v30 = vpop.eup %10584 }
 0xbdc   : > { %v7692_v31 = vmul.f32 %v10585_v30, %v11321_v3 }
 0xbdd   : > { %v7696_v10 = vpop.permute.xlu1 %7695 }
 0xbde   : > { %v7701_v58 = vsel %vm6680_vm2, %v7696_v10, 0  ;;  %9131 = vmatmul.mubr.msk.bf16.vlgmr.msra.gmra.mxu1 %vm6664_vm3, %v7582_v2  ;;  %v7693_v13 = vpack.c.bf16 %v7692_v31, %v7692_v31 }
 0xbdf   : > { %9141 = vmatpush3.bf16.msra.mxu1 %v7701_v58  ;;  %9142 = vmatprep.mubr.msk.bf16.mxu1 %vm10750_vm1, %v10749_v7 }
 0xbe0   : > { %9152 = vmatprep.subr.bf16.mxu1 %v10749_v7 }
 0xbe3   : > { %v10587_v28 = vpop.eup %10586 }
 0xbe4   : > { %v7807_v32 = vmul.f32 %v10587_v28, %v11325_v4 }
 0xbe6   : > { %9143 = vmatmul.mubr.msk.bf16.vlgmr.msra.gmra.mxu1 %vm6664_vm3, %v7693_v13  ;;  %v7808_v14 = vpack.c.bf16 %v7807_v32, %v7807_v32 }
 0xbe7   : > { %9153 = vmatpush3.bf16.msra.mxu1 %v7813_v34  ;;  %9154 = vmatprep.mubr.msk.bf16.mxu1 %vm10750_vm1, %v10749_v7  ;;  %v10589_v16 = vpop.eup %10588 }
 0xbe8   : > { %9164 = vmatprep.subr.bf16.mxu1 %v10749_v7  ;;  %v7918_v25 = vmul.f32 %v10589_v16, %v11329_v17 }
 0xbea   : > { %v7919_v62 = vpack.c.bf16 %v7918_v25, %v7918_v25 }
 0xbee   : > { %9155 = vmatmul.mubr.msk.bf16.vlgmr.msra.gmra.mxu1 %vm6664_vm3, %v7808_v14 }
 0xbef   : > { %9165 = vmatpush3.bf16.msra.mxu1 %v7927_v23  ;;  %9166 = vmatprep.mubr.msk.bf16.mxu1 %vm10750_vm1, %v10749_v7 }
 0xbf6   : > { %9167 = vmatmul.mubr.msk.bf16.vlgmr.msra.gmra.mxu1 %vm6664_vm3, %v7919_v62 }
 0xc6b   : > { %v7059_v37 = vpop.f32.mrf.mxu1 }
 0xc6c   : > { %7066 = vrot.lane.b32.xlu0 %v7059_v37, %s10748_s18 }
 0xc6d   : > { %v9072_v27 = vpop.f32.mrf.mxu1 }
 0xc6f   : > { %v7062_v33 = vpop.f32.mrf.mxu1 }
 0xc71   : > { %v9073_v3 = vpop.f32.mrf.mxu1 }
 0xc73   : > { %v7171_v43 = vpop.f32.mrf.mxu1 }
 0xc74   : > { %7177 = vst.msk [vmem:[%s11169_s20 + $0x10] sm:$0xff] %vm6617_vm0, %v7171_v43 }
 0xc75   : > { %v9084_v4 = vpop.f32.mrf.mxu1 }
 0xc77   : > { %v7174_v51 = vpop.f32.mrf.mxu1 }
 0xc79   : > { %v9085_v59 = vpop.f32.mrf.mxu1 }
 0xc7b   : > { %v7285_v53 = vpop.f32.mrf.mxu1 }
 0xc7c   : > { %7292 = vrot.lane.b32.xlu1 %v7285_v53, %s10748_s18 }
 0xc7d   : > { %v9096_v7 = vpop.f32.mrf.mxu1 }
 0xc7f   : > { %v7288_v17 = vpop.f32.mrf.mxu1 }
 0xc81   : > { %v9097_v44 = vpop.f32.mrf.mxu1 }
 0xc83   : > { %v7397_v54 = vpop.f32.mrf.mxu1 }
 0xc84   : > { %7403 = vst.msk [vmem:[%s11169_s20 + $0x18] sm:$0xff] %vm6617_vm0, %v7397_v54 }
 0xc85   : > { %v9108_v60 = vpop.f32.mrf.mxu1 }
 0xc87   : > { %v7400_v8 = vpop.f32.mrf.mxu1 }
 0xc89   : > { %v9109_v48 = vpop.f32.mrf.mxu1 }
 0xc96   : > { %v7511_v36 = vpop.f32.mrf.mxu1 }
 0xc97   : > { %7518 = vrot.lane.b32.xlu0 %v7511_v36, %s10748_s18 }
 0xc98   : > { %v9120_v38 = vpop.f32.mrf.mxu1 }
 0xc9a   : > { %v7514_v18 = vpop.f32.mrf.mxu1 }
 0xc9c   : > { %v9121_v55 = vpop.f32.mrf.mxu1 }
 0xc9e   : > { %v7623_v15 = vpop.f32.mrf.mxu1 }
 0xc9f   : > { %7629 = vst.msk [vmem:[%s11169_s20 + $0x20] sm:$0xff] %vm6617_vm0, %v7623_v15 }
 0xca0   : > { %v9132_v9 = vpop.f32.mrf.mxu1 }
 0xca2   : > { %v7626_v39 = vpop.f32.mrf.mxu1 }
 0xca4   : > { %v9133_v0 = vpop.f32.mrf.mxu1 }
 0xca6   : > { %v7737_v29 = vpop.f32.mrf.mxu1 }
 0xca7   : > { %7744 = vrot.lane.b32.xlu1 %v7737_v29, %s10748_s18 }
 0xca8   : > { %v9144_v12 = vpop.f32.mrf.mxu1 }
 0xcaa   : > { %v7740_v6 = vpop.f32.mrf.mxu1 }
 0xcac   : > { %v9145_v40 = vpop.f32.mrf.mxu1 }
 0xcae   : > { %v7849_v21 = vpop.f32.mrf.mxu1 }
 0xcaf   : > { %7855 = vst.msk [vmem:[%s11169_s20 + $0x28] sm:$0xff] %vm6617_vm0, %v7849_v21 }
 0xcb0   : > { %v9156_v35 = vpop.f32.mrf.mxu1 }
 0xcb2   : > { %v7852_v42 = vpop.f32.mrf.mxu1 }
 0xcb4   : > { %v9157_v46 = vpop.f32.mrf.mxu1 }
 0xcb6   : > { %v7963_v45 = vpop.f32.mrf.mxu1 }
 0xcb7   : > { %7970 = vrot.lane.b32.xlu0 %v7963_v45, %s10748_s18 }
 0xcb8   : > { %v9168_v47 = vpop.f32.mrf.mxu1 }
 0xcba   : > { %v7966_v5 = vpop.f32.mrf.mxu1 }
 0xcbc   : > { %v9169_v20 = vpop.f32.mrf.mxu1 }
 0xcde   : > { %v7067_v50 = vpop.permute.xlu0 %7066 }
 0xcdf   : > { %7069 = vst.msk [vmem:[%s11169_s20 + $0x8] sm:$0xff] %vm6842_vm4, %v7067_v50 }
 0xcee   : > { %v7293_v19 = vpop.permute.xlu1 %7292 }
 0xcef   : > { %7295 = vst.msk [vmem:[%s11169_s20 + $0x10] sm:$0xff] %vm6842_vm4, %v7293_v19 }
 0xd09   : > { %v7519_v26 = vpop.permute.xlu0 %7518 }
 0xd0a   : > { %7521 = vst.msk [vmem:[%s11169_s20 + $0x18] sm:$0xff] %vm6842_vm4, %v7519_v26 }
 0xd19   : > { %v7745_v22 = vpop.permute.xlu1 %7744 }
 0xd1a   : > { %7747 = vst.msk [vmem:[%s11169_s20 + $0x20] sm:$0xff] %vm6842_vm4, %v7745_v22 }
 0xd29   : > { %v7971_v56 = vpop.permute.xlu0 %7970 }
 0xd2a   : > { %7973 = vst.msk [vmem:[%s11169_s20 + $0x28] sm:$0xff] %vm6842_vm4, %v7971_v56 }
 0xd2b   : > { %10686 = shalt.err (!%p10683_p9)
}
 0xd2c   : > { %s10687_s17 = scalar_lea.hbm %s11426_s5, 768  ;;  %s10691_s25 = scalar_lea.hbm %s11468_s3, 1536 }
 0xd2d   : > { %p10688_p13 = scmp.ne.s32.totalorder %s11426_s5, %s10687_s17  ;;  %p10692_p4 = scmp.lt.s32.totalorder %s11426_s5, %s11468_s3 }
 0xd2e   : > { %p10693_p8 = scmp.lt.s32.totalorder %s10691_s25, %s10687_s17 }
 0xd2f   : > { %p10689_p5 = pnand %p10688_p13, %p11484_p0 }
 0xd30   : > { %p10694_p3 = por %p10693_p8, %p10692_p4 }
 0xd31   : > { %p10690_p10 = pneg %p10689_p5 }
 0xd33   : > { %p10695_p11 = pnand %p10694_p3, %p10690_p10 }
 0xd35   : > { %10698 = shalt.err (!%p10695_p11)
}
 0xd36   : > { %9184 = dma.vmem_to_hbm [thread:$0]  (%p11484_p0), %s7990_s26, 768, %s11426_s5, %s7975_s6  }
 0xd37 PF: > { %s8001_s4 = sand.u32 1, %s10729_s12   ;;  %p11485_p1 = scmp.ne.s32.totalorder %s11474_s19, 0 }
 0xd38   : > { %p11486_p2 = scmp.ge.s32.totalorder %s10741_s15, 2  ;;  %s8002_s18 = scalar_lea.sflag [#allocation4], %s8001_s4 }
 0xd3a   : > { %p9198_p6 = pnand %p11486_p2, %p11485_p1 }
 0xd3c   : > { %p9199_p12 = pneg %p9198_p6 }
 0xd3e   : > { %10724 = dma.done.wait (%p9199_p12), %s8002_s18, 768  }
 0xd3f   : > { %10726 = vsyncadd (%p9199_p12), %s8002_s18, 4294966528  ;;  %p17_p7 = scmp.ge.s32.totalorder %s10844_s7, 4   ;;  %s11487_s12 = smov %s10733_s13 }
 0xd40   : > { %s11488_s13 = smov %s10737_s14  ;;  %s11489_s14 = smov %s10860_s11 }
 0xd41   : > { %s11490_s15 = smov %s10844_s7  ;;  %19 = sbr.rel (!%p17_p7) target bundleno = 6 (0x6), region = 85 }
 0xd46   :  { %8007 = vsyncpa [#allocation3], 1 }
 0xd47   :  { %8009 = vsyncpa [#allocation3 + $0x1], 1 }
 0xd48   :  { %8010 = vsyncpa [#allocation6], 1 }
 0xd49   :  { %8011 = vsyncpa [#allocation4], 1 }
 0xd4a   :  { %8013 = vsyncpa [#allocation4 + $0x1], 1 }

</bundles_post_ra>
